<compile_context>
chip_gen: v7x
topology: tpu7x:2x2x1
jax: 0.10.0
libtpu: 0.0.40
codegen_flags: <defaults>
</compile_context>

<pallas_src>
import functools

import numpy as np
import jax
import jax.numpy as jnp
from jax.experimental import pallas as pl
from jax.experimental.pallas import tpu as pltpu


# ----------------------------------------------------------------------------
# Exact (erf-based) GELU, matching torch.nn.GELU() default (approximate='none')
# erf via the Eigen/XLA float32 rational polynomial (mul/add/div only).
# ----------------------------------------------------------------------------
def _erf_f32(x):
    x = jnp.clip(x, -4.0, 4.0)
    x2 = x * x
    p = jnp.float32(-2.72614225801306e-10)
    p = p * x2 + jnp.float32(2.77068142495902e-08)
    p = p * x2 + jnp.float32(-2.10102402082508e-06)
    p = p * x2 + jnp.float32(-5.69250639462346e-05)
    p = p * x2 + jnp.float32(-7.34990630326855e-04)
    p = p * x2 + jnp.float32(-2.95459980854025e-03)
    p = p * x2 + jnp.float32(-1.60960333262415e-02)
    p = p * x
    q = jnp.float32(-1.45660718464996e-05)
    q = q * x2 + jnp.float32(-2.13374055278905e-04)
    q = q * x2 + jnp.float32(-1.68282697438203e-03)
    q = q * x2 + jnp.float32(-7.37332916720468e-03)
    q = q * x2 + jnp.float32(-1.42647390514189e-02)
    return p / q


def _gelu(x):
    return 0.5 * x * (1.0 + _erf_f32(x * jnp.float32(0.7071067811865476)))


# ----------------------------------------------------------------------------
# ContinuousSincosEmbed (kappamodules-style), plain JAX glue.
# ----------------------------------------------------------------------------
def sincos_embed(coords, dim, ndim, max_wavelength=10000.0):
    ndim_padding = dim % ndim
    dim_per_ndim = (dim - ndim_padding) // ndim
    sincos_padding = dim_per_ndim % 2
    padding = ndim_padding + sincos_padding * ndim
    eff = (dim - padding) // ndim
    assert eff > 0
    omega = 1.0 / max_wavelength ** (
        jnp.arange(0, eff, 2, dtype=jnp.float32) / eff
    )  # (eff // 2,)
    out = coords[:, :, None].astype(jnp.float32) * omega[None, None, :]
    emb = jnp.concatenate([jnp.sin(out), jnp.cos(out)], axis=-1)  # (N, ndim, eff)
    emb = emb.reshape(coords.shape[0], ndim * eff)
    if padding > 0:
        emb = jnp.concatenate(
            [emb, jnp.zeros((coords.shape[0], padding), emb.dtype)], axis=-1
        )
    return emb


def _round_up(x, m):
    return ((x + m - 1) // m) * m


def _pad2(a, rows, cols):
    return jnp.pad(a, ((0, rows - a.shape[0]), (0, cols - a.shape[1])))


# ----------------------------------------------------------------------------
# Fused Pallas kernel: per-edge message MLP + one-hot scatter-mean.
# grid = (grid-row tiles [parallel], per-tile edge tiles [arbitrary/reduction])
# Scalar prefetch carries per-grid-tile CSR edge-tile start / count.
# ----------------------------------------------------------------------------
def _fused_gno_kernel(etile_start_ref, etile_count_ref,      # scalar prefetch (SMEM)
                      gidx_ref, x_ref,                       # edge-tile inputs
                      w1_ref, b1_ref, w2_ref, b2_ref, w3_ref, b3_ref,
                      inv_ref,                               # per-grid-row 1/count
                      out_ref, acc_ref):
    g = pl.program_id(0)
    e = pl.program_id(1)

    @pl.when(e == 0)
    def _init():
        acc_ref[...] = jnp.zeros_like(acc_ref)

    # Only the edge tiles that actually belong to this grid-row tile do work;
    # skipped steps revisit the same (clamped) block -> no extra DMA, no MXU.
    @pl.when(e < etile_count_ref[g])
    def _compute():
        # --- message MLP (bf16 MXU operands, f32 accumulation) -------------
        x = x_ref[...]                                                   # (te, d2p) bf16
        h = jnp.dot(x, w1_ref[...], preferred_element_type=jnp.float32) + b1_ref[...]
        h = _gelu(h)
        h = jnp.dot(h.astype(jnp.bfloat16), w2_ref[...],
                    preferred_element_type=jnp.float32) + b2_ref[...]
        h = _gelu(h)
        msg = jnp.dot(h.astype(jnp.bfloat16), w3_ref[...],
                      preferred_element_type=jnp.float32) + b3_ref[...]  # (te, dp) f32

        # --- one-hot scatter-sum into the grid-row accumulator -------------
        tg = acc_ref.shape[0]
        te = x.shape[0]
        gidx = gidx_ref[...]                                             # (1, te) int32
        rows = jax.lax.broadcasted_iota(jnp.int32, (tg, te), 0) + g * tg
        onehot = (rows == gidx).astype(jnp.bfloat16)                     # exact in bf16
        acc_ref[...] += jnp.dot(onehot, msg.astype(jnp.bfloat16),
                                preferred_element_type=jnp.float32)

    @pl.when(e == pl.num_programs(1) - 1)
    def _finalize():
        out_ref[...] = (acc_ref[...] * inv_ref[...]).astype(out_ref.dtype)


def fused_gno_scatter(gidx_pad, x_pad, weights, inv_cnt,
                      etile_start, etile_count, *, tg, te, max_etiles, dp):
    G_pad = inv_cnt.shape[0]
    E_pad, d2p = x_pad.shape
    n_etiles = E_pad // te
    W1, b1, W2, b2, W3, b3 = weights

    def eblock(g, e, s_ref, c_ref):
        # clamp skipped steps to the last valid tile so the block is revisited
        eb = s_ref[g] + jnp.minimum(e, jnp.maximum(c_ref[g] - 1, 0))
        return jnp.minimum(eb, n_etiles - 1)

    full = lambda a: pl.BlockSpec(a.shape, lambda g, e, s, c: (0, 0))

    return pl.pallas_call(
        _fused_gno_kernel,
        out_shape=jax.ShapeDtypeStruct((G_pad, dp), jnp.float32),
        grid_spec=pltpu.PrefetchScalarGridSpec(
            num_scalar_prefetch=2,
            grid=(G_pad // tg, max_etiles),
            in_specs=[
                pl.BlockSpec((1, te), lambda g, e, s, c: (0, eblock(g, e, s, c))),
                pl.BlockSpec((te, d2p), lambda g, e, s, c: (eblock(g, e, s, c), 0)),
                full(W1), full(b1), full(W2), full(b2), full(W3), full(b3),
                pl.BlockSpec((tg, 1), lambda g, e, s, c: (g, 0)),
            ],
            out_specs=pl.BlockSpec((tg, dp), lambda g, e, s, c: (g, 0)),
            scratch_shapes=[pltpu.VMEM((tg, dp), jnp.float32)],
        ),
        compiler_params=pltpu.CompilerParams(
            dimension_semantics=("parallel", "arbitrary"),   # grid axis megacore-shardable
            vmem_limit_bytes=48 * 1024 * 1024,               # <= v7x 64 MiB/TC budget
        ),
    )(etile_start, etile_count, gidx_pad, x_pad, W1, b1, W2, b2, W3, b3, inv_cnt)


# ----------------------------------------------------------------------------
# Full forward pass (equivalent to RansGinoMeshToGridOg.forward with int dim).
# Edges must be sorted by destination grid index (same precondition as the
# original segment_csr-based module).
# ----------------------------------------------------------------------------
def rans_gino_mesh_to_grid(params, mesh_pos, grid_pos, mesh_to_grid_edges,
                           dim, resolution, max_edge_tiles=None,
                           tg=128, te=512, sorted_edges=True):
    ndim = len(resolution)
    num_grid_points = int(np.prod(resolution))
    G = grid_pos.shape[0]
    assert mesh_pos.ndim == 2 and grid_pos.ndim == 2 and mesh_to_grid_edges.ndim == 2
    assert G % num_grid_points == 0

    mesh_emb = sincos_embed(mesh_pos, dim, ndim)   # (Nm, dim)
    grid_emb = sincos_embed(grid_pos, dim, ndim)   # (G, dim)

    grid_idx = mesh_to_grid_edges[:, 0].astype(jnp.int32)
    mesh_idx = mesh_to_grid_edges[:, 1].astype(jnp.int32)
    E = grid_idx.shape[0]

    d2 = 2 * dim
    d2p = _round_up(d2, 128)            # lane-dense MLP input/hidden width
    dp = _round_up(dim, 128)            # lane-dense output width
    E_pad = _round_up(max(E, te), te)
    G_pad = _round_up(max(G, tg), tg)
    n_etiles = E_pad // te
    num_gtiles = G_pad // tg

    # edge features (gather + concat), padded & cast to bf16 for the MXU
    x = jnp.concatenate([mesh_emb[mesh_idx], grid_emb[grid_idx]], axis=1)  # (E, 2*dim)
    x_pad = jnp.pad(x, ((0, E_pad - E), (0, d2p - d2))).astype(jnp.bfloat16)
    gidx_pad = jnp.pad(grid_idx, (0, E_pad - E), constant_values=-1).reshape(1, E_pad)

    # per-grid-row inverse counts (precomputed -> no per-step count reduction)
    counts = jax.ops.segment_sum(jnp.ones((E,), jnp.int32), grid_idx, num_segments=G)
    inv_cnt = 1.0 / jnp.maximum(counts.astype(jnp.float32), 1.0)
    inv_cnt = jnp.pad(inv_cnt, (0, G_pad - G)).reshape(G_pad, 1)

    # CSR edge-tile offsets per grid-row tile (edges sorted by destination)
    if sorted_edges:
        indptr = jnp.concatenate(
            [jnp.zeros((1,), jnp.int32), jnp.cumsum(counts, dtype=jnp.int32)])
        gt = jnp.arange(num_gtiles, dtype=jnp.int32)
        edge_lo = indptr[jnp.minimum(gt * tg, G)]
        edge_hi = indptr[jnp.minimum((gt + 1) * tg, G)]
        etile_start = jnp.clip(edge_lo // te, 0, n_etiles - 1).astype(jnp.int32)
        etile_count = jnp.where(
            edge_hi > edge_lo, (edge_hi - 1) // te - edge_lo // te + 1, 0
        ).astype(jnp.int32)
    else:
        # fallback: dense sweep (correct for any edge order, O(G x E) work)
        etile_start = jnp.zeros((num_gtiles,), jnp.int32)
        etile_count = jnp.full((num_gtiles,), n_etiles, jnp.int32)

    if max_edge_tiles is None:
        max_etiles = n_etiles                      # conservative static bound
    else:
        max_etiles = max(1, min(int(max_edge_tiles), n_etiles))

    # weights padded to lane multiples, bf16 for the MXU (biases stay f32)
    W1 = _pad2(params["W1"], d2p, d2p).astype(jnp.bfloat16)
    b1 = _pad2(params["b1"], 1, d2p)
    W2 = _pad2(params["W2"], d2p, d2p).astype(jnp.bfloat16)
    b2 = _pad2(params["b2"], 1, d2p)
    W3 = _pad2(params["W3"], d2p, dp).astype(jnp.bfloat16)
    b3 = _pad2(params["b3"], 1, dp)

    out = fused_gno_scatter(
        gidx_pad, x_pad, (W1, b1, W2, b2, W3, b3), inv_cnt,
        etile_start, etile_count, tg=tg, te=te, max_etiles=max_etiles, dp=dp)

    out = out[:G, :dim]
    # x.reshape(-1, *resolution, dim) followed by 'b ... d -> b (...) d'
    return out.reshape(-1, num_grid_points, dim)


# ----------------------------------------------------------------------------
# Static helper (host-side) to compute the exact reduction-axis grid extent.
# ----------------------------------------------------------------------------
def compute_max_edge_tiles(grid_idx_np, num_grid, tg, te):
    counts = np.bincount(np.asarray(grid_idx_np), minlength=num_grid)
    indptr = np.concatenate([[0], np.cumsum(counts)])
    G_pad = _round_up(max(num_grid, tg), tg)
    mx = 1
    for g in range(G_pad // tg):
        lo = indptr[min(g * tg, num_grid)]
        hi = indptr[min((g + 1) * tg, num_grid)]
        if hi > lo:
            mx = max(mx, (hi - 1) // te - lo // te + 1)
    return int(mx)


# ----------------------------------------------------------------------------
# Pure-JAX f32 reference for correctness check
# ----------------------------------------------------------------------------
def reference(params, mesh_pos, grid_pos, mesh_to_grid_edges, dim, resolution):
    ndim = len(resolution)
    num_grid_points = int(np.prod(resolution))
    mesh_emb = sincos_embed(mesh_pos, dim, ndim)
    grid_emb = sincos_embed(grid_pos, dim, ndim)
    gi = mesh_to_grid_edges[:, 0].astype(jnp.int32)
    mi = mesh_to_grid_edges[:, 1].astype(jnp.int32)
    x = jnp.concatenate([mesh_emb[mi], grid_emb[gi]], axis=1)
    h = _gelu(x @ params["W1"] + params["b1"])
    h = _gelu(h @ params["W2"] + params["b2"])
    msg = h @ params["W3"] + params["b3"]
    G = grid_pos.shape[0]
    summed = jax.ops.segment_sum(msg, gi, num_segments=G)
    cnt = jax.ops.segment_sum(jnp.ones((gi.shape[0],), jnp.float32), gi, num_segments=G)
    out = summed / jnp.maximum(cnt, 1.0)[:, None]
    return out.reshape(-1, num_grid_points, dim)


# ----------------------------------------------------------------------------
# Deterministic parameter init (torch.nn.Linear-style uniform bounds)
# ----------------------------------------------------------------------------
def init_params(key, dim):
    def linear(key, fan_in, fan_out):
        k1, k2 = jax.random.split(key)
        bound = 1.0 / float(np.sqrt(fan_in))
        W = jax.random.uniform(k1, (fan_in, fan_out), jnp.float32, -bound, bound)
        b = jax.random.uniform(k2, (1, fan_out), jnp.float32, -bound, bound)
        return W, b

    k1, k2, k3 = jax.random.split(key, 3)
    W1, b1 = linear(k1, 2 * dim, 2 * dim)
    W2, b2 = linear(k2, 2 * dim, 2 * dim)
    W3, b3 = linear(k3, 2 * dim, dim)
    return {"W1": W1, "b1": b1, "W2": W2, "b2": b2, "W3": W3, "b3": b3}


if __name__ == "__main__":
    key = jax.random.PRNGKey(0)

    dim = 32
    resolution = (8, 8)
    ndim = len(resolution)
    num_grid_points = int(np.prod(resolution))
    batch = 3
    num_mesh = 40
    edges_per_grid = 3
    TG, TE = 128, 512

    k_param, k_mesh = jax.random.split(key)
    params = init_params(k_param, dim)

    # mesh positions (Nm, 2)
    mesh_pos = jax.random.uniform(k_mesh, (num_mesh, ndim), jnp.float32) * 2.0 - 1.0

    # regular grid positions, repeated per batch: (batch * 64, 2)
    lin = jnp.linspace(-1.0, 1.0, resolution[0], dtype=jnp.float32)
    gy, gx = jnp.meshgrid(lin, lin, indexing="ij")
    grid_single = jnp.stack([gy.reshape(-1), gx.reshape(-1)], axis=1)
    grid_pos = jnp.tile(grid_single, (batch, 1))
    G = grid_pos.shape[0]

    # edges sorted by destination grid index (segment_csr precondition)
    grid_idx_np = np.repeat(np.arange(G, dtype=np.int32), edges_per_grid)
    mesh_idx_np = np.array(
        [(g * 5 + j * 7) % num_mesh for g in range(G) for j in range(edges_per_grid)],
        dtype=np.int32,
    )
    mesh_to_grid_edges = jnp.asarray(
        np.stack([grid_idx_np, mesh_idx_np], axis=1), dtype=jnp.int32)

    # static reduction-axis bound derived host-side from the CSR structure
    max_et = compute_max_edge_tiles(grid_idx_np, G, TG, TE)

    fwd = jax.jit(functools.partial(
        rans_gino_mesh_to_grid, dim=dim, resolution=resolution,
        max_edge_tiles=max_et, tg=TG, te=TE, sorted_edges=True))
    out = fwd(params, mesh_pos, grid_pos, mesh_to_grid_edges)
    out = jax.block_until_ready(out)

    ref = reference(params, mesh_pos, grid_pos, mesh_to_grid_edges, dim, resolution)
    ref = jax.block_until_ready(ref)

    assert out.shape == (batch, num_grid_points, dim), out.shape
    assert bool(jnp.all(jnp.isfinite(out)))
    # bf16 MXU operands with f32 accumulation -> compare at 2e-2 tolerance
    assert bool(jnp.allclose(out, ref, rtol=2e-2, atol=2e-2))

    print("KERNEL_OK")
</pallas_src>

<mosaic_0001>
module attributes {stable_mosaic.version = 11 : i64} {
  func.func private @main(%arg0: i32) attributes {dimension_semantics = [#tpu.dimension_semantics<core_parallel>], iteration_bounds = array<i64: 2>, tpu.core_type = #tpu.core_type<sc_scalar_subcore>, window_params = []} {
    return
  }
}

module attributes {stable_mosaic.version = 11 : i64} {
  func.func private @main(%arg0: i32) attributes {dimension_semantics = [#tpu.dimension_semantics<core_parallel>], iteration_bounds = array<i64: 2>, tpu.core_type = #tpu.core_type<sc_scalar_subcore>, window_params = []} {
    return
  }
}

module attributes {stable_mosaic.version = 11 : i64} {
  func.func @_fused_gno_kernel(%arg0: i32, %arg1: i32, %arg2: memref<2xi32, #tpu.memory_space<smem>>, %arg3: memref<2xi32, #tpu.memory_space<smem>>, %arg4: memref<1x512xi32, #tpu.memory_space<vmem>>, %arg5: memref<512x128xbf16, #tpu.memory_space<vmem>>, %arg6: memref<128x128xbf16, #tpu.memory_space<vmem>>, %arg7: memref<1x128xf32, #tpu.memory_space<vmem>>, %arg8: memref<128x128xbf16, #tpu.memory_space<vmem>>, %arg9: memref<1x128xf32, #tpu.memory_space<vmem>>, %arg10: memref<128x128xbf16, #tpu.memory_space<vmem>>, %arg11: memref<1x128xf32, #tpu.memory_space<vmem>>, %arg12: memref<128x1xf32, #tpu.memory_space<vmem>>, %arg13: memref<128x128xf32, #tpu.memory_space<vmem>>, %arg14: memref<128x128xf32, #tpu.memory_space<vmem>>) attributes {dimension_semantics = [#tpu.dimension_semantics<parallel>, #tpu.dimension_semantics<arbitrary>], iteration_bounds = array<i64: 2, 2>, scalar_prefetch = 2 : i64, scratch_operands = 1 : i64, tpu.core_type = #tpu.core_type<tc>, window_params = [{transform_indices = @transform_0, window_bounds = array<i64: 1, 512>}, {transform_indices = @transform_1, window_bounds = array<i64: 512, 128>}, {pipeline_mode = #tpu.pipeline_mode<synchronous>, transform_indices = @transform_2, window_bounds = array<i64: 128, 128>}, {pipeline_mode = #tpu.pipeline_mode<synchronous>, transform_indices = @transform_3, window_bounds = array<i64: 1, 128>}, {pipeline_mode = #tpu.pipeline_mode<synchronous>, transform_indices = @transform_4, window_bounds = array<i64: 128, 128>}, {pipeline_mode = #tpu.pipeline_mode<synchronous>, transform_indices = @transform_5, window_bounds = array<i64: 1, 128>}, {pipeline_mode = #tpu.pipeline_mode<synchronous>, transform_indices = @transform_6, window_bounds = array<i64: 128, 128>}, {pipeline_mode = #tpu.pipeline_mode<synchronous>, transform_indices = @transform_7, window_bounds = array<i64: 1, 128>}, {transform_indices = @transform_8, window_bounds = array<i64: 128, 1>}, {transform_indices = @transform_9, window_bounds = array<i64: 128, 128>}]} {
    %c0_i32 = arith.constant 0 : i32
    %0 = arith.cmpi eq, %arg1, %c0_i32 : i32
    %1 = arith.extui %0 : i1 to i32
    %c0_i32_0 = arith.constant 0 : i32
    %2 = arith.cmpi ne, %1, %c0_i32_0 : i32
    scf.if %2 {
      %cst = arith.constant 0.000000e+00 : f32
      %11 = vector.broadcast %cst : f32 to vector<128x128xf32>
      %c0 = arith.constant 0 : index
      %c0_3 = arith.constant 0 : index
      %12 = vector.load %arg14[%c0, %c0_3] : memref<128x128xf32, #tpu.memory_space<vmem>>, vector<128x128xf32>
      tpu.vector_store %arg14[%c0, %c0_3], %11 {strides = array<i32>} : memref<128x128xf32, #tpu.memory_space<vmem>>, vector<128x128xf32>,
    } else {
    }
    %3 = arith.index_cast %arg0 : i32 to index
    %4 = memref.load %arg3[%3] : memref<2xi32, #tpu.memory_space<smem>>
    %5 = arith.cmpi slt, %arg1, %4 : i32
    %6 = arith.extui %5 : i1 to i32
    %c0_i32_1 = arith.constant 0 : i32
    %7 = arith.cmpi ne, %6, %c0_i32_1 : i32
    scf.if %7 {
      %c0 = arith.constant 0 : index
      %c0_3 = arith.constant 0 : index
      %11 = vector.load %arg5[%c0, %c0_3] : memref<512x128xbf16, #tpu.memory_space<vmem>>, vector<512x128xbf16>
      %c0_4 = arith.constant 0 : index
      %c0_5 = arith.constant 0 : index
      %12 = vector.load %arg6[%c0_4, %c0_5] : memref<128x128xbf16, #tpu.memory_space<vmem>>, vector<128x128xbf16>
      %cst = arith.constant dense<0.000000e+00> : vector<512x128xf32>
      %13 = tpu.matmul %11, %12, %cst {dimension_numbers = #tpu.dot_dimension_numbers<[1], [0], [0], [1], [0, 0, 1, 1], [], []>} : vector<512x128xbf16>, vector<128x128xbf16>, vector<512x128xf32> -> vector<512x128xf32>
      %c0_6 = arith.constant 0 : index
      %c0_7 = arith.constant 0 : index
      %14 = vector.load %arg7[%c0_6, %c0_7] : memref<1x128xf32, #tpu.memory_space<vmem>>, vector<1x128xf32>
      %15 = vector.broadcast %14 : vector<1x128xf32> to vector<512x128xf32>
      %16 = arith.addf %13, %15 : vector<512x128xf32>
      %cst_8 = arith.constant 5.000000e-01 : f32
      %17 = vector.broadcast %cst_8 : f32 to vector<512x128xf32>
      %18 = arith.mulf %17, %16 : vector<512x128xf32>
      %cst_9 = arith.constant 0.707106769 : f32
      %19 = vector.broadcast %cst_9 : f32 to vector<512x128xf32>
      %20 = arith.mulf %16, %19 : vector<512x128xf32>
      %cst_10 = arith.constant -4.000000e+00 : f32
      %cst_11 = arith.constant 4.000000e+00 : f32
      %21 = vector.broadcast %cst_10 : f32 to vector<512x128xf32>
      %22 = arith.maximumf %21, %20 : vector<512x128xf32>
      %23 = vector.broadcast %cst_11 : f32 to vector<512x128xf32>
      %24 = arith.minimumf %23, %22 : vector<512x128xf32>
      %25 = arith.mulf %24, %24 : vector<512x128xf32>
      %cst_12 = arith.constant -2.72614237E-10 : f32
      %26 = vector.broadcast %cst_12 : f32 to vector<512x128xf32>
      %27 = arith.mulf %26, %25 : vector<512x128xf32>
      %cst_13 = arith.constant 2.77068146E-8 : f32
      %28 = vector.broadcast %cst_13 : f32 to vector<512x128xf32>
      %29 = arith.addf %27, %28 : vector<512x128xf32>
      %30 = arith.mulf %29, %25 : vector<512x128xf32>
      %cst_14 = arith.constant -2.10102394E-6 : f32
      %31 = vector.broadcast %cst_14 : f32 to vector<512x128xf32>
      %32 = arith.addf %30, %31 : vector<512x128xf32>
      %33 = arith.mulf %32, %25 : vector<512x128xf32>
      %cst_15 = arith.constant -5.69250624E-5 : f32
      %34 = vector.broadcast %cst_15 : f32 to vector<512x128xf32>
      %35 = arith.addf %33, %34 : vector<512x128xf32>
      %36 = arith.mulf %35, %25 : vector<512x128xf32>
      %cst_16 = arith.constant -7.34990637E-4 : f32
      %37 = vector.broadcast %cst_16 : f32 to vector<512x128xf32>
      %38 = arith.addf %36, %37 : vector<512x128xf32>
      %39 = arith.mulf %38, %25 : vector<512x128xf32>
      %cst_17 = arith.constant -2.954600e-03 : f32
      %40 = vector.broadcast %cst_17 : f32 to vector<512x128xf32>
      %41 = arith.addf %39, %40 : vector<512x128xf32>
      %42 = arith.mulf %41, %25 : vector<512x128xf32>
      %cst_18 = arith.constant -0.0160960332 : f32
      %43 = vector.broadcast %cst_18 : f32 to vector<512x128xf32>
      %44 = arith.addf %42, %43 : vector<512x128xf32>
      %45 = arith.mulf %44, %24 : vector<512x128xf32>
      %cst_19 = arith.constant -1.45660715E-5 : f32
      %46 = vector.broadcast %cst_19 : f32 to vector<512x128xf32>
      %47 = arith.mulf %46, %25 : vector<512x128xf32>
      %cst_20 = arith.constant -2.13374049E-4 : f32
      %48 = vector.broadcast %cst_20 : f32 to vector<512x128xf32>
      %49 = arith.addf %47, %48 : vector<512x128xf32>
      %50 = arith.mulf %49, %25 : vector<512x128xf32>
      %cst_21 = arith.constant -0.00168282702 : f32
      %51 = vector.broadcast %cst_21 : f32 to vector<512x128xf32>
      %52 = arith.addf %50, %51 : vector<512x128xf32>
      %53 = arith.mulf %52, %25 : vector<512x128xf32>
      %cst_22 = arith.constant -0.00737332925 : f32
      %54 = vector.broadcast %cst_22 : f32 to vector<512x128xf32>
      %55 = arith.addf %53, %54 : vector<512x128xf32>
      %56 = arith.mulf %55, %25 : vector<512x128xf32>
      %cst_23 = arith.constant -0.0142647391 : f32
      %57 = vector.broadcast %cst_23 : f32 to vector<512x128xf32>
      %58 = arith.addf %56, %57 : vector<512x128xf32>
      %59 = arith.divf %45, %58 : vector<512x128xf32>
      %cst_24 = arith.constant 1.000000e+00 : f32
      %60 = vector.broadcast %cst_24 : f32 to vector<512x128xf32>
      %61 = arith.addf %60, %59 : vector<512x128xf32>
      %62 = arith.mulf %18, %61 : vector<512x128xf32>
      %63 = arith.truncf %62 : vector<512x128xf32> to vector<512x128xbf16>
      %c0_25 = arith.constant 0 : index
      %c0_26 = arith.constant 0 : index
      %64 = vector.load %arg8[%c0_25, %c0_26] : memref<128x128xbf16, #tpu.memory_space<vmem>>, vector<128x128xbf16>
      %cst_27 = arith.constant dense<0.000000e+00> : vector<512x128xf32>
      %65 = tpu.matmul %63, %64, %cst_27 {dimension_numbers = #tpu.dot_dimension_numbers<[1], [0], [0], [1], [0, 0, 1, 1], [], []>} : vector<512x128xbf16>, vector<128x128xbf16>, vector<512x128xf32> -> vector<512x128xf32>
      %c0_28 = arith.constant 0 : index
      %c0_29 = arith.constant 0 : index
      %66 = vector.load %arg9[%c0_28, %c0_29] : memref<1x128xf32, #tpu.memory_space<vmem>>, vector<1x128xf32>
      %67 = vector.broadcast %66 : vector<1x128xf32> to vector<512x128xf32>
      %68 = arith.addf %65, %67 : vector<512x128xf32>
      %cst_30 = arith.constant 5.000000e-01 : f32
      %69 = vector.broadcast %cst_30 : f32 to vector<512x128xf32>
      %70 = arith.mulf %69, %68 : vector<512x128xf32>
      %cst_31 = arith.constant 0.707106769 : f32
      %71 = vector.broadcast %cst_31 : f32 to vector<512x128xf32>
      %72 = arith.mulf %68, %71 : vector<512x128xf32>
      %cst_32 = arith.constant -4.000000e+00 : f32
      %cst_33 = arith.constant 4.000000e+00 : f32
      %73 = vector.broadcast %cst_32 : f32 to vector<512x128xf32>
      %74 = arith.maximumf %73, %72 : vector<512x128xf32>
      %75 = vector.broadcast %cst_33 : f32 to vector<512x128xf32>
      %76 = arith.minimumf %75, %74 : vector<512x128xf32>
      %77 = arith.mulf %76, %76 : vector<512x128xf32>
      %cst_34 = arith.constant -2.72614237E-10 : f32
      %78 = vector.broadcast %cst_34 : f32 to vector<512x128xf32>
      %79 = arith.mulf %78, %77 : vector<512x128xf32>
      %cst_35 = arith.constant 2.77068146E-8 : f32
      %80 = vector.broadcast %cst_35 : f32 to vector<512x128xf32>
      %81 = arith.addf %79, %80 : vector<512x128xf32>
      %82 = arith.mulf %81, %77 : vector<512x128xf32>
      %cst_36 = arith.constant -2.10102394E-6 : f32
      %83 = vector.broadcast %cst_36 : f32 to vector<512x128xf32>
      %84 = arith.addf %82, %83 : vector<512x128xf32>
      %85 = arith.mulf %84, %77 : vector<512x128xf32>
      %cst_37 = arith.constant -5.69250624E-5 : f32
      %86 = vector.broadcast %cst_37 : f32 to vector<512x128xf32>
      %87 = arith.addf %85, %86 : vector<512x128xf32>
      %88 = arith.mulf %87, %77 : vector<512x128xf32>
      %cst_38 = arith.constant -7.34990637E-4 : f32
      %89 = vector.broadcast %cst_38 : f32 to vector<512x128xf32>
      %90 = arith.addf %88, %89 : vector<512x128xf32>
      %91 = arith.mulf %90, %77 : vector<512x128xf32>
      %cst_39 = arith.constant -2.954600e-03 : f32
      %92 = vector.broadcast %cst_39 : f32 to vector<512x128xf32>
      %93 = arith.addf %91, %92 : vector<512x128xf32>
      %94 = arith.mulf %93, %77 : vector<512x128xf32>
      %cst_40 = arith.constant -0.0160960332 : f32
      %95 = vector.broadcast %cst_40 : f32 to vector<512x128xf32>
      %96 = arith.addf %94, %95 : vector<512x128xf32>
      %97 = arith.mulf %96, %76 : vector<512x128xf32>
      %cst_41 = arith.constant -1.45660715E-5 : f32
      %98 = vector.broadcast %cst_41 : f32 to vector<512x128xf32>
      %99 = arith.mulf %98, %77 : vector<512x128xf32>
      %cst_42 = arith.constant -2.13374049E-4 : f32
      %100 = vector.broadcast %cst_42 : f32 to vector<512x128xf32>
      %101 = arith.addf %99, %100 : vector<512x128xf32>
      %102 = arith.mulf %101, %77 : vector<512x128xf32>
      %cst_43 = arith.constant -0.00168282702 : f32
      %103 = vector.broadcast %cst_43 : f32 to vector<512x128xf32>
      %104 = arith.addf %102, %103 : vector<512x128xf32>
      %105 = arith.mulf %104, %77 : vector<512x128xf32>
      %cst_44 = arith.constant -0.00737332925 : f32
      %106 = vector.broadcast %cst_44 : f32 to vector<512x128xf32>
      %107 = arith.addf %105, %106 : vector<512x128xf32>
      %108 = arith.mulf %107, %77 : vector<512x128xf32>
      %cst_45 = arith.constant -0.0142647391 : f32
      %109 = vector.broadcast %cst_45 : f32 to vector<512x128xf32>
      %110 = arith.addf %108, %109 : vector<512x128xf32>
      %111 = arith.divf %97, %110 : vector<512x128xf32>
      %cst_46 = arith.constant 1.000000e+00 : f32
      %112 = vector.broadcast %cst_46 : f32 to vector<512x128xf32>
      %113 = arith.addf %112, %111 : vector<512x128xf32>
      %114 = arith.mulf %70, %113 : vector<512x128xf32>
      %115 = arith.truncf %114 : vector<512x128xf32> to vector<512x128xbf16>
      %c0_47 = arith.constant 0 : index
      %c0_48 = arith.constant 0 : index
      %116 = vector.load %arg10[%c0_47, %c0_48] : memref<128x128xbf16, #tpu.memory_space<vmem>>, vector<128x128xbf16>
      %cst_49 = arith.constant dense<0.000000e+00> : vector<512x128xf32>
      %117 = tpu.matmul %115, %116, %cst_49 {dimension_numbers = #tpu.dot_dimension_numbers<[1], [0], [0], [1], [0, 0, 1, 1], [], []>} : vector<512x128xbf16>, vector<128x128xbf16>, vector<512x128xf32> -> vector<512x128xf32>
      %c0_50 = arith.constant 0 : index
      %c0_51 = arith.constant 0 : index
      %118 = vector.load %arg11[%c0_50, %c0_51] : memref<1x128xf32, #tpu.memory_space<vmem>>, vector<1x128xf32>
      %119 = vector.broadcast %118 : vector<1x128xf32> to vector<512x128xf32>
      %120 = arith.addf %117, %119 : vector<512x128xf32>
      %c0_52 = arith.constant 0 : index
      %c0_53 = arith.constant 0 : index
      %121 = vector.load %arg4[%c0_52, %c0_53] : memref<1x512xi32, #tpu.memory_space<vmem>>, vector<1x512xi32>
      %122 = tpu.iota {dimensions = array<i32: 0>} : vector<128x512xi32>
      %c128_i32 = arith.constant 128 : i32
      %123 = arith.muli %arg0, %c128_i32 : i32
      %124 = vector.broadcast %123 : i32 to vector<128x512xi32>
      %125 = arith.addi %122, %124 : vector<128x512xi32>
      %126 = vector.broadcast %121 : vector<1x512xi32> to vector<128x512xi32>
      %127 = arith.cmpi eq, %125, %126 : vector<128x512xi32>
      %128 = arith.extui %127 : vector<128x512xi1> to vector<128x512xi32>
      %129 = arith.sitofp %128 : vector<128x512xi32> to vector<128x512xf32>
      %130 = arith.truncf %129 : vector<128x512xf32> to vector<128x512xbf16>
      %c0_54 = arith.constant 0 : index
      %c0_55 = arith.constant 0 : index
      %131 = vector.load %arg14[%c0_54, %c0_55] : memref<128x128xf32, #tpu.memory_space<vmem>>, vector<128x128xf32>
      %132 = arith.truncf %120 : vector<512x128xf32> to vector<512x128xbf16>
      %cst_56 = arith.constant dense<0.000000e+00> : vector<128x128xf32>
      %133 = tpu.matmul %130, %132, %cst_56 {dimension_numbers = #tpu.dot_dimension_numbers<[1], [0], [0], [1], [0, 0, 1, 1], [], []>} : vector<128x512xbf16>, vector<512x128xbf16>, vector<128x128xf32> -> vector<128x128xf32>
      %134 = arith.addf %131, %133 : vector<128x128xf32>
      %c0_57 = arith.constant 0 : index
      %c0_58 = arith.constant 0 : index
      %135 = vector.load %arg14[%c0_57, %c0_58] : memref<128x128xf32, #tpu.memory_space<vmem>>, vector<128x128xf32>
      tpu.vector_store %arg14[%c0_57, %c0_58], %134 {strides = array<i32>} : memref<128x128xf32, #tpu.memory_space<vmem>>, vector<128x128xf32>,
    } else {
    }
    %c1_i32 = arith.constant 1 : i32
    %8 = arith.cmpi eq, %arg1, %c1_i32 : i32
    %9 = arith.extui %8 : i1 to i32
    %c0_i32_2 = arith.constant 0 : i32
    %10 = arith.cmpi ne, %9, %c0_i32_2 : i32
    scf.if %10 {
      %c0 = arith.constant 0 : index
      %c0_3 = arith.constant 0 : index
      %11 = vector.load %arg14[%c0, %c0_3] : memref<128x128xf32, #tpu.memory_space<vmem>>, vector<128x128xf32>
      %c0_4 = arith.constant 0 : index
      %c0_5 = arith.constant 0 : index
      %12 = vector.load %arg12[%c0_4, %c0_5] : memref<128x1xf32, #tpu.memory_space<vmem>>, vector<128x1xf32>
      %13 = vector.broadcast %12 : vector<128x1xf32> to vector<128x128xf32>
      %14 = arith.mulf %11, %13 : vector<128x128xf32>
      %c0_6 = arith.constant 0 : index
      %c0_7 = arith.constant 0 : index
      %15 = vector.load %arg13[%c0_6, %c0_7] : memref<128x128xf32, #tpu.memory_space<vmem>>, vector<128x128xf32>
      tpu.vector_store %arg13[%c0_6, %c0_7], %14 {strides = array<i32>} : memref<128x128xf32, #tpu.memory_space<vmem>>, vector<128x128xf32>,
    } else {
    }
    return
  }
  func.func @transform_0(%arg0: i32, %arg1: i32, %arg2: memref<2xi32, #tpu.memory_space<smem>>, %arg3: memref<2xi32, #tpu.memory_space<smem>>) -> (i32, i32) {
    %0 = arith.index_cast %arg0 : i32 to index
    %1 = memref.load %arg2[%0] : memref<2xi32, #tpu.memory_space<smem>>
    %2 = arith.index_cast %arg0 : i32 to index
    %3 = memref.load %arg3[%2] : memref<2xi32, #tpu.memory_space<smem>>
    %c1_i32 = arith.constant 1 : i32
    %4 = arith.subi %3, %c1_i32 : i32
    %c0_i32 = arith.constant 0 : i32
    %5 = arith.maxsi %4, %c0_i32 : i32
    %6 = arith.minsi %arg1, %5 : i32
    %7 = arith.addi %1, %6 : i32
    %c1_i32_0 = arith.constant 1 : i32
    %8 = arith.minsi %7, %c1_i32_0 : i32
    %c0_i32_1 = arith.constant 0 : i32
    %c0_i32_2 = arith.constant 0 : i32
    return %c0_i32_1, %8 : i32, i32
  }
  func.func @transform_1(%arg0: i32, %arg1: i32, %arg2: memref<2xi32, #tpu.memory_space<smem>>, %arg3: memref<2xi32, #tpu.memory_space<smem>>) -> (i32, i32) {
    %0 = arith.index_cast %arg0 : i32 to index
    %1 = memref.load %arg2[%0] : memref<2xi32, #tpu.memory_space<smem>>
    %2 = arith.index_cast %arg0 : i32 to index
    %3 = memref.load %arg3[%2] : memref<2xi32, #tpu.memory_space<smem>>
    %c1_i32 = arith.constant 1 : i32
    %4 = arith.subi %3, %c1_i32 : i32
    %c0_i32 = arith.constant 0 : i32
    %5 = arith.maxsi %4, %c0_i32 : i32
    %6 = arith.minsi %arg1, %5 : i32
    %7 = arith.addi %1, %6 : i32
    %c1_i32_0 = arith.constant 1 : i32
    %8 = arith.minsi %7, %c1_i32_0 : i32
    %c0_i32_1 = arith.constant 0 : i32
    %c0_i32_2 = arith.constant 0 : i32
    return %8, %c0_i32_1 : i32, i32
  }
  func.func @transform_2(%arg0: i32, %arg1: i32, %arg2: memref<2xi32, #tpu.memory_space<smem>>, %arg3: memref<2xi32, #tpu.memory_space<smem>>) -> (i32, i32) {
    %c0_i32 = arith.constant 0 : i32
    %c0_i32_0 = arith.constant 0 : i32
    %c0_i32_1 = arith.constant 0 : i32
    return %c0_i32, %c0_i32_0 : i32, i32
  }
  func.func @transform_3(%arg0: i32, %arg1: i32, %arg2: memref<2xi32, #tpu.memory_space<smem>>, %arg3: memref<2xi32, #tpu.memory_space<smem>>) -> (i32, i32) {
    %c0_i32 = arith.constant 0 : i32
    %c0_i32_0 = arith.constant 0 : i32
    %c0_i32_1 = arith.constant 0 : i32
    return %c0_i32, %c0_i32_0 : i32, i32
  }
  func.func @transform_4(%arg0: i32, %arg1: i32, %arg2: memref<2xi32, #tpu.memory_space<smem>>, %arg3: memref<2xi32, #tpu.memory_space<smem>>) -> (i32, i32) {
    %c0_i32 = arith.constant 0 : i32
    %c0_i32_0 = arith.constant 0 : i32
    %c0_i32_1 = arith.constant 0 : i32
    return %c0_i32, %c0_i32_0 : i32, i32
  }
  func.func @transform_5(%arg0: i32, %arg1: i32, %arg2: memref<2xi32, #tpu.memory_space<smem>>, %arg3: memref<2xi32, #tpu.memory_space<smem>>) -> (i32, i32) {
    %c0_i32 = arith.constant 0 : i32
    %c0_i32_0 = arith.constant 0 : i32
    %c0_i32_1 = arith.constant 0 : i32
    return %c0_i32, %c0_i32_0 : i32, i32
  }
  func.func @transform_6(%arg0: i32, %arg1: i32, %arg2: memref<2xi32, #tpu.memory_space<smem>>, %arg3: memref<2xi32, #tpu.memory_space<smem>>) -> (i32, i32) {
    %c0_i32 = arith.constant 0 : i32
    %c0_i32_0 = arith.constant 0 : i32
    %c0_i32_1 = arith.constant 0 : i32
    return %c0_i32, %c0_i32_0 : i32, i32
  }
  func.func @transform_7(%arg0: i32, %arg1: i32, %arg2: memref<2xi32, #tpu.memory_space<smem>>, %arg3: memref<2xi32, #tpu.memory_space<smem>>) -> (i32, i32) {
    %c0_i32 = arith.constant 0 : i32
    %c0_i32_0 = arith.constant 0 : i32
    %c0_i32_1 = arith.constant 0 : i32
    return %c0_i32, %c0_i32_0 : i32, i32
  }
  func.func @transform_8(%arg0: i32, %arg1: i32, %arg2: memref<2xi32, #tpu.memory_space<smem>>, %arg3: memref<2xi32, #tpu.memory_space<smem>>) -> (i32, i32) {
    %c0_i32 = arith.constant 0 : i32
    %c0_i32_0 = arith.constant 0 : i32
    return %arg0, %c0_i32 : i32, i32
  }
  func.func @transform_9(%arg0: i32, %arg1: i32, %arg2: memref<2xi32, #tpu.memory_space<smem>>, %arg3: memref<2xi32, #tpu.memory_space<smem>>) -> (i32, i32) {
    %c0_i32 = arith.constant 0 : i32
    %c0_i32_0 = arith.constant 0 : i32
    return %arg0, %c0_i32 : i32, i32
  }
}

</mosaic_0001>

<bundles_post_ra>
// kernel: rans_gino_mesh_to_grid.1
= control target key start
LH: loop header
LB: loop body
LE: loop exit
PB: predicated region body
PF: predicated region fallthrough
CT: control target
= control target key end

     0   :  { %s12398_s0 = inlined_call_operand.vmem [shape: s32[2], index: 0, kind: input, shape index: {}]   ;;  %s12399_s2 = inlined_call_operand.vmem [shape: s32[1,1024], index: 2, kind: input, shape index: {}]   ;;  %s12400_s3 = inlined_call_operand.vmem [shape: bf16[1024,128], index: 3, kind: input, shape index: {}]   ;;  %s12401_s4 = inlined_call_operand.vmem [shape: bf16[128,128], index: 4, kind: input, shape index: {}]   ;;  %s12402_s5 = inlined_call_operand.vmem [shape: f32[1,128], index: 5, kind: input, shape index: {}]   ;;  %s12403_s6 = inlined_call_operand.vmem [shape: bf16[128,128], index: 6, kind: input, shape index: {}]   ;;  %s12404_s7 = inlined_call_operand.vmem [shape: f32[1,128], index: 7, kind: input, shape index: {}]   ;;  %s12405_s8 = inlined_call_operand.vmem [shape: bf16[128,128], index: 8, kind: input, shape index: {}]   ;;  %s12406_s9 = inlined_call_operand.vmem [shape: f32[1,128], index: 9, kind: input, shape index: {}]   ;;  %s12407_s10 = inlined_call_operand.vmem [shape: f32[256,1], index: 10, kind: input, shape index: {}]   ;;  %s12408_s11 = inlined_call_operand.vmem [shape: f32[256,128], index: 11, kind: output, shape index: {}]   ;;  %s12409_s1 = inlined_call_operand.vmem [shape: s32[2], index: 1, kind: input, shape index: {}]  }
   0x1   :  { %s16_s19 = sshll.u32 %s12398_s0, 4  ;;  %s20_s22 = sshll.u32 %s12409_s1, 4  ;;  %s17_s19 = int_to_ptr.vmem [resolvable:$true] %s16_s19  ;;  %s21_s22 = int_to_ptr.vmem [resolvable:$true] %s20_s22 }
   0x2   :  { %s7786_s23 = scalar_lea.vmem %s17_s19, 16  ;;  %p7791_p1 = scmp.lt.s32.totalorder %s17_s19, %s17_s19 }
   0x3   :  { %p7787_p0 = scmp.ne.s32.totalorder %s17_s19, %s7786_s23  ;;  %p7792_p2 = scmp.lt.s32.totalorder %s7786_s23, %s7786_s23 }
   0x5   :  { %p7793_p3 = por %p7792_p2, %p7791_p1 }
   0x7   :  { %p7794_p4 = pnand %p7793_p3, %p7787_p0 }
   0x9   :  { %7797 = shalt.err (!%p7794_p4)  }
   0xa   :  { %s7852_s24 = smov [#allocation4]   ;;  %s7798_s25 = scalar_lea.vmem %s21_s22, 16 }
   0xb   :  { %19 = dma.vmem_to_smem %s17_s19, 16, %s7852_s24, [#allocation3] }
   0xc   :  { %p7799_p5 = scmp.ne.s32.totalorder %s21_s22, %s7798_s25  ;;  %p7803_p6 = scmp.lt.s32.totalorder %s21_s22, %s21_s22 }
   0xd   :  { %p7804_p7 = scmp.lt.s32.totalorder %s7798_s25, %s7798_s25 }
   0xf   :  { %p7805_p8 = por %p7804_p7, %p7803_p6 }
  0x11   :  { %p7806_p9 = pnand %p7805_p8, %p7799_p5 }
  0x13   :  { %7809 = shalt.err (!%p7806_p9)  }
  0x14   :  { %s7853_s0 = smov [#allocation5]  }
  0x15   :  { %23 = dma.vmem_to_smem %s21_s22, 16, %s7853_s0, [#allocation3] }
  0x16   :  { %7830 = dma.done.wait [#allocation3], 32 }
  0x17   :  { %7831 = vsyncadd [#allocation3], 4294967264 }
  0x18   :  { %25 = sfence }
  0x19   :  { %s7923_s1 = smov 0   ;;  %s7925_s26 = smov 0  }
  0x1a   :  { %s7927_s27 = smov 0   ;;  %s7929_s28 = smov 0  }
  0x1b   :  { %s7931_s29 = smov 0  }
  0x1c LB: > { %12411 = sst [smem:[#allocation7_spill]] %s7846_s28  ;;  %s40_s30 = sadd.s32 1, %s7842_s27  ;;  %s7850_s29 = sphi %s7931_s29, %s31_s29   ;;  %s7846_s28 = sphi %s7929_s28, %s12555_s28   ;;  %s7842_s27 = sphi %s7927_s27, %s12557_s27   ;;  %s7838_s26 = sphi %s7925_s26, %s12553_s26   ;;  %s7834_s1 = sphi %s7923_s1, %s12556_s1  }
  0x1d   : > { %s43_s12 = sadd.s32 1, %s7846_s28  ;;  %p41_p10 = scmp.ge.s32.totalorder %s40_s30, 2 }
  0x1e   : > { %p6602_p11 = scmp.ge.s32.totalorder %s7850_s29, 1  ;;  %p413_p12 = scmp.lt.s32.totalorder %s7850_s29, 5 }
  0x1f   : > { %s12559_s30 = smov (%p41_p10, %s40_s30), 0  ;;  %s12561_s12 = smov (!%p41_p10, %s43_s12), %s7846_s28 }
  0x20   : > { %12412 = sst [smem:[#allocation8_spill]] %s12559_s30  ;;  %p414_p13 = pnand %p6602_p11, %p413_p12 }
  0x21   : > { %p45_p0 = scmp.ge.s32.totalorder %s12561_s12, 2  ;;  %s479_s13 = sld [smem:[#allocation5 + %s7838_s26]] (!%p414_p13) }
  0x22   : > { %417 = sbr.rel (%p414_p13) target bundleno = 1992 (0x7c8), region = 56  ;;  %s504_s14 = sld [smem:[#allocation5 + %s7838_s26]] (!%p414_p13) }
  0x23   : > { %s12563_s12 = smov (%p45_p0, %s12561_s12), 0  ;;  %s6608_s15 = sshll.u32 (!%p414_p13), %s7838_s26, 4 }
  0x24   : > { %12413 = sst [smem:[#allocation9_spill]] %s12563_s12  ;;  %p530_p1 = scmp.lt.s32.totalorder (!%p414_p13), %s6608_s15, 31 }
  0x25   : > { %s478_s16 = sld [smem:[#allocation4 + %s7838_s26]] (!%p414_p13)  ;;  %p6612_p10 = scmp.ne.s32.totalorder (!%p414_p13), %s7834_s1, 0 }
  0x26   : > { %s503_s18 = sld [smem:[#allocation4 + %s7838_s26]] (!%p414_p13) }
  0x27   : > { %s6603_s17 = sadd.s32 (!%p414_p13), 4294967295, %s479_s13 }
  0x28   : > { %p481_p2 = scmp.gt.s32.totalorder (!%p414_p13), %s6603_s17, 0  ;;  %s6605_s19 = sadd.s32 (!%p414_p13), 4294967295, %s504_s14 }
  0x29   : > { %s12565_s15 = smov (!%p530_p1, %s6608_s15), 31  ;;  %p506_p3 = scmp.gt.s32.totalorder %s6605_s19, 0  ;;  %v7854_v0 = vmov (!%p6612_p10), 0.0  }
  0x2a   : > { %s6609_s20 = sshll.u32 %s12565_s15, 3  ;;  %s12567_s17 = smov (!%p481_p2, %s6603_s17), 0  ;;  %546 = vst [vmem:[#allocation2] sm:$0xff] (!%p6612_p10), %v7854_v0  ;;  %547 = vst [vmem:[#allocation2 + $0x8] sm:$0xff] (!%p6612_p10), %v7854_v0 }
  0x2b   : > { %s12569_s19 = smov (!%p506_p3, %s6605_s19), 0  ;;  %p483_p4 = scmp.lt.s32.totalorder %s7834_s1, %s12567_s17  ;;  %548 = vst [vmem:[#allocation2 + $0x10] sm:$0xff] (!%p6612_p10), %v7854_v0  ;;  %549 = vst [vmem:[#allocation2 + $0x18] sm:$0xff] (!%p6612_p10), %v7854_v0 }
  0x2c   : > { %s7966_s23 = scalar_lea.vmem %s12407_s10, %s6609_s20  ;;  %p508_p5 = scmp.lt.s32.totalorder %s7834_s1, %s12569_s19  ;;  %550 = vst [vmem:[#allocation2 + $0x20] sm:$0xff] (!%p6612_p10), %v7854_v0  ;;  %551 = vst [vmem:[#allocation2 + $0x28] sm:$0xff] (!%p6612_p10), %v7854_v0 }
  0x2d   : > { %s7972_s0 = scalar_lea.vmem %s12408_s11, %s6609_s20  ;;  %552 = vst [vmem:[#allocation2 + $0x30] sm:$0xff] (!%p6612_p10), %v7854_v0  ;;  %553 = vst [vmem:[#allocation2 + $0x38] sm:$0xff] (!%p6612_p10), %v7854_v0 }
  0x2e   : > { %s484_s13 = scalar_select %p483_p4, %s7834_s1, %s12567_s17 }
  0x2f   : > { %s509_s12 = scalar_select %p508_p5, %s7834_s1, %s12569_s19 }
  0x30   : > { %s485_s30 = sadd.s32 %s484_s13, %s478_s16  ;;  %554 = vst [vmem:[#allocation2 + $0x40] sm:$0xff] (!%p6612_p10), %v7854_v0  ;;  %555 = vst [vmem:[#allocation2 + $0x48] sm:$0xff] (!%p6612_p10), %v7854_v0 }
  0x31   : > { %p486_p6 = scmp.lt.s32.totalorder %s485_s30, 1  ;;  %s510_s14 = sadd.s32 %s509_s12, %s503_s18  ;;  %556 = vst [vmem:[#allocation2 + $0x50] sm:$0xff] (!%p6612_p10), %v7854_v0  ;;  %557 = vst [vmem:[#allocation2 + $0x58] sm:$0xff] (!%p6612_p10), %v7854_v0 }
  0x32   : > { %p511_p7 = scmp.lt.s32.totalorder %s510_s14, 1  ;;  %558 = vst [vmem:[#allocation2 + $0x60] sm:$0xff] (!%p6612_p10), %v7854_v0  ;;  %559 = vst [vmem:[#allocation2 + $0x68] sm:$0xff] (!%p6612_p10), %v7854_v0 }
  0x33   : > { %s12571_s30 = smov (!%p486_p6, %s485_s30), 1  ;;  %560 = vst [vmem:[#allocation2 + $0x70] sm:$0xff] (!%p6612_p10), %v7854_v0  ;;  %561 = vst [vmem:[#allocation2 + $0x78] sm:$0xff] (!%p6612_p10), %v7854_v0 }
  0x34   : > { %s12573_s14 = smov (!%p511_p7, %s510_s14), 1  ;;  %s6604_s15 = sshll.u32 %s12571_s30, 2 }
  0x35   : > { %p489_p8 = scmp.lt.s32.totalorder %s6604_s15, 7  ;;  %s6606_s28 = sshll.u32 %s12573_s14, 6 }
  0x36   : > { %p514_p9 = scmp.lt.s32.totalorder %s6606_s28, 127  ;;  %545 = sbr.rel (%p6612_p10) target bundleno = 61 (0x3d), region = 60 }
  0x37   : > { %s12575_s15 = smov (!%p489_p8, %s6604_s15), 7 }
  0x38   : > { %s12577_s28 = smov (!%p514_p9, %s6606_s28), 127  ;;  %s491_s20 = scalar_lea.vmem %s12399_s2, %s12575_s15 }
  0x39   : > { %s6607_s17 = sshll.u32 %s12577_s28, 2 }
  0x3a   : > { %s7985_s12 = scalar_lea.vmem %s12400_s3, %s6607_s17 }
  0x3d PF: > { %s562_s28 = sld [smem:[#allocation5 + %s7838_s26]] }
  0x43   : > { %p6613_p11 = scmp.ge.s32.totalorder %s7834_s1, %s562_s28 }
  0x45   : > { %566 = sbr.rel (%p6613_p11) target bundleno = 1830 (0x726), region = 64 }
  0x4c   : > { %v7466_v1 = vld [vmem:[%s12401_s4] sm:$0xff]   ;;  %v7467_v2 = vld [vmem:[%s12401_s4 + $0x8] sm:$0xff]   ;;  %v7468_v3 = vld [vmem:[%s12401_s4 + $0x10] sm:$0xff]   ;;  %s6801_s24 = sshll.u32 %s7838_s26, 7 }
  0x4d   : > { %7181 = vmatprep.subr.bf16.mxu0 %v7466_v1  ;;  %v7469_v4 = vld [vmem:[%s12401_s4 + $0x18] sm:$0xff]   ;;  %v7474_v5 = vld [vmem:[%s7985_s12] sm:$0xff]   ;;  %v7471_v7 = vld [vmem:[%s12401_s4 + $0x28] sm:$0xff]  }
  0x4e   : > { %7182 = vmatpush3.bf16.msra.mxu0 %v7466_v1  ;;  %7197 = vmatprep.mubr.bf16.mxu0 %v7474_v5  ;;  %v7470_v6 = vld [vmem:[%s12401_s4 + $0x20] sm:$0xff]   ;;  %v7472_v8 = vld [vmem:[%s12401_s4 + $0x30] sm:$0xff]   ;;  %v7473_v9 = vld [vmem:[%s12401_s4 + $0x38] sm:$0xff]  }
  0x4f   : > { %7183 = vmatprep.subr.bf16.mxu0 %v7467_v2  ;;  %v7475_v10 = vld [vmem:[%s7985_s12 + $0x8] sm:$0xff]   ;;  %v7476_v11 = vld [vmem:[%s7985_s12 + $0x10] sm:$0xff]   ;;  %v7477_v12 = vld [vmem:[%s7985_s12 + $0x18] sm:$0xff]  }
  0x50   : > { %v7478_v13 = vld [vmem:[%s7985_s12 + $0x20] sm:$0xff]   ;;  %v7479_v14 = vld [vmem:[%s7985_s12 + $0x28] sm:$0xff]   ;;  %v7480_v15 = vld [vmem:[%s7985_s12 + $0x30] sm:$0xff]  }
  0x51   : > { %v7481_v16 = vld [vmem:[%s7985_s12 + $0x38] sm:$0xff]   ;;  %v7482_v17 = vld [vmem:[%s7985_s12 + $0x40] sm:$0xff]   ;;  %v7483_v18 = vld [vmem:[%s7985_s12 + $0x48] sm:$0xff]  }
  0x52   : > { %7184 = vmatpush3.bf16.msra.mxu0 %v7467_v2  ;;  %v7484_v19 = vld [vmem:[%s7985_s12 + $0x50] sm:$0xff]   ;;  %v7485_v20 = vld [vmem:[%s7985_s12 + $0x58] sm:$0xff]   ;;  %v7486_v21 = vld [vmem:[%s7985_s12 + $0x60] sm:$0xff]  }
  0x53   : > { %7185 = vmatprep.subr.bf16.mxu0 %v7468_v3  ;;  %v7487_v22 = vld [vmem:[%s7985_s12 + $0x68] sm:$0xff]   ;;  %v7488_v23 = vld [vmem:[%s7985_s12 + $0x70] sm:$0xff]   ;;  %v7489_v24 = vld [vmem:[%s7985_s12 + $0x78] sm:$0xff]  }
  0x54   : > { %v7490_v25 = vld [vmem:[%s7985_s12 + $0x80] sm:$0xff]   ;;  %v7491_v26 = vld [vmem:[%s7985_s12 + $0x88] sm:$0xff]   ;;  %v7492_v27 = vld [vmem:[%s7985_s12 + $0x90] sm:$0xff]  }
  0x55   : > { %v7493_v28 = vld [vmem:[%s7985_s12 + $0x98] sm:$0xff]   ;;  %v7494_v29 = vld [vmem:[%s7985_s12 + $0xa0] sm:$0xff]   ;;  %v7495_v30 = vld [vmem:[%s7985_s12 + $0xa8] sm:$0xff]  }
  0x56   : > { %7186 = vmatpush3.bf16.msra.mxu0 %v7468_v3  ;;  %v7496_v31 = vld [vmem:[%s7985_s12 + $0xb0] sm:$0xff]   ;;  %v7497_v32 = vld [vmem:[%s7985_s12 + $0xb8] sm:$0xff]   ;;  %v7498_v33 = vld [vmem:[%s7985_s12 + $0xc0] sm:$0xff]  }
  0x57   : > { %7187 = vmatprep.subr.bf16.mxu0 %v7469_v4  ;;  %v7499_v34 = vld [vmem:[%s7985_s12 + $0xc8] sm:$0xff]   ;;  %v7500_v35 = vld [vmem:[%s7985_s12 + $0xd0] sm:$0xff]   ;;  %v7501_v36 = vld [vmem:[%s7985_s12 + $0xd8] sm:$0xff]  }
  0x58   : > { %v7502_v37 = vld [vmem:[%s7985_s12 + $0xe0] sm:$0xff]   ;;  %v7503_v38 = vld [vmem:[%s7985_s12 + $0xe8] sm:$0xff]   ;;  %v7504_v39 = vld [vmem:[%s7985_s12 + $0xf0] sm:$0xff]  }
  0x59   : > { %v7505_v40 = vld [vmem:[%s7985_s12 + $0xf8] sm:$0xff]   ;;  %v7506_v41 = vld [vmem:[%s12403_s6] sm:$0xff]   ;;  %v7507_v42 = vld [vmem:[%s12403_s6 + $0x8] sm:$0xff]  }
  0x5a   : > { %7188 = vmatpush3.bf16.msra.mxu0 %v7469_v4  ;;  %7261 = vmatprep.subr.bf16.mxu1 %v7506_v41  ;;  %v7508_v43 = vld [vmem:[%s12403_s6 + $0x10] sm:$0xff]   ;;  %v7509_v44 = vld [vmem:[%s12403_s6 + $0x18] sm:$0xff]   ;;  %v7510_v45 = vld [vmem:[%s12403_s6 + $0x20] sm:$0xff]  }
  0x5b   : > { %7189 = vmatprep.subr.bf16.mxu0 %v7470_v6  ;;  %7262 = vmatpush3.bf16.msra.mxu1 %v7506_v41  ;;  %v7511_v46 = vld [vmem:[%s12403_s6 + $0x28] sm:$0xff]   ;;  %v8067_v47 = vld [vmem:[%s12402_s5] ss:$0 sm:$0xff]  ;;  %v7512_v60 = vld [vmem:[%s12403_s6 + $0x30] sm:$0xff]  }
  0x5c   : > { %7263 = vmatprep.subr.bf16.mxu1 %v7507_v42 }
  0x5e   : > { %7190 = vmatpush3.bf16.msra.mxu0 %v7470_v6 }
  0x5f   : > { %7191 = vmatprep.subr.bf16.mxu0 %v7471_v7  ;;  %7264 = vmatpush3.bf16.msra.mxu1 %v7507_v42 }
  0x60   : > { %7265 = vmatprep.subr.bf16.mxu1 %v7508_v43 }
  0x62   : > { %7192 = vmatpush3.bf16.msra.mxu0 %v7471_v7 }
  0x63   : > { %7193 = vmatprep.subr.bf16.mxu0 %v7472_v8  ;;  %7266 = vmatpush3.bf16.msra.mxu1 %v7508_v43 }
  0x64   : > { %7267 = vmatprep.subr.bf16.mxu1 %v7509_v44 }
  0x66   : > { %7194 = vmatpush3.bf16.msra.mxu0 %v7472_v8 }
  0x67   : > { %7195 = vmatprep.subr.bf16.mxu0 %v7473_v9  ;;  %7268 = vmatpush3.bf16.msra.mxu1 %v7509_v44 }
  0x68   : > { %7269 = vmatprep.subr.bf16.mxu1 %v7510_v45 }
  0x6a   : > { %7196 = vmatpush3.bf16.msra.mxu0 %v7473_v9 }
  0x6b   : > { %7270 = vmatpush3.bf16.msra.mxu1 %v7510_v45 }
  0x6c   : > { %7271 = vmatprep.subr.bf16.mxu1 %v7511_v46 }
  0x6d   : > { %7198 = vmatmul.mubr.bf16.vlgmr.msra.gmra.mrb[0].mxu0 %v7475_v10 }
  0x6e   : > { %7201 = vmatprep.mubr.bf16.mxu0 %v7476_v11 }
  0x6f   : > { %7272 = vmatpush3.bf16.msra.mxu1 %v7511_v46 }
  0x70   : > { %7273 = vmatprep.subr.bf16.mxu1 %v7512_v60 }
  0x73   : > { %7274 = vmatpush3.bf16.msra.mxu1 %v7512_v60 }
  0x75   : > { %7202 = vmatmul.mubr.bf16.gmra.mrb[4].mxu0 %v7477_v12 }
  0x76   : > { %7205 = vmatprep.mubr.bf16.mxu0 %v7478_v13 }
  0x7d   : > { %7206 = vmatmul.mubr.bf16.gmra.mrb[8].mxu0 %v7479_v14 }
  0x7e   : > { %7209 = vmatprep.mubr.bf16.mxu0 %v7480_v15 }
  0x85   : > { %7210 = vmatmul.mubr.bf16.gmra.mrb[12].mxu0 %v7481_v16 }
  0x86   : > { %7213 = vmatprep.mubr.bf16.mxu0 %v7482_v17 }
  0x8d   : > { %7214 = vmatmul.mubr.bf16.gmra.mrb[16].mxu0 %v7483_v18 }
  0x8e   : > { %7217 = vmatprep.mubr.bf16.mxu0 %v7484_v19 }
  0x95   : > { %7218 = vmatmul.mubr.bf16.gmra.mrb[20].mxu0 %v7485_v20 }
  0x96   : > { %7221 = vmatprep.mubr.bf16.mxu0 %v7486_v21 }
  0x9d   : > { %7222 = vmatmul.mubr.bf16.gmra.mrb[24].mxu0 %v7487_v22 }
  0x9e   : > { %7225 = vmatprep.mubr.bf16.mxu0 %v7488_v23 }
  0xa5   : > { %7226 = vmatmul.mubr.bf16.gmra.mrb[28].mxu0 %v7489_v24 }
  0xa6   : > { %7229 = vmatprep.mubr.bf16.mxu0 %v7490_v25 }
  0xad   : > { %7230 = vmatmul.mubr.bf16.gmra.mrb[32].mxu0 %v7491_v26 }
  0xae   : > { %7233 = vmatprep.mubr.bf16.mxu0 %v7492_v27 }
  0xb5   : > { %7234 = vmatmul.mubr.bf16.gmra.mrb[36].mxu0 %v7493_v28 }
  0xb6   : > { %7237 = vmatprep.mubr.bf16.mxu0 %v7494_v29 }
  0xbd   : > { %7238 = vmatmul.mubr.bf16.gmra.mrb[40].mxu0 %v7495_v30 }
  0xbe   : > { %7241 = vmatprep.mubr.bf16.mxu0 %v7496_v31 }
  0xc5   : > { %7242 = vmatmul.mubr.bf16.gmra.mrb[44].mxu0 %v7497_v32 }
  0xc6   : > { %7245 = vmatprep.mubr.bf16.mxu0 %v7498_v33 }
  0xcd   : > { %7246 = vmatmul.mubr.bf16.gmra.mrb[48].mxu0 %v7499_v34 }
  0xce   : > { %7249 = vmatprep.mubr.bf16.mxu0 %v7500_v35 }
  0xd5   : > { %7250 = vmatmul.mubr.bf16.gmra.mrb[52].mxu0 %v7501_v36 }
  0xd6   : > { %7253 = vmatprep.mubr.bf16.mxu0 %v7502_v37 }
  0xdd   : > { %7254 = vmatmul.mubr.bf16.gmra.mrb[56].mxu0 %v7503_v38 }
  0xde   : > { %7257 = vmatprep.mubr.bf16.mxu0 %v7504_v39 }
  0xe5   : > { %7258 = vmatmul.mubr.bf16.gmra.mrb[60].mxu0 %v7505_v40 }
 0x140   : > { %v7199_v48 = vpop.f32.mrb[0].mxu0 }
 0x141   : > { %v937_v49 = vadd.f32 %v7199_v48, %v8067_v47  ;;  %v928_v50 = vpop.f32.mrb[1].mxu0 }
 0x142   : > { %v929_v51 = vadd.f32 %v8067_v47, %v928_v50  ;;  %v7200_v52 = vpop.f32.mrb[2].mxu0 }
 0x143   : > { %v1249_v53 = vmul.f32 0.70710677, %v937_v49  ;;  %v940_v54 = vadd.f32 %v7200_v52, %v8067_v47  ;;  %v931_v55 = vpop.f32.mrb[3].mxu0  ;;  %v8086_v1 = vmul.f32 0.5, %v937_v49 }
 0x144   : > { %v1247_v56 = vmul.f32 0.70710677, %v929_v51  ;;  %v932_v57 = vadd.f32 %v8067_v47, %v931_v55  ;;  %v8088_v2 = vmul.f32 0.5, %v929_v51 }
 0x145   : > { %v8073_v58 = vclamps-f32 %v1249_v53, 4.0  ;;  %v1250_v59 = vmul.f32 0.70710677, %v940_v54  ;;  %v8098_v8 = vmul.f32 0.5, %v940_v54 }
 0x146   : > { %v8078_v61 = vclamps-f32 %v1247_v56, 4.0  ;;  %v1248_v62 = vmul.f32 0.70710677, %v932_v57  ;;  %v8105_v12 = vmul.f32 0.5, %v932_v57 }
 0x147   : > { %v8082_v63 = vmul.f32 %v8073_v58, %v8073_v58  ;;  %v8084_v0 = vclamps-f32 %v1250_v59, 4.0 }
 0x148   : > { %v8092_v3 = vmul.f32 %v8078_v61, %v8078_v61  ;;  %v8094_v4 = vclamps-f32 %v1248_v62, 4.0  ;;  %v7203_v5 = vpop.f32.mrb[4].mxu0  ;;  %12414 = vst [vmem:[#allocation10_spill] sm:$0xff] %v8105_v12 }
 0x149   : > { %v1505_v6 = vmul.f32 -2.7261424e-10, %v8082_v63  ;;  %v2337_v7 = vmul.f32 -1.45660715e-05, %v8082_v63  ;;  %v8102_v9 = vmul.f32 %v8084_v0, %v8084_v0  ;;  %v944_v10 = vpop.f32.mrb[5].mxu0  ;;  %v8112_v14 = vadd.f32 %v7203_v5, %v8067_v47 }
 0x14a   : > { %v1503_v11 = vmul.f32 -2.7261424e-10, %v8092_v3  ;;  %v8109_v13 = vmul.f32 %v8094_v4, %v8094_v4  ;;  %v8114_v15 = vpop.f32.mrb[6].mxu0  ;;  %v8122_v25 = vadd.f32 %v8067_v47, %v944_v10  ;;  %v8130_v34 = vmul.f32 -1.45660715e-05, %v8092_v3 }
 0x14b   : > { %v1569_v16 = vadd.f32 2.7706815e-08, %v1505_v6  ;;  %v2401_v17 = vadd.f32 -0.00021337405, %v2337_v7  ;;  %v1506_v18 = vmul.f32 -2.7261424e-10, %v8102_v9 }
 0x14c   : > { %v1567_v19 = vadd.f32 2.7706815e-08, %v1503_v11  ;;  %v2338_v20 = vmul.f32 -1.45660715e-05, %v8102_v9  ;;  %v1504_v21 = vmul.f32 -2.7261424e-10, %v8109_v13 }
 0x14d   : > { %v1633_v22 = vmul.f32 %v1569_v16, %v8082_v63  ;;  %v2465_v23 = vmul.f32 %v2401_v17, %v8082_v63  ;;  %v1570_v24 = vadd.f32 2.7706815e-08, %v1506_v18  ;;  %v8124_v26 = vpop.f32.mrb[7].mxu0  ;;  %v1253_v30 = vmul.f32 0.70710677, %v8112_v14 }
 0x14e   : > { %v1631_v27 = vmul.f32 %v1567_v19, %v8092_v3  ;;  %v2402_v28 = vadd.f32 -0.00021337405, %v2338_v20  ;;  %v1568_v29 = vadd.f32 2.7706815e-08, %v1504_v21  ;;  %v1251_v43 = vmul.f32 0.70710677, %v8122_v25 }
 0x14f   : > { %v1697_v31 = vadd.f32 -2.101024e-06, %v1633_v22  ;;  %v2529_v32 = vadd.f32 -0.001682827, %v2465_v23  ;;  %v1634_v33 = vmul.f32 %v1570_v24, %v8102_v9  ;;  %v8134_v38 = vclamps-f32 %v1253_v30, 4.0 }
 0x150   : > { %v1695_v35 = vadd.f32 -2.101024e-06, %v1631_v27  ;;  %v2466_v36 = vmul.f32 %v2402_v28, %v8102_v9  ;;  %v1632_v37 = vmul.f32 %v1568_v29, %v8109_v13  ;;  %v8136_v39 = vpop.f32.mrb[8].mxu0  ;;  %v8151_v54 = vclamps-f32 %v1251_v43, 4.0 }
 0x151   : > { %v1761_v40 = vmul.f32 %v1697_v31, %v8082_v63  ;;  %v2593_v41 = vmul.f32 %v2529_v32, %v8082_v63  ;;  %v1698_v42 = vadd.f32 -2.101024e-06, %v1634_v33  ;;  %v8141_v44 = vpop.f32.mrb[9].mxu0  ;;  %v8146_v49 = vmul.f32 %v8134_v38, %v8134_v38 }
 0x152   : > { %v1759_v45 = vmul.f32 %v1695_v35, %v8092_v3  ;;  %v2530_v46 = vadd.f32 -0.001682827, %v2466_v36  ;;  %v1696_v48 = vadd.f32 -2.101024e-06, %v1632_v37  ;;  %v8148_v50 = vpop.f32.mrb[10].mxu0  ;;  %v8176_v43 = vmul.f32 %v8151_v54, %v8151_v54 }
 0x153   : > { %v1825_v51 = vadd.f32 -5.6925062e-05, %v1761_v40  ;;  %v2657_v52 = vadd.f32 -0.0073733293, %v2593_v41  ;;  %v1762_v53 = vmul.f32 %v1698_v42, %v8102_v9  ;;  %v8153_v55 = vpop.f32.mrb[11].mxu0 }
 0x154   : > { %v1823_v56 = vadd.f32 -5.6925062e-05, %v1759_v45  ;;  %v2594_v57 = vmul.f32 %v2530_v46, %v8102_v9  ;;  %v1760_v59 = vmul.f32 %v1696_v48, %v8109_v13  ;;  %v1509_v60 = vmul.f32 -2.7261424e-10, %v8146_v49 }
 0x155   : > { %v1889_v62 = vmul.f32 %v1825_v51, %v8082_v63  ;;  %v2721_v5 = vmul.f32 %v2657_v52, %v8082_v63  ;;  %v1826_v6 = vadd.f32 -5.6925062e-05, %v1762_v53  ;;  %v2341_v7 = vmul.f32 -1.45660715e-05, %v8146_v49 }
 0x156   : > { %v1887_v10 = vmul.f32 %v1823_v56, %v8092_v3  ;;  %v2658_v11 = vadd.f32 -0.0073733293, %v2594_v57  ;;  %v1824_v16 = vadd.f32 -5.6925062e-05, %v1760_v59  ;;  %v1573_v17 = vadd.f32 2.7706815e-08, %v1509_v60 }
 0x157   : > { %v1953_v18 = vadd.f32 -0.00073499064, %v1889_v62  ;;  %v2785_v19 = vadd.f32 -0.014264739, %v2721_v5  ;;  %v1890_v20 = vmul.f32 %v1826_v6, %v8102_v9  ;;  %v2405_v21 = vadd.f32 -0.00021337405, %v2341_v7 }
 0x158   : > { %v1951_v22 = vadd.f32 -0.00073499064, %v1887_v10  ;;  %v2722_v23 = vmul.f32 %v2658_v11, %v8102_v9  ;;  %v1888_v24 = vmul.f32 %v1824_v16, %v8109_v13  ;;  %v1637_v27 = vmul.f32 %v1573_v17, %v8146_v49  ;;  %v8166_v28 = vpop.f32.mrb[12].mxu0  ;;  %v7513_v60 = vld [vmem:[%s12403_s6 + $0x38] sm:$0xff]  }
 0x159   : > { %v2017_v29 = vmul.f32 %v1953_v18, %v8082_v63  ;;  %7522 = vrcp.f32 %v2785_v19  ;;  %v1954_v30 = vadd.f32 -0.00073499064, %v1890_v20  ;;  %v2469_v31 = vmul.f32 %v2405_v21, %v8146_v49  ;;  %v8170_v32 = vpop.f32.mrb[13].mxu0  ;;  %7275 = vmatprep.subr.bf16.mxu1 %v7513_v60 }
 0x15a   : > { %v2015_v33 = vmul.f32 %v1951_v22, %v8092_v3  ;;  %v2786_v35 = vadd.f32 -0.014264739, %v2722_v23  ;;  %v1952_v36 = vadd.f32 -0.00073499064, %v1888_v24  ;;  %v1701_v37 = vadd.f32 -2.101024e-06, %v1637_v27  ;;  %7276 = vmatpush3.bf16.msra.mxu1 %v7513_v60 }
 0x15b   : > { %v2081_v40 = vadd.f32 -0.0029546, %v2017_v29  ;;  %v2018_v41 = vmul.f32 %v1954_v30, %v8102_v9  ;;  %v2533_v42 = vadd.f32 -0.001682827, %v2469_v31  ;;  %v8178_v45 = vpop.f32.mrb[14].mxu0  ;;  %v956_v20 = vadd.f32 %v8114_v15, %v8067_v47 }
 0x15c   : > { %v2079_v46 = vadd.f32 -0.0029546, %v2015_v33  ;;  %7524 = vrcp.f32 %v2786_v35  ;;  %v2016_v48 = vmul.f32 %v1952_v36, %v8109_v13  ;;  %v1765_v51 = vmul.f32 %v1701_v37, %v8146_v49  ;;  %v8182_v52 = vpop.f32.mrb[15].mxu0 }
 0x15d   : > { %v2145_v53 = vmul.f32 %v2081_v40, %v8082_v63  ;;  %v2082_v56 = vadd.f32 -0.0029546, %v2018_v41  ;;  %v2597_v57 = vmul.f32 %v2533_v42, %v8146_v49  ;;  %v1507_v59 = vmul.f32 -2.7261424e-10, %v8176_v43 }
 0x15e   : > { %v2143_v62 = vmul.f32 %v2079_v46, %v8092_v3  ;;  %v2080_v5 = vadd.f32 -0.0029546, %v2016_v48  ;;  %v1829_v6 = vadd.f32 -5.6925062e-05, %v1765_v51  ;;  %v2339_v7 = vmul.f32 -1.45660715e-05, %v8176_v43 }
 0x15f   : > { %v2209_v10 = vadd.f32 -0.016096033, %v2145_v53  ;;  %v2146_v11 = vmul.f32 %v2082_v56, %v8102_v9  ;;  %v2661_v16 = vadd.f32 -0.0073733293, %v2597_v57  ;;  %v1571_v63 = vadd.f32 2.7706815e-08, %v1507_v59 }
 0x160   : > { %v2144_v17 = vmul.f32 %v2080_v5, %v8109_v13  ;;  %v1893_v18 = vmul.f32 %v1829_v6, %v8146_v49  ;;  %v2403_v19 = vadd.f32 -0.00021337405, %v2339_v7  ;;  %v8197_v21 = vpop.f32.mrb[16].mxu0  ;;  %v2207_v29 = vadd.f32 -0.016096033, %v2143_v62 }
 0x161   : > { %v2273_v22 = vmul.f32 %v8073_v58, %v2209_v10  ;;  %v2210_v23 = vadd.f32 -0.016096033, %v2146_v11  ;;  %v2725_v24 = vmul.f32 %v2661_v16, %v8146_v49  ;;  %v1635_v9 = vmul.f32 %v1571_v63, %v8176_v43  ;;  %v8202_v27 = vpop.f32.mrb[17].mxu0 }
 0x162   : > { %v8205_v30 = vmul.f32 0.5, %v8112_v14  ;;  %v1957_v31 = vadd.f32 -0.00073499064, %v1893_v18  ;;  %v2467_v33 = vmul.f32 %v2403_v19, %v8176_v43  ;;  %v8208_v15 = vpop.f32.mrb[18].mxu0  ;;  %v2208_v36 = vadd.f32 -0.016096033, %v2144_v17 }
 0x163   : > { %v7523_v35 = vpop.eup %7522  ;;  %v8211_v58 = vmul.f32 0.5, %v8122_v25  ;;  %v1699_v37 = vadd.f32 -2.101024e-06, %v1635_v9  ;;  %v8213_v40 = vpop.f32.mrb[19].mxu0  ;;  %v2274_v42 = vmul.f32 %v8084_v0, %v2210_v23  ;;  %v2789_v48 = vadd.f32 -0.014264739, %v2725_v24 }
 0x164   : > { %v2852_v41 = vmul.f32 %v7523_v35, %v2273_v22  ;;  %v2021_v46 = vmul.f32 %v1957_v31, %v8146_v49  ;;  %v2531_v14 = vadd.f32 -0.001682827, %v2467_v33  ;;  %v1254_v53 = vmul.f32 0.70710677, %v956_v20 }
 0x165   : > { %v1763_v51 = vmul.f32 %v1699_v37, %v8176_v43  ;;  %v948_v56 = vadd.f32 %v8067_v47, %v8124_v26  ;;  %v8221_v25 = vmul.f32 %v8078_v61, %v2207_v29  ;;  %v969_v0 = vadd.f32 %v8136_v39, %v8067_v47 }
 0x166   : > { %v7525_v57 = vpop.eup %7524  ;;  %v2085_v59 = vadd.f32 -0.0029546, %v2021_v46  ;;  %v2595_v60 = vmul.f32 %v2531_v14, %v8176_v43  ;;  %v2977_v62 = vadd.f32 1.0, %v2852_v41  ;;  %v8226_v6 = vmul.f32 0.5, %v956_v20 }
 0x167   : > { %v1827_v5 = vadd.f32 -5.6925062e-05, %v1763_v51  ;;  %v8228_v7 = vclamps-f32 %v1254_v53, 4.0  ;;  %v8231_v10 = vmul.f32 %v8094_v4, %v2208_v36  ;;  %v1252_v61 = vmul.f32 0.70710677, %v948_v56 }
 0x168   : > { %v2149_v26 = vmul.f32 %v2085_v59, %v8146_v49  ;;  %v2659_v11 = vadd.f32 -0.0073733293, %v2595_v60  ;;  %v8234_v16 = vpop.f32.mrb[20].mxu0  ;;  %v2854_v63 = vmul.f32 %v7525_v57, %v2274_v42  ;;  %7526 = vrcp.f32 %v2789_v48 }
 0x169   : > { %v1891_v17 = vmul.f32 %v1827_v5, %v8176_v43  ;;  %v8239_v39 = vmul.f32 %v8228_v7, %v8228_v7  ;;  %v8241_v18 = vpop.f32.mrb[21].mxu0  ;;  %v8244_v4 = vmul.f32 0.5, %v948_v56  ;;  %v8246_v20 = vclamps-f32 %v1252_v61, 4.0 }
 0x16a   : > { %v2723_v19 = vmul.f32 %v2659_v11, %v8176_v43  ;;  %v1257_v49 = vmul.f32 0.70710677, %v969_v0  ;;  %v8248_v22 = vpop.f32.mrb[22].mxu0  ;;  %v8251_v23 = vmul.f32 %v2977_v62, %v8086_v1  ;;  %v2213_v31 = vadd.f32 -0.016096033, %v2149_v26 }
 0x16b   : > { %v1955_v24 = vadd.f32 -0.00073499064, %v1891_v17  ;;  %v1510_v9 = vmul.f32 -2.7261424e-10, %v8239_v39  ;;  %v2342_v29 = vmul.f32 -1.45660715e-05, %v8239_v39  ;;  %v8257_v35 = vmul.f32 %v8246_v20, %v8246_v20 }
 0x16c   : > { %v2787_v33 = vadd.f32 -0.014264739, %v2723_v19  ;;  %v8259_v36 = vclamps-f32 %v1257_v49, 4.0  ;;  %v8261_v37 = vpop.f32.mrb[23].mxu0  ;;  %v2978_v41 = vadd.f32 1.0, %v2854_v63  ;;  %v8272_v59 = vmul.f32 0.5, %v969_v0 }
 0x16d   : > { %v2019_v42 = vmul.f32 %v1955_v24, %v8176_v43  ;;  %v1574_v1 = vadd.f32 2.7706815e-08, %v1510_v9  ;;  %v2406_v46 = vadd.f32 -0.00021337405, %v2342_v29  ;;  %v1508_v14 = vmul.f32 -2.7261424e-10, %v8257_v35 }
 0x16e   : > { %7528 = vrcp.f32 %v2787_v33  ;;  %v2340_v48 = vmul.f32 -1.45660715e-05, %v8257_v35  ;;  %v8268_v51 = vmul.f32 %v8259_v36, %v8259_v36  ;;  %v2277_v60 = vmul.f32 %v8134_v38, %v2213_v31 }
 0x16f   : > { %v2083_v53 = vadd.f32 -0.0029546, %v2019_v42  ;;  %v1638_v56 = vmul.f32 %v1574_v1, %v8239_v39  ;;  %v2470_v57 = vmul.f32 %v2406_v46, %v8239_v39  ;;  %v1572_v62 = vadd.f32 2.7706815e-08, %v1508_v14 }
 0x170   : > { %v2404_v5 = vadd.f32 -0.00021337405, %v2340_v48  ;;  %v1513_v26 = vmul.f32 -2.7261424e-10, %v8268_v51  ;;  %v2345_v17 = vmul.f32 -1.45660715e-05, %v8268_v51  ;;  %v8282_v0 = vadd.f32 %v8067_v47, %v8141_v44 }
 0x171   : > { %v2147_v11 = vmul.f32 %v2083_v53, %v8176_v43  ;;  %v1702_v61 = vadd.f32 -2.101024e-06, %v1638_v56  ;;  %v2534_v63 = vadd.f32 -0.001682827, %v2470_v57  ;;  %v1636_v19 = vmul.f32 %v1572_v62, %v8257_v35 }
 0x172   : > { %v2468_v49 = vmul.f32 %v2404_v5, %v8257_v35  ;;  %v1577_v24 = vadd.f32 2.7706815e-08, %v1513_v26  ;;  %v7527_v38 = vpop.eup %7526  ;;  %v2409_v43 = vadd.f32 -0.00021337405, %v2345_v17  ;;  %v8287_v33 = vmul.f32 %v2978_v41, %v8098_v8 }
 0x173   : > { %v2211_v9 = vadd.f32 -0.016096033, %v2147_v11  ;;  %v1766_v29 = vmul.f32 %v1702_v61, %v8239_v39  ;;  %v2598_v31 = vmul.f32 %v2534_v63, %v8239_v39  ;;  %v1700_v42 = vadd.f32 -2.101024e-06, %v1636_v19 }
 0x174   : > { %v2532_v1 = vadd.f32 -0.001682827, %v2468_v49  ;;  %v1641_v46 = vmul.f32 %v1577_v24, %v8268_v51  ;;  %v2473_v44 = vmul.f32 %v2409_v43, %v8268_v51  ;;  %v1255_v5 = vmul.f32 0.70710677, %v8282_v0 }
 0x175   : > { %v2275_v14 = vmul.f32 %v8151_v54, %v2211_v9  ;;  %v1830_v48 = vadd.f32 -5.6925062e-05, %v1766_v29  ;;  %v2662_v53 = vadd.f32 -0.0073733293, %v2598_v31  ;;  %v1764_v56 = vmul.f32 %v1700_v42, %v8257_v35 }
 0x176   : > { %v2596_v57 = vmul.f32 %v2532_v1, %v8257_v35  ;;  %v1705_v62 = vadd.f32 -2.101024e-06, %v1641_v46  ;;  %v2860_v26 = vmul.f32 %v7527_v38, %v2277_v60  ;;  %v2537_v11 = vadd.f32 -0.001682827, %v2473_v44 }
 0x177   : > { %v1894_v8 = vmul.f32 %v1830_v48, %v8239_v39  ;;  %v2726_v41 = vmul.f32 %v2662_v53, %v8239_v39  ;;  %v1828_v63 = vadd.f32 -5.6925062e-05, %v1764_v56  ;;  %v8298_v19 = vclamps-f32 %v1255_v5, 4.0 }
 0x178   : > { %v7529_v61 = vpop.eup %7528  ;;  %v2660_v54 = vadd.f32 -0.0073733293, %v2596_v57  ;;  %v1769_v17 = vmul.f32 %v1705_v62, %v8268_v51  ;;  %v2601_v29 = vmul.f32 %v2537_v11, %v8268_v51  ;;  %v972_v46 = vadd.f32 %v8148_v50, %v8067_v47 }
 0x179   : > { %v2856_v49 = vmul.f32 %v7529_v61, %v2275_v14  ;;  %v1958_v24 = vadd.f32 -0.00073499064, %v1894_v8  ;;  %v2790_v9 = vadd.f32 -0.014264739, %v2726_v41  ;;  %v1892_v31 = vmul.f32 %v1828_v63, %v8257_v35 }
 0x17a   : > { %v2724_v60 = vmul.f32 %v2660_v54, %v8257_v35  ;;  %v1833_v38 = vadd.f32 -5.6925062e-05, %v1769_v17  ;;  %v8305_v43 = vmul.f32 %v8298_v19, %v8298_v19  ;;  %v2665_v1 = vadd.f32 -0.0073733293, %v2601_v29 }
 0x17b   : > { %v2022_v42 = vmul.f32 %v1958_v24, %v8239_v39  ;;  %7530 = vrcp.f32 %v2790_v9  ;;  %v1956_v14 = vadd.f32 -0.00073499064, %v1892_v31  ;;  %v2981_v56 = vadd.f32 1.0, %v2860_v26 }
 0x17c   : > { %v2788_v48 = vadd.f32 -0.014264739, %v2724_v60  ;;  %v1897_v53 = vmul.f32 %v1833_v38, %v8268_v51  ;;  %v1511_v44 = vmul.f32 -2.7261424e-10, %v8305_v43  ;;  %v2729_v62 = vmul.f32 %v2665_v1, %v8268_v51 }
 0x17d   : > { %v2086_v57 = vadd.f32 -0.0029546, %v2022_v42  ;;  %v2343_v5 = vmul.f32 -1.45660715e-05, %v8305_v43  ;;  %v2979_v8 = vadd.f32 1.0, %v2856_v49  ;;  %v2020_v41 = vmul.f32 %v1956_v14, %v8257_v35 }
 0x17e   : > { %v1961_v11 = vadd.f32 -0.00073499064, %v1897_v53  ;;  %v1575_v61 = vadd.f32 2.7706815e-08, %v1511_v44  ;;  %7532 = vrcp.f32 %v2788_v48  ;;  %v2793_v50 = vadd.f32 -0.014264739, %v2729_v62 }
 0x17f   : > { %v2150_v63 = vmul.f32 %v2086_v57, %v8239_v39  ;;  %v2407_v54 = vadd.f32 -0.00021337405, %v2343_v5  ;;  %v2084_v17 = vadd.f32 -0.0029546, %v2020_v41  ;;  %v1258_v9 = vmul.f32 0.70710677, %v972_v46 }
 0x180   : > { %v2025_v24 = vmul.f32 %v1961_v11, %v8268_v51  ;;  %v1639_v26 = vmul.f32 %v1575_v61, %v8305_v43  ;;  %7534 = vrcp.f32 %v2793_v50  ;;  %v964_v49 = vadd.f32 %v8067_v47, %v8153_v55 }
 0x181   : > { %v2214_v29 = vadd.f32 -0.016096033, %v2150_v63  ;;  %v2471_v31 = vmul.f32 %v2407_v54, %v8305_v43  ;;  %v2148_v60 = vmul.f32 %v2084_v17, %v8257_v35  ;;  %v8322_v42 = vclamps-f32 %v1258_v9, 4.0 }
 0x182   : > { %v2089_v38 = vadd.f32 -0.0029546, %v2025_v24  ;;  %v1703_v39 = vadd.f32 -2.101024e-06, %v1639_v26  ;;  %v8326_v14 = vmul.f32 0.5, %v8282_v0  ;;  %v8335_v5 = vmul.f32 %v2981_v56, %v8205_v30 }
 0x183   : > { %v2278_v1 = vmul.f32 %v8228_v7, %v2214_v29  ;;  %v2535_v48 = vadd.f32 -0.001682827, %v2471_v31  ;;  %v1256_v53 = vmul.f32 0.70710677, %v964_v49  ;;  %v2212_v44 = vadd.f32 -0.016096033, %v2148_v60 }
 0x184   : > { %v2153_v57 = vmul.f32 %v2089_v38, %v8268_v51  ;;  %v1767_v62 = vmul.f32 %v1703_v39, %v8305_v43  ;;  %v8332_v55 = vmul.f32 %v8322_v42, %v8322_v42  ;;  %12415 = vst [vmem:[#allocation11_spill] sm:$0xff] %v8335_v5  ;;  %v8338_v7 = vmul.f32 %v2979_v8, %v8211_v58 }
 0x185   : > { %v7531_v35 = vpop.eup %7530  ;;  %v2599_v0 = vmul.f32 %v2535_v48, %v8305_v43  ;;  %v8341_v41 = vclamps-f32 %v1256_v53, 4.0  ;;  %v8343_v63 = vmul.f32 0.5, %v972_v46  ;;  %v2276_v58 = vmul.f32 %v8246_v20, %v2212_v44 }
 0x186   : > { %v2862_v11 = vmul.f32 %v7531_v35, %v2278_v1  ;;  %v2217_v61 = vadd.f32 -0.016096033, %v2153_v57  ;;  %v1831_v51 = vadd.f32 -5.6925062e-05, %v1767_v62  ;;  %v1514_v54 = vmul.f32 -2.7261424e-10, %v8332_v55 }
 0x187   : > { %v2663_v50 = vadd.f32 -0.0073733293, %v2599_v0  ;;  %v2346_v17 = vmul.f32 -1.45660715e-05, %v8332_v55  ;;  %v8349_v30 = vmul.f32 %v8341_v41, %v8341_v41  ;;  %v8353_v8 = vmul.f32 0.5, %v964_v49 }
 0x188   : > { %v1895_v56 = vmul.f32 %v1831_v51, %v8305_v43  ;;  %v985_v24 = vadd.f32 %v8166_v28, %v8067_v47  ;;  %v7533_v46 = vpop.eup %7532  ;;  %v2281_v26 = vmul.f32 %v8259_v36, %v2217_v61  ;;  %v1578_v29 = vadd.f32 2.7706815e-08, %v1514_v54  ;;  %v8365_v36 = vpop.f32.mrb[24].mxu0 }
 0x189   : > { %v2727_v9 = vmul.f32 %v2663_v50, %v8305_v43  ;;  %v2410_v31 = vadd.f32 -0.00021337405, %v2346_v17  ;;  %v1512_v38 = vmul.f32 -2.7261424e-10, %v8349_v30  ;;  %v2344_v39 = vmul.f32 -1.45660715e-05, %v8349_v30 }
 0x18a   : > { %v1959_v60 = vadd.f32 -0.00073499064, %v1895_v56  ;;  %v977_v20 = vadd.f32 %v8067_v47, %v8170_v32  ;;  %v7535_v49 = vpop.eup %7534  ;;  %v2982_v1 = vadd.f32 1.0, %v2862_v11  ;;  %v1642_v28 = vmul.f32 %v1578_v29, %v8332_v55  ;;  %v8368_v50 = vpop.f32.mrb[25].mxu0 }
 0x18b   : > { %v2791_v48 = vadd.f32 -0.014264739, %v2727_v9  ;;  %v2474_v53 = vmul.f32 %v2410_v31, %v8332_v55  ;;  %v2858_v44 = vmul.f32 %v7533_v46, %v2276_v58  ;;  %v1576_v62 = vadd.f32 2.7706815e-08, %v1512_v38  ;;  %v8374_v56 = vpop.f32.mrb[26].mxu0 }
 0x18c   : > { %v2023_v57 = vmul.f32 %v1959_v60, %v8305_v43  ;;  %v2408_v35 = vadd.f32 -0.00021337405, %v2344_v39  ;;  %v2868_v0 = vmul.f32 %v7535_v49, %v2281_v26  ;;  %v1706_v61 = vadd.f32 -2.101024e-06, %v1642_v28  ;;  %v8381_v29 = vpop.f32.mrb[27].mxu0 }
 0x18d   : > { %7536 = vrcp.f32 %v2791_v48  ;;  %v2538_v51 = vadd.f32 -0.001682827, %v2474_v53  ;;  %v1640_v11 = vmul.f32 %v1576_v62, %v8349_v30  ;;  %v8372_v17 = vmul.f32 0.5, %v985_v24 }
 0x18e   : > { %v2087_v32 = vadd.f32 -0.0029546, %v2023_v57  ;;  %v2472_v54 = vmul.f32 %v2408_v35, %v8349_v30  ;;  %v8377_v58 = vmul.f32 %v2982_v1, %v8226_v6  ;;  %v1770_v46 = vmul.f32 %v1706_v61, %v8332_v55 }
 0x18f   : > { %v2602_v26 = vmul.f32 %v2538_v51, %v8332_v55  ;;  %v1261_v9 = vmul.f32 0.70710677, %v985_v24  ;;  %v2980_v31 = vadd.f32 1.0, %v2858_v44  ;;  %v1704_v38 = vadd.f32 -2.101024e-06, %v1640_v11  ;;  %v8401_v11 = vpop.f32.mrb[28].mxu0 }
 0x190   : > { %12416 = vst [vmem:[#allocation12_spill] sm:$0xff] %v8377_v58  ;;  %v2151_v60 = vmul.f32 %v2087_v32, %v8305_v43  ;;  %v2536_v39 = vadd.f32 -0.001682827, %v2472_v54  ;;  %v2985_v49 = vadd.f32 1.0, %v2868_v0  ;;  %v1834_v48 = vadd.f32 -5.6925062e-05, %v1770_v46 }
 0x191   : > { %v2666_v28 = vadd.f32 -0.0073733293, %v2602_v26  ;;  %v8384_v53 = vclamps-f32 %v1261_v9, 4.0  ;;  %v1768_v6 = vmul.f32 %v1704_v38, %v8349_v30  ;;  %v1259_v62 = vmul.f32 0.70710677, %v977_v20 }
 0x192   : > { %v2215_v57 = vadd.f32 -0.016096033, %v2151_v60  ;;  %v2600_v1 = vmul.f32 %v2536_v39, %v8349_v30  ;;  %v1898_v24 = vmul.f32 %v1834_v48, %v8332_v55  ;;  %v988_v44 = vadd.f32 %v8178_v45, %v8067_v47 }
 0x193   : > { %v2730_v35 = vmul.f32 %v2666_v28, %v8332_v55  ;;  %v8392_v43 = vmul.f32 %v8384_v53, %v8384_v53  ;;  %v8397_v0 = vmul.f32 %v2980_v31, %v8244_v4  ;;  %v1832_v61 = vadd.f32 -5.6925062e-05, %v1768_v6  ;;  %v8412_v31 = vpop.f32.mrb[29].mxu0 }
 0x194   : > { %v2664_v51 = vadd.f32 -0.0073733293, %v2600_v1  ;;  %v8399_v32 = vclamps-f32 %v1259_v62, 4.0  ;;  %v2279_v54 = vmul.f32 %v8298_v19, %v2215_v57  ;;  %v1962_v46 = vadd.f32 -0.00073499064, %v1898_v24  ;;  %12417 = vst [vmem:[#allocation13_spill] sm:$0xff] %v8412_v31 }
 0x195   : > { %v2794_v26 = vadd.f32 -0.014264739, %v2730_v35  ;;  %v1517_v9 = vmul.f32 -2.7261424e-10, %v8392_v43  ;;  %v1896_v60 = vmul.f32 %v1832_v61, %v8349_v30  ;;  %v2349_v45 = vmul.f32 -1.45660715e-05, %v8392_v43 }
 0x196   : > { %v2728_v38 = vmul.f32 %v2664_v51, %v8349_v30  ;;  %v8410_v4 = vmul.f32 %v8399_v32, %v8399_v32  ;;  %v2026_v48 = vmul.f32 %v1962_v46, %v8332_v55  ;;  %v8415_v28 = vmul.f32 0.5, %v977_v20  ;;  %v8417_v6 = vpop.f32.mrb[30].mxu0 }
 0x197   : > { %v7537_v39 = vpop.eup %7536  ;;  %v1581_v19 = vadd.f32 2.7706815e-08, %v1517_v9  ;;  %v1262_v57 = vmul.f32 0.70710677, %v988_v44  ;;  %12418 = vst [vmem:[#allocation14_spill] sm:$0xff] %v8417_v6  ;;  %7538 = vrcp.f32 %v2794_v26  ;;  %v8424_v9 = vpop.f32.mrb[31].mxu0 }
 0x198   : > { %v1960_v1 = vadd.f32 -0.00073499064, %v1896_v60  ;;  %v2792_v62 = vadd.f32 -0.014264739, %v2728_v38  ;;  %v2413_v24 = vadd.f32 -0.00021337405, %v2349_v45  ;;  %v2864_v58 = vmul.f32 %v7537_v39, %v2279_v54 }
 0x199   : > { %v2090_v35 = vadd.f32 -0.0029546, %v2026_v48  ;;  %v1645_v61 = vmul.f32 %v1581_v19, %v8392_v43  ;;  %v1515_v51 = vmul.f32 -2.7261424e-10, %v8410_v4  ;;  %v2347_v31 = vmul.f32 -1.45660715e-05, %v8410_v4 }
 0x19a   : > { %v2024_v46 = vmul.f32 %v1960_v1, %v8349_v30  ;;  %7540 = vrcp.f32 %v2792_v62  ;;  %v2477_v20 = vmul.f32 %v2413_v24, %v8392_v43  ;;  %v8427_v19 = vmul.f32 0.5, %v988_v44 }
 0x19b   : > { %v2154_v26 = vmul.f32 %v2090_v35, %v8332_v55  ;;  %v1709_v60 = vadd.f32 -2.101024e-06, %v1645_v61  ;;  %v1579_v38 = vadd.f32 2.7706815e-08, %v1515_v51  ;;  %v2411_v45 = vadd.f32 -0.00021337405, %v2347_v31 }
 0x19c   : > { %v2088_v48 = vadd.f32 -0.0029546, %v2024_v46  ;;  %v2541_v6 = vadd.f32 -0.001682827, %v2477_v20  ;;  %v8429_v5 = vclamps-f32 %v1262_v57, 4.0  ;;  %v2983_v62 = vadd.f32 1.0, %v2864_v58 }
 0x19d   : > { %v2218_v12 = vadd.f32 -0.016096033, %v2154_v26  ;;  %v1773_v54 = vmul.f32 %v1709_v60, %v8392_v43  ;;  %v1643_v39 = vmul.f32 %v1579_v38, %v8410_v4  ;;  %v2475_v1 = vmul.f32 %v2411_v45, %v8410_v4 }
 0x19e   : > { %v2152_v24 = vmul.f32 %v2088_v48, %v8349_v30  ;;  %v2605_v55 = vmul.f32 %v2541_v6, %v8392_v43  ;;  %v8438_v31 = vmul.f32 %v8429_v5, %v8429_v5  ;;  %v8441_v44 = vmul.f32 %v2985_v49, %v8272_v59 }
 0x19f   : > { %v1837_v57 = vadd.f32 -5.6925062e-05, %v1773_v54  ;;  %v1707_v35 = vadd.f32 -2.101024e-06, %v1643_v39  ;;  %v2539_v61 = vadd.f32 -0.001682827, %v2475_v1  ;;  %v2282_v51 = vmul.f32 %v8322_v42, %v2218_v12 }
 0x1a0   : > { %12419 = vst [vmem:[#allocation15_spill] sm:$0xff] %v8441_v44  ;;  %v2216_v46 = vadd.f32 -0.016096033, %v2152_v24  ;;  %v2669_v20 = vadd.f32 -0.0073733293, %v2605_v55  ;;  %v980_v12 = vadd.f32 %v8067_v47, %v8182_v52  ;;  %v8454_v42 = vmul.f32 %v2983_v62, %v8326_v14 }
 0x1a1   : > { %v1518_v58 = vmul.f32 -2.7261424e-10, %v8438_v31  ;;  %v1901_v30 = vmul.f32 %v1837_v57, %v8392_v43  ;;  %v1771_v6 = vmul.f32 %v1707_v35, %v8410_v4  ;;  %v2603_v26 = vmul.f32 %v2539_v61, %v8410_v4  ;;  %v7539_v38 = vpop.eup %7538 }
 0x1a2   : > { %v2350_v60 = vmul.f32 -1.45660715e-05, %v8438_v31  ;;  %v2280_v59 = vmul.f32 %v8341_v41, %v2216_v46  ;;  %v2733_v49 = vmul.f32 %v2669_v20, %v8392_v43  ;;  %v1001_v41 = vadd.f32 %v8197_v21, %v8067_v47 }
 0x1a3   : > { %v1582_v45 = vadd.f32 2.7706815e-08, %v1518_v58  ;;  %v1965_v48 = vadd.f32 -0.00073499064, %v1901_v30  ;;  %v1835_v54 = vadd.f32 -5.6925062e-05, %v1771_v6  ;;  %v2870_v35 = vmul.f32 %v7539_v38, %v2282_v51 }
 0x1a4   : > { %v2667_v39 = vadd.f32 -0.0073733293, %v2603_v26  ;;  %v7541_v1 = vpop.eup %7540  ;;  %v2797_v24 = vadd.f32 -0.014264739, %v2733_v49  ;;  %v2414_v57 = vadd.f32 -0.00021337405, %v2350_v60  ;;  %v993_v26 = vadd.f32 %v8067_v47, %v8202_v27 }
 0x1a5   : > { %v1646_v55 = vmul.f32 %v1582_v45, %v8438_v31  ;;  %v2029_v61 = vmul.f32 %v1965_v48, %v8392_v43  ;;  %v1899_v46 = vmul.f32 %v1835_v54, %v8410_v4  ;;  %v2866_v14 = vmul.f32 %v7541_v1, %v2280_v59  ;;  %v8470_v54 = vpop.f32.mrb[32].mxu0 }
 0x1a6   : > { %v2731_v52 = vmul.f32 %v2667_v39, %v8410_v4  ;;  %7542 = vrcp.f32 %v2797_v24  ;;  %v2478_v20 = vmul.f32 %v2414_v57, %v8438_v31  ;;  %v8463_v6 = vmul.f32 0.5, %v980_v12 }
 0x1a7   : > { %v1710_v62 = vadd.f32 -2.101024e-06, %v1646_v55  ;;  %v2093_v58 = vadd.f32 -0.0029546, %v2029_v61  ;;  %v1963_v30 = vadd.f32 -0.00073499064, %v1899_v46 }
 0x1a8   : > { %v2795_v21 = vadd.f32 -0.014264739, %v2731_v52  ;;  %v2542_v60 = vadd.f32 -0.001682827, %v2478_v20  ;;  %v1260_v38 = vmul.f32 0.70710677, %v980_v12 }
 0x1a9   : > { %v1774_v51 = vmul.f32 %v1710_v62, %v8438_v31  ;;  %v2986_v49 = vadd.f32 1.0, %v2870_v35  ;;  %v2157_v45 = vmul.f32 %v2093_v58, %v8392_v43  ;;  %v2027_v59 = vmul.f32 %v1963_v30, %v8410_v4 }
 0x1aa   : > { %v1265_v48 = vmul.f32 0.70710677, %v1001_v41  ;;  %v2984_v39 = vadd.f32 1.0, %v2866_v14  ;;  %v2606_v24 = vmul.f32 %v2542_v60, %v8438_v31  ;;  %v8473_v55 = vclamps-f32 %v1260_v38, 4.0 }
 0x1ab   : > { %v1838_v1 = vadd.f32 -5.6925062e-05, %v1774_v51  ;;  %v2221_v27 = vadd.f32 -0.016096033, %v2157_v45  ;;  %v2091_v57 = vadd.f32 -0.0029546, %v2027_v59  ;;  %7544 = vrcp.f32 %v2795_v21 }
 0x1ac   : > { %v8475_v61 = vmul.f32 0.5, %v1001_v41  ;;  %v8477_v46 = vclamps-f32 %v1265_v48, 4.0  ;;  %v2670_v12 = vadd.f32 -0.0073733293, %v2606_v24  ;;  %v8482_v35 = vmul.f32 %v8473_v55, %v8473_v55 }
 0x1ad   : > { %v1902_v43 = vmul.f32 %v1838_v1, %v8438_v31  ;;  %v2285_v52 = vmul.f32 %v8384_v53, %v2221_v27  ;;  %v2155_v14 = vmul.f32 %v2091_v57, %v8410_v4  ;;  %v1263_v41 = vmul.f32 0.70710677, %v993_v26 }
 0x1ae   : > { %v8488_v62 = vmul.f32 %v8477_v46, %v8477_v46  ;;  %v2734_v58 = vmul.f32 %v2670_v12, %v8438_v31  ;;  %v1516_v30 = vmul.f32 -2.7261424e-10, %v8482_v35  ;;  %v2348_v21 = vmul.f32 -1.45660715e-05, %v8482_v35  ;;  %v8502_v12 = vpop.f32.mrb[33].mxu0 }
 0x1af   : > { %v1966_v20 = vadd.f32 -0.00073499064, %v1902_v43  ;;  %v8494_v51 = vmul.f32 %v2986_v49, %v8343_v63  ;;  %v2219_v60 = vadd.f32 -0.016096033, %v2155_v14  ;;  %v8500_v24 = vmul.f32 %v2984_v39, %v8353_v8  ;;  %v8508_v44 = vpop.f32.mrb[34].mxu0 }
 0x1b0   : > { %v1521_v53 = vmul.f32 -2.7261424e-10, %v8488_v62  ;;  %v2353_v4 = vmul.f32 -1.45660715e-05, %v8488_v62  ;;  %v7543_v38 = vpop.eup %7542  ;;  %v2798_v59 = vadd.f32 -0.014264739, %v2734_v58  ;;  %v1004_v39 = vadd.f32 %v8208_v15, %v8067_v47 }
 0x1b1   : > { %12420 = vst [vmem:[#allocation16_spill] sm:$0xff] %v8494_v51  ;;  %v2030_v45 = vmul.f32 %v1966_v20, %v8438_v31  ;;  %v1580_v48 = vadd.f32 2.7706815e-08, %v1516_v30  ;;  %v2412_v1 = vadd.f32 -0.00021337405, %v2348_v21  ;;  %v2876_v27 = vmul.f32 %v7543_v38, %v2285_v52 }
 0x1b2   : > { %v1585_v57 = vadd.f32 2.7706815e-08, %v1521_v53  ;;  %v2417_v43 = vadd.f32 -0.00021337405, %v2353_v4  ;;  %v8506_v51 = vmul.f32 0.5, %v993_v26  ;;  %v8512_v8 = vclamps-f32 %v1263_v41, 4.0 }
 0x1b3   : > { %v2094_v63 = vadd.f32 -0.0029546, %v2030_v45  ;;  %v1644_v49 = vmul.f32 %v1580_v48, %v8482_v35  ;;  %v2476_v14 = vmul.f32 %v2412_v1, %v8482_v35  ;;  %v2989_v52 = vadd.f32 1.0, %v2876_v27  ;;  %v8521_v45 = vpop.f32.mrb[35].mxu0 }
 0x1b4   : > { %v1649_v20 = vmul.f32 %v1585_v57, %v8488_v62  ;;  %v2481_v58 = vmul.f32 %v2417_v43, %v8488_v62  ;;  %v8518_v53 = vadd.f32 %v8067_v47, %v8213_v40  ;;  %v2283_v26 = vmul.f32 %v8399_v32, %v2219_v60 }
 0x1b5   : > { %v1708_v30 = vadd.f32 -2.101024e-06, %v1644_v49  ;;  %v2540_v21 = vadd.f32 -0.001682827, %v2476_v14  ;;  %7546 = vrcp.f32 %v2798_v59  ;;  %v7545_v48 = vpop.eup %7544  ;;  %v2158_v41 = vmul.f32 %v2094_v63, %v8438_v31 }
 0x1b6   : > { %v1713_v4 = vadd.f32 -2.101024e-06, %v1649_v20  ;;  %v2545_v38 = vadd.f32 -0.001682827, %v2481_v58  ;;  %v8528_v27 = vmul.f32 %v8512_v8, %v8512_v8  ;;  %v8532_v32 = vmul.f32 0.5, %v1004_v39 }
 0x1b7   : > { %v1772_v1 = vmul.f32 %v1708_v30, %v8482_v35  ;;  %v2604_v15 = vmul.f32 %v2540_v21, %v8482_v35  ;;  %v1266_v60 = vmul.f32 0.70710677, %v1004_v39  ;;  %v8535_v59 = vmul.f32 %v2989_v52, %v8372_v17 }
 0x1b8   : > { %v1777_v47 = vmul.f32 %v1713_v4, %v8488_v62  ;;  %v2609_v40 = vmul.f32 %v2545_v38, %v8488_v62  ;;  %v1519_v43 = vmul.f32 -2.7261424e-10, %v8528_v27  ;;  %v2872_v63 = vmul.f32 %v7545_v48, %v2283_v26 }
 0x1b9   : > { %12421 = vst [vmem:[#allocation17_spill] sm:$0xff] %v8535_v59  ;;  %v1836_v57 = vadd.f32 -5.6925062e-05, %v1772_v1  ;;  %v2668_v31 = vadd.f32 -0.0073733293, %v2604_v15  ;;  %v8541_v4 = vclamps-f32 %v1266_v60, 4.0 }
 0x1ba   : > { %v1841_v49 = vadd.f32 -5.6925062e-05, %v1777_v47  ;;  %v2673_v14 = vadd.f32 -0.0073733293, %v2609_v40  ;;  %v2351_v20 = vmul.f32 -1.45660715e-05, %v8528_v27 }
 0x1bb   : > { %v1900_v58 = vmul.f32 %v1836_v57, %v8482_v35  ;;  %v2732_v30 = vmul.f32 %v2668_v31, %v8482_v35  ;;  %v1583_v21 = vadd.f32 2.7706815e-08, %v1519_v43  ;;  %v2222_v39 = vadd.f32 -0.016096033, %v2158_v41 }
 0x1bc   : > { %v1905_v17 = vmul.f32 %v1841_v49, %v8488_v62  ;;  %v2737_v52 = vmul.f32 %v2673_v14, %v8488_v62  ;;  %v2415_v38 = vadd.f32 -0.00021337405, %v2351_v20  ;;  %v8548_v48 = vmul.f32 %v8541_v4, %v8541_v4 }
 0x1bd   : > { %v1964_v1 = vadd.f32 -0.00073499064, %v1900_v58  ;;  %v2796_v15 = vadd.f32 -0.014264739, %v2732_v30  ;;  %v1647_v26 = vmul.f32 %v1583_v21, %v8528_v27  ;;  %v2987_v47 = vadd.f32 1.0, %v2872_v63 }
 0x1be   : > { %v1969_v40 = vadd.f32 -0.00073499064, %v1905_v17  ;;  %v2801_v57 = vadd.f32 -0.014264739, %v2737_v52  ;;  %v2479_v60 = vmul.f32 %v2415_v38, %v8528_v27  ;;  %v1522_v43 = vmul.f32 -2.7261424e-10, %v8548_v48 }
 0x1bf   : > { %v2028_v41 = vmul.f32 %v1964_v1, %v8482_v35  ;;  %7548 = vrcp.f32 %v2796_v15  ;;  %v1711_v31 = vadd.f32 -2.101024e-06, %v1647_v26  ;;  %v7547_v49 = vpop.eup %7546  ;;  %v2286_v14 = vmul.f32 %v8429_v5, %v2222_v39 }
 0x1c0   : > { %v2033_v20 = vmul.f32 %v1969_v40, %v8488_v62  ;;  %7550 = vrcp.f32 %v2801_v57  ;;  %v2543_v58 = vadd.f32 -0.001682827, %v2479_v60  ;;  %v1586_v21 = vadd.f32 2.7706815e-08, %v1522_v43 }
 0x1c1   : > { %v2092_v30 = vadd.f32 -0.0029546, %v2028_v41  ;;  %v1775_v63 = vmul.f32 %v1711_v31, %v8528_v27  ;;  %v2354_v17 = vmul.f32 -1.45660715e-05, %v8548_v48  ;;  %v8558_v52 = vmul.f32 %v2987_v47, %v8415_v28  ;;  %v8570_v28 = vld [vmem:[%s12402_s5] ss:$0 sm:$0xff] }
 0x1c2   : > { %v2097_v38 = vadd.f32 -0.0029546, %v2033_v20  ;;  %v2607_v1 = vmul.f32 %v2543_v58, %v8528_v27  ;;  %v1264_v15 = vmul.f32 0.70710677, %v8518_v53  ;;  %v1650_v26 = vmul.f32 %v1586_v21, %v8548_v48 }
 0x1c3   : > { %v2156_v5 = vmul.f32 %v2092_v30, %v8482_v35  ;;  %v1839_v39 = vadd.f32 -5.6925062e-05, %v1775_v63  ;;  %v2418_v40 = vadd.f32 -0.00021337405, %v2354_v17  ;;  %v1017_v47 = vadd.f32 %v8570_v28, %v8234_v16 }
 0x1c4   : > { %v2161_v57 = vmul.f32 %v2097_v38, %v8488_v62  ;;  %v2671_v60 = vadd.f32 -0.0073733293, %v2607_v1  ;;  %v8565_v41 = vclamps-f32 %v1264_v15, 4.0  ;;  %v1714_v43 = vadd.f32 -2.101024e-06, %v1650_v26  ;;  %v8583_v1 = vpop.f32.mrb[36].mxu0 }
 0x1c5   : > { %v2220_v31 = vadd.f32 -0.016096033, %v2156_v5  ;;  %v1903_v35 = vmul.f32 %v1839_v39, %v8528_v27  ;;  %v2482_v20 = vmul.f32 %v2418_v40, %v8548_v48  ;;  %v2878_v58 = vmul.f32 %v7547_v49, %v2286_v14  ;;  %12422 = vst [vmem:[#allocation18_spill] sm:$0xff] %v8583_v1  ;;  %v8594_v59 = vpop.f32.mrb[37].mxu0 }
 0x1c6   : > { %v2225_v30 = vadd.f32 -0.016096033, %v2161_v57  ;;  %v2735_v62 = vmul.f32 %v2671_v60, %v8528_v27  ;;  %v8579_v63 = vmul.f32 %v8565_v41, %v8565_v41  ;;  %v1778_v38 = vmul.f32 %v1714_v43, %v8548_v48 }
 0x1c7   : > { %v2284_v21 = vmul.f32 %v8473_v55, %v2220_v31  ;;  %v1967_v17 = vadd.f32 -0.00073499064, %v1903_v35  ;;  %v2546_v16 = vadd.f32 -0.001682827, %v2482_v20  ;;  %v1269_v55 = vmul.f32 0.70710677, %v1017_v47 }
 0x1c8   : > { %v2289_v15 = vmul.f32 %v8477_v46, %v2225_v30  ;;  %v2799_v5 = vadd.f32 -0.014264739, %v2735_v62  ;;  %v1520_v49 = vmul.f32 -2.7261424e-10, %v8579_v63  ;;  %v2352_v14 = vmul.f32 -1.45660715e-05, %v8579_v63 }
 0x1c9   : > { %v7549_v39 = vpop.eup %7548  ;;  %v2031_v26 = vmul.f32 %v1967_v17, %v8528_v27  ;;  %v1842_v40 = vadd.f32 -5.6925062e-05, %v1778_v38  ;;  %v2610_v57 = vmul.f32 %v2546_v16, %v8548_v48  ;;  %v8591_v35 = vmul.f32 0.5, %v8518_v53 }
 0x1ca   : > { %v7551_v60 = vpop.eup %7550  ;;  %v2874_v31 = vmul.f32 %v7549_v39, %v2284_v21  ;;  %v1584_v43 = vadd.f32 2.7706815e-08, %v1520_v49  ;;  %v2416_v20 = vadd.f32 -0.00021337405, %v2352_v14  ;;  %7552 = vrcp.f32 %v2799_v5 }
 0x1cb   : > { %v2884_v46 = vmul.f32 %v7551_v60, %v2289_v15  ;;  %v2095_v30 = vadd.f32 -0.0029546, %v2031_v26  ;;  %v1906_v62 = vmul.f32 %v1842_v40, %v8548_v48  ;;  %v2674_v1 = vadd.f32 -0.0073733293, %v2610_v57 }
 0x1cc   : > { %v1648_v17 = vmul.f32 %v1584_v43, %v8579_v63  ;;  %v2480_v38 = vmul.f32 %v2416_v20, %v8579_v63  ;;  %v8598_v16 = vclamps-f32 %v1269_v55, 4.0  ;;  %v2990_v21 = vadd.f32 1.0, %v2878_v58  ;;  %v8609_v43 = vpop.f32.mrb[38].mxu0 }
 0x1cd   : > { %v2159_v53 = vmul.f32 %v2095_v30, %v8528_v27  ;;  %v1970_v39 = vadd.f32 -0.00073499064, %v1906_v62  ;;  %v2738_v49 = vmul.f32 %v2674_v1, %v8548_v48  ;;  %v8602_v26 = vmul.f32 0.5, %v1017_v47 }
 0x1ce   : > { %v1712_v15 = vadd.f32 -2.101024e-06, %v1648_v17  ;;  %v2544_v14 = vadd.f32 -0.001682827, %v2480_v38  ;;  %v8606_v40 = vmul.f32 %v8598_v16, %v8598_v16  ;;  %v2988_v5 = vadd.f32 1.0, %v2874_v31 }
 0x1cf   : > { %v2993_v57 = vadd.f32 1.0, %v2884_v46  ;;  %v2034_v60 = vmul.f32 %v1970_v39, %v8548_v48  ;;  %v2802_v55 = vadd.f32 -0.014264739, %v2738_v49  ;;  %v2223_v20 = vadd.f32 -0.016096033, %v2159_v53 }
 0x1d0   : > { %v1776_v27 = vmul.f32 %v1712_v15, %v8579_v63  ;;  %v2608_v58 = vmul.f32 %v2544_v14, %v8579_v63  ;;  %v1525_v1 = vmul.f32 -2.7261424e-10, %v8606_v40  ;;  %v2357_v47 = vmul.f32 -1.45660715e-05, %v8606_v40 }
 0x1d1   : > { %v2098_v30 = vadd.f32 -0.0029546, %v2034_v60  ;;  %7554 = vrcp.f32 %v2802_v55  ;;  %v1009_v31 = vadd.f32 %v8570_v28, %v8241_v18  ;;  %v8618_v46 = vmul.f32 %v2990_v21, %v8427_v19 }
 0x1d2   : > { %v1840_v62 = vadd.f32 -5.6925062e-05, %v1776_v27  ;;  %v2672_v17 = vadd.f32 -0.0073733293, %v2608_v58  ;;  %v1589_v38 = vadd.f32 2.7706815e-08, %v1525_v1  ;;  %v1020_v14 = vadd.f32 %v8570_v28, %v8248_v22 }
 0x1d3   : > { %v2162_v39 = vmul.f32 %v2098_v30, %v8548_v48  ;;  %v2421_v49 = vadd.f32 -0.00021337405, %v2357_v47  ;;  %v1267_v15 = vmul.f32 0.70710677, %v1009_v31  ;;  %v8624_v53 = vmul.f32 %v2988_v5, %v8463_v6 }
 0x1d4   : > { %v1904_v60 = vmul.f32 %v1840_v62, %v8579_v63  ;;  %v2736_v18 = vmul.f32 %v2672_v17, %v8579_v63  ;;  %v1653_v19 = vmul.f32 %v1589_v38, %v8606_v40  ;;  %v2287_v21 = vmul.f32 %v8512_v8, %v2223_v20  ;;  %v7553_v58 = vpop.eup %7552 }
 0x1d5   : > { %v2226_v55 = vadd.f32 -0.016096033, %v2162_v39  ;;  %v2485_v27 = vmul.f32 %v2421_v49, %v8606_v40  ;;  %v8631_v48 = vclamps-f32 %v1267_v15, 4.0  ;;  %v8634_v1 = vmul.f32 %v2993_v57, %v8475_v61  ;;  %v8647_v57 = vpop.f32.mrb[39].mxu0 }
 0x1d6   : > { %v1968_v22 = vadd.f32 -0.00073499064, %v1904_v60  ;;  %v1717_v6 = vadd.f32 -2.101024e-06, %v1653_v19  ;;  %v8636_v5 = vmul.f32 0.5, %v1009_v31  ;;  %v8642_v8 = vmul.f32 0.5, %v1020_v14 }
 0x1d7   : > { %12423 = vst [vmem:[#allocation19_spill] sm:$0xff] %v8634_v1  ;;  %v2800_v47 = vadd.f32 -0.014264739, %v2736_v18  ;;  %v2549_v30 = vadd.f32 -0.001682827, %v2485_v27  ;;  %v8640_v62 = vmul.f32 %v8631_v48, %v8631_v48  ;;  %v2290_v20 = vmul.f32 %v8541_v4, %v2226_v55  ;;  %12424 = vst [vmem:[#allocation20_spill] sm:$0xff] %v8647_v57 }
 0x1d8   : > { %v2032_v17 = vmul.f32 %v1968_v22, %v8579_v63  ;;  %v1781_v38 = vmul.f32 %v1717_v6, %v8606_v40  ;;  %v1270_v61 = vmul.f32 0.70710677, %v1020_v14  ;;  %v2880_v39 = vmul.f32 %v7553_v58, %v2287_v21 }
 0x1d9   : > { %v2613_v31 = vmul.f32 %v2549_v30, %v8606_v40  ;;  %v1523_v49 = vmul.f32 -2.7261424e-10, %v8640_v62  ;;  %v2355_v15 = vmul.f32 -1.45660715e-05, %v8640_v62  ;;  %v1012_v4 = vadd.f32 %v8570_v28, %v8261_v37 }
 0x1da   : > { %v2096_v60 = vadd.f32 -0.0029546, %v2032_v17  ;;  %v1845_v18 = vadd.f32 -5.6925062e-05, %v1781_v38  ;;  %v8652_v19 = vclamps-f32 %v1270_v61, 4.0  ;;  %7556 = vrcp.f32 %v2800_v47 }
 0x1db   : > { %v7555_v55 = vpop.eup %7554  ;;  %v2677_v27 = vadd.f32 -0.0073733293, %v2613_v31  ;;  %v1587_v14 = vadd.f32 2.7706815e-08, %v1523_v49  ;;  %v2419_v22 = vadd.f32 -0.00021337405, %v2355_v15 }
 0x1dc   : > { %v2886_v6 = vmul.f32 %v7555_v55, %v2290_v20  ;;  %v2160_v21 = vmul.f32 %v2096_v60, %v8579_v63  ;;  %v1909_v58 = vmul.f32 %v1845_v18, %v8606_v40  ;;  %v8660_v30 = vmul.f32 %v8652_v19, %v8652_v19 }
 0x1dd   : > { %v2991_v17 = vadd.f32 1.0, %v2880_v39  ;;  %v2741_v38 = vmul.f32 %v2677_v27, %v8606_v40  ;;  %v1651_v61 = vmul.f32 %v1587_v14, %v8640_v62  ;;  %v2483_v37 = vmul.f32 %v2419_v22, %v8640_v62 }
 0x1de   : > { %v1973_v47 = vadd.f32 -0.00073499064, %v1909_v58  ;;  %v8665_v31 = vmul.f32 0.5, %v1012_v4  ;;  %v1268_v49 = vmul.f32 0.70710677, %v1012_v4  ;;  %v8669_v63 = vadd.f32 %v8570_v28, %v8365_v36 }
 0x1df   : > { %v2805_v20 = vadd.f32 -0.014264739, %v2741_v38  ;;  %v1715_v15 = vadd.f32 -2.101024e-06, %v1651_v61  ;;  %v2547_v60 = vadd.f32 -0.001682827, %v2483_v37 }
 0x1e0   : > { %v2994_v18 = vadd.f32 1.0, %v2886_v6  ;;  %v2224_v55 = vadd.f32 -0.016096033, %v2160_v21  ;;  %v2037_v27 = vmul.f32 %v1973_v47, %v8606_v40  ;;  %v1526_v14 = vmul.f32 -2.7261424e-10, %v8660_v30 }
 0x1e1   : > { %7558 = vrcp.f32 %v2805_v20  ;;  %v1779_v22 = vmul.f32 %v1715_v15, %v8640_v62  ;;  %v2611_v4 = vmul.f32 %v2547_v60, %v8640_v62  ;;  %v2358_v36 = vmul.f32 -1.45660715e-05, %v8660_v30 }
 0x1e2   : > { %v2101_v58 = vadd.f32 -0.0029546, %v2037_v27  ;;  %v1590_v38 = vadd.f32 2.7706815e-08, %v1526_v14  ;;  %v8678_v61 = vclamps-f32 %v1268_v49, 4.0  ;;  %v8681_v37 = vmul.f32 0.5, %v8669_v63 }
 0x1e3   : > { %v8684_v6 = vmul.f32 %v2991_v17, %v8506_v51  ;;  %v1843_v21 = vadd.f32 -5.6925062e-05, %v1779_v22  ;;  %v2675_v47 = vadd.f32 -0.0073733293, %v2611_v4  ;;  %v2422_v39 = vadd.f32 -0.00021337405, %v2358_v36 }
 0x1e4   : > { %v2288_v20 = vmul.f32 %v8565_v41, %v2224_v55  ;;  %v2165_v15 = vmul.f32 %v2101_v58, %v8606_v40  ;;  %v1654_v60 = vmul.f32 %v1590_v38, %v8660_v30  ;;  %v8691_v27 = vmul.f32 %v8678_v61, %v8678_v61  ;;  %v8693_v49 = vpop.f32.mrb[40].mxu0  ;;  %v7557_v14 = vpop.eup %7556 }
 0x1e5   : > { %12425 = vst [vmem:[#allocation21_spill] sm:$0xff] %v8684_v6  ;;  %12426 = vst [vmem:[#allocation22_spill] sm:$0xff] %v8693_v49  ;;  %v1907_v1 = vmul.f32 %v1843_v21, %v8640_v62  ;;  %v2739_v51 = vmul.f32 %v2675_v47, %v8640_v62  ;;  %v2486_v17 = vmul.f32 %v2422_v39, %v8660_v30  ;;  %v2336_v22 = vmul.f32 -1.45660715e-05, %v8109_v13 }
 0x1e6   : > { %v8700_v41 = vmul.f32 %v2994_v18, %v8532_v32  ;;  %v2229_v40 = vadd.f32 -0.016096033, %v2165_v15  ;;  %v1718_v55 = vadd.f32 -2.101024e-06, %v1654_v60  ;;  %v1524_v4 = vmul.f32 -2.7261424e-10, %v8691_v27 }
 0x1e7   : > { %v1971_v36 = vadd.f32 -0.00073499064, %v1907_v1  ;;  %v2803_v58 = vadd.f32 -0.014264739, %v2739_v51  ;;  %v2550_v38 = vadd.f32 -0.001682827, %v2486_v17  ;;  %v8705_v49 = vadd.f32 %v8570_v28, %v8368_v50 }
 0x1e8   : > { %12427 = vst [vmem:[#allocation23_spill] sm:$0xff] %v8700_v41  ;;  %v2293_v21 = vmul.f32 %v8598_v16, %v2229_v40  ;;  %v1782_v39 = vmul.f32 %v1718_v55, %v8660_v30  ;;  %v1588_v47 = vadd.f32 2.7706815e-08, %v1524_v4  ;;  %v2356_v57 = vmul.f32 -1.45660715e-05, %v8691_v27 }
 0x1e9   : > { %v2882_v32 = vmul.f32 %v7557_v14, %v2288_v20  ;;  %v2035_v18 = vmul.f32 %v1971_v36, %v8640_v62  ;;  %v2614_v15 = vmul.f32 %v2550_v38, %v8660_v30  ;;  %v2399_v1 = vadd.f32 -0.00021337405, %v8130_v34 }
 0x1ea   : > { %v1846_v60 = vadd.f32 -5.6925062e-05, %v1782_v39  ;;  %v1652_v51 = vmul.f32 %v1588_v47, %v8691_v27  ;;  %v2420_v17 = vadd.f32 -0.00021337405, %v2356_v57  ;;  %v2400_v50 = vadd.f32 -0.00021337405, %v2336_v22 }
 0x1eb   : > { %v7559_v41 = vpop.eup %7558  ;;  %v2099_v6 = vadd.f32 -0.0029546, %v2035_v18  ;;  %7560 = vrcp.f32 %v2803_v58  ;;  %v2678_v16 = vadd.f32 -0.0073733293, %v2614_v15  ;;  %v2463_v40 = vmul.f32 %v2399_v1, %v8092_v3 }
 0x1ec   : > { %v2892_v55 = vmul.f32 %v7559_v41, %v2293_v21  ;;  %v1910_v20 = vmul.f32 %v1846_v60, %v8660_v30  ;;  %v1716_v14 = vadd.f32 -2.101024e-06, %v1652_v51  ;;  %v2484_v4 = vmul.f32 %v2420_v17, %v8691_v27  ;;  %v8725_v51 = vpop.f32.mrb[41].mxu0 }
 0x1ed   : > { %v2163_v36 = vmul.f32 %v2099_v6, %v8640_v62  ;;  %v2742_v34 = vmul.f32 %v2678_v16, %v8660_v30  ;;  %v2464_v38 = vmul.f32 %v2400_v50, %v8109_v13  ;;  %v2527_v57 = vadd.f32 -0.001682827, %v2463_v40 }
 0x1ee   : > { %v1974_v22 = vadd.f32 -0.00073499064, %v1910_v20  ;;  %v1780_v39 = vmul.f32 %v1716_v14, %v8691_v27  ;;  %v2548_v58 = vadd.f32 -0.001682827, %v2484_v4  ;;  %v1273_v47 = vmul.f32 0.70710677, %v8669_v63 }
 0x1ef   : > { %v2992_v18 = vadd.f32 1.0, %v2882_v32  ;;  %v2806_v41 = vadd.f32 -0.014264739, %v2742_v34  ;;  %v2528_v21 = vadd.f32 -0.001682827, %v2464_v38  ;;  %v2591_v15 = vmul.f32 %v2527_v57, %v8092_v3  ;;  %v8731_v14 = vpop.f32.mrb[42].mxu0 }
 0x1f0   : > { %v2227_v1 = vadd.f32 -0.016096033, %v2163_v36  ;;  %v2038_v60 = vmul.f32 %v1974_v22, %v8660_v30  ;;  %v1844_v62 = vadd.f32 -5.6925062e-05, %v1780_v39  ;;  %v2612_v6 = vmul.f32 %v2548_v58, %v8691_v27 }
 0x1f1   : > { %v2997_v17 = vadd.f32 1.0, %v2892_v55  ;;  %7562 = vrcp.f32 %v2806_v41  ;;  %v2592_v50 = vmul.f32 %v2528_v21, %v8109_v13  ;;  %v2655_v16 = vadd.f32 -0.0073733293, %v2591_v15 }
 0x1f2   : > { %v2102_v40 = vadd.f32 -0.0029546, %v2038_v60  ;;  %v1908_v63 = vmul.f32 %v1844_v62, %v8691_v27  ;;  %v2676_v32 = vadd.f32 -0.0073733293, %v2612_v6  ;;  %v8729_v20 = vclamps-f32 %v1273_v47, 4.0 }
 0x1f3   : > { %v2656_v4 = vadd.f32 -0.0073733293, %v2592_v50  ;;  %v2719_v36 = vmul.f32 %v2655_v16, %v8092_v3  ;;  %v1271_v34 = vmul.f32 0.70710677, %v8705_v49  ;;  %v1036_v55 = vadd.f32 %v8570_v28, %v8374_v56 }
 0x1f4   : > { %v2291_v38 = vmul.f32 %v8631_v48, %v2227_v1  ;;  %v2166_v57 = vmul.f32 %v2102_v40, %v8660_v30  ;;  %v1972_v22 = vadd.f32 -0.00073499064, %v1908_v63  ;;  %v2740_v39 = vmul.f32 %v2676_v32, %v8691_v27  ;;  %v8757_v40 = vpop.f32.mrb[43].mxu0 }
 0x1f5   : > { %v7561_v58 = vpop.eup %7560  ;;  %v2720_v47 = vmul.f32 %v2656_v4, %v8109_v13  ;;  %v2783_v41 = vadd.f32 -0.014264739, %v2719_v36  ;;  %v8743_v21 = vmul.f32 %v8729_v20, %v8729_v20  ;;  %v8745_v3 = vclamps-f32 %v1271_v34, 4.0 }
 0x1f6   : > { %v8748_v15 = vmul.f32 %v2992_v18, %v8591_v35  ;;  %v8751_v56 = vmul.f32 %v2997_v17, %v8602_v26  ;;  %v2230_v48 = vadd.f32 -0.016096033, %v2166_v57  ;;  %v2036_v30 = vmul.f32 %v1972_v22, %v8691_v27 }
 0x1f7   : > { %v2784_v1 = vadd.f32 -0.014264739, %v2720_v47  ;;  %7564 = vrcp.f32 %v2783_v41  ;;  %v1529_v13 = vmul.f32 -2.7261424e-10, %v8743_v21  ;;  %v2361_v60 = vmul.f32 -1.45660715e-05, %v8743_v21 }
 0x1f8   : > { %v2888_v62 = vmul.f32 %v7561_v58, %v2291_v38  ;;  %v2294_v6 = vmul.f32 %v8652_v19, %v2230_v48  ;;  %v2100_v50 = vadd.f32 -0.0029546, %v2036_v30  ;;  %v2804_v16 = vadd.f32 -0.014264739, %v2740_v39 }
 0x1f9   : > { %7566 = vrcp.f32 %v2784_v1  ;;  %v1593_v35 = vadd.f32 2.7706815e-08, %v1529_v13  ;;  %v2425_v26 = vadd.f32 -0.00021337405, %v2361_v60  ;;  %v8761_v18 = vmul.f32 %v8745_v3, %v8745_v3 }
 0x1fa   : > { %v2164_v17 = vmul.f32 %v2100_v50, %v8691_v27  ;;  %v8765_v63 = vmul.f32 0.5, %v8705_v49  ;;  %v1274_v32 = vmul.f32 0.70710677, %v1036_v55  ;;  %v1028_v19 = vadd.f32 %v8570_v28, %v8381_v29 }
 0x1fb   : > { %v7563_v4 = vpop.eup %7562  ;;  %v1657_v36 = vmul.f32 %v1593_v35, %v8743_v21  ;;  %v2489_v34 = vmul.f32 %v2425_v26, %v8743_v21  ;;  %v1527_v38 = vmul.f32 -2.7261424e-10, %v8761_v18  ;;  %v2359_v57 = vmul.f32 -1.45660715e-05, %v8761_v18  ;;  %v8793_v26 = vpop.f32.mrb[44].mxu0 }
 0x1fc   : > { %v2995_v22 = vadd.f32 1.0, %v2888_v62  ;;  %v2894_v39 = vmul.f32 %v7563_v4, %v2294_v6  ;;  %7568 = vrcp.f32 %v2804_v16  ;;  %v8773_v27 = vclamps-f32 %v1274_v32, 4.0  ;;  %12428 = vst [vmem:[#allocation24_spill] sm:$0xff] %v8793_v26 }
 0x1fd   : > { %v1721_v49 = vadd.f32 -2.101024e-06, %v1657_v36  ;;  %v2553_v58 = vadd.f32 -0.001682827, %v2489_v34  ;;  %v1591_v47 = vadd.f32 2.7706815e-08, %v1527_v38 }
 0x1fe   : > { %v2228_v41 = vadd.f32 -0.016096033, %v2164_v17  ;;  %v2423_v48 = vadd.f32 -0.00021337405, %v2359_v57  ;;  %v8777_v30 = vmul.f32 0.5, %v1036_v55  ;;  %v8781_v1 = vmul.f32 %v8773_v27, %v8773_v27 }
 0x1ff   : > { %v1785_v13 = vmul.f32 %v1721_v49, %v8743_v21  ;;  %v2617_v60 = vmul.f32 %v2553_v58, %v8743_v21  ;;  %v1655_v62 = vmul.f32 %v1591_v47, %v8761_v18  ;;  %v8786_v6 = vmul.f32 0.5, %v1028_v19 }
 0x200   : > { %v8788_v50 = vadd.f32 1.0, %v2894_v39  ;;  %v2487_v16 = vmul.f32 %v2423_v48, %v8761_v18  ;;  %v1530_v35 = vmul.f32 -2.7261424e-10, %v8781_v1  ;;  %v2362_v55 = vmul.f32 -1.45660715e-05, %v8781_v1 }
 0x201   : > { %v7565_v17 = vpop.eup %7564  ;;  %v8796_v32 = vmul.f32 %v2995_v22, %v8636_v5  ;;  %v1849_v4 = vadd.f32 -5.6925062e-05, %v1785_v13  ;;  %v2681_v36 = vadd.f32 -0.0073733293, %v2617_v60  ;;  %v1719_v34 = vadd.f32 -2.101024e-06, %v1655_v62 }
 0x202   : > { %v2848_v38 = vmul.f32 %v7565_v17, %v8221_v25  ;;  %v2551_v57 = vadd.f32 -0.001682827, %v2487_v16  ;;  %v1594_v39 = vadd.f32 2.7706815e-08, %v1530_v35  ;;  %v2426_v49 = vadd.f32 -0.00021337405, %v2362_v55 }
 0x203   : > { %v7567_v58 = vpop.eup %7566  ;;  %v2292_v47 = vmul.f32 %v8678_v61, %v2228_v41  ;;  %v1913_v48 = vmul.f32 %v1849_v4, %v8743_v21  ;;  %v2745_v29 = vmul.f32 %v2681_v36, %v8743_v21  ;;  %v1783_v26 = vmul.f32 %v1719_v34, %v8761_v18  ;;  %v8811_v36 = vpop.f32.mrb[45].mxu0 }
 0x204   : > { %v2850_v5 = vmul.f32 %v7567_v58, %v8231_v10  ;;  %v2975_v22 = vadd.f32 1.0, %v2848_v38  ;;  %v2615_v13 = vmul.f32 %v2551_v57, %v8761_v18  ;;  %v1658_v60 = vmul.f32 %v1594_v39, %v8781_v1 }
 0x205   : > { %v1977_v25 = vadd.f32 -0.00073499064, %v1913_v48  ;;  %v2809_v62 = vadd.f32 -0.014264739, %v2745_v29  ;;  %v2490_v16 = vmul.f32 %v2426_v49, %v8781_v1  ;;  %v1272_v35 = vmul.f32 0.70710677, %v1028_v19 }
 0x206   : > { %v7569_v55 = vpop.eup %7568  ;;  %v2976_v61 = vadd.f32 1.0, %v2850_v5  ;;  %v1847_v41 = vadd.f32 -5.6925062e-05, %v1783_v26  ;;  %v2679_v17 = vadd.f32 -0.0073733293, %v2615_v13  ;;  %v8809_v4 = vadd.f32 %v8570_v28, %v8401_v11  ;;  %v12429_v29 = vld [vmem:[#allocation10_spill] sm:$0xff] }
 0x207   : > { %v3039_v10 = vmul.f32 %v2975_v22, %v8088_v2  ;;  %v2041_v34 = vmul.f32 %v1977_v25, %v8743_v21  ;;  %7570 = vrcp.f32 %v2809_v62  ;;  %v1722_v38 = vadd.f32 -2.101024e-06, %v1658_v60 }
 0x208   : > { %v3040_v57 = vmul.f32 %v2976_v61, %v12429_v29  ;;  %v1911_v19 = vmul.f32 %v1847_v41, %v8761_v18  ;;  %v2743_v39 = vmul.f32 %v2679_v17, %v8761_v18  ;;  %v2554_v26 = vadd.f32 -0.001682827, %v2490_v16  ;;  %v12431_v61 = vld [vmem:[#allocation12_spill] sm:$0xff] }
 0x209   : > { %v2890_v49 = vmul.f32 %v7569_v55, %v2292_v47  ;;  %v2105_v58 = vadd.f32 -0.0029546, %v2041_v34  ;;  %v1786_v11 = vmul.f32 %v1722_v38, %v8781_v1  ;;  %v8819_v48 = vclamps-f32 %v1272_v35, 4.0  ;;  %v12430_v55 = vld [vmem:[#allocation11_spill] sm:$0xff] }
 0x20a   : > { %v3103_v5 = vpack.c.bf16 %v3040_v57, %v3039_v10  ;;  %v1975_v13 = vadd.f32 -0.00073499064, %v1911_v19  ;;  %v2807_v2 = vadd.f32 -0.014264739, %v2743_v39  ;;  %v2618_v22 = vmul.f32 %v2554_v26, %v8781_v1  ;;  %v12434_v26 = vld [vmem:[#allocation13_spill] sm:$0xff] }
 0x20b   : > { %v2169_v60 = vmul.f32 %v2105_v58, %v8743_v21  ;;  %v1850_v25 = vadd.f32 -5.6925062e-05, %v1786_v11  ;;  %v8825_v62 = vmul.f32 %v8819_v48, %v8819_v48  ;;  %v1277_v16 = vmul.f32 0.70710677, %v8809_v4 }
 0x20c   : > { %7277 = vmatprep.mubr.bf16.mxu1 %v3103_v5  ;;  %v2039_v47 = vmul.f32 %v1975_v13, %v8761_v18  ;;  %7572 = vrcp.f32 %v2807_v2  ;;  %v2682_v35 = vadd.f32 -0.0073733293, %v2618_v22  ;;  %v3106_v41 = vpack.c.bf16 %v12431_v61, %v12430_v55 }
 0x20d   : > { %v2233_v17 = vadd.f32 -0.016096033, %v2169_v60  ;;  %v12432_v10 = vpack.c.bf16 %v8287_v33, %v8251_v23  ;;  %v1914_v21 = vmul.f32 %v1850_v25, %v8781_v1  ;;  %v1528_v34 = vmul.f32 -2.7261424e-10, %v8825_v62  ;;  %v8845_v23 = vpop.f32.mrb[46].mxu0 }
 0x20e   : > { %v2360_v38 = vmul.f32 -1.45660715e-05, %v8825_v62  ;;  %v2103_v29 = vadd.f32 -0.0029546, %v2039_v47  ;;  %v2746_v57 = vmul.f32 %v2682_v35, %v8781_v1  ;;  %v12433_v19 = vpack.c.bf16 %v8397_v0, %v8338_v7 }
 0x20f   : > { %7278 = vmatmul.mubr.bf16.vlgmr.msra.gmra.mrb[0].mxu1 %v12432_v10  ;;  %v8841_v39 = vclamps-f32 %v1277_v16, 4.0  ;;  %v1041_v58 = vadd.f32 %v8570_v28, %v12434_v26  ;;  %v2297_v33 = vmul.f32 %v8729_v20, %v2233_v17  ;;  %v1978_v11 = vadd.f32 -0.00073499064, %v1914_v21 }
 0x210   : > { %7281 = vmatprep.mubr.bf16.mxu1 %v12433_v19  ;;  %v1592_v5 = vadd.f32 2.7706815e-08, %v1528_v34  ;;  %v2424_v13 = vadd.f32 -0.00021337405, %v2360_v38  ;;  %v8850_v2 = vmul.f32 %v8788_v50, %v8642_v8  ;;  %v2167_v22 = vmul.f32 %v2103_v29, %v8761_v18  ;;  %v12435_v38 = vld [vmem:[#allocation14_spill] sm:$0xff] }
 0x211   : > { %v2810_v7 = vadd.f32 -0.014264739, %v2746_v57  ;;  %v8855_v0 = vmul.f32 %v8841_v39, %v8841_v39  ;;  %v7571_v60 = vpop.eup %7570  ;;  %v2042_v25 = vmul.f32 %v1978_v11, %v8781_v1  ;;  %v1275_v47 = vmul.f32 0.70710677, %v1041_v58 }
 0x212   : > { %v1656_v16 = vmul.f32 %v1592_v5, %v8825_v62  ;;  %v2488_v20 = vmul.f32 %v2424_v13, %v8825_v62  ;;  %v2996_v35 = vadd.f32 1.0, %v2890_v49  ;;  %v2231_v55 = vadd.f32 -0.016096033, %v2167_v22 }
 0x213   : > { %7574 = vrcp.f32 %v2810_v7  ;;  %v1533_v8 = vmul.f32 -2.7261424e-10, %v8855_v0  ;;  %v2900_v50 = vmul.f32 %v7571_v60, %v2297_v33  ;;  %v2106_v18 = vadd.f32 -0.0029546, %v2042_v25  ;;  %v8870_v33 = vpop.f32.mrb[47].mxu0 }
 0x214   : > { %v1720_v61 = vadd.f32 -2.101024e-06, %v1656_v16  ;;  %v2552_v17 = vadd.f32 -0.001682827, %v2488_v20  ;;  %v2295_v10 = vmul.f32 %v8745_v3, %v2231_v55  ;;  %v2365_v34 = vmul.f32 -1.45660715e-05, %v8855_v0 }
 0x215   : > { %v1597_v21 = vadd.f32 2.7706815e-08, %v1533_v8  ;;  %v1052_v29 = vadd.f32 %v8570_v28, %v12435_v38  ;;  %v2170_v57 = vmul.f32 %v2106_v18, %v8781_v1  ;;  %v8868_v26 = vclamps-f32 %v1275_v47, 4.0 }
 0x216   : > { %v1784_v49 = vmul.f32 %v1720_v61, %v8825_v62  ;;  %v2616_v19 = vmul.f32 %v2552_v17, %v8825_v62  ;;  %v7573_v11 = vpop.eup %7572  ;;  %v8873_v3 = vmul.f32 0.5, %v8809_v4  ;;  %v2429_v13 = vadd.f32 -0.00021337405, %v2365_v34 }
 0x217   : > { %7282 = vmatmul.mubr.bf16.gmra.mrb[4].mxu1 %v3106_v41  ;;  %v1661_v5 = vmul.f32 %v1597_v21, %v8855_v0  ;;  %v8876_v22 = vmul.f32 0.5, %v1041_v58  ;;  %v8879_v1 = vmul.f32 %v2996_v35, %v8665_v31  ;;  %v2234_v7 = vadd.f32 -0.016096033, %v2170_v57 }
 0x218   : > { %v1848_v60 = vadd.f32 -5.6925062e-05, %v1784_v49  ;;  %v2680_v25 = vadd.f32 -0.0073733293, %v2616_v19  ;;  %v2493_v16 = vmul.f32 %v2429_v13, %v8855_v0  ;;  %v8884_v20 = vmul.f32 %v8868_v26, %v8868_v26 }
 0x219   : > { %v1725_v41 = vadd.f32 -2.101024e-06, %v1661_v5  ;;  %v1278_v4 = vmul.f32 0.70710677, %v1052_v29  ;;  %v3001_v47 = vadd.f32 1.0, %v2900_v50  ;;  %v2896_v55 = vmul.f32 %v7573_v11, %v2295_v10 }
 0x21a   : > { %v1912_v8 = vmul.f32 %v1848_v60, %v8825_v62  ;;  %v2744_v58 = vmul.f32 %v2680_v25, %v8825_v62  ;;  %v2557_v35 = vadd.f32 -0.001682827, %v2493_v16  ;;  %v1531_v18 = vmul.f32 -2.7261424e-10, %v8884_v20  ;;  %v8905_v16 = vpop.f32.mrb[48].mxu0 }
 0x21b   : > { %v1789_v31 = vmul.f32 %v1725_v41, %v8855_v0  ;;  %v2363_v61 = vmul.f32 -1.45660715e-05, %v8884_v20  ;;  %v2298_v17 = vmul.f32 %v8773_v27, %v2234_v7  ;;  %v8892_v38 = vclamps-f32 %v1278_v4, 4.0 }
 0x21c   : > { %v1976_v21 = vadd.f32 -0.00073499064, %v1912_v8  ;;  %v2808_v34 = vadd.f32 -0.014264739, %v2744_v58  ;;  %v2621_v10 = vmul.f32 %v2557_v35, %v8855_v0  ;;  %v1595_v49 = vadd.f32 2.7706815e-08, %v1531_v18 }
 0x21d   : > { %v7575_v57 = vpop.eup %7574  ;;  %v1853_v50 = vadd.f32 -5.6925062e-05, %v1789_v31  ;;  %v2427_v19 = vadd.f32 -0.00021337405, %v2363_v61  ;;  %v2999_v11 = vadd.f32 1.0, %v2896_v55  ;;  %v8896_v13 = vmul.f32 0.5, %v1052_v29 }
 0x21e   : > { %v2040_v5 = vmul.f32 %v1976_v21, %v8825_v62  ;;  %v8900_v60 = vmul.f32 %v8892_v38, %v8892_v38  ;;  %v2685_v7 = vadd.f32 -0.0073733293, %v2621_v10  ;;  %v1659_v25 = vmul.f32 %v1595_v49, %v8884_v20 }
 0x21f   : > { %v1917_v27 = vmul.f32 %v1853_v50, %v8855_v0  ;;  %v2491_v41 = vmul.f32 %v2427_v19, %v8884_v20  ;;  %v2902_v4 = vmul.f32 %v7575_v57, %v2298_v17  ;;  %7576 = vrcp.f32 %v2808_v34 }
 0x220   : > { %v2104_v8 = vadd.f32 -0.0029546, %v2040_v5  ;;  %v1534_v55 = vmul.f32 -2.7261424e-10, %v8900_v60  ;;  %v2749_v58 = vmul.f32 %v2685_v7, %v8855_v0  ;;  %v1723_v31 = vadd.f32 -2.101024e-06, %v1659_v25 }
 0x221   : > { %v1981_v29 = vadd.f32 -0.00073499064, %v1917_v27  ;;  %v2555_v35 = vadd.f32 -0.001682827, %v2491_v41  ;;  %v2366_v21 = vmul.f32 -1.45660715e-05, %v8900_v60  ;;  %v1044_v50 = vadd.f32 %v8570_v28, %v8424_v9 }
 0x222   : > { %v2168_v18 = vmul.f32 %v2104_v8, %v8825_v62  ;;  %v1598_v61 = vadd.f32 2.7706815e-08, %v1534_v55  ;;  %v2813_v17 = vadd.f32 -0.014264739, %v2749_v58  ;;  %v1787_v34 = vmul.f32 %v1723_v31, %v8884_v20 }
 0x223   : > { %v2045_v10 = vmul.f32 %v1981_v29, %v8855_v0  ;;  %v2619_v57 = vmul.f32 %v2555_v35, %v8884_v20  ;;  %v3002_v49 = vadd.f32 1.0, %v2902_v4  ;;  %v2430_v27 = vadd.f32 -0.00021337405, %v2366_v21 }
 0x224   : > { %v2232_v19 = vadd.f32 -0.016096033, %v2168_v18  ;;  %v1662_v5 = vmul.f32 %v1598_v61, %v8900_v60  ;;  %v8918_v62 = vmul.f32 %v3001_v47, %v8681_v37  ;;  %v1851_v25 = vadd.f32 -5.6925062e-05, %v1787_v34 }
 0x225   : > { %v2109_v7 = vadd.f32 -0.0029546, %v2045_v10  ;;  %v2683_v41 = vadd.f32 -0.0073733293, %v2619_v57  ;;  %7578 = vrcp.f32 %v2813_v17  ;;  %v2494_v8 = vmul.f32 %v2430_v27, %v8900_v60 }
 0x226   : > { %v1726_v9 = vadd.f32 -2.101024e-06, %v1662_v5  ;;  %v1276_v55 = vmul.f32 0.70710677, %v1044_v50  ;;  %v1915_v58 = vmul.f32 %v1851_v25, %v8884_v20  ;;  %v3107_v31 = vpack.c.bf16 %v8500_v24, %v8454_v42  ;;  %v12436_v25 = vld [vmem:[#allocation15_spill] sm:$0xff] }
 0x227   : > { %v2173_v29 = vmul.f32 %v2109_v7, %v8855_v0  ;;  %v2747_v4 = vmul.f32 %v2683_v41, %v8884_v20  ;;  %v8927_v37 = vmul.f32 %v2999_v11, %v8765_v63  ;;  %v2558_v35 = vadd.f32 -0.001682827, %v2494_v8  ;;  %v12437_v41 = vld [vmem:[#allocation16_spill] sm:$0xff]  ;;  %v8951_v8 = vpop.f32.mrb[49].mxu0 }
 0x228   : > { %v1790_v47 = vmul.f32 %v1726_v9, %v8900_v60  ;;  %v8930_v18 = vclamps-f32 %v1276_v55, 4.0  ;;  %v2296_v61 = vmul.f32 %v8819_v48, %v2232_v19  ;;  %v1979_v21 = vadd.f32 -0.00073499064, %v1915_v58  ;;  %7285 = vmatprep.mubr.bf16.mxu1 %v3107_v31 }
 0x229   : > { %v2811_v10 = vadd.f32 -0.014264739, %v2747_v4  ;;  %v1065_v0 = vadd.f32 %v8570_v28, %v8470_v54  ;;  %v7577_v17 = vpop.eup %7576  ;;  %v8936_v34 = vmul.f32 %v3002_v49, %v8777_v30  ;;  %v2622_v24 = vmul.f32 %v2558_v35, %v8900_v60 }
 0x22a   : > { %v1854_v42 = vadd.f32 -5.6925062e-05, %v1790_v47  ;;  %v8941_v63 = vmul.f32 %v8930_v18, %v8930_v18  ;;  %v2237_v11 = vadd.f32 -0.016096033, %v2173_v29  ;;  %v2043_v48 = vmul.f32 %v1979_v21, %v8884_v20 }
 0x22b   : > { %7580 = vrcp.f32 %v2811_v10  ;;  %v8944_v57 = vmul.f32 0.5, %v1044_v50  ;;  %v2686_v54 = vadd.f32 -0.0073733293, %v2622_v24  ;;  %v2898_v49 = vmul.f32 %v7577_v17, %v2296_v61  ;;  %v8960_v61 = vpop.f32.mrb[50].mxu0 }
 0x22c   : > { %v1918_v19 = vmul.f32 %v1854_v42, %v8900_v60  ;;  %v1532_v5 = vmul.f32 -2.7261424e-10, %v8941_v63  ;;  %v2364_v30 = vmul.f32 -1.45660715e-05, %v8941_v63  ;;  %v2107_v27 = vadd.f32 -0.0029546, %v2043_v48 }
 0x22d   : > { %v1281_v7 = vmul.f32 0.70710677, %v1065_v0  ;;  %v3108_v9 = vpack.c.bf16 %v12437_v41, %v12436_v25  ;;  %v2750_v29 = vmul.f32 %v2686_v54, %v8900_v60  ;;  %v2301_v4 = vmul.f32 %v8841_v39, %v2237_v11 }
 0x22e   : > { %v1982_v55 = vadd.f32 -0.00073499064, %v1918_v19  ;;  %v1596_v50 = vadd.f32 2.7706815e-08, %v1532_v5  ;;  %v2428_v58 = vadd.f32 -0.00021337405, %v2364_v30  ;;  %v2171_v31 = vmul.f32 %v2107_v27, %v8884_v20 }
 0x22f   : > { %v8956_v47 = vmul.f32 0.5, %v1065_v0  ;;  %v8958_v35 = vclamps-f32 %v1281_v7, 4.0  ;;  %7286 = vmatmul.mubr.bf16.gmra.mrb[8].mxu1 %v3108_v9  ;;  %v7579_v21 = vpop.eup %7578  ;;  %v2814_v17 = vadd.f32 -0.014264739, %v2750_v29  ;;  %v1057_v24 = vadd.f32 %v8570_v28, %v8502_v12 }
 0x230   : > { %v2046_v10 = vmul.f32 %v1982_v55, %v8900_v60  ;;  %v1660_v42 = vmul.f32 %v1596_v50, %v8941_v63  ;;  %v3000_v48 = vadd.f32 1.0, %v2898_v49  ;;  %v2235_v39 = vadd.f32 -0.016096033, %v2171_v31  ;;  %v8982_v50 = vpop.f32.mrb[51].mxu0 }
 0x231   : > { %v2492_v20 = vmul.f32 %v2428_v58, %v8941_v63  ;;  %v8969_v0 = vmul.f32 %v8958_v35, %v8958_v35  ;;  %7582 = vrcp.f32 %v2814_v17  ;;  %v1068_v54 = vadd.f32 %v8570_v28, %v8508_v44 }
 0x232   : > { %v2110_v11 = vadd.f32 -0.0029546, %v2046_v10  ;;  %v1724_v19 = vadd.f32 -2.101024e-06, %v1660_v42  ;;  %v2908_v5 = vmul.f32 %v7579_v21, %v2301_v4  ;;  %v2299_v49 = vmul.f32 %v8868_v26, %v2235_v39 }
 0x233   : > { %v2556_v30 = vadd.f32 -0.001682827, %v2492_v20  ;;  %v1537_v27 = vmul.f32 -2.7261424e-10, %v8969_v0  ;;  %v2369_v12 = vmul.f32 -1.45660715e-05, %v8969_v0  ;;  %v8979_v55 = vmul.f32 %v3000_v48, %v8786_v6 }
 0x234   : > { %v2174_v7 = vmul.f32 %v2110_v11, %v8900_v60  ;;  %v1788_v25 = vmul.f32 %v1724_v19, %v8941_v63  ;;  %v1279_v41 = vmul.f32 0.70710677, %v1057_v24  ;;  %v8984_v31 = vmul.f32 0.5, %v1057_v24 }
 0x235   : > { %v7581_v9 = vpop.eup %7580  ;;  %v2620_v29 = vmul.f32 %v2556_v30, %v8941_v63  ;;  %v1601_v44 = vadd.f32 2.7706815e-08, %v1537_v27  ;;  %v2433_v28 = vadd.f32 -0.00021337405, %v2369_v12  ;;  %v1282_v17 = vmul.f32 0.70710677, %v1068_v54 }
 0x236   : > { %v2238_v58 = vadd.f32 -0.016096033, %v2174_v7  ;;  %v1852_v4 = vadd.f32 -5.6925062e-05, %v1788_v25  ;;  %v8986_v26 = vclamps-f32 %v1279_v41, 4.0  ;;  %v3005_v6 = vadd.f32 1.0, %v2908_v5 }
 0x237   : > { %v2684_v60 = vadd.f32 -0.0073733293, %v2620_v29  ;;  %v1665_v21 = vmul.f32 %v1601_v44, %v8969_v0  ;;  %v2497_v10 = vmul.f32 %v2433_v28, %v8969_v0  ;;  %v2904_v42 = vmul.f32 %v7581_v9, %v2299_v49 }
 0x238   : > { %v1916_v48 = vmul.f32 %v1852_v4, %v8941_v63  ;;  %v8993_v39 = vmul.f32 %v8986_v26, %v8986_v26  ;;  %v8996_v19 = vclamps-f32 %v1282_v17, 4.0  ;;  %v2302_v30 = vmul.f32 %v8892_v38, %v2238_v58 }
 0x239   : > { %v2748_v20 = vmul.f32 %v2684_v60, %v8941_v63  ;;  %v1729_v24 = vadd.f32 -2.101024e-06, %v1665_v21  ;;  %v2561_v11 = vadd.f32 -0.001682827, %v2497_v10  ;;  %v9008_v38 = vmul.f32 0.5, %v1068_v54 }
 0x23a   : > { %v1980_v27 = vadd.f32 -0.00073499064, %v1916_v48  ;;  %v1535_v12 = vmul.f32 -2.7261424e-10, %v8993_v39  ;;  %v2367_v5 = vmul.f32 -1.45660715e-05, %v8993_v39  ;;  %v9005_v41 = vmul.f32 %v8996_v19, %v8996_v19 }
 0x23b   : > { %v2812_v49 = vadd.f32 -0.014264739, %v2748_v20  ;;  %v1793_v7 = vmul.f32 %v1729_v24, %v8969_v0  ;;  %v2625_v25 = vmul.f32 %v2561_v11, %v8969_v0  ;;  %v7583_v9 = vpop.eup %7582  ;;  %v3003_v58 = vadd.f32 1.0, %v2904_v42  ;;  %v9013_v20 = vpop.f32.mrb[52].mxu0 }
 0x23c   : > { %v2044_v29 = vmul.f32 %v1980_v27, %v8941_v63  ;;  %v1599_v44 = vadd.f32 2.7706815e-08, %v1535_v12  ;;  %v2431_v28 = vadd.f32 -0.00021337405, %v2367_v5  ;;  %v1538_v48 = vmul.f32 -2.7261424e-10, %v9005_v41 }
 0x23d   : > { %7584 = vrcp.f32 %v2812_v49  ;;  %v1857_v4 = vadd.f32 -5.6925062e-05, %v1793_v7  ;;  %v2689_v60 = vadd.f32 -0.0073733293, %v2625_v25  ;;  %v2910_v24 = vmul.f32 %v7583_v9, %v2302_v30 }
 0x23e   : > { %v2108_v21 = vadd.f32 -0.0029546, %v2044_v29  ;;  %v1663_v10 = vmul.f32 %v1599_v44, %v8993_v39  ;;  %v2495_v17 = vmul.f32 %v2431_v28, %v8993_v39  ;;  %v2370_v54 = vmul.f32 -1.45660715e-05, %v9005_v41  ;;  %v9022_v44 = vld [vmem:[%s12402_s5] ss:$0 sm:$0xff] }
 0x23f   : > { %v1921_v11 = vmul.f32 %v1857_v4, %v8969_v0  ;;  %v2753_v27 = vmul.f32 %v2689_v60, %v8969_v0  ;;  %v1602_v49 = vadd.f32 2.7706815e-08, %v1538_v48  ;;  %v1060_v30 = vadd.f32 %v9022_v44, %v8521_v45 }
 0x240   : > { %v2172_v42 = vmul.f32 %v2108_v21, %v8941_v63  ;;  %v1727_v12 = vadd.f32 -2.101024e-06, %v1663_v10  ;;  %v2559_v5 = vadd.f32 -0.001682827, %v2495_v17  ;;  %v2434_v29 = vadd.f32 -0.00021337405, %v2370_v54 }
 0x241   : > { %v1985_v7 = vadd.f32 -0.00073499064, %v1921_v11  ;;  %v2817_v25 = vadd.f32 -0.014264739, %v2753_v27  ;;  %v1666_v63 = vmul.f32 %v1602_v49, %v9005_v41  ;;  %v3006_v60 = vadd.f32 1.0, %v2910_v24 }
 0x242   : > { %v2236_v9 = vadd.f32 -0.016096033, %v2172_v42  ;;  %v1791_v28 = vmul.f32 %v1727_v12, %v8993_v39  ;;  %v2623_v4 = vmul.f32 %v2559_v5, %v8993_v39  ;;  %v2498_v10 = vmul.f32 %v2434_v29, %v9005_v41 }
 0x243   : > { %v2049_v21 = vmul.f32 %v1985_v7, %v8969_v0  ;;  %7586 = vrcp.f32 %v2817_v25  ;;  %v9032_v17 = vmul.f32 %v3005_v6, %v8873_v3  ;;  %v1730_v27 = vadd.f32 -2.101024e-06, %v1666_v63  ;;  %v12439_v63 = vld [vmem:[#allocation18_spill] sm:$0xff] }
 0x244   : > { %v1855_v48 = vadd.f32 -5.6925062e-05, %v1791_v28  ;;  %v2687_v11 = vadd.f32 -0.0073733293, %v2623_v4  ;;  %v2562_v54 = vadd.f32 -0.001682827, %v2498_v10  ;;  %v3109_v12 = vpack.c.bf16 %v8624_v53, %v8558_v52 }
 0x245   : > { %v2113_v45 = vadd.f32 -0.0029546, %v2049_v21  ;;  %v1280_v42 = vmul.f32 0.70710677, %v1060_v30  ;;  %v2300_v5 = vmul.f32 %v8930_v18, %v2236_v9  ;;  %v1794_v7 = vmul.f32 %v1730_v27, %v9005_v41  ;;  %v12438_v28 = vld [vmem:[#allocation17_spill] sm:$0xff]  ;;  %v9046_v52 = vpop.f32.mrb[53].mxu0 }
 0x246   : > { %v1919_v24 = vmul.f32 %v1855_v48, %v8993_v39  ;;  %v2751_v49 = vmul.f32 %v2687_v11, %v8993_v39  ;;  %v2626_v6 = vmul.f32 %v2562_v54, %v9005_v41  ;;  %7289 = vmatprep.mubr.bf16.mxu1 %v3109_v12  ;;  %v3110_v4 = vpack.c.bf16 %v8618_v46, %v12438_v28 }
 0x247   : > { %v7585_v25 = vpop.eup %7584  ;;  %v2177_v3 = vmul.f32 %v2113_v45, %v8969_v0  ;;  %v9042_v29 = vclamps-f32 %v1280_v42, 4.0  ;;  %v1858_v9 = vadd.f32 -5.6925062e-05, %v1794_v7  ;;  %v1081_v21 = vadd.f32 %v9022_v44, %v12439_v63 }
 0x248   : > { %v1983_v53 = vadd.f32 -0.00073499064, %v1919_v24  ;;  %v2815_v18 = vadd.f32 -0.014264739, %v2751_v49  ;;  %v9051_v10 = vmul.f32 %v3003_v58, %v8876_v22  ;;  %v2690_v48 = vadd.f32 -0.0073733293, %v2626_v6  ;;  %7290 = vmatmul.mubr.bf16.gmra.mrb[12].mxu1 %v3110_v4 }
 0x249   : > { %v2241_v0 = vadd.f32 -0.016096033, %v2177_v3  ;;  %v9055_v11 = vmul.f32 %v9042_v29, %v9042_v29  ;;  %v9058_v46 = vmul.f32 %v3006_v60, %v8896_v13  ;;  %v2906_v27 = vmul.f32 %v7585_v25, %v2300_v5 }
 0x24a   : > { %v2047_v45 = vmul.f32 %v1983_v53, %v8993_v39  ;;  %v1922_v54 = vmul.f32 %v1858_v9, %v9005_v41  ;;  %v2754_v22 = vmul.f32 %v2690_v48, %v9005_v41  ;;  %7588 = vrcp.f32 %v2815_v18  ;;  %v9072_v53 = vpop.f32.mrb[54].mxu0 }
 0x24b   : > { %v2305_v42 = vmul.f32 %v8958_v35, %v2241_v0  ;;  %v1536_v58 = vmul.f32 -2.7261424e-10, %v9055_v11  ;;  %v2368_v12 = vmul.f32 -1.45660715e-05, %v9055_v11  ;;  %v1285_v7 = vmul.f32 0.70710677, %v1081_v21 }
 0x24c   : > { %v2111_v24 = vadd.f32 -0.0029546, %v2047_v45  ;;  %v1986_v49 = vadd.f32 -0.00073499064, %v1922_v54  ;;  %v2818_v13 = vadd.f32 -0.014264739, %v2754_v22  ;;  %v1073_v25 = vadd.f32 %v9022_v44, %v8594_v59 }
 0x24d   : > { %v7587_v3 = vpop.eup %7586  ;;  %v1600_v60 = vadd.f32 2.7706815e-08, %v1536_v58  ;;  %v2432_v5 = vadd.f32 -0.00021337405, %v2368_v12  ;;  %v9070_v4 = vclamps-f32 %v1285_v7, 4.0  ;;  %12440 = vst [vmem:[#allocation10_spill] sm:$0xff] %v9072_v53  ;;  %v1084_v12 = vadd.f32 %v9022_v44, %v8609_v43 }
 0x24e   : > { %v2916_v6 = vmul.f32 %v7587_v3, %v2305_v42  ;;  %v2175_v35 = vmul.f32 %v2111_v24, %v8993_v39  ;;  %v2050_v28 = vmul.f32 %v1986_v49, %v9005_v41  ;;  %v3004_v9 = vadd.f32 1.0, %v2906_v27 }
 0x24f   : > { %v9074_v18 = vmul.f32 0.5, %v1060_v30  ;;  %v1664_v63 = vmul.f32 %v1600_v60, %v9055_v11  ;;  %v2496_v0 = vmul.f32 %v2432_v5, %v9055_v11  ;;  %v9080_v59 = vmul.f32 %v9070_v4, %v9070_v4  ;;  %v9101_v5 = vpop.f32.mrb[55].mxu0 }
 0x250   : > { %v3009_v48 = vadd.f32 1.0, %v2916_v6  ;;  %v2239_v45 = vadd.f32 -0.016096033, %v2175_v35  ;;  %v2114_v54 = vadd.f32 -0.0029546, %v2050_v28  ;;  %7590 = vrcp.f32 %v2818_v13  ;;  %12442 = vst [vmem:[#allocation12_spill] sm:$0xff] %v9101_v5 }
 0x251   : > { %v1728_v39 = vadd.f32 -2.101024e-06, %v1664_v63  ;;  %v2560_v42 = vadd.f32 -0.001682827, %v2496_v0  ;;  %v1283_v22 = vmul.f32 0.70710677, %v1073_v25  ;;  %v9094_v13 = vmul.f32 %v3004_v9, %v8944_v57 }
 0x252   : > { %v2178_v58 = vmul.f32 %v2114_v54, %v9005_v41  ;;  %v9083_v27 = vmul.f32 0.5, %v1081_v21  ;;  %v1541_v30 = vmul.f32 -2.7261424e-10, %v9080_v59  ;;  %v2373_v7 = vmul.f32 -1.45660715e-05, %v9080_v59 }
 0x253   : > { %v1792_v24 = vmul.f32 %v1728_v39, %v9055_v11  ;;  %v2624_v49 = vmul.f32 %v2560_v42, %v9055_v11  ;;  %v9091_v3 = vclamps-f32 %v1283_v22, 4.0  ;;  %v9097_v41 = vmul.f32 %v3009_v48, %v8956_v47  ;;  %v12443_v22 = vld [vmem:[#allocation21_spill] sm:$0xff] }
 0x254   : > { %v1605_v21 = vadd.f32 2.7706815e-08, %v1541_v30  ;;  %v9099_v60 = vmul.f32 0.5, %v1073_v25  ;;  %v2303_v43 = vmul.f32 %v8986_v26, %v2239_v45  ;;  %v2437_v28 = vadd.f32 -0.00021337405, %v2373_v7  ;;  %v7589_v63 = vpop.eup %7588 }
 0x255   : > { %12441 = vst [vmem:[#allocation11_spill] sm:$0xff] %v9097_v41  ;;  %v1856_v6 = vadd.f32 -5.6925062e-05, %v1792_v24  ;;  %v2688_v35 = vadd.f32 -0.0073733293, %v2624_v49  ;;  %v9107_v57 = vmul.f32 %v9091_v3, %v9091_v3  ;;  %v9109_v47 = vmul.f32 0.5, %v1084_v12 }
 0x256   : > { %v2242_v0 = vadd.f32 -0.016096033, %v2178_v58  ;;  %v1669_v54 = vmul.f32 %v1605_v21, %v9080_v59  ;;  %v2501_v48 = vmul.f32 %v2437_v28, %v9080_v59  ;;  %v1286_v26 = vmul.f32 0.70710677, %v1084_v12 }
 0x257   : > { %v1920_v25 = vmul.f32 %v1856_v6, %v9055_v11  ;;  %v2752_v9 = vmul.f32 %v2688_v35, %v9055_v11  ;;  %v1539_v39 = vmul.f32 -2.7261424e-10, %v9107_v57  ;;  %v2371_v42 = vmul.f32 -1.45660715e-05, %v9107_v57 }
 0x258   : > { %v1733_v45 = vadd.f32 -2.101024e-06, %v1669_v54  ;;  %v3111_v58 = vpack.c.bf16 %v8748_v15, %v12443_v22  ;;  %v2912_v30 = vmul.f32 %v7589_v63, %v2303_v43  ;;  %v2565_v7 = vadd.f32 -0.001682827, %v2501_v48 }
 0x259   : > { %v1984_v24 = vadd.f32 -0.00073499064, %v1920_v25  ;;  %v2816_v49 = vadd.f32 -0.014264739, %v2752_v9  ;;  %v2306_v21 = vmul.f32 %v8996_v19, %v2242_v0  ;;  %v1603_v35 = vadd.f32 2.7706815e-08, %v1539_v39 }
 0x25a   : > { %v1797_v6 = vmul.f32 %v1733_v45, %v9080_v59  ;;  %v2435_v41 = vadd.f32 -0.00021337405, %v2371_v42  ;;  %7293 = vmatprep.mubr.bf16.mxu1 %v3111_v58  ;;  %v7591_v12 = vpop.eup %7590  ;;  %v2629_v54 = vmul.f32 %v2565_v7, %v9080_v59  ;;  %v9122_v5 = vclamps-f32 %v1286_v26, 4.0  ;;  %v12444_v25 = vld [vmem:[#allocation20_spill] sm:$0xff]  ;;  %v9132_v39 = vpop.f32.mrb[56].mxu0 }
 0x25b   : > { %v2048_v28 = vmul.f32 %v1984_v24, %v9055_v11  ;;  %7592 = vrcp.f32 %v2816_v49  ;;  %v1667_v43 = vmul.f32 %v1603_v35, %v9107_v57  ;;  %v1076_v19 = vadd.f32 %v9022_v44, %v12444_v25  ;;  %12445 = vst [vmem:[#allocation13_spill] sm:$0xff] %v9132_v39 }
 0x25c   : > { %v1861_v15 = vadd.f32 -5.6925062e-05, %v1797_v6  ;;  %v2499_v63 = vmul.f32 %v2435_v41, %v9107_v57  ;;  %v3007_v0 = vadd.f32 1.0, %v2912_v30  ;;  %v2693_v48 = vadd.f32 -0.0073733293, %v2629_v54 }
 0x25d   : > { %v2112_v9 = vadd.f32 -0.0029546, %v2048_v28  ;;  %v9130_v45 = vmul.f32 %v9122_v5, %v9122_v5  ;;  %v2918_v42 = vmul.f32 %v7591_v12, %v2306_v21  ;;  %v1731_v22 = vadd.f32 -2.101024e-06, %v1667_v43 }
 0x25e   : > { %v1925_v26 = vmul.f32 %v1861_v15, %v9080_v59  ;;  %v2563_v58 = vadd.f32 -0.001682827, %v2499_v63  ;;  %v2757_v41 = vmul.f32 %v2693_v48, %v9080_v59  ;;  %v1284_v28 = vmul.f32 0.70710677, %v1076_v19  ;;  %v12446_v15 = vld [vmem:[#allocation22_spill] sm:$0xff] }
 0x25f   : > { %v2176_v24 = vmul.f32 %v2112_v9, %v9055_v11  ;;  %v1542_v49 = vmul.f32 -2.7261424e-10, %v9130_v45  ;;  %v2374_v30 = vmul.f32 -1.45660715e-05, %v9130_v45  ;;  %v1795_v6 = vmul.f32 %v1731_v22, %v9107_v57 }
 0x260   : > { %v1989_v7 = vadd.f32 -0.00073499064, %v1925_v26  ;;  %v2627_v35 = vmul.f32 %v2563_v58, %v9107_v57  ;;  %v2821_v21 = vadd.f32 -0.014264739, %v2757_v41  ;;  %v9143_v43 = vadd.f32 %v9022_v44, %v12446_v15  ;;  %v9153_v15 = vpop.f32.mrb[57].mxu0 }
 0x261   : > { %v2240_v54 = vadd.f32 -0.016096033, %v2176_v24  ;;  %v1606_v12 = vadd.f32 2.7706815e-08, %v1542_v49  ;;  %v1859_v63 = vadd.f32 -5.6925062e-05, %v1795_v6  ;;  %v9156_v6 = vmul.f32 %v3007_v0, %v8984_v31 }
 0x262   : > { %v2053_v11 = vmul.f32 %v1989_v7, %v9080_v59  ;;  %v2691_v25 = vadd.f32 -0.0073733293, %v2627_v35  ;;  %v2438_v9 = vadd.f32 -0.00021337405, %v2374_v30  ;;  %7594 = vrcp.f32 %v2821_v21  ;;  %12447 = vst [vmem:[#allocation14_spill] sm:$0xff] %v9153_v15  ;;  %v9168_v15 = vpop.f32.mrb[58].mxu0 }
 0x263   : > { %v2304_v48 = vmul.f32 %v9042_v29, %v2240_v54  ;;  %v1670_v26 = vmul.f32 %v1606_v12, %v9130_v45  ;;  %v9148_v22 = vclamps-f32 %v1284_v28, 4.0  ;;  %v1923_v24 = vmul.f32 %v1859_v63, %v9107_v57  ;;  %12448 = vst [vmem:[#allocation15_spill] sm:$0xff] %v9156_v6  ;;  %12449 = vst [vmem:[#allocation16_spill] sm:$0xff] %v9168_v15 }
 0x264   : > { %v2117_v58 = vadd.f32 -0.0029546, %v2053_v11  ;;  %v2755_v41 = vmul.f32 %v2691_v25, %v9107_v57  ;;  %v2502_v49 = vmul.f32 %v2438_v9, %v9130_v45  ;;  %v1289_v35 = vmul.f32 0.70710677, %v9143_v43 }
 0x265   : > { %v7593_v7 = vpop.eup %7592  ;;  %v1734_v30 = vadd.f32 -2.101024e-06, %v1670_v26  ;;  %v9160_v29 = vmul.f32 %v9148_v22, %v9148_v22  ;;  %v1987_v21 = vadd.f32 -0.00073499064, %v1923_v24  ;;  %v3010_v0 = vadd.f32 1.0, %v2918_v42 }
 0x266   : > { %v2914_v28 = vmul.f32 %v7593_v7, %v2304_v48  ;;  %v2181_v54 = vmul.f32 %v2117_v58, %v9080_v59  ;;  %v2819_v12 = vadd.f32 -0.014264739, %v2755_v41  ;;  %v2566_v63 = vadd.f32 -0.001682827, %v2502_v49 }
 0x267   : > { %v1798_v11 = vmul.f32 %v1734_v30, %v9130_v45  ;;  %v1540_v25 = vmul.f32 -2.7261424e-10, %v9160_v29  ;;  %v2372_v31 = vmul.f32 -1.45660715e-05, %v9160_v29  ;;  %v2051_v26 = vmul.f32 %v1987_v21, %v9107_v57 }
 0x268   : > { %v2245_v9 = vadd.f32 -0.016096033, %v2181_v54  ;;  %7596 = vrcp.f32 %v2819_v12  ;;  %v2630_v48 = vmul.f32 %v2566_v63, %v9130_v45  ;;  %v3008_v24 = vadd.f32 1.0, %v2914_v28  ;;  %v12450_v28 = vld [vmem:[#allocation19_spill] sm:$0xff] }
 0x269   : > { %v1862_v39 = vadd.f32 -5.6925062e-05, %v1798_v11  ;;  %v1604_v59 = vadd.f32 2.7706815e-08, %v1540_v25  ;;  %v2436_v58 = vadd.f32 -0.00021337405, %v2372_v31  ;;  %v9196_v53 = vmul.f32 %v3010_v0, %v9008_v38 }
 0x26a   : > { %v2115_v41 = vadd.f32 -0.0029546, %v2051_v26  ;;  %v9171_v7 = vmul.f32 0.5, %v1076_v19  ;;  %v9173_v49 = vclamps-f32 %v1289_v35, 4.0  ;;  %v2694_v42 = vadd.f32 -0.0073733293, %v2630_v48 }
 0x26b   : > { %v1926_v30 = vmul.f32 %v1862_v39, %v9130_v45  ;;  %v1668_v54 = vmul.f32 %v1604_v59, %v9160_v29  ;;  %v2500_v21 = vmul.f32 %v2436_v58, %v9160_v29  ;;  %v2309_v12 = vmul.f32 %v9070_v4, %v2245_v9  ;;  %v12451_v19 = vld [vmem:[#allocation23_spill] sm:$0xff] }
 0x26c   : > { %v2179_v11 = vmul.f32 %v2115_v41, %v9107_v57  ;;  %v9182_v63 = vmul.f32 %v9173_v49, %v9173_v49  ;;  %v3112_v25 = vpack.c.bf16 %v12451_v19, %v12450_v28  ;;  %v7595_v35 = vpop.eup %7594  ;;  %v2758_v39 = vmul.f32 %v2694_v42, %v9130_v45 }
 0x26d   : > { %v1990_v31 = vadd.f32 -0.00073499064, %v1926_v30  ;;  %v1732_v26 = vadd.f32 -2.101024e-06, %v1668_v54  ;;  %v2564_v48 = vadd.f32 -0.001682827, %v2500_v21  ;;  %v1089_v57 = vadd.f32 %v9022_v44, %v8725_v51 }
 0x26e   : > { %v2243_v59 = vadd.f32 -0.016096033, %v2179_v11  ;;  %v1545_v58 = vmul.f32 -2.7261424e-10, %v9182_v63  ;;  %v2377_v4 = vmul.f32 -1.45660715e-05, %v9182_v63  ;;  %7294 = vmatmul.mubr.bf16.gmra.mrb[16].mxu1 %v3112_v25  ;;  %v2924_v19 = vmul.f32 %v7595_v35, %v2309_v12 }
 0x26f   : > { %v2054_v9 = vmul.f32 %v1990_v31, %v9130_v45  ;;  %v2822_v41 = vadd.f32 -0.014264739, %v2758_v39  ;;  %v1796_v28 = vmul.f32 %v1732_v26, %v9160_v29  ;;  %v2628_v30 = vmul.f32 %v2564_v48, %v9160_v29  ;;  %v9203_v12 = vpop.f32.mrb[59].mxu0 }
 0x270   : > { %v2307_v42 = vmul.f32 %v9091_v3, %v2243_v59  ;;  %v1609_v54 = vadd.f32 2.7706815e-08, %v1545_v58  ;;  %v2441_v21 = vadd.f32 -0.00021337405, %v2377_v4  ;;  %v9199_v51 = vmul.f32 0.5, %v9143_v43 }
 0x271   : > { %v2118_v11 = vadd.f32 -0.0029546, %v2054_v9  ;;  %7598 = vrcp.f32 %v2822_v41  ;;  %v1860_v15 = vadd.f32 -5.6925062e-05, %v1796_v28  ;;  %v2692_v6 = vadd.f32 -0.0073733293, %v2628_v30 }
 0x272   : > { %v7597_v25 = vpop.eup %7596  ;;  %v1673_v31 = vmul.f32 %v1609_v54, %v9182_v63  ;;  %v2505_v39 = vmul.f32 %v2441_v21, %v9182_v63  ;;  %v9209_v59 = vmul.f32 %v3008_v24, %v9074_v18  ;;  %v1287_v43 = vmul.f32 0.70710677, %v1089_v57 }
 0x273   : > { %v2920_v3 = vmul.f32 %v7597_v25, %v2307_v42  ;;  %v2182_v35 = vmul.f32 %v2118_v11, %v9130_v45  ;;  %v1924_v26 = vmul.f32 %v1860_v15, %v9160_v29  ;;  %v2756_v48 = vmul.f32 %v2692_v6, %v9160_v29 }
 0x274   : > { %v1737_v38 = vadd.f32 -2.101024e-06, %v1673_v31  ;;  %v2569_v0 = vadd.f32 -0.001682827, %v2505_v39  ;;  %v3013_v58 = vadd.f32 1.0, %v2924_v19  ;;  %v1100_v41 = vadd.f32 %v9022_v44, %v8731_v14 }
 0x275   : > { %v2246_v4 = vadd.f32 -0.016096033, %v2182_v35  ;;  %v1988_v9 = vadd.f32 -0.00073499064, %v1924_v26  ;;  %v2820_v28 = vadd.f32 -0.014264739, %v2756_v48  ;;  %v1092_v19 = vadd.f32 %v9022_v44, %v8757_v40 }
 0x276   : > { %v1801_v30 = vmul.f32 %v1737_v38, %v9182_v63  ;;  %v2633_v45 = vmul.f32 %v2569_v0, %v9182_v63  ;;  %v9215_v15 = vclamps-f32 %v1287_v43, 4.0  ;;  %v3011_v6 = vadd.f32 1.0, %v2920_v3 }
 0x277   : > { %v2310_v18 = vmul.f32 %v9122_v5, %v2246_v4  ;;  %v2052_v24 = vmul.f32 %v1988_v9, %v9160_v29  ;;  %7600 = vrcp.f32 %v2820_v28  ;;  %v9226_v21 = vmul.f32 %v3013_v58, %v9083_v27 }
 0x278   : > { %v1865_v42 = vadd.f32 -5.6925062e-05, %v1801_v30  ;;  %v2697_v54 = vadd.f32 -0.0073733293, %v2633_v45  ;;  %v9223_v14 = vmul.f32 %v9215_v15, %v9215_v15  ;;  %v1290_v25 = vmul.f32 0.70710677, %v1100_v41 }
 0x279   : > { %v2116_v11 = vadd.f32 -0.0029546, %v2052_v24  ;;  %v3113_v5 = vpack.c.bf16 %v8879_v1, %v8796_v32  ;;  %v9235_v48 = vmul.f32 0.5, %v1089_v57  ;;  %v1288_v38 = vmul.f32 0.70710677, %v1092_v19 }
 0x27a   : > { %v1929_v31 = vmul.f32 %v1865_v42, %v9182_v63  ;;  %v2761_v39 = vmul.f32 %v2697_v54, %v9182_v63  ;;  %v1543_v40 = vmul.f32 -2.7261424e-10, %v9223_v14  ;;  %v2375_v3 = vmul.f32 -1.45660715e-05, %v9223_v14 }
 0x27b   : > { %v7599_v35 = vpop.eup %7598  ;;  %v2180_v26 = vmul.f32 %v2116_v11, %v9160_v29  ;;  %v9237_v27 = vclamps-f32 %v1290_v25, 4.0  ;;  %7297 = vmatprep.mubr.bf16.mxu1 %v3113_v5  ;;  %v9240_v0 = vmul.f32 %v3011_v6, %v9099_v60  ;;  %v9246_v28 = vclamps-f32 %v1288_v38, 4.0  ;;  %v9252_v60 = vpop.f32.mrb[60].mxu0 }
 0x27c   : > { %v2926_v32 = vmul.f32 %v7599_v35, %v2310_v18  ;;  %v1993_v1 = vadd.f32 -0.00073499064, %v1929_v31  ;;  %v1607_v43 = vadd.f32 2.7706815e-08, %v1543_v40  ;;  %v2439_v4 = vadd.f32 -0.00021337405, %v2375_v3 }
 0x27d   : > { %v2244_v58 = vadd.f32 -0.016096033, %v2180_v26  ;;  %v9244_v9 = vmul.f32 %v9237_v27, %v9237_v27  ;;  %v2825_v57 = vadd.f32 -0.014264739, %v2761_v39  ;;  %v9250_v45 = vmul.f32 0.5, %v1100_v41 }
 0x27e   : > { %v2057_v29 = vmul.f32 %v1993_v1, %v9182_v63  ;;  %v1671_v30 = vmul.f32 %v1607_v43, %v9223_v14  ;;  %v3014_v6 = vadd.f32 1.0, %v2926_v32  ;;  %v2503_v18 = vmul.f32 %v2439_v4, %v9223_v14  ;;  %v12452_v4 = vld [vmem:[#allocation24_spill] sm:$0xff] }
 0x27f   : > { %v1546_v24 = vmul.f32 -2.7261424e-10, %v9244_v9  ;;  %v2378_v42 = vmul.f32 -1.45660715e-05, %v9244_v9  ;;  %v2308_v54 = vmul.f32 %v9148_v22, %v2244_v58  ;;  %v9260_v5 = vmul.f32 %v9246_v28, %v9246_v28 }
 0x280   : > { %v2121_v11 = vadd.f32 -0.0029546, %v2057_v29  ;;  %v1735_v25 = vadd.f32 -2.101024e-06, %v1671_v30  ;;  %v2567_v31 = vadd.f32 -0.001682827, %v2503_v18  ;;  %v3114_v40 = vpack.c.bf16 %v8850_v2, %v8751_v56 }
 0x281   : > { %v1610_v41 = vadd.f32 2.7706815e-08, %v1546_v24  ;;  %v2442_v39 = vadd.f32 -0.00021337405, %v2378_v42  ;;  %v7601_v3 = vpop.eup %7600  ;;  %v9266_v38 = vmul.f32 0.5, %v1092_v19  ;;  %7602 = vrcp.f32 %v2825_v57 }
 0x282   : > { %v2185_v35 = vmul.f32 %v2121_v11, %v9182_v63  ;;  %v1799_v26 = vmul.f32 %v1735_v25, %v9223_v14  ;;  %v1544_v22 = vmul.f32 -2.7261424e-10, %v9260_v5  ;;  %v2631_v32 = vmul.f32 %v2567_v31, %v9223_v14  ;;  %7298 = vmatmul.mubr.bf16.gmra.mrb[20].mxu1 %v3114_v40 }
 0x283   : > { %v1674_v1 = vmul.f32 %v1610_v41, %v9244_v9  ;;  %v2506_v43 = vmul.f32 %v2442_v39, %v9244_v9  ;;  %v2376_v58 = vmul.f32 -1.45660715e-05, %v9260_v5  ;;  %v1113_v63 = vadd.f32 %v9022_v44, %v12452_v4 }
 0x284   : > { %v1863_v56 = vadd.f32 -5.6925062e-05, %v1799_v26  ;;  %v1608_v2 = vadd.f32 2.7706815e-08, %v1544_v22  ;;  %v9276_v19 = vmul.f32 %v3014_v6, %v9109_v47  ;;  %v2922_v29 = vmul.f32 %v7601_v3, %v2308_v54  ;;  %v9286_v47 = vpop.f32.mrb[61].mxu0 }
 0x285   : > { %v2695_v30 = vadd.f32 -0.0073733293, %v2631_v32  ;;  %v1738_v18 = vadd.f32 -2.101024e-06, %v1674_v1  ;;  %v2249_v24 = vadd.f32 -0.016096033, %v2185_v35  ;;  %v9284_v39 = vadd.f32 %v9022_v44, %v8811_v36 }
 0x286   : > { %v1927_v42 = vmul.f32 %v1863_v56, %v9223_v14  ;;  %v2570_v11 = vadd.f32 -0.001682827, %v2506_v43  ;;  %v1672_v25 = vmul.f32 %v1608_v2, %v9260_v5  ;;  %v2440_v41 = vadd.f32 -0.00021337405, %v2376_v58 }
 0x287   : > { %v2759_v31 = vmul.f32 %v2695_v30, %v9223_v14  ;;  %v1802_v57 = vmul.f32 %v1738_v18, %v9244_v9  ;;  %v1293_v3 = vmul.f32 0.70710677, %v1113_v63  ;;  %v3012_v35 = vadd.f32 1.0, %v2922_v29  ;;  %v9297_v30 = vpop.f32.mrb[62].mxu0 }
 0x288   : > { %v1991_v6 = vadd.f32 -0.00073499064, %v1927_v42  ;;  %v2634_v54 = vmul.f32 %v2570_v11, %v9244_v9  ;;  %v1736_v40 = vadd.f32 -2.101024e-06, %v1672_v25  ;;  %v2504_v32 = vmul.f32 %v2440_v41, %v9260_v5 }
 0x289   : > { %v2823_v26 = vadd.f32 -0.014264739, %v2759_v31  ;;  %v1866_v22 = vadd.f32 -5.6925062e-05, %v1802_v57  ;;  %v9292_v56 = vclamps-f32 %v1293_v3, 4.0  ;;  %v9295_v4 = vmul.f32 0.5, %v1113_v63 }
 0x28a   : > { %v2055_v1 = vmul.f32 %v1991_v6, %v9223_v14  ;;  %v2698_v43 = vadd.f32 -0.0073733293, %v2634_v54  ;;  %v1800_v58 = vmul.f32 %v1736_v40, %v9260_v5  ;;  %v2568_v2 = vadd.f32 -0.001682827, %v2504_v32 }
 0x28b   : > { %7604 = vrcp.f32 %v2823_v26  ;;  %v1930_v36 = vmul.f32 %v1866_v22, %v9244_v9  ;;  %v9302_v11 = vmul.f32 %v9292_v56, %v9292_v56  ;;  %v9305_v25 = vmul.f32 %v3012_v35, %v9171_v7  ;;  %v7603_v63 = vpop.eup %7602 }
 0x28c   : > { %v2119_v29 = vadd.f32 -0.0029546, %v2055_v1  ;;  %v2762_v18 = vmul.f32 %v2698_v43, %v9244_v9  ;;  %v1864_v42 = vadd.f32 -5.6925062e-05, %v1800_v58  ;;  %v2313_v31 = vmul.f32 %v9173_v49, %v2249_v24 }
 0x28d   : > { %v1994_v57 = vadd.f32 -0.00073499064, %v1930_v36  ;;  %v2632_v41 = vmul.f32 %v2568_v2, %v9260_v5  ;;  %v1549_v3 = vmul.f32 -2.7261424e-10, %v9302_v11  ;;  %v2381_v32 = vmul.f32 -1.45660715e-05, %v9302_v11 }
 0x28e   : > { %v2183_v6 = vmul.f32 %v2119_v29, %v9223_v14  ;;  %v2826_v54 = vadd.f32 -0.014264739, %v2762_v18  ;;  %v1928_v40 = vmul.f32 %v1864_v42, %v9260_v5  ;;  %v1291_v7 = vmul.f32 0.70710677, %v9284_v39  ;;  %v9318_v36 = vpop.f32.mrb[63].mxu0 }
 0x28f   : > { %v2058_v26 = vmul.f32 %v1994_v57, %v9244_v9  ;;  %v2696_v22 = vadd.f32 -0.0073733293, %v2632_v41  ;;  %v1613_v24 = vadd.f32 2.7706815e-08, %v1549_v3  ;;  %v2445_v14 = vadd.f32 -0.00021337405, %v2381_v32 }
 0x290   : > { %v2247_v35 = vadd.f32 -0.016096033, %v2183_v6  ;;  %7606 = vrcp.f32 %v2826_v54  ;;  %v1992_v49 = vadd.f32 -0.00073499064, %v1928_v40  ;;  %v9316_v58 = vclamps-f32 %v1291_v7, 4.0  ;;  %12453 = vst [vmem:[#allocation17_spill] sm:$0xff] %v9318_v36 }
 0x291   : > { %v2122_v1 = vadd.f32 -0.0029546, %v2058_v26  ;;  %v2760_v43 = vmul.f32 %v2696_v22, %v9260_v5  ;;  %v1677_v18 = vmul.f32 %v1613_v24, %v9302_v11  ;;  %v1116_v42 = vadd.f32 %v9022_v44, %v8845_v23 }
 0x292   : > { %v2311_v2 = vmul.f32 %v9215_v15, %v2247_v35  ;;  %v2056_v29 = vmul.f32 %v1992_v49, %v9260_v5  ;;  %v2509_v6 = vmul.f32 %v2445_v14, %v9302_v11  ;;  %v9329_v54 = vmul.f32 %v9316_v58, %v9316_v58 }
 0x293   : > { %v2186_v57 = vmul.f32 %v2122_v1, %v9244_v9  ;;  %v2824_v41 = vadd.f32 -0.014264739, %v2760_v43  ;;  %v2932_v40 = vmul.f32 %v7603_v63, %v2313_v31  ;;  %v1741_v26 = vadd.f32 -2.101024e-06, %v1677_v18 }
 0x294   : > { %v2120_v3 = vadd.f32 -0.0029546, %v2056_v29  ;;  %v1108_v15 = vadd.f32 %v9022_v44, %v8870_v33  ;;  %v2573_v7 = vadd.f32 -0.001682827, %v2509_v6  ;;  %v1547_v23 = vmul.f32 -2.7261424e-10, %v9329_v54 }
 0x295   : > { %v7605_v22 = vpop.eup %7604  ;;  %v2250_v32 = vadd.f32 -0.016096033, %v2186_v57  ;;  %7608 = vrcp.f32 %v2824_v41  ;;  %v1805_v49 = vmul.f32 %v1741_v26, %v9302_v11  ;;  %v2379_v24 = vmul.f32 -1.45660715e-05, %v9329_v54 }
 0x296   : > { %v2928_v9 = vmul.f32 %v7605_v22, %v2311_v2  ;;  %v2184_v35 = vmul.f32 %v2120_v3, %v9260_v5  ;;  %v2637_v63 = vmul.f32 %v2573_v7, %v9302_v11  ;;  %v1611_v1 = vadd.f32 2.7706815e-08, %v1547_v23 }
 0x297   : > { %v2314_v31 = vmul.f32 %v9237_v27, %v2250_v32  ;;  %v1294_v43 = vmul.f32 0.70710677, %v1116_v42  ;;  %v3017_v33 = vadd.f32 1.0, %v2932_v40  ;;  %v1869_v29 = vadd.f32 -5.6925062e-05, %v1805_v49 }
 0x298   : > { %v2248_v14 = vadd.f32 -0.016096033, %v2184_v35  ;;  %v9340_v18 = vmul.f32 0.5, %v9284_v39  ;;  %v2701_v57 = vadd.f32 -0.0073733293, %v2637_v63  ;;  %v1675_v2 = vmul.f32 %v1611_v1, %v9329_v54 }
 0x299   : > { %v2443_v5 = vadd.f32 -0.00021337405, %v2379_v24  ;;  %v9343_v41 = vclamps-f32 %v1294_v43, 4.0  ;;  %v9345_v3 = vadd.f32 1.0, %v2928_v9  ;;  %v1933_v27 = vmul.f32 %v1869_v29, %v9302_v11 }
 0x29a   : > { %v7607_v6 = vpop.eup %7606  ;;  %v9348_v26 = vmul.f32 0.5, %v1116_v42  ;;  %v1292_v22 = vmul.f32 0.70710677, %v1108_v15  ;;  %v2765_v32 = vmul.f32 %v2701_v57, %v9302_v11  ;;  %v1739_v7 = vadd.f32 -2.101024e-06, %v1675_v2 }
 0x29b   : > { %v2934_v40 = vmul.f32 %v7607_v6, %v2314_v31  ;;  %v2507_v39 = vmul.f32 %v2443_v5, %v9329_v54  ;;  %v1997_v23 = vadd.f32 -0.00073499064, %v1933_v27  ;;  %v9354_v35 = vmul.f32 %v9343_v41, %v9343_v41 }
 0x29c   : > { %v9356_v49 = vclamps-f32 %v1292_v22, 4.0  ;;  %v3115_v9 = vpack.c.bf16 %v8979_v55, %v8927_v37  ;;  %v2312_v42 = vmul.f32 %v9246_v28, %v2248_v14  ;;  %v2829_v24 = vadd.f32 -0.014264739, %v2765_v32 }
 0x29d   : > { %v1803_v31 = vmul.f32 %v1739_v7, %v9329_v54  ;;  %v2571_v63 = vadd.f32 -0.001682827, %v2507_v39  ;;  %v2061_v1 = vmul.f32 %v1997_v23, %v9302_v11  ;;  %v1550_v43 = vmul.f32 -2.7261424e-10, %v9354_v35 }
 0x29e   : > { %v2382_v29 = vmul.f32 -1.45660715e-05, %v9354_v35  ;;  %v9367_v57 = vmul.f32 %v9356_v49, %v9356_v49  ;;  %7301 = vmatprep.mubr.bf16.mxu1 %v3115_v9  ;;  %v3018_v5 = vadd.f32 1.0, %v2934_v40  ;;  %v9370_v28 = vmul.f32 0.5, %v1108_v15 }
 0x29f   : > { %v7609_v2 = vpop.eup %7608  ;;  %v1867_v37 = vadd.f32 -5.6925062e-05, %v1803_v31  ;;  %v2635_v55 = vmul.f32 %v2571_v63, %v9329_v54  ;;  %v2125_v14 = vadd.f32 -0.0029546, %v2061_v1  ;;  %7610 = vrcp.f32 %v2829_v24 }
 0x2a0   : > { %v1614_v6 = vadd.f32 2.7706815e-08, %v1550_v43  ;;  %v2446_v27 = vadd.f32 -0.00021337405, %v2382_v29  ;;  %v1548_v7 = vmul.f32 -2.7261424e-10, %v9367_v57  ;;  %v2930_v23 = vmul.f32 %v7609_v2, %v2312_v42 }
 0x2a1   : > { %v1931_v22 = vmul.f32 %v1867_v37, %v9329_v54  ;;  %v2699_v32 = vadd.f32 -0.0073733293, %v2635_v55  ;;  %v2380_v39 = vmul.f32 -1.45660715e-05, %v9367_v57  ;;  %v2189_v9 = vmul.f32 %v2125_v14, %v9302_v11 }
 0x2a2   : > { %v1678_v40 = vmul.f32 %v1614_v6, %v9354_v35  ;;  %v2510_v31 = vmul.f32 %v2446_v27, %v9354_v35  ;;  %v1612_v24 = vadd.f32 2.7706815e-08, %v1548_v7  ;;  %v9380_v43 = vmul.f32 %v3017_v33, %v9199_v51 }
 0x2a3   : > { %v1995_v15 = vadd.f32 -0.00073499064, %v1931_v22  ;;  %v2763_v63 = vmul.f32 %v2699_v32, %v9329_v54  ;;  %v2444_v1 = vadd.f32 -0.00021337405, %v2380_v39  ;;  %v2253_v29 = vadd.f32 -0.016096033, %v2189_v9 }
 0x2a4   : > { %v1742_v37 = vadd.f32 -2.101024e-06, %v1678_v40  ;;  %v2574_v55 = vadd.f32 -0.001682827, %v2510_v31  ;;  %v1676_v11 = vmul.f32 %v1612_v24, %v9367_v57  ;;  %v3016_v14 = vadd.f32 1.0, %v2930_v23 }
 0x2a5   : > { %v2059_v36 = vmul.f32 %v1995_v15, %v9329_v54  ;;  %v2827_v42 = vadd.f32 -0.014264739, %v2763_v63  ;;  %v2508_v2 = vmul.f32 %v2444_v1, %v9367_v57  ;;  %v1129_v22 = vadd.f32 %v9022_v44, %v8905_v16 }
 0x2a6   : > { %v1806_v6 = vmul.f32 %v1742_v37, %v9354_v35  ;;  %v2638_v27 = vmul.f32 %v2574_v55, %v9354_v35  ;;  %v1740_v33 = vadd.f32 -2.101024e-06, %v1676_v11  ;;  %v2317_v7 = vmul.f32 %v9292_v56, %v2253_v29 }
 0x2a7   : > { %v2123_v51 = vadd.f32 -0.0029546, %v2059_v36  ;;  %7612 = vrcp.f32 %v2827_v42  ;;  %v2572_v32 = vadd.f32 -0.001682827, %v2508_v2  ;;  %v3116_v40 = vpack.c.bf16 %v8936_v34, %v8918_v62 }
 0x2a8   : > { %v1870_v39 = vadd.f32 -5.6925062e-05, %v1806_v6  ;;  %v2702_v9 = vadd.f32 -0.0073733293, %v2638_v27  ;;  %v1804_v31 = vmul.f32 %v1740_v33, %v9367_v57  ;;  %v1297_v63 = vmul.f32 0.70710677, %v1129_v22 }
 0x2a9   : > { %v2187_v23 = vmul.f32 %v2123_v51, %v9329_v54  ;;  %v2636_v15 = vmul.f32 %v2572_v32, %v9367_v57  ;;  %v7611_v24 = vpop.eup %7610  ;;  %v9397_v16 = vmul.f32 %v9345_v3, %v9235_v48  ;;  %v9400_v36 = vmul.f32 %v3018_v5, %v9250_v45  ;;  %7302 = vmatmul.mubr.bf16.gmra.mrb[24].mxu1 %v3116_v40 }
 0x2aa   : > { %v1934_v56 = vmul.f32 %v1870_v39, %v9354_v35  ;;  %v2766_v1 = vmul.f32 %v2702_v9, %v9354_v35  ;;  %v1868_v34 = vadd.f32 -5.6925062e-05, %v1804_v31  ;;  %v1121_v29 = vadd.f32 %v9022_v44, %v8951_v8 }
 0x2ab   : > { %v2251_v62 = vadd.f32 -0.016096033, %v2187_v23  ;;  %v2700_v54 = vadd.f32 -0.0073733293, %v2636_v15  ;;  %v9407_v37 = vmul.f32 %v3016_v14, %v9266_v38  ;;  %v9409_v3 = vclamps-f32 %v1297_v63, 4.0 }
 0x2ac   : > { %v1998_v55 = vadd.f32 -0.00073499064, %v1934_v56  ;;  %v2830_v48 = vadd.f32 -0.014264739, %v2766_v1  ;;  %v2940_v45 = vmul.f32 %v7611_v24, %v2317_v7  ;;  %v1932_v5 = vmul.f32 %v1868_v34, %v9367_v57 }
 0x2ad   : > { %v2764_v42 = vmul.f32 %v2700_v54, %v9367_v57  ;;  %v9413_v11 = vmul.f32 0.5, %v1129_v22  ;;  %v2315_v2 = vmul.f32 %v9316_v58, %v2251_v62  ;;  %v9419_v8 = vmul.f32 %v9409_v3, %v9409_v3 }
 0x2ae   : > { %v2062_v6 = vmul.f32 %v1998_v55, %v9354_v35  ;;  %v1132_v38 = vadd.f32 %v9022_v44, %v8960_v61  ;;  %7614 = vrcp.f32 %v2830_v48  ;;  %v1996_v14 = vadd.f32 -0.00073499064, %v1932_v5 }
 0x2af   : > { %v2828_v27 = vadd.f32 -0.014264739, %v2764_v42  ;;  %v1295_v51 = vmul.f32 0.70710677, %v1121_v29  ;;  %v1553_v32 = vmul.f32 -2.7261424e-10, %v9419_v8  ;;  %v3117_v58 = vpack.c.bf16 %v9094_v13, %v9051_v10 }
 0x2b0   : > { %v2126_v33 = vadd.f32 -0.0029546, %v2062_v6  ;;  %v2385_v22 = vmul.f32 -1.45660715e-05, %v9419_v8  ;;  %v3021_v39 = vadd.f32 1.0, %v2940_v45  ;;  %v2060_v9 = vmul.f32 %v1996_v14, %v9367_v57 }
 0x2b1   : > { %v7613_v7 = vpop.eup %7612  ;;  %v9428_v40 = vmul.f32 0.5, %v1121_v29  ;;  %v9430_v23 = vclamps-f32 %v1295_v51, 4.0  ;;  %v1617_v31 = vadd.f32 2.7706815e-08, %v1553_v32  ;;  %v1124_v63 = vadd.f32 %v9022_v44, %v8982_v50  ;;  %7305 = vmatprep.mubr.bf16.mxu1 %v3117_v58 }
 0x2b2   : > { %v2190_v61 = vmul.f32 %v2126_v33, %v9354_v35  ;;  %v2449_v15 = vadd.f32 -0.00021337405, %v2385_v22  ;;  %v2936_v24 = vmul.f32 %v7613_v7, %v2315_v2  ;;  %v2124_v56 = vadd.f32 -0.0029546, %v2060_v9 }
 0x2b3   : > { %v9437_v10 = vmul.f32 %v9430_v23, %v9430_v23  ;;  %v1298_v13 = vmul.f32 0.70710677, %v1132_v38  ;;  %7616 = vrcp.f32 %v2828_v27  ;;  %v1681_v62 = vmul.f32 %v1617_v31, %v9419_v8 }
 0x2b4   : > { %v2254_v1 = vadd.f32 -0.016096033, %v2190_v61  ;;  %v2513_v34 = vmul.f32 %v2449_v15, %v9419_v8  ;;  %v2188_v35 = vmul.f32 %v2124_v56, %v9367_v57  ;;  %v9447_v29 = vmul.f32 %v3021_v39, %v9295_v4 }
 0x2b5   : > { %v1551_v54 = vmul.f32 -2.7261424e-10, %v9437_v10  ;;  %v2383_v50 = vmul.f32 -1.45660715e-05, %v9437_v10  ;;  %v9444_v44 = vclamps-f32 %v1298_v13, 4.0  ;;  %v9449_v45 = vmul.f32 0.5, %v1132_v38 }
 0x2b6   : > { %v1745_v55 = vadd.f32 -2.101024e-06, %v1681_v62  ;;  %v2577_v48 = vadd.f32 -0.001682827, %v2513_v34  ;;  %v3019_v5 = vadd.f32 1.0, %v2936_v24  ;;  %v2318_v57 = vmul.f32 %v9343_v41, %v2254_v1 }
 0x2b7   : > { %v1615_v42 = vadd.f32 2.7706815e-08, %v1551_v54  ;;  %v2447_v2 = vadd.f32 -0.00021337405, %v2383_v50  ;;  %v9453_v6 = vmul.f32 %v9444_v44, %v9444_v44  ;;  %v1296_v51 = vmul.f32 0.70710677, %v1124_v63 }
 0x2b8   : > { %v1809_v14 = vmul.f32 %v1745_v55, %v9419_v8  ;;  %v2641_v27 = vmul.f32 %v2577_v48, %v9419_v8  ;;  %v7615_v4 = vpop.eup %7614  ;;  %v2252_v33 = vadd.f32 -0.016096033, %v2188_v35  ;;  %v9460_v22 = vmul.f32 0.5, %v1124_v63 }
 0x2b9   : > { %v1679_v32 = vmul.f32 %v1615_v42, %v9437_v10  ;;  %v2511_v38 = vmul.f32 %v2447_v2, %v9437_v10  ;;  %v1554_v39 = vmul.f32 -2.7261424e-10, %v9453_v6  ;;  %v3118_v41 = vpack.c.bf16 %v9058_v46, %v9032_v17  ;;  %v9478_v46 = vld [vmem:[%s12402_s5] ss:$0 sm:$0xff] }
 0x2ba   : > { %v1873_v58 = vadd.f32 -5.6925062e-05, %v1809_v14  ;;  %v2705_v7 = vadd.f32 -0.0073733293, %v2641_v27  ;;  %v9466_v9 = vmul.f32 %v3019_v5, %v9340_v18  ;;  %v9468_v15 = vclamps-f32 %v1296_v51, 4.0 }
 0x2bb   : > { %v1743_v61 = vadd.f32 -2.101024e-06, %v1679_v32  ;;  %v2575_v31 = vadd.f32 -0.001682827, %v2511_v38  ;;  %v2942_v24 = vmul.f32 %v7615_v4, %v2318_v57  ;;  %v1618_v13 = vadd.f32 2.7706815e-08, %v1554_v39  ;;  %7306 = vmatmul.mubr.bf16.gmra.mrb[28].mxu1 %v3118_v41 }
 0x2bc   : > { %v1937_v56 = vmul.f32 %v1873_v58, %v9419_v8  ;;  %v2769_v63 = vmul.f32 %v2705_v7, %v9419_v8  ;;  %v2386_v17 = vmul.f32 -1.45660715e-05, %v9453_v6  ;;  %v9482_v18 = vadd.f32 %v9478_v46, %v9013_v20 }
 0x2bd   : > { %v1807_v1 = vmul.f32 %v1743_v61, %v9437_v10  ;;  %v2639_v62 = vmul.f32 %v2575_v31, %v9437_v10  ;;  %v7617_v34 = vpop.eup %7616  ;;  %v2316_v35 = vmul.f32 %v9356_v49, %v2252_v33  ;;  %v1682_v55 = vmul.f32 %v1618_v13, %v9453_v6 }
 0x2be   : > { %v2001_v54 = vadd.f32 -0.00073499064, %v1937_v56  ;;  %v2833_v50 = vadd.f32 -0.014264739, %v2769_v63  ;;  %v2450_v42 = vadd.f32 -0.00021337405, %v2386_v17  ;;  %v9488_v2 = vmul.f32 %v9468_v15, %v9468_v15 }
 0x2bf   : > { %v1871_v48 = vadd.f32 -5.6925062e-05, %v1807_v1  ;;  %v2703_v5 = vadd.f32 -0.0073733293, %v2639_v62  ;;  %v3022_v57 = vadd.f32 1.0, %v2942_v24  ;;  %v2938_v33 = vmul.f32 %v7617_v34, %v2316_v35 }
 0x2c0   : > { %v2065_v14 = vmul.f32 %v2001_v54, %v9419_v8  ;;  %7618 = vrcp.f32 %v2833_v50  ;;  %v1746_v20 = vadd.f32 -2.101024e-06, %v1682_v55  ;;  %v2514_v51 = vmul.f32 %v2450_v42, %v9453_v6 }
 0x2c1   : > { %v1935_v27 = vmul.f32 %v1871_v48, %v9437_v10  ;;  %v2767_v49 = vmul.f32 %v2703_v5, %v9437_v10  ;;  %v1552_v4 = vmul.f32 -2.7261424e-10, %v9488_v2  ;;  %v2384_v58 = vmul.f32 -1.45660715e-05, %v9488_v2 }
 0x2c2   : > { %v2129_v32 = vadd.f32 -0.0029546, %v2065_v14  ;;  %v1810_v38 = vmul.f32 %v1746_v20, %v9453_v6  ;;  %v2578_v41 = vadd.f32 -0.001682827, %v2514_v51  ;;  %v1137_v61 = vadd.f32 %v9478_v46, %v9046_v52 }
 0x2c3   : > { %v1999_v7 = vadd.f32 -0.00073499064, %v1935_v27  ;;  %v2831_v39 = vadd.f32 -0.014264739, %v2767_v49  ;;  %v1616_v56 = vadd.f32 2.7706815e-08, %v1552_v4  ;;  %v9509_v48 = vmul.f32 %v3022_v57, %v9348_v26 }
 0x2c4   : > { %v2193_v31 = vmul.f32 %v2129_v32, %v9419_v8  ;;  %v1874_v24 = vadd.f32 -5.6925062e-05, %v1810_v38  ;;  %v2448_v63 = vadd.f32 -0.00021337405, %v2384_v58  ;;  %v2642_v1 = vmul.f32 %v2578_v41, %v9453_v6 }
 0x2c5   : > { %v2063_v13 = vmul.f32 %v1999_v7, %v9437_v10  ;;  %7620 = vrcp.f32 %v2831_v39  ;;  %v1301_v62 = vmul.f32 0.70710677, %v9482_v18  ;;  %v1680_v35 = vmul.f32 %v1616_v56, %v9488_v2 }
 0x2c6   : > { %v2257_v17 = vadd.f32 -0.016096033, %v2193_v31  ;;  %v1938_v34 = vmul.f32 %v1874_v24, %v9453_v6  ;;  %v2512_v54 = vmul.f32 %v2448_v63, %v9488_v2  ;;  %v3020_v52 = vadd.f32 1.0, %v2938_v33  ;;  %v12454_v31 = vld [vmem:[#allocation10_spill] sm:$0xff] }
 0x2c7   : > { %v2127_v50 = vadd.f32 -0.0029546, %v2063_v13  ;;  %v2706_v8 = vadd.f32 -0.0073733293, %v2642_v1  ;;  %v9506_v55 = vclamps-f32 %v1301_v62, 4.0  ;;  %v1148_v24 = vadd.f32 %v9478_v46, %v12454_v31 }
 0x2c8   : > { %v2002_v5 = vadd.f32 -0.00073499064, %v1938_v34  ;;  %v1744_v42 = vadd.f32 -2.101024e-06, %v1680_v35  ;;  %v2576_v14 = vadd.f32 -0.001682827, %v2512_v54  ;;  %v2321_v20 = vmul.f32 %v9409_v3, %v2257_v17 }
 0x2c9   : > { %v2191_v27 = vmul.f32 %v2127_v50, %v9437_v10  ;;  %v2770_v49 = vmul.f32 %v2706_v8, %v9453_v6  ;;  %v9516_v51 = vmul.f32 %v9506_v55, %v9506_v55  ;;  %v1299_v57 = vmul.f32 0.70710677, %v1137_v61 }
 0x2ca   : > { %v7619_v4 = vpop.eup %7618  ;;  %v2066_v33 = vmul.f32 %v2002_v5, %v9453_v6  ;;  %v1808_v32 = vmul.f32 %v1744_v42, %v9488_v2  ;;  %v2640_v26 = vmul.f32 %v2576_v14, %v9488_v2  ;;  %v9522_v38 = vmul.f32 %v3020_v52, %v9370_v28 }
 0x2cb   : > { %v2255_v3 = vadd.f32 -0.016096033, %v2191_v27  ;;  %v2834_v58 = vadd.f32 -0.014264739, %v2770_v49  ;;  %v1557_v10 = vmul.f32 -2.7261424e-10, %v9516_v51  ;;  %v2948_v56 = vmul.f32 %v7619_v4, %v2321_v20 }
 0x2cc   : > { %v2130_v7 = vadd.f32 -0.0029546, %v2066_v33  ;;  %v1872_v39 = vadd.f32 -5.6925062e-05, %v1808_v32  ;;  %v2704_v41 = vadd.f32 -0.0073733293, %v2640_v26 }
 0x2cd   : > { %v2319_v63 = vmul.f32 %v9430_v23, %v2255_v3  ;;  %7622 = vrcp.f32 %v2834_v58  ;;  %v1621_v13 = vadd.f32 2.7706815e-08, %v1557_v10  ;;  %v2389_v17 = vmul.f32 -1.45660715e-05, %v9516_v51 }
 0x2ce   : > { %v2194_v1 = vmul.f32 %v2130_v7, %v9453_v6  ;;  %v1936_v28 = vmul.f32 %v1872_v39, %v9488_v2  ;;  %v2768_v62 = vmul.f32 %v2704_v41, %v9488_v2  ;;  %v9533_v35 = vmul.f32 0.5, %v9482_v18  ;;  %v12455_v6 = vld [vmem:[#allocation12_spill] sm:$0xff] }
 0x2cf   : > { %v7621_v34 = vpop.eup %7620  ;;  %v1685_v54 = vmul.f32 %v1621_v13, %v9516_v51  ;;  %v9536_v52 = vmul.f32 0.5, %v1137_v61  ;;  %v9538_v50 = vclamps-f32 %v1299_v57, 4.0  ;;  %v1140_v42 = vadd.f32 %v9478_v46, %v12455_v6 }
 0x2d0   : > { %v2258_v23 = vadd.f32 -0.016096033, %v2194_v1  ;;  %v2000_v8 = vadd.f32 -0.00073499064, %v1936_v28  ;;  %v2832_v5 = vadd.f32 -0.014264739, %v2768_v62  ;;  %v2944_v4 = vmul.f32 %v7621_v34, %v2319_v63 }
 0x2d1   : > { %v1749_v14 = vadd.f32 -2.101024e-06, %v1685_v54  ;;  %v2453_v20 = vadd.f32 -0.00021337405, %v2389_v17  ;;  %v9544_v27 = vmul.f32 %v9538_v50, %v9538_v50  ;;  %v1302_v18 = vmul.f32 0.70710677, %v1148_v24 }
 0x2d2   : > { %v3025_v49 = vadd.f32 1.0, %v2948_v56  ;;  %v2064_v61 = vmul.f32 %v2000_v8, %v9488_v2  ;;  %7624 = vrcp.f32 %v2832_v5  ;;  %v2322_v3 = vmul.f32 %v9444_v44, %v2258_v23  ;;  %v12456_v56 = vld [vmem:[#allocation15_spill] sm:$0xff] }
 0x2d3   : > { %v1813_v33 = vmul.f32 %v1749_v14, %v9516_v51  ;;  %v2517_v32 = vmul.f32 %v2453_v20, %v9516_v51  ;;  %v1555_v26 = vmul.f32 -2.7261424e-10, %v9544_v27  ;;  %v2387_v57 = vmul.f32 -1.45660715e-05, %v9544_v27  ;;  %v12457_v20 = vld [vmem:[#allocation11_spill] sm:$0xff] }
 0x2d4   : > { %v2128_v58 = vadd.f32 -0.0029546, %v2064_v61  ;;  %v9552_v10 = vmul.f32 0.5, %v1148_v24  ;;  %v9554_v7 = vclamps-f32 %v1302_v18, 4.0  ;;  %v3119_v63 = vpack.c.bf16 %v9209_v59, %v12456_v56 }
 0x2d5   : > { %v1877_v39 = vadd.f32 -5.6925062e-05, %v1813_v33  ;;  %v2581_v41 = vadd.f32 -0.001682827, %v2517_v32  ;;  %v1619_v31 = vadd.f32 2.7706815e-08, %v1555_v26  ;;  %v3120_v18 = vpack.c.bf16 %v9196_v53, %v12457_v20 }
 0x2d6   : > { %v3023_v13 = vadd.f32 1.0, %v2944_v4  ;;  %v2192_v1 = vmul.f32 %v2128_v58, %v9488_v2  ;;  %v2451_v28 = vadd.f32 -0.00021337405, %v2387_v57  ;;  %v9561_v62 = vmul.f32 %v9554_v7, %v9554_v7  ;;  %7309 = vmatprep.mubr.bf16.mxu1 %v3119_v63 }
 0x2d7   : > { %v7623_v44 = vpop.eup %7622  ;;  %v1941_v24 = vmul.f32 %v1877_v39, %v9516_v51  ;;  %v2645_v17 = vmul.f32 %v2581_v41, %v9516_v51  ;;  %v1683_v34 = vmul.f32 %v1619_v31, %v9544_v27  ;;  %v1300_v54 = vmul.f32 0.70710677, %v1140_v42  ;;  %7310 = vmatmul.mubr.bf16.gmra.mrb[32].mxu1 %v3120_v18 }
 0x2d8   : > { %v2950_v23 = vmul.f32 %v7623_v44, %v2322_v3  ;;  %v2256_v8 = vadd.f32 -0.016096033, %v2192_v1  ;;  %v2515_v59 = vmul.f32 %v2451_v28, %v9544_v27  ;;  %v1558_v2 = vmul.f32 -2.7261424e-10, %v9561_v62 }
 0x2d9   : > { %v2005_v5 = vadd.f32 -0.00073499064, %v1941_v24  ;;  %v2709_v6 = vadd.f32 -0.0073733293, %v2645_v17  ;;  %v1747_v14 = vadd.f32 -2.101024e-06, %v1683_v34 }
 0x2da   : > { %v2320_v4 = vmul.f32 %v9468_v15, %v2256_v8  ;;  %v2579_v61 = vadd.f32 -0.001682827, %v2515_v59  ;;  %v1622_v33 = vadd.f32 2.7706815e-08, %v1558_v2  ;;  %v9571_v32 = vmul.f32 0.5, %v1140_v42 }
 0x2db   : > { %v2069_v26 = vmul.f32 %v2005_v5, %v9516_v51  ;;  %v2773_v57 = vmul.f32 %v2709_v6, %v9516_v51  ;;  %v1811_v3 = vmul.f32 %v1747_v14, %v9544_v27  ;;  %v2390_v58 = vmul.f32 -1.45660715e-05, %v9561_v62  ;;  %v12458_v14 = vld [vmem:[#allocation13_spill] sm:$0xff] }
 0x2dc   : > { %v7625_v39 = vpop.eup %7624  ;;  %v3026_v41 = vadd.f32 1.0, %v2950_v23  ;;  %v2643_v31 = vmul.f32 %v2579_v61, %v9544_v27  ;;  %v1686_v53 = vmul.f32 %v1622_v33, %v9561_v62  ;;  %v9579_v15 = vclamps-f32 %v1300_v54, 4.0 }
 0x2dd   : > { %v9582_v42 = vmul.f32 %v3025_v49, %v9413_v11  ;;  %v2133_v56 = vadd.f32 -0.0029546, %v2069_v26  ;;  %v2837_v63 = vadd.f32 -0.014264739, %v2773_v57  ;;  %v1875_v1 = vadd.f32 -5.6925062e-05, %v1811_v3 }
 0x2de   : > { %v2707_v28 = vadd.f32 -0.0073733293, %v2643_v31  ;;  %v1750_v44 = vadd.f32 -2.101024e-06, %v1686_v53  ;;  %v2454_v24 = vadd.f32 -0.00021337405, %v2390_v58  ;;  %v9586_v17 = vmul.f32 %v9579_v15, %v9579_v15 }
 0x2df   : > { %v2946_v34 = vmul.f32 %v7625_v39, %v2320_v4  ;;  %v2197_v23 = vmul.f32 %v2133_v56, %v9516_v51  ;;  %7626 = vrcp.f32 %v2837_v63  ;;  %v1939_v54 = vmul.f32 %v1875_v1, %v9544_v27  ;;  %v12459_v53 = vld [vmem:[#allocation14_spill] sm:$0xff] }
 0x2e0   : > { %v2771_v8 = vmul.f32 %v2707_v28, %v9544_v27  ;;  %v1814_v11 = vmul.f32 %v1750_v44, %v9561_v62  ;;  %v2518_v49 = vmul.f32 %v2454_v24, %v9561_v62  ;;  %v1556_v59 = vmul.f32 -2.7261424e-10, %v9586_v17 }
 0x2e1   : > { %v2261_v2 = vadd.f32 -0.016096033, %v2197_v23  ;;  %v2003_v5 = vadd.f32 -0.00073499064, %v1939_v54  ;;  %v2388_v6 = vmul.f32 -1.45660715e-05, %v9586_v17  ;;  %v1161_v20 = vadd.f32 %v9478_v46, %v12458_v14 }
 0x2e2   : > { %v9598_v51 = vmul.f32 %v3023_v13, %v9428_v40  ;;  %v2835_v18 = vadd.f32 -0.014264739, %v2771_v8  ;;  %v1878_v4 = vadd.f32 -5.6925062e-05, %v1814_v11  ;;  %v2582_v61 = vadd.f32 -0.001682827, %v2518_v49 }
 0x2e3   : > { %v3024_v33 = vadd.f32 1.0, %v2946_v34  ;;  %v2067_v26 = vmul.f32 %v2003_v5, %v9544_v27  ;;  %v1620_v57 = vadd.f32 2.7706815e-08, %v1556_v59  ;;  %v2452_v3 = vadd.f32 -0.00021337405, %v2388_v6  ;;  %v9601_v58 = vpop.f32.mrb[0].mxu1 }
 0x2e4   : > { %7628 = vrcp.f32 %v2835_v18  ;;  %v1942_v39 = vmul.f32 %v1878_v4, %v9561_v62  ;;  %v2646_v31 = vmul.f32 %v2582_v61, %v9561_v62  ;;  %v1153_v56 = vadd.f32 %v9478_v46, %v12459_v53  ;;  %v9607_v40 = vpop.f32.mrb[1].mxu1 }
 0x2e5   : > { %v2131_v13 = vadd.f32 -0.0029546, %v2067_v26  ;;  %v1684_v63 = vmul.f32 %v1620_v57, %v9586_v17  ;;  %v2516_v1 = vmul.f32 %v2452_v3, %v9586_v17  ;;  %v1305_v28 = vmul.f32 0.70710677, %v1161_v20  ;;  %v9611_v44 = vpop.f32.mrb[2].mxu1  ;;  %v12460_v57 = vld [vmem:[#allocation16_spill] sm:$0xff] }
 0x2e6   : > { %v9614_v24 = vmul.f32 %v3026_v41, %v9449_v45  ;;  %v2325_v34 = vmul.f32 %v9506_v55, %v2261_v2  ;;  %v2006_v23 = vadd.f32 -0.00073499064, %v1942_v39  ;;  %v2710_v54 = vadd.f32 -0.0073733293, %v2646_v31  ;;  %v9617_v8 = vpop.f32.mrb[3].mxu1 }
 0x2e7   : > { %v2195_v11 = vmul.f32 %v2131_v13, %v9544_v27  ;;  %v1748_v49 = vadd.f32 -2.101024e-06, %v1684_v63  ;;  %v2580_v59 = vadd.f32 -0.001682827, %v2516_v1  ;;  %v9620_v5 = vclamps-f32 %v1305_v28, 4.0 }
 0x2e8   : > { %v9623_v6 = vmul.f32 %v3024_v33, %v9460_v22  ;;  %v2070_v14 = vmul.f32 %v2006_v23, %v9561_v62  ;;  %v2774_v45 = vmul.f32 %v2710_v54, %v9561_v62  ;;  %v1303_v41 = vmul.f32 0.70710677, %v1153_v56 }
 0x2e9   : > { %v7627_v18 = vpop.eup %7626  ;;  %v2259_v55 = vadd.f32 -0.016096033, %v2195_v11  ;;  %v1812_v2 = vmul.f32 %v1748_v49, %v9586_v17  ;;  %v2644_v4 = vmul.f32 %v2580_v59, %v9586_v17  ;;  %v9631_v27 = vmul.f32 %v9620_v5, %v9620_v5 }
 0x2ea   : > { %v9633_v61 = vpop.f32.mrb[4].mxu1  ;;  %v2134_v26 = vadd.f32 -0.0029546, %v2070_v14  ;;  %v2838_v22 = vadd.f32 -0.014264739, %v2774_v45  ;;  %v9635_v33 = vclamps-f32 %v1303_v41, 4.0  ;;  %v1164_v3 = vadd.f32 %v9478_v46, %v12460_v57 }
 0x2eb   : > { %v9639_v39 = vpop.f32.mrb[5].mxu1  ;;  %v2956_v31 = vmul.f32 %v7627_v18, %v2325_v34  ;;  %v1876_v53 = vadd.f32 -5.6925062e-05, %v1812_v2  ;;  %v2708_v13 = vadd.f32 -0.0073733293, %v2644_v4  ;;  %v2323_v1 = vmul.f32 %v9538_v50, %v2259_v55 }
 0x2ec   : > { %v1561_v63 = vmul.f32 -2.7261424e-10, %v9631_v27  ;;  %v2198_v28 = vmul.f32 %v2134_v26, %v9561_v62  ;;  %7630 = vrcp.f32 %v2838_v22  ;;  %v2393_v23 = vmul.f32 -1.45660715e-05, %v9631_v27  ;;  %v9651_v34 = vpop.f32.mrb[6].mxu1 }
 0x2ed   : > { %v1940_v54 = vmul.f32 %v1876_v53, %v9586_v17  ;;  %v2772_v11 = vmul.f32 %v2708_v13, %v9586_v17  ;;  %v9649_v59 = vmul.f32 %v9635_v33, %v9635_v33  ;;  %12461 = vst [vmem:[#allocation18_spill] sm:$0xff] %v9651_v34  ;;  %v9653_v41 = vmul.f32 0.5, %v1161_v20 }
 0x2ee   : > { %v1625_v49 = vadd.f32 2.7706815e-08, %v1561_v63  ;;  %v7629_v14 = vpop.eup %7628  ;;  %v2262_v45 = vadd.f32 -0.016096033, %v2198_v28  ;;  %v2457_v50 = vadd.f32 -0.00021337405, %v2393_v23 }
 0x2ef   : > { %v9655_v62 = vmul.f32 0.5, %v1153_v56  ;;  %v2004_v18 = vadd.f32 -0.00073499064, %v1940_v54  ;;  %v2836_v55 = vadd.f32 -0.014264739, %v2772_v11  ;;  %v2952_v26 = vmul.f32 %v7629_v14, %v2323_v1 }
 0x2f0   : > { %v1689_v2 = vmul.f32 %v1625_v49, %v9631_v27  ;;  %v1306_v4 = vmul.f32 0.70710677, %v1164_v3  ;;  %v2521_v22 = vmul.f32 %v2457_v50, %v9631_v27  ;;  %v1559_v57 = vmul.f32 -2.7261424e-10, %v9649_v59 }
 0x2f1   : > { %v2391_v53 = vmul.f32 -1.45660715e-05, %v9649_v59  ;;  %v3029_v13 = vadd.f32 1.0, %v2956_v31  ;;  %v2068_v63 = vmul.f32 %v2004_v18, %v9586_v17  ;;  %v9662_v28 = vmul.f32 0.5, %v1164_v3 }
 0x2f2   : > { %v1753_v20 = vadd.f32 -2.101024e-06, %v1689_v2  ;;  %v2326_v56 = vmul.f32 %v9554_v7, %v2262_v45  ;;  %v2585_v23 = vadd.f32 -0.001682827, %v2521_v22  ;;  %v1623_v54 = vadd.f32 2.7706815e-08, %v1559_v57 }
 0x2f3   : > { %v2455_v11 = vadd.f32 -0.00021337405, %v2391_v53  ;;  %v2132_v49 = vadd.f32 -0.0029546, %v2068_v63  ;;  %7632 = vrcp.f32 %v2836_v55  ;;  %v9666_v14 = vclamps-f32 %v1306_v4, 4.0 }
 0x2f4   : > { %v1817_v1 = vmul.f32 %v1753_v20, %v9631_v27  ;;  %v3027_v50 = vadd.f32 1.0, %v2952_v26  ;;  %v2649_v34 = vmul.f32 %v2585_v23, %v9631_v27  ;;  %v1687_v31 = vmul.f32 %v1623_v54, %v9649_v59  ;;  %v9685_v23 = vpop.f32.mrb[7].mxu1 }
 0x2f5   : > { %v2519_v18 = vmul.f32 %v2455_v11, %v9649_v59  ;;  %v2196_v3 = vmul.f32 %v2132_v49, %v9586_v17  ;;  %v9674_v7 = vmul.f32 %v9666_v14, %v9666_v14  ;;  %v1156_v45 = vadd.f32 %v9478_v46, %v9203_v12 }
 0x2f6   : > { %v1881_v2 = vadd.f32 -5.6925062e-05, %v1817_v1  ;;  %v7631_v55 = vpop.eup %7630  ;;  %v2713_v4 = vadd.f32 -0.0073733293, %v2649_v34  ;;  %v1751_v22 = vadd.f32 -2.101024e-06, %v1687_v31  ;;  %v3121_v57 = vpack.c.bf16 %v9305_v25, %v9240_v0 }
 0x2f7   : > { %v2583_v26 = vadd.f32 -0.001682827, %v2519_v18  ;;  %v9681_v53 = vmul.f32 %v3029_v13, %v9533_v35  ;;  %v2260_v63 = vadd.f32 -0.016096033, %v2196_v3  ;;  %v1562_v20 = vmul.f32 -2.7261424e-10, %v9674_v7 }
 0x2f8   : > { %v1945_v17 = vmul.f32 %v1881_v2, %v9631_v27  ;;  %v2777_v54 = vmul.f32 %v2713_v4, %v9631_v27  ;;  %v1815_v12 = vmul.f32 %v1751_v22, %v9649_v59  ;;  %v2394_v11 = vmul.f32 -1.45660715e-05, %v9674_v7  ;;  %7313 = vmatprep.mubr.bf16.mxu1 %v3121_v57 }
 0x2f9   : > { %v2647_v34 = vmul.f32 %v2583_v26, %v9649_v59  ;;  %v9692_v0 = vmul.f32 %v3027_v50, %v9536_v52  ;;  %v1626_v35 = vadd.f32 2.7706815e-08, %v1562_v20  ;;  %v1304_v13 = vmul.f32 0.70710677, %v1156_v45 }
 0x2fa   : > { %v2009_v25 = vadd.f32 -0.00073499064, %v1945_v17  ;;  %v2958_v49 = vmul.f32 %v7631_v55, %v2326_v56  ;;  %v2841_v1 = vadd.f32 -0.014264739, %v2777_v54  ;;  %v1879_v31 = vadd.f32 -5.6925062e-05, %v1815_v12 }
 0x2fb   : > { %v2711_v18 = vadd.f32 -0.0073733293, %v2647_v34  ;;  %v2324_v3 = vmul.f32 %v9579_v15, %v2260_v63  ;;  %v1690_v4 = vmul.f32 %v1626_v35, %v9674_v7  ;;  %v2458_v22 = vadd.f32 -0.00021337405, %v2394_v11 }
 0x2fc   : > { %v2073_v2 = vmul.f32 %v2009_v25, %v9631_v27  ;;  %7634 = vrcp.f32 %v2841_v1  ;;  %v1943_v26 = vmul.f32 %v1879_v31, %v9649_v59  ;;  %v1177_v50 = vadd.f32 %v9478_v46, %v9252_v60 }
 0x2fd   : > { %v2775_v52 = vmul.f32 %v2711_v18, %v9649_v59  ;;  %v7633_v57 = vpop.eup %7632  ;;  %v1754_v55 = vadd.f32 -2.101024e-06, %v1690_v4  ;;  %v2522_v17 = vmul.f32 %v2458_v22, %v9674_v7  ;;  %v9702_v20 = vclamps-f32 %v1304_v13, 4.0 }
 0x2fe   : > { %v2137_v56 = vadd.f32 -0.0029546, %v2073_v2  ;;  %v3030_v15 = vadd.f32 1.0, %v2958_v49  ;;  %v2007_v63 = vadd.f32 -0.00073499064, %v1943_v26  ;;  %v9704_v12 = vmul.f32 0.5, %v1156_v45 }
 0x2ff   : > { %v2839_v54 = vadd.f32 -0.014264739, %v2775_v52  ;;  %v1818_v11 = vmul.f32 %v1754_v55, %v9674_v7  ;;  %v2586_v25 = vadd.f32 -0.001682827, %v2522_v17  ;;  %v9710_v60 = vmul.f32 %v9702_v20, %v9702_v20 }
 0x300   : > { %v2201_v34 = vmul.f32 %v2137_v56, %v9631_v27  ;;  %v2954_v35 = vmul.f32 %v7633_v57, %v2324_v3  ;;  %v2071_v1 = vmul.f32 %v2007_v63, %v9649_v59  ;;  %v1309_v13 = vmul.f32 0.70710677, %v1177_v50 }
 0x301   : > { %7636 = vrcp.f32 %v2839_v54  ;;  %v1882_v49 = vadd.f32 -5.6925062e-05, %v1818_v11  ;;  %v2650_v18 = vmul.f32 %v2586_v25, %v9674_v7  ;;  %v1560_v45 = vmul.f32 -2.7261424e-10, %v9710_v60 }
 0x302   : > { %v2265_v31 = vadd.f32 -0.016096033, %v2201_v34  ;;  %v2135_v2 = vadd.f32 -0.0029546, %v2071_v1  ;;  %v2392_v27 = vmul.f32 -1.45660715e-05, %v9710_v60  ;;  %v3122_v22 = vpack.c.bf16 %v9276_v19, %v9226_v21 }
 0x303   : > { %v9716_v4 = vclamps-f32 %v1309_v13, 4.0  ;;  %v9720_v26 = vpop.f32.mrb[8].mxu1  ;;  %v1946_v52 = vmul.f32 %v1882_v49, %v9674_v7  ;;  %v2714_v57 = vadd.f32 -0.0073733293, %v2650_v18  ;;  %v1624_v56 = vadd.f32 2.7706815e-08, %v1560_v45 }
 0x304   : > { %v2329_v3 = vmul.f32 %v9620_v5, %v2265_v31  ;;  %v9725_v55 = vmul.f32 %v3030_v15, %v9552_v10  ;;  %v2199_v17 = vmul.f32 %v2135_v2, %v9649_v59  ;;  %v2456_v63 = vadd.f32 -0.00021337405, %v2392_v27  ;;  %7314 = vmatmul.mubr.bf16.gmra.mrb[36].mxu1 %v3122_v22  ;;  %v9741_v18 = vpop.f32.mrb[9].mxu1 }
 0x305   : > { %v9730_v54 = vmul.f32 %v9716_v4, %v9716_v4  ;;  %v3028_v21 = vadd.f32 1.0, %v2954_v35  ;;  %v2010_v19 = vadd.f32 -0.00073499064, %v1946_v52  ;;  %v2778_v34 = vmul.f32 %v2714_v57, %v9674_v7  ;;  %v7514_v35 = vld [vmem:[%s12405_s8] sm:$0xff]  }
 0x306   : > { %v1688_v5 = vmul.f32 %v1624_v56, %v9710_v60  ;;  %v7635_v11 = vpop.eup %7634  ;;  %v2263_v25 = vadd.f32 -0.016096033, %v2199_v17  ;;  %v2520_v1 = vmul.f32 %v2456_v63, %v9710_v60  ;;  %v9745_v22 = vadd.f32 %v9478_v46, %v9286_v47  ;;  %7341 = vmatprep.subr.bf16.mxu0 %v7514_v35 }
 0x307   : > { %v1565_v10 = vmul.f32 -2.7261424e-10, %v9730_v54  ;;  %v2397_v59 = vmul.f32 -1.45660715e-05, %v9730_v54  ;;  %v2964_v15 = vmul.f32 %v7635_v11, %v2329_v3  ;;  %v2074_v13 = vmul.f32 %v2010_v19, %v9674_v7  ;;  %7342 = vmatpush3.bf16.msra.mxu0 %v7514_v35  ;;  %v9764_v35 = vpop.f32.mrb[10].mxu1 }
 0x308   : > { %v2842_v31 = vadd.f32 -0.014264739, %v2778_v34  ;;  %v1752_v49 = vadd.f32 -2.101024e-06, %v1688_v5  ;;  %v2584_v45 = vadd.f32 -0.001682827, %v2520_v1  ;;  %v2327_v52 = vmul.f32 %v9635_v33, %v2263_v25 }
 0x309   : > { %v1629_v2 = vadd.f32 2.7706815e-08, %v1565_v10  ;;  %v2461_v27 = vadd.f32 -0.00021337405, %v2397_v59  ;;  %v2138_v3 = vadd.f32 -0.0029546, %v2074_v13  ;;  %v9755_v47 = vmul.f32 %v3028_v21, %v9571_v32 }
 0x30a   : > { %7638 = vrcp.f32 %v2842_v31  ;;  %v1816_v57 = vmul.f32 %v1752_v49, %v9710_v60  ;;  %v2648_v17 = vmul.f32 %v2584_v45, %v9710_v60  ;;  %v9750_v63 = vmul.f32 0.5, %v1177_v50 }
 0x30b   : > { %v7637_v56 = vpop.eup %7636  ;;  %v1693_v19 = vmul.f32 %v1629_v2, %v9730_v54  ;;  %v2525_v34 = vmul.f32 %v2461_v27, %v9730_v54  ;;  %v3033_v5 = vadd.f32 1.0, %v2964_v15  ;;  %v2202_v33 = vmul.f32 %v2138_v3, %v9674_v7  ;;  %v12462_v15 = vld [vmem:[#allocation17_spill] sm:$0xff] }
 0x30c   : > { %v1880_v11 = vadd.f32 -5.6925062e-05, %v1816_v57  ;;  %v2712_v25 = vadd.f32 -0.0073733293, %v2648_v17  ;;  %v9760_v59 = vadd.f32 %v9478_v46, %v9297_v30  ;;  %v2960_v50 = vmul.f32 %v7637_v56, %v2327_v52 }
 0x30d   : > { %v1757_v1 = vadd.f32 -2.101024e-06, %v1693_v19  ;;  %v2589_v10 = vadd.f32 -0.001682827, %v2525_v34  ;;  %v2266_v13 = vadd.f32 -0.016096033, %v2202_v33  ;;  %v9771_v45 = vadd.f32 %v9478_v46, %v12462_v15 }
 0x30e   : > { %v1944_v31 = vmul.f32 %v1880_v11, %v9710_v60  ;;  %v1307_v49 = vmul.f32 0.70710677, %v9745_v22  ;;  %v2776_v32 = vmul.f32 %v2712_v25, %v9710_v60  ;;  %v9774_v30 = vmul.f32 %v3033_v5, %v9653_v41  ;;  %v9799_v15 = vpop.f32.mrb[11].mxu1 }
 0x30f   : > { %v1821_v7 = vmul.f32 %v1757_v1, %v9730_v54  ;;  %v2653_v21 = vmul.f32 %v2589_v10, %v9730_v54  ;;  %v2330_v2 = vmul.f32 %v9666_v14, %v2266_v13  ;;  %v3123_v17 = vpack.c.bf16 %v9407_v37, %v9397_v16 }
 0x310   : > { %v2008_v27 = vadd.f32 -0.00073499064, %v1944_v31  ;;  %v9777_v52 = vclamps-f32 %v1307_v49, 4.0  ;;  %v2840_v3 = vadd.f32 -0.014264739, %v2776_v32  ;;  %v3031_v19 = vadd.f32 1.0, %v2960_v50 }
 0x311   : > { %v1885_v57 = vadd.f32 -5.6925062e-05, %v1821_v7  ;;  %v2717_v56 = vadd.f32 -0.0073733293, %v2653_v21  ;;  %v1310_v41 = vmul.f32 0.70710677, %v9760_v59  ;;  %7317 = vmatprep.mubr.bf16.mxu1 %v3123_v17  ;;  %v3124_v1 = vpack.c.bf16 %v9400_v36, %v9380_v43 }
 0x312   : > { %v2072_v34 = vmul.f32 %v2008_v27, %v9710_v60  ;;  %v9784_v46 = vmul.f32 %v9777_v52, %v9777_v52  ;;  %7640 = vrcp.f32 %v2840_v3  ;;  %v1308_v33 = vmul.f32 0.70710677, %v9771_v45 }
 0x313   : > { %v1949_v14 = vmul.f32 %v1885_v57, %v9730_v54  ;;  %v2781_v5 = vmul.f32 %v2717_v56, %v9730_v54  ;;  %v9794_v31 = vclamps-f32 %v1310_v41, 4.0  ;;  %7318 = vmatmul.mubr.bf16.gmra.mrb[40].mxu1 %v3124_v1  ;;  %v9813_v56 = vmul.f32 %v3031_v19, %v9655_v62 }
 0x314   : > { %v7639_v11 = vpop.eup %7638  ;;  %v2136_v25 = vadd.f32 -0.0029546, %v2072_v34  ;;  %v1563_v16 = vmul.f32 -2.7261424e-10, %v9784_v46  ;;  %v2395_v37 = vmul.f32 -1.45660715e-05, %v9784_v46 }
 0x315   : > { %v2966_v10 = vmul.f32 %v7639_v11, %v2330_v2  ;;  %v2013_v50 = vadd.f32 -0.00073499064, %v1949_v14  ;;  %v2845_v13 = vadd.f32 -0.014264739, %v2781_v5  ;;  %v9797_v21 = vclamps-f32 %v1308_v33, 4.0 }
 0x316   : > { %v2200_v49 = vmul.f32 %v2136_v25, %v9710_v60  ;;  %v1627_v32 = vadd.f32 2.7706815e-08, %v1563_v16  ;;  %v2459_v7 = vadd.f32 -0.00021337405, %v2395_v37  ;;  %v9804_v43 = vmul.f32 %v9794_v31, %v9794_v31 }
 0x317   : > { %v3034_v27 = vadd.f32 1.0, %v2966_v10  ;;  %v2077_v3 = vmul.f32 %v2013_v50, %v9730_v54  ;;  %7642 = vrcp.f32 %v2845_v13  ;;  %v9810_v57 = vmul.f32 %v9797_v21, %v9797_v21 }
 0x318   : > { %v2264_v36 = vadd.f32 -0.016096033, %v2200_v49  ;;  %v1691_v2 = vmul.f32 %v1627_v32, %v9784_v46  ;;  %v2523_v60 = vmul.f32 %v2459_v7, %v9784_v46  ;;  %v1566_v34 = vmul.f32 -2.7261424e-10, %v9804_v43 }
 0x319   : > { %v2141_v17 = vadd.f32 -0.0029546, %v2077_v3  ;;  %v2398_v41 = vmul.f32 -1.45660715e-05, %v9804_v43  ;;  %v1564_v11 = vmul.f32 -2.7261424e-10, %v9810_v57  ;;  %v3125_v50 = vpack.c.bf16 %v9522_v38, %v9466_v9 }
 0x31a   : > { %v2328_v14 = vmul.f32 %v9702_v20, %v2264_v36  ;;  %v1755_v5 = vadd.f32 -2.101024e-06, %v1691_v2  ;;  %v2587_v33 = vadd.f32 -0.001682827, %v2523_v60  ;;  %v1630_v16 = vadd.f32 2.7706815e-08, %v1566_v34 }
 0x31b   : > { %v2205_v25 = vmul.f32 %v2141_v17, %v9730_v54  ;;  %v2462_v37 = vadd.f32 -0.00021337405, %v2398_v41  ;;  %v2396_v1 = vmul.f32 -1.45660715e-05, %v9810_v57  ;;  %v1628_v10 = vadd.f32 2.7706815e-08, %v1564_v11  ;;  %7321 = vmatprep.mubr.bf16.mxu1 %v3125_v50 }
 0x31c   : > { %v1819_v62 = vmul.f32 %v1755_v5, %v9784_v46  ;;  %v2651_v19 = vmul.f32 %v2587_v33, %v9784_v46  ;;  %v7515_v20 = vld [vmem:[%s12405_s8 + $0x8] sm:$0xff]   ;;  %v7641_v13 = vpop.eup %7640  ;;  %v1694_v54 = vmul.f32 %v1630_v16, %v9804_v43  ;;  %v9830_v3 = vpop.f32.mrb[12].mxu1 }
 0x31d   : > { %v2269_v49 = vadd.f32 -0.016096033, %v2205_v25  ;;  %v2526_v32 = vmul.f32 %v2462_v37, %v9804_v43  ;;  %v2460_v7 = vadd.f32 -0.00021337405, %v2396_v1  ;;  %v2962_v36 = vmul.f32 %v7641_v13, %v2328_v14  ;;  %7343 = vmatprep.subr.bf16.mxu0 %v7515_v20 }
 0x31e   : > { %v1883_v2 = vadd.f32 -5.6925062e-05, %v1819_v62  ;;  %v2715_v60 = vadd.f32 -0.0073733293, %v2651_v19  ;;  %v1692_v17 = vmul.f32 %v1628_v10, %v9810_v57  ;;  %v1758_v38 = vadd.f32 -2.101024e-06, %v1694_v54  ;;  %7344 = vmatpush3.bf16.msra.mxu0 %v7515_v20 }
 0x31f   : > { %v2333_v9 = vmul.f32 %v9716_v4, %v2269_v49  ;;  %v2590_v34 = vadd.f32 -0.001682827, %v2526_v32  ;;  %v2524_v41 = vmul.f32 %v2460_v7, %v9810_v57  ;;  %v3032_v5 = vadd.f32 1.0, %v2962_v36 }
 0x320   : > { %v1947_v33 = vmul.f32 %v1883_v2, %v9784_v46  ;;  %v2779_v11 = vmul.f32 %v2715_v60, %v9784_v46  ;;  %v1756_v25 = vadd.f32 -2.101024e-06, %v1692_v17  ;;  %v1822_v16 = vmul.f32 %v1758_v38, %v9804_v43 }
 0x321   : > { %v7643_v14 = vpop.eup %7642  ;;  %v2654_v37 = vmul.f32 %v2590_v34, %v9804_v43  ;;  %v2588_v1 = vadd.f32 -0.001682827, %v2524_v41  ;;  %v3126_v4 = vpack.c.bf16 %v9509_v48, %v9447_v29  ;;  %v9842_v62 = vmul.f32 %v3034_v27, %v9662_v28 }
 0x322   : > { %v2972_v19 = vmul.f32 %v7643_v14, %v2333_v9  ;;  %v2011_v10 = vadd.f32 -0.00073499064, %v1947_v33  ;;  %v2843_v50 = vadd.f32 -0.014264739, %v2779_v11  ;;  %v1886_v20 = vadd.f32 -5.6925062e-05, %v1822_v16 }
 0x323   : > { %v2718_v13 = vadd.f32 -0.0073733293, %v2654_v37  ;;  %v1820_v49 = vmul.f32 %v1756_v25, %v9810_v57  ;;  %v2652_v54 = vmul.f32 %v2588_v1, %v9810_v57  ;;  %7322 = vmatmul.mubr.bf16.gmra.mrb[44].mxu1 %v3126_v4  ;;  %v9847_v32 = vmul.f32 %v3032_v5, %v9704_v12  ;;  %v7516_v9 = vld [vmem:[%s12405_s8 + $0x10] sm:$0xff]   ;;  %v9868_v5 = vld [vmem:[%s12404_s7] ss:$0 sm:$0xff] }
 0x324   : > { %v2075_v7 = vmul.f32 %v2011_v10, %v9784_v46  ;;  %7644 = vrcp.f32 %v2843_v50  ;;  %v3127_v29 = vpack.c.bf16 %v9623_v6, %v9598_v51  ;;  %v1950_v48 = vmul.f32 %v1886_v20, %v9804_v43  ;;  %v9861_v51 = vpop.f32.mrb[13].mxu1  ;;  %7345 = vmatprep.subr.bf16.mxu0 %v7516_v9 }
 0x325   : > { %v2782_v28 = vmul.f32 %v2718_v13, %v9804_v43  ;;  %v1884_v27 = vadd.f32 -5.6925062e-05, %v1820_v49  ;;  %v2716_v36 = vadd.f32 -0.0073733293, %v2652_v54  ;;  %v3037_v2 = vadd.f32 1.0, %v2972_v19  ;;  %7346 = vmatpush3.bf16.msra.mxu0 %v7516_v9  ;;  %v9895_v1 = vpop.f32.mrb[14].mxu1 }
 0x326   : > { %v2139_v60 = vadd.f32 -0.0029546, %v2075_v7  ;;  %7325 = vmatprep.mubr.bf16.mxu1 %v3127_v29  ;;  %v3128_v17 = vpack.c.bf16 %v9614_v24, %v9582_v42  ;;  %v3129_v12 = vpack.c.bf16 %v9755_v47, %v9692_v0  ;;  %v2014_v6 = vadd.f32 -0.00073499064, %v1950_v48 }
 0x327   : > { %v2846_v38 = vadd.f32 -0.014264739, %v2782_v28  ;;  %v1948_v34 = vmul.f32 %v1884_v27, %v9810_v57  ;;  %v2780_v41 = vmul.f32 %v2716_v36, %v9810_v57  ;;  %v3130_v24 = vpack.c.bf16 %v9725_v55, %v9681_v53 }
 0x328   : > { %v2203_v42 = vmul.f32 %v2139_v60, %v9784_v46  ;;  %v3131_v0 = vpack.c.bf16 %v9847_v32, %v9813_v56  ;;  %v3132_v47 = vpack.c.bf16 %v9842_v62, %v9774_v30  ;;  %v2078_v33 = vmul.f32 %v2014_v6, %v9804_v43  ;;  %v7518_v30 = vld [vmem:[%s12405_s8 + $0x20] sm:$0xff]  }
 0x329   : > { %7646 = vrcp.f32 %v2846_v38  ;;  %v2012_v11 = vadd.f32 -0.00073499064, %v1948_v34  ;;  %v2844_v25 = vadd.f32 -0.014264739, %v2780_v41  ;;  %v9880_v46 = vadd.f32 %v9601_v58, %v9868_v5 }
 0x32a   : > { %v2267_v14 = vadd.f32 -0.016096033, %v2203_v42  ;;  %v9884_v53 = vadd.f32 %v9868_v5, %v9607_v40  ;;  %v9888_v55 = vadd.f32 %v9611_v44, %v9868_v5  ;;  %v2142_v56 = vadd.f32 -0.0029546, %v2078_v33 }
 0x32b   : > { %v2076_v16 = vmul.f32 %v2012_v11, %v9810_v57  ;;  %7648 = vrcp.f32 %v2844_v25  ;;  %7326 = vmatmul.mubr.bf16.gmra.mrb[48].mxu1 %v3128_v17  ;;  %v9893_v37 = vadd.f32 %v9868_v5, %v9617_v8  ;;  %v1243_v58 = vmul.f32 0.5, %v9745_v22 }
 0x32c   : > { %v2331_v40 = vmul.f32 %v9777_v52, %v2267_v14  ;;  %v1246_v4 = vmul.f32 0.5, %v9760_v59  ;;  %7329 = vmatprep.mubr.bf16.mxu1 %v3129_v12  ;;  %v3561_v44 = vmul.f32 0.70710677, %v9880_v46  ;;  %v2206_v19 = vmul.f32 %v2142_v56, %v9804_v43 }
 0x32d   : > { %v1244_v10 = vmul.f32 0.5, %v9771_v45  ;;  %v2140_v50 = vadd.f32 -0.0029546, %v2076_v16  ;;  %v3559_v20 = vmul.f32 0.70710677, %v9884_v53  ;;  %v9905_v13 = vmul.f32 %v3037_v2, %v9750_v63 }
 0x32e   : > { %v7645_v8 = vpop.eup %7644  ;;  %v9907_v49 = vclamps-f32 %v3561_v44, 4.0  ;;  %v3562_v22 = vmul.f32 0.70710677, %v9888_v55  ;;  %v3560_v59 = vmul.f32 0.70710677, %v9893_v37  ;;  %v9924_v29 = vadd.f32 %v9633_v61, %v9868_v5 }
 0x32f   : > { %v2968_v52 = vmul.f32 %v7645_v8, %v2331_v40  ;;  %v2270_v54 = vadd.f32 -0.016096033, %v2206_v19  ;;  %v2204_v32 = vmul.f32 %v2140_v50, %v9810_v57  ;;  %v9912_v43 = vclamps-f32 %v3559_v20, 4.0 }
 0x330   : > { %v9916_v45 = vmul.f32 %v9907_v49, %v9907_v49  ;;  %v9918_v7 = vclamps-f32 %v3562_v22, 4.0  ;;  %v9920_v63 = vclamps-f32 %v3560_v59, 4.0  ;;  %v9948_v56 = vadd.f32 %v9868_v5, %v9639_v39 }
 0x331   : > { %v3035_v48 = vadd.f32 1.0, %v2968_v52  ;;  %v2334_v28 = vmul.f32 %v9794_v31, %v2270_v54  ;;  %v2268_v27 = vadd.f32 -0.016096033, %v2204_v32  ;;  %v9929_v57 = vmul.f32 %v9912_v43, %v9912_v43 }
 0x332   : > { %v3817_v36 = vmul.f32 -2.7261424e-10, %v9916_v45  ;;  %v4649_v2 = vmul.f32 -1.45660715e-05, %v9916_v45  ;;  %v9935_v60 = vmul.f32 %v9918_v7, %v9918_v7  ;;  %v9939_v61 = vmul.f32 %v9920_v63, %v9920_v63 }
 0x333   : > { %v7647_v17 = vpop.eup %7646  ;;  %v3099_v12 = vmul.f32 %v3035_v48, %v1243_v58  ;;  %v2332_v31 = vmul.f32 %v9797_v21, %v2268_v27  ;;  %7330 = vmatmul.mubr.bf16.gmra.mrb[52].mxu1 %v3130_v24  ;;  %v3815_v9 = vmul.f32 -2.7261424e-10, %v9929_v57  ;;  %v4647_v6 = vmul.f32 -1.45660715e-05, %v9929_v57 }
 0x334   : > { %v2974_v38 = vmul.f32 %v7647_v17, %v2334_v28  ;;  %7333 = vmatprep.mubr.bf16.mxu1 %v3131_v0  ;;  %v3881_v34 = vadd.f32 2.7706815e-08, %v3817_v36  ;;  %v4713_v41 = vadd.f32 -0.00021337405, %v4649_v2  ;;  %v3818_v42 = vmul.f32 -2.7261424e-10, %v9935_v60 }
 0x335   : > { %v7649_v33 = vpop.eup %7648  ;;  %v3879_v11 = vadd.f32 2.7706815e-08, %v3815_v9  ;;  %v4711_v25 = vadd.f32 -0.00021337405, %v4647_v6  ;;  %v4650_v14 = vmul.f32 -1.45660715e-05, %v9935_v60 }
 0x336   : > { %v3038_v21 = vadd.f32 1.0, %v2974_v38  ;;  %v2970_v24 = vmul.f32 %v7649_v33, %v2332_v31  ;;  %v3945_v16 = vmul.f32 %v3881_v34, %v9916_v45  ;;  %v4777_v58 = vmul.f32 %v4713_v41, %v9916_v45  ;;  %v9952_v0 = vpop.f32.mrb[15].mxu1 }
 0x337   : > { %v3943_v40 = vmul.f32 %v3879_v11, %v9929_v57  ;;  %v4775_v44 = vmul.f32 %v4711_v25, %v9929_v57  ;;  %v3882_v19 = vadd.f32 2.7706815e-08, %v3818_v42  ;;  %v4714_v50 = vadd.f32 -0.00021337405, %v4650_v14 }
 0x338   : > { %v3102_v20 = vmul.f32 %v3038_v21, %v1246_v4  ;;  %v3036_v8 = vadd.f32 1.0, %v2970_v24  ;;  %v4009_v22 = vadd.f32 -2.101024e-06, %v3945_v16  ;;  %v4841_v59 = vadd.f32 -0.001682827, %v4777_v58  ;;  %v7517_v4 = vld [vmem:[%s12405_s8 + $0x18] sm:$0xff]  }
 0x339   : > { %v4007_v39 = vadd.f32 -2.101024e-06, %v3943_v40  ;;  %v4839_v52 = vadd.f32 -0.001682827, %v4775_v44  ;;  %v3946_v54 = vmul.f32 %v3882_v19, %v9935_v60  ;;  %v4778_v32 = vmul.f32 %v4714_v50, %v9935_v60  ;;  %7347 = vmatprep.subr.bf16.mxu0 %v7517_v4 }
 0x33a   : > { %v3100_v48 = vmul.f32 %v3036_v8, %v1244_v10  ;;  %v3134_v28 = vpack.c.bf16 %v3102_v20, %v9905_v13  ;;  %v4073_v27 = vmul.f32 %v4009_v22, %v9916_v45  ;;  %v4905_v36 = vmul.f32 %v4841_v59, %v9916_v45  ;;  %7348 = vmatpush3.bf16.msra.mxu0 %v7517_v4 }
 0x33b   : > { %7334 = vmatmul.mubr.bf16.gmra.mrb[56].mxu1 %v3132_v47  ;;  %v4071_v2 = vmul.f32 %v4007_v39, %v9929_v57  ;;  %v4903_v17 = vmul.f32 %v4839_v52, %v9929_v57  ;;  %v4010_v31 = vadd.f32 -2.101024e-06, %v3946_v54  ;;  %v4842_v10 = vadd.f32 -0.001682827, %v4778_v32  ;;  %7349 = vmatprep.subr.bf16.mxu0 %v7518_v30  ;;  %v7519_v54 = vld [vmem:[%s12405_s8 + $0x28] sm:$0xff]  }
 0x33c   : > { %v3133_v9 = vpack.c.bf16 %v3100_v48, %v3099_v12  ;;  %v4137_v13 = vadd.f32 -5.6925062e-05, %v4073_v27  ;;  %v4969_v6 = vadd.f32 -0.0073733293, %v4905_v36  ;;  %v3816_v38 = vmul.f32 -2.7261424e-10, %v9939_v61 }
 0x33d   : > { %v4135_v34 = vadd.f32 -5.6925062e-05, %v4071_v2  ;;  %v4967_v41 = vadd.f32 -0.0073733293, %v4903_v17  ;;  %v4074_v42 = vmul.f32 %v4010_v31, %v9935_v60  ;;  %v4906_v33 = vmul.f32 %v4842_v10, %v9935_v60 }
 0x33e   : > { %7337 = vmatprep.mubr.bf16.mxu1 %v3133_v9  ;;  %v4201_v62 = vmul.f32 %v4137_v13, %v9916_v45  ;;  %v5033_v47 = vmul.f32 %v4969_v6, %v9916_v45  ;;  %v3880_v12 = vadd.f32 2.7706815e-08, %v3816_v38  ;;  %v4648_v11 = vmul.f32 -1.45660715e-05, %v9939_v61  ;;  %7350 = vmatpush3.bf16.msra.mxu0 %v7518_v30 }
 0x33f   : > { %v4199_v25 = vmul.f32 %v4135_v34, %v9929_v57  ;;  %v5031_v14 = vmul.f32 %v4967_v41, %v9929_v57  ;;  %v4138_v21 = vadd.f32 -5.6925062e-05, %v4074_v42  ;;  %v4970_v24 = vadd.f32 -0.0073733293, %v4906_v33  ;;  %7351 = vmatprep.subr.bf16.mxu0 %v7519_v54  ;;  %v7520_v42 = vld [vmem:[%s12405_s8 + $0x30] sm:$0xff]  }
 0x340   : > { %v4265_v16 = vadd.f32 -0.00073499064, %v4201_v62  ;;  %v5097_v58 = vadd.f32 -0.014264739, %v5033_v47  ;;  %v3944_v40 = vmul.f32 %v3880_v12, %v9939_v61  ;;  %v4712_v44 = vadd.f32 -0.00021337405, %v4648_v11 }
 0x341   : > { %v4263_v19 = vadd.f32 -0.00073499064, %v4199_v25  ;;  %v5095_v50 = vadd.f32 -0.014264739, %v5031_v14  ;;  %v4202_v20 = vmul.f32 %v4138_v21, %v9935_v60  ;;  %v5034_v8 = vmul.f32 %v4970_v24, %v9935_v60  ;;  %v9985_v52 = vpop.f32.mrb[16].mxu1 }
 0x342   : > { %v4329_v22 = vmul.f32 %v4265_v16, %v9916_v45  ;;  %7650 = vrcp.f32 %v5097_v58  ;;  %v4008_v59 = vadd.f32 -2.101024e-06, %v3944_v40  ;;  %v4776_v39 = vmul.f32 %v4712_v44, %v9939_v61  ;;  %v9991_v36 = vpop.f32.mrb[17].mxu1  ;;  %7352 = vmatpush3.bf16.msra.mxu0 %v7519_v54  ;;  %v12463_v58 = vld [vmem:[#allocation18_spill] sm:$0xff] }
 0x343   : > { %7338 = vmatmul.mubr.bf16.gmra.mrb[60].mxu1 %v3134_v28  ;;  %v4327_v32 = vmul.f32 %v4263_v19, %v9929_v57  ;;  %7652 = vrcp.f32 %v5095_v50  ;;  %v4266_v48 = vadd.f32 -0.00073499064, %v4202_v20  ;;  %v5098_v27 = vadd.f32 -0.014264739, %v5034_v8  ;;  %v9994_v31 = vpop.f32.mrb[18].mxu1  ;;  %7353 = vmatprep.subr.bf16.mxu0 %v7520_v42 }
 0x344   : > { %v4393_v4 = vadd.f32 -0.0029546, %v4329_v22  ;;  %v4072_v2 = vmul.f32 %v4008_v59, %v9939_v61  ;;  %v4840_v17 = vadd.f32 -0.001682827, %v4776_v39  ;;  %v3565_v28 = vmul.f32 0.70710677, %v9924_v29 }
 0x345   : > { %v4391_v10 = vadd.f32 -0.0029546, %v4327_v32  ;;  %v4330_v9 = vmul.f32 %v4266_v48, %v9935_v60  ;;  %7654 = vrcp.f32 %v5098_v27  ;;  %v9998_v13 = vpop.f32.mrb[19].mxu1  ;;  %v10001_v6 = vmul.f32 0.5, %v9880_v46 }
 0x346   : > { %v4457_v38 = vmul.f32 %v4393_v4, %v9916_v45  ;;  %v4136_v34 = vadd.f32 -5.6925062e-05, %v4072_v2  ;;  %v4904_v41 = vmul.f32 %v4840_v17, %v9939_v61  ;;  %v10009_v62 = vclamps-f32 %v3565_v28, 4.0  ;;  %7354 = vmatpush3.bf16.msra.mxu0 %v7520_v42 }
 0x347   : > { %v4455_v33 = vmul.f32 %v4391_v10, %v9929_v57  ;;  %v4394_v30 = vadd.f32 -0.0029546, %v4330_v9  ;;  %v3563_v47 = vmul.f32 0.70710677, %v9948_v56  ;;  %v10013_v46 = vmul.f32 0.5, %v9884_v53 }
 0x348   : > { %v4521_v12 = vadd.f32 -0.016096033, %v4457_v38  ;;  %v4200_v45 = vmul.f32 %v4136_v34, %v9939_v61  ;;  %v4968_v11 = vadd.f32 -0.0073733293, %v4904_v41  ;;  %v10019_v21 = vmul.f32 %v10009_v62, %v10009_v62 }
 0x349   : > { %v4519_v25 = vadd.f32 -0.016096033, %v4455_v33  ;;  %v4458_v14 = vmul.f32 %v4394_v30, %v9935_v60  ;;  %v10021_v57 = vclamps-f32 %v3563_v47, 4.0  ;;  %v10027_v40 = vadd.f32 %v12463_v58, %v9868_v5 }
 0x34a   : > { %v4585_v24 = vmul.f32 %v9907_v49, %v4521_v12  ;;  %v4264_v16 = vadd.f32 -0.00073499064, %v4200_v45  ;;  %v5032_v53 = vmul.f32 %v4968_v11, %v9939_v61  ;;  %v3821_v60 = vmul.f32 -2.7261424e-10, %v10019_v21 }
 0x34b   : > { %v4583_v44 = vmul.f32 %v9912_v43, %v4519_v25  ;;  %v4522_v19 = vadd.f32 -0.016096033, %v4458_v14  ;;  %v4653_v50 = vmul.f32 -1.45660715e-05, %v10019_v21  ;;  %v3498_v8 = vmul.f32 0.5, %v9888_v55 }
 0x34c   : > { %v7651_v20 = vpop.eup %7650  ;;  %v4328_v22 = vmul.f32 %v4264_v16, %v9939_v61  ;;  %v5096_v49 = vadd.f32 -0.014264739, %v5032_v53  ;;  %v10036_v59 = vmul.f32 %v10021_v57, %v10021_v57  ;;  %v3885_v43 = vadd.f32 2.7706815e-08, %v3821_v60 }
 0x34d   : > { %v7653_v39 = vpop.eup %7652  ;;  %v5164_v54 = vmul.f32 %v7651_v20, %v4585_v24  ;;  %v4586_v32 = vmul.f32 %v9918_v7, %v4522_v19  ;;  %v4717_v48 = vadd.f32 -0.00021337405, %v4653_v50  ;;  %v10040_v4 = vmul.f32 0.5, %v9893_v37  ;;  %v7521_v7 = vld [vmem:[%s12405_s8 + $0x38] sm:$0xff]  }
 0x34e   : > { %v5160_v27 = vmul.f32 %v7653_v39, %v4583_v44  ;;  %v4392_v2 = vadd.f32 -0.0029546, %v4328_v22  ;;  %v3819_v55 = vmul.f32 -2.7261424e-10, %v10036_v59  ;;  %v3949_v10 = vmul.f32 %v3885_v43, %v10019_v21  ;;  %7355 = vmatprep.subr.bf16.mxu0 %v7521_v7 }
 0x34f   : > { %v7655_v17 = vpop.eup %7654  ;;  %v4781_v9 = vmul.f32 %v4717_v48, %v10019_v21  ;;  %v4651_v28 = vmul.f32 -1.45660715e-05, %v10036_v59  ;;  %v3566_v38 = vmul.f32 0.70710677, %v10027_v40  ;;  %v5289_v34 = vadd.f32 1.0, %v5164_v54  ;;  %7356 = vmatpush3.bf16.msra.mxu0 %v7521_v7 }
 0x350   : > { %v5166_v41 = vmul.f32 %v7655_v17, %v4586_v32  ;;  %v10051_v37 = vmul.f32 0.5, %v9924_v29  ;;  %v3883_v42 = vadd.f32 2.7706815e-08, %v3819_v55  ;;  %7656 = vrcp.f32 %v5096_v49 }
 0x351   : > { %v4013_v33 = vadd.f32 -2.101024e-06, %v3949_v10  ;;  %v4845_v30 = vadd.f32 -0.001682827, %v4781_v9  ;;  %v4715_v47 = vadd.f32 -0.00021337405, %v4651_v28  ;;  %v4456_v11 = vmul.f32 %v4392_v2, %v9939_v61 }
 0x352   : > { %v10053_v12 = vadd.f32 1.0, %v5160_v27  ;;  %v5290_v45 = vadd.f32 1.0, %v5166_v41  ;;  %v3947_v25 = vmul.f32 %v3883_v42, %v10036_v59  ;;  %v10060_v16 = vclamps-f32 %v3566_v38, 4.0 }
 0x353   : > { %v4077_v14 = vmul.f32 %v4013_v33, %v10019_v21  ;;  %v4909_v24 = vmul.f32 %v4845_v30, %v10019_v21  ;;  %v4779_v29 = vmul.f32 %v4715_v47, %v10036_v59  ;;  %v10063_v53 = vmul.f32 %v5289_v34, %v10001_v6 }
 0x354   : > { %v10065_v58 = vmul.f32 %v5290_v45, %v3498_v8  ;;  %v4011_v44 = vadd.f32 -2.101024e-06, %v3947_v25  ;;  %v10069_v61 = vadd.f32 %v9868_v5, %v9685_v23  ;;  %v10073_v20 = vmul.f32 %v10060_v16, %v10060_v16 }
 0x355   : > { %v4141_v19 = vadd.f32 -5.6925062e-05, %v4077_v14  ;;  %v4973_v60 = vadd.f32 -0.0073733293, %v4909_v24  ;;  %v4843_v50 = vadd.f32 -0.001682827, %v4779_v29 }
 0x356   : > { %v4520_v49 = vadd.f32 -0.016096033, %v4456_v11  ;;  %v4075_v6 = vmul.f32 %v4011_v44, %v10036_v59  ;;  %v3564_v8 = vmul.f32 0.70710677, %v10069_v61  ;;  %v3822_v32 = vmul.f32 -2.7261424e-10, %v10073_v20 }
 0x357   : > { %v4205_v39 = vmul.f32 %v4141_v19, %v10019_v21  ;;  %v5037_v23 = vmul.f32 %v4973_v60, %v10019_v21  ;;  %v4907_v54 = vmul.f32 %v4843_v50, %v10036_v59  ;;  %v10083_v43 = vpop.f32.mrb[20].mxu1  ;;  %v4654_v27 = vmul.f32 -1.45660715e-05, %v10073_v20 }
 0x358   : > { %v4139_v48 = vadd.f32 -5.6925062e-05, %v4075_v6  ;;  %v10086_v2 = vclamps-f32 %v3564_v8, 4.0  ;;  %v10088_v55 = vpop.f32.mrb[21].mxu1  ;;  %v3886_v38 = vadd.f32 2.7706815e-08, %v3822_v32  ;;  %v4584_v33 = vmul.f32 %v9920_v63, %v4520_v49 }
 0x359   : > { %v4269_v17 = vadd.f32 -0.00073499064, %v4205_v39  ;;  %v5101_v10 = vadd.f32 -0.014264739, %v5037_v23  ;;  %v4971_v9 = vadd.f32 -0.0073733293, %v4907_v54  ;;  %v3281_v63 = vadd.f32 %v9720_v26, %v9868_v5 }
 0x35a   : > { %v4203_v28 = vmul.f32 %v4139_v48, %v10036_v59  ;;  %v4718_v7 = vadd.f32 -0.00021337405, %v4654_v27  ;;  %v10093_v34 = vmul.f32 %v10086_v2, %v10086_v2  ;;  %v10095_v41 = vpop.f32.mrb[22].mxu1  ;;  %v7657_v42 = vpop.eup %7656  ;;  %v3950_v25 = vmul.f32 %v3886_v38, %v10073_v20 }
 0x35b   : > { %v4333_v30 = vmul.f32 %v4269_v17, %v10019_v21  ;;  %7658 = vrcp.f32 %v5101_v10  ;;  %v5035_v47 = vmul.f32 %v4971_v9, %v10036_v59  ;;  %v10100_v45 = vpop.f32.mrb[23].mxu1  ;;  %v5162_v8 = vmul.f32 %v7657_v42, %v4584_v33 }
 0x35c   : > { %v4267_v11 = vadd.f32 -0.00073499064, %v4203_v28  ;;  %v4782_v14 = vmul.f32 %v4718_v7, %v10073_v20  ;;  %v3820_v24 = vmul.f32 -2.7261424e-10, %v10093_v34  ;;  %v4652_v19 = vmul.f32 -1.45660715e-05, %v10093_v34 }
 0x35d   : > { %v4397_v29 = vadd.f32 -0.0029546, %v4333_v30  ;;  %v5099_v44 = vadd.f32 -0.014264739, %v5035_v47  ;;  %v4014_v50 = vadd.f32 -2.101024e-06, %v3950_v25  ;;  %v3273_v9 = vadd.f32 %v9868_v5, %v9741_v18 }
 0x35e   : > { %v4331_v60 = vmul.f32 %v4267_v11, %v10036_v59  ;;  %v4846_v49 = vadd.f32 -0.001682827, %v4782_v14  ;;  %v3884_v6 = vadd.f32 2.7706815e-08, %v3820_v24  ;;  %v4716_v23 = vadd.f32 -0.00021337405, %v4652_v19 }
 0x35f   : > { %v4461_v39 = vmul.f32 %v4397_v29, %v10019_v21  ;;  %7660 = vrcp.f32 %v5099_v44  ;;  %v4078_v32 = vmul.f32 %v4014_v50, %v10073_v20  ;;  %v3569_v10 = vmul.f32 0.70710677, %v3281_v63 }
 0x360   : > { %v4395_v54 = vadd.f32 -0.0029546, %v4331_v60  ;;  %v4910_v48 = vmul.f32 %v4846_v49, %v10073_v20  ;;  %v3948_v27 = vmul.f32 %v3884_v6, %v10093_v34  ;;  %v4780_v26 = vmul.f32 %v4716_v23, %v10093_v34 }
 0x361   : > { %v4525_v17 = vadd.f32 -0.016096033, %v4461_v39  ;;  %v4142_v38 = vadd.f32 -5.6925062e-05, %v4078_v32  ;;  %v5288_v42 = vadd.f32 1.0, %v5162_v8  ;;  %v10118_v33 = vmul.f32 0.5, %v9948_v56 }
 0x362   : > { %v4459_v28 = vmul.f32 %v4395_v54, %v10036_v59  ;;  %v4974_v21 = vadd.f32 -0.0073733293, %v4910_v48  ;;  %v4012_v7 = vadd.f32 -2.101024e-06, %v3948_v27  ;;  %v4844_v30 = vadd.f32 -0.001682827, %v4780_v26 }
 0x363   : > { %v10120_v47 = vclamps-f32 %v3569_v10, 4.0  ;;  %v4589_v11 = vmul.f32 %v10009_v62, %v4525_v17  ;;  %v4206_v25 = vmul.f32 %v4142_v38, %v10073_v20  ;;  %v10127_v59 = vmul.f32 0.5, %v10027_v40 }
 0x364   : > { %v5038_v14 = vmul.f32 %v4974_v21, %v10073_v20  ;;  %v4076_v18 = vmul.f32 %v4012_v7, %v10093_v34  ;;  %v4908_v29 = vmul.f32 %v4844_v30, %v10093_v34  ;;  %v3567_v44 = vmul.f32 0.70710677, %v3273_v9 }
 0x365   : > { %v7659_v24 = vpop.eup %7658  ;;  %v10132_v56 = vmul.f32 %v10120_v47, %v10120_v47  ;;  %v10136_v62 = vmul.f32 %v10053_v12, %v10013_v46  ;;  %v4523_v19 = vadd.f32 -0.016096033, %v4459_v28  ;;  %v4270_v60 = vadd.f32 -0.00073499064, %v4206_v25 }
 0x366   : > { %v10139_v50 = vmul.f32 0.5, %v10069_v61  ;;  %v10142_v49 = vmul.f32 %v5288_v42, %v10040_v4  ;;  %v4140_v40 = vadd.f32 -5.6925062e-05, %v4076_v18  ;;  %v4972_v6 = vadd.f32 -0.0073733293, %v4908_v29 }
 0x367   : > { %v3825_v8 = vmul.f32 -2.7261424e-10, %v10132_v56  ;;  %v5172_v39 = vmul.f32 %v7659_v24, %v4589_v11  ;;  %v4334_v23 = vmul.f32 %v4270_v60, %v10073_v20  ;;  %v5102_v54 = vadd.f32 -0.014264739, %v5038_v14 }
 0x368   : > { %v4657_v32 = vmul.f32 -1.45660715e-05, %v10132_v56  ;;  %v4204_v12 = vmul.f32 %v4140_v40, %v10093_v34  ;;  %v5036_v48 = vmul.f32 %v4972_v6, %v10093_v34  ;;  %v10149_v27 = vclamps-f32 %v3567_v44, 4.0 }
 0x369   : > { %v7661_v46 = vpop.eup %7660  ;;  %v3889_v61 = vadd.f32 2.7706815e-08, %v3825_v8  ;;  %v4587_v4 = vmul.f32 %v10021_v57, %v4523_v19  ;;  %v4398_v17 = vadd.f32 -0.0029546, %v4334_v23  ;;  %v10152_v26 = vmul.f32 0.5, %v3281_v63 }
 0x36a   : > { %v4721_v10 = vadd.f32 -0.00021337405, %v4657_v32  ;;  %v4268_v28 = vadd.f32 -0.00073499064, %v4204_v12  ;;  %v10157_v21 = vmul.f32 %v10149_v27, %v10149_v27  ;;  %v3284_v7 = vadd.f32 %v9764_v35, %v9868_v5 }
 0x36b   : > { %v3953_v38 = vmul.f32 %v3889_v61, %v10132_v56  ;;  %v5293_v42 = vadd.f32 1.0, %v5172_v39  ;;  %v5100_v30 = vadd.f32 -0.014264739, %v5036_v48  ;;  %v10164_v57 = vadd.f32 %v9868_v5, %v9799_v15 }
 0x36c   : > { %v4785_v11 = vmul.f32 %v4721_v10, %v10132_v56  ;;  %7662 = vrcp.f32 %v5102_v54  ;;  %v4332_v63 = vmul.f32 %v4268_v28, %v10093_v34  ;;  %v3823_v14 = vmul.f32 -2.7261424e-10, %v10157_v21 }
 0x36d   : > { %v4017_v25 = vadd.f32 -2.101024e-06, %v3953_v38  ;;  %v5168_v18 = vmul.f32 %v7661_v46, %v4587_v4  ;;  %v4462_v24 = vmul.f32 %v4398_v17, %v10073_v20  ;;  %v4655_v35 = vmul.f32 -1.45660715e-05, %v10157_v21 }
 0x36e   : > { %v4849_v29 = vadd.f32 -0.001682827, %v4785_v11  ;;  %v4396_v44 = vadd.f32 -0.0029546, %v4332_v63  ;;  %v3887_v60 = vadd.f32 2.7706815e-08, %v3823_v14  ;;  %7664 = vrcp.f32 %v5100_v30 }
 0x36f   : > { %v4081_v19 = vmul.f32 %v4017_v25, %v10132_v56  ;;  %v3570_v40 = vmul.f32 0.70710677, %v3284_v7  ;;  %v10172_v6 = vmul.f32 0.5, %v3273_v9  ;;  %v4719_v8 = vadd.f32 -0.00021337405, %v4655_v35 }
 0x370   : > { %v4913_v15 = vmul.f32 %v4849_v29, %v10132_v56  ;;  %v4460_v39 = vmul.f32 %v4396_v44, %v10093_v34  ;;  %v3951_v54 = vmul.f32 %v3887_v60, %v10157_v21  ;;  %v10179_v32 = vmul.f32 %v5293_v42, %v10051_v37 }
 0x371   : > { %v4145_v23 = vadd.f32 -5.6925062e-05, %v4081_v19  ;;  %v10176_v20 = vclamps-f32 %v3570_v40, 4.0  ;;  %v4783_v12 = vmul.f32 %v4719_v8, %v10157_v21  ;;  %v3568_v48 = vmul.f32 0.70710677, %v10164_v57 }
 0x372   : > { %v4977_v46 = vadd.f32 -0.0073733293, %v4913_v15  ;;  %v10183_v61 = vadd.f32 1.0, %v5168_v18  ;;  %v4526_v9 = vadd.f32 -0.016096033, %v4462_v24  ;;  %v10194_v11 = vmul.f32 0.5, %v3284_v7 }
 0x373   : > { %v4209_v4 = vmul.f32 %v4145_v23, %v10132_v56  ;;  %v4015_v17 = vadd.f32 -2.101024e-06, %v3951_v54  ;;  %v4847_v10 = vadd.f32 -0.001682827, %v4783_v12  ;;  %v10189_v28 = vmul.f32 %v10176_v20, %v10176_v20 }
 0x374   : > { %v5041_v34 = vmul.f32 %v4977_v46, %v10132_v56  ;;  %v10191_v37 = vclamps-f32 %v3568_v48, 4.0  ;;  %v4524_v38 = vadd.f32 -0.016096033, %v4460_v39  ;;  %v4590_v29 = vmul.f32 %v10060_v16, %v4526_v9 }
 0x375   : > { %v4273_v42 = vadd.f32 -0.00073499064, %v4209_v4  ;;  %v4079_v30 = vmul.f32 %v4015_v17, %v10157_v21  ;;  %v4911_v25 = vmul.f32 %v4847_v10, %v10157_v21  ;;  %v3826_v14 = vmul.f32 -2.7261424e-10, %v10189_v28 }
 0x376   : > { %v5105_v63 = vadd.f32 -0.014264739, %v5041_v34  ;;  %v4658_v18 = vmul.f32 -1.45660715e-05, %v10189_v28  ;;  %v7663_v24 = vpop.eup %7662  ;;  %v10203_v19 = vmul.f32 %v10191_v37, %v10191_v37  ;;  %v10207_v40 = vadd.f32 %v9830_v3, %v9868_v5 }
 0x377   : > { %v4337_v35 = vmul.f32 %v4273_v42, %v10132_v56  ;;  %v4143_v44 = vadd.f32 -5.6925062e-05, %v4079_v30  ;;  %v4975_v7 = vadd.f32 -0.0073733293, %v4911_v25  ;;  %v3890_v60 = vadd.f32 2.7706815e-08, %v3826_v14 }
 0x378   : > { %7666 = vrcp.f32 %v5105_v63  ;;  %v4722_v39 = vadd.f32 -0.00021337405, %v4658_v18  ;;  %v3824_v16 = vmul.f32 -2.7261424e-10, %v10203_v19  ;;  %v7665_v23 = vpop.eup %7664  ;;  %v4588_v54 = vmul.f32 %v10086_v2, %v4524_v38 }
 0x379   : > { %v4401_v15 = vadd.f32 -0.0029546, %v4337_v35  ;;  %v4207_v8 = vmul.f32 %v4143_v44, %v10157_v21  ;;  %v5039_v46 = vmul.f32 %v4975_v7, %v10157_v21  ;;  %v3954_v12 = vmul.f32 %v3890_v60, %v10189_v28 }
 0x37a   : > { %v4656_v48 = vmul.f32 -1.45660715e-05, %v10203_v19  ;;  %v4786_v3 = vmul.f32 %v4722_v39, %v10189_v28  ;;  %v3888_v17 = vadd.f32 2.7706815e-08, %v3824_v16  ;;  %v5174_v34 = vmul.f32 %v7663_v24, %v4590_v29 }
 0x37b   : > { %v4465_v9 = vmul.f32 %v4401_v15, %v10132_v56  ;;  %v4271_v4 = vadd.f32 -0.00073499064, %v4207_v8  ;;  %v5103_v10 = vadd.f32 -0.014264739, %v5039_v46  ;;  %v4018_v42 = vadd.f32 -2.101024e-06, %v3954_v12 }
 0x37c   : > { %v4720_v30 = vadd.f32 -0.00021337405, %v4656_v48  ;;  %v4850_v2 = vadd.f32 -0.001682827, %v4786_v3  ;;  %v3952_v38 = vmul.f32 %v3888_v17, %v10203_v19  ;;  %v5170_v14 = vmul.f32 %v7665_v23, %v4588_v54  ;;  %v10221_v35 = vpop.f32.mrb[24].mxu1 }
 0x37d   : > { %v4529_v63 = vadd.f32 -0.016096033, %v4465_v9  ;;  %v4335_v25 = vmul.f32 %v4271_v4, %v10157_v21  ;;  %7668 = vrcp.f32 %v5103_v10  ;;  %v4082_v18 = vmul.f32 %v4018_v42, %v10189_v28  ;;  %v10225_v60 = vpop.f32.mrb[25].mxu1 }
 0x37e   : > { %v4784_v56 = vmul.f32 %v4720_v30, %v10203_v19  ;;  %v4914_v29 = vmul.f32 %v4850_v2, %v10189_v28  ;;  %v4016_v7 = vadd.f32 -2.101024e-06, %v3952_v38  ;;  %v3573_v39 = vmul.f32 0.70710677, %v10207_v40 }
 0x37f   : > { %v4593_v44 = vmul.f32 %v10120_v47, %v4529_v63  ;;  %v4399_v24 = vadd.f32 -0.0029546, %v4335_v25  ;;  %v4146_v15 = vadd.f32 -5.6925062e-05, %v4082_v18  ;;  %v3289_v16 = vadd.f32 %v9868_v5, %v9861_v51  ;;  %v10232_v47 = vpop.f32.mrb[26].mxu1 }
 0x380   : > { %v4848_v8 = vadd.f32 -0.001682827, %v4784_v56  ;;  %v5294_v23 = vadd.f32 1.0, %v5174_v34  ;;  %v4978_v46 = vadd.f32 -0.0073733293, %v4914_v29  ;;  %v4080_v12 = vmul.f32 %v4016_v7, %v10203_v19  ;;  %v10238_v10 = vpop.f32.mrb[27].mxu1 }
 0x381   : > { %v4463_v54 = vmul.f32 %v4399_v24, %v10157_v21  ;;  %v5292_v9 = vadd.f32 1.0, %v5170_v14  ;;  %v4210_v4 = vmul.f32 %v4146_v15, %v10189_v28  ;;  %v10236_v17 = vclamps-f32 %v3573_v39, 4.0 }
 0x382   : > { %v7667_v48 = vpop.eup %7666  ;;  %v4912_v3 = vmul.f32 %v4848_v8, %v10203_v19  ;;  %v5042_v34 = vmul.f32 %v4978_v46, %v10189_v28  ;;  %v4144_v21 = vadd.f32 -5.6925062e-05, %v4080_v12  ;;  %v3571_v2 = vmul.f32 0.70710677, %v3289_v16 }
 0x383   : > { %v5180_v42 = vmul.f32 %v7667_v48, %v4593_v44  ;;  %v4527_v51 = vadd.f32 -0.016096033, %v4463_v54  ;;  %v4274_v30 = vadd.f32 -0.00073499064, %v4210_v4  ;;  %v10243_v25 = vmul.f32 %v10236_v17, %v10236_v17 }
 0x384   : > { %v4976_v63 = vadd.f32 -0.0073733293, %v4912_v3  ;;  %v10247_v38 = vmul.f32 %v10183_v61, %v10118_v33  ;;  %v10250_v14 = vmul.f32 %v5294_v23, %v10127_v59  ;;  %v10253_v18 = vmul.f32 0.5, %v10164_v57 }
 0x385   : > { %v4208_v56 = vmul.f32 %v4144_v21, %v10203_v19  ;;  %v5297_v44 = vadd.f32 1.0, %v5180_v42  ;;  %v4338_v24 = vmul.f32 %v4274_v30, %v10189_v28  ;;  %v3829_v29 = vmul.f32 -2.7261424e-10, %v10243_v25 }
 0x386   : > { %v4661_v7 = vmul.f32 -1.45660715e-05, %v10243_v25  ;;  %v10260_v15 = vmul.f32 %v5292_v9, %v10139_v50  ;;  %v5106_v33 = vadd.f32 -0.014264739, %v5042_v34  ;;  %v10262_v8 = vclamps-f32 %v3571_v2, 4.0 }
 0x387   : > { %v4272_v61 = vadd.f32 -0.00073499064, %v4208_v56  ;;  %v7669_v59 = vpop.eup %7668  ;;  %v4591_v57 = vmul.f32 %v10149_v27, %v4527_v51  ;;  %v5040_v39 = vmul.f32 %v4976_v63, %v10203_v19  ;;  %v10267_v23 = vmul.f32 0.5, %v10207_v40 }
 0x388   : > { %v3893_v54 = vadd.f32 2.7706815e-08, %v3829_v29  ;;  %v4402_v46 = vadd.f32 -0.0029546, %v4338_v24  ;;  %v4725_v48 = vadd.f32 -0.00021337405, %v4661_v7  ;;  %v10272_v50 = vmul.f32 %v10262_v8, %v10262_v8 }
 0x389   : > { %v4336_v12 = vmul.f32 %v4272_v61, %v10203_v19  ;;  %v10275_v9 = vmul.f32 %v5297_v44, %v10152_v26  ;;  %v10278_v27 = vmul.f32 0.5, %v3289_v16  ;;  %v3300_v40 = vadd.f32 %v9895_v1, %v9868_v5 }
 0x38a   : > { %v3957_v4 = vmul.f32 %v3893_v54, %v10243_v25  ;;  %7670 = vrcp.f32 %v5106_v33  ;;  %v4789_v42 = vmul.f32 %v4725_v48, %v10243_v25  ;;  %v3827_v51 = vmul.f32 -2.7261424e-10, %v10272_v50 }
 0x38b   : > { %12464 = vst [vmem:[#allocation21_spill] sm:$0xff] %v10275_v9  ;;  %v4400_v3 = vadd.f32 -0.0029546, %v4336_v12  ;;  %v5104_v34 = vadd.f32 -0.014264739, %v5040_v39  ;;  %v3292_v26 = vadd.f32 %v9868_v5, %v9952_v0  ;;  %v5176_v63 = vmul.f32 %v7669_v59, %v4591_v57 }
 0x38c   : > { %v4021_v21 = vadd.f32 -2.101024e-06, %v3957_v4  ;;  %v4659_v30 = vmul.f32 -1.45660715e-05, %v10272_v50  ;;  %v4466_v16 = vmul.f32 %v4402_v46, %v10189_v28  ;;  %v4853_v2 = vadd.f32 -0.001682827, %v4789_v42 }
 0x38d   : > { %v3891_v56 = vadd.f32 2.7706815e-08, %v3827_v51  ;;  %v10289_v24 = vmul.f32 0.5, %v3300_v40  ;;  %v3574_v29 = vmul.f32 0.70710677, %v3300_v40  ;;  %v4464_v7 = vmul.f32 %v4400_v3, %v10203_v19 }
 0x38e   : > { %v4085_v1 = vmul.f32 %v4021_v21, %v10243_v25  ;;  %v4723_v44 = vadd.f32 -0.00021337405, %v4659_v30  ;;  %v4917_v33 = vmul.f32 %v4853_v2, %v10243_v25  ;;  %v10296_v0 = vadd.f32 %v9985_v52, %v9868_v5  ;;  %v10301_v54 = vpop.f32.mrb[28].mxu1 }
 0x38f   : > { %v3955_v61 = vmul.f32 %v3891_v56, %v10272_v50  ;;  %v10299_v57 = vclamps-f32 %v3574_v29, 4.0  ;;  %v3572_v39 = vmul.f32 0.70710677, %v3292_v26  ;;  %v5295_v46 = vadd.f32 1.0, %v5176_v63  ;;  %v10303_v48 = vpop.f32.mrb[29].mxu1 }
 0x390   : > { %v4149_v59 = vadd.f32 -5.6925062e-05, %v4085_v1  ;;  %v4787_v28 = vmul.f32 %v4723_v44, %v10272_v50  ;;  %7672 = vrcp.f32 %v5104_v34  ;;  %v4981_v12 = vadd.f32 -0.0073733293, %v4917_v33  ;;  %v10310_v52 = vpop.f32.mrb[30].mxu1 }
 0x391   : > { %v4019_v19 = vadd.f32 -2.101024e-06, %v3955_v61  ;;  %v4530_v4 = vadd.f32 -0.016096033, %v4466_v16  ;;  %v10308_v5 = vmul.f32 %v10299_v57, %v10299_v57  ;;  %v4528_v42 = vadd.f32 -0.016096033, %v4464_v7 }
 0x392   : > { %v4213_v40 = vmul.f32 %v4149_v59, %v10243_v25  ;;  %v4851_v3 = vadd.f32 -0.001682827, %v4787_v28  ;;  %v5045_v51 = vmul.f32 %v4981_v12, %v10243_v25  ;;  %v10314_v34 = vclamps-f32 %v3572_v39, 4.0  ;;  %v10316_v30 = vpop.f32.mrb[31].mxu1 }
 0x393   : > { %v4083_v21 = vmul.f32 %v4019_v19, %v10272_v50  ;;  %v3830_v2 = vmul.f32 -2.7261424e-10, %v10308_v5  ;;  %v3577_v56 = vmul.f32 0.70710677, %v10296_v0  ;;  %v10322_v44 = vmul.f32 %v5295_v46, %v10172_v6 }
 0x394   : > { %v4277_v63 = vadd.f32 -0.00073499064, %v4213_v40  ;;  %v4915_v16 = vmul.f32 %v4851_v3, %v10272_v50  ;;  %v7671_v1 = vpop.eup %7670  ;;  %v5109_v29 = vadd.f32 -0.014264739, %v5045_v51  ;;  %v4662_v33 = vmul.f32 -1.45660715e-05, %v10308_v5 }
 0x395   : > { %12465 = vst [vmem:[#allocation20_spill] sm:$0xff] %v10322_v44  ;;  %v4147_v7 = vadd.f32 -5.6925062e-05, %v4083_v21  ;;  %v4594_v61 = vmul.f32 %v10176_v20, %v4530_v4  ;;  %v3894_v39 = vadd.f32 2.7706815e-08, %v3830_v2  ;;  %v4592_v12 = vmul.f32 %v10191_v37, %v4528_v42 }
 0x396   : > { %v4341_v59 = vmul.f32 %v4277_v63, %v10243_v25  ;;  %v4979_v28 = vadd.f32 -0.0073733293, %v4915_v16  ;;  %v4726_v40 = vadd.f32 -0.00021337405, %v4662_v33  ;;  %v10329_v3 = vmul.f32 0.5, %v3292_v26 }
 0x397   : > { %v4211_v19 = vmul.f32 %v4147_v7, %v10272_v50  ;;  %v3958_v46 = vmul.f32 %v3894_v39, %v10308_v5  ;;  %v10335_v51 = vmul.f32 %v10314_v34, %v10314_v34  ;;  %7674 = vrcp.f32 %v5109_v29 }
 0x398   : > { %v4405_v22 = vadd.f32 -0.0029546, %v4341_v59  ;;  %v5043_v6 = vmul.f32 %v4979_v28, %v10272_v50  ;;  %v4790_v4 = vmul.f32 %v4726_v40, %v10308_v5  ;;  %v10338_v21 = vclamps-f32 %v3577_v56, 4.0 }
 0x399   : > { %v4275_v20 = vadd.f32 -0.00073499064, %v4211_v19  ;;  %v4022_v26 = vadd.f32 -2.101024e-06, %v3958_v46  ;;  %v3828_v63 = vmul.f32 -2.7261424e-10, %v10335_v51  ;;  %v5182_v40 = vmul.f32 %v7671_v1, %v4594_v61 }
 0x39a   : > { %v4469_v37 = vmul.f32 %v4405_v22, %v10243_v25  ;;  %v5107_v42 = vadd.f32 -0.014264739, %v5043_v6  ;;  %v7673_v16 = vpop.eup %7672  ;;  %v4854_v7 = vadd.f32 -0.001682827, %v4790_v4  ;;  %v4660_v33 = vmul.f32 -1.45660715e-05, %v10335_v51 }
 0x39b   : > { %v4339_v2 = vmul.f32 %v4275_v20, %v10272_v50  ;;  %v10346_v29 = vmul.f32 %v10338_v21, %v10338_v21  ;;  %v4086_v56 = vmul.f32 %v4022_v26, %v10308_v5  ;;  %v3892_v28 = vadd.f32 2.7706815e-08, %v3828_v63 }
 0x39c   : > { %v4533_v59 = vadd.f32 -0.016096033, %v4469_v37  ;;  %7676 = vrcp.f32 %v5107_v42  ;;  %v4918_v25 = vmul.f32 %v4854_v7, %v10308_v5  ;;  %v4724_v39 = vadd.f32 -0.00021337405, %v4660_v33 }
 0x39d   : > { %v4403_v22 = vadd.f32 -0.0029546, %v4339_v2  ;;  %v3833_v19 = vmul.f32 -2.7261424e-10, %v10346_v29  ;;  %v4150_v6 = vadd.f32 -5.6925062e-05, %v4086_v56  ;;  %v3956_v46 = vmul.f32 %v3892_v28, %v10335_v51 }
 0x39e   : > { %v4665_v20 = vmul.f32 -1.45660715e-05, %v10346_v29  ;;  %v4982_v9 = vadd.f32 -0.0073733293, %v4918_v25  ;;  %v4788_v37 = vmul.f32 %v4724_v39, %v10335_v51  ;;  %v5178_v26 = vmul.f32 %v7673_v16, %v4592_v12 }
 0x39f   : > { %v4467_v4 = vmul.f32 %v4403_v22, %v10272_v50  ;;  %v3897_v42 = vadd.f32 2.7706815e-08, %v3833_v19  ;;  %v4214_v63 = vmul.f32 %v4150_v6, %v10308_v5  ;;  %v4020_v2 = vadd.f32 -2.101024e-06, %v3956_v46 }
 0x3a0   : > { %v4729_v7 = vadd.f32 -0.00021337405, %v4665_v20  ;;  %v4597_v33 = vmul.f32 %v10236_v17, %v4533_v59  ;;  %v5046_v1 = vmul.f32 %v4982_v9, %v10308_v5  ;;  %v4852_v61 = vadd.f32 -0.001682827, %v4788_v37  ;;  %v10365_v17 = vld [vmem:[%s12404_s7] ss:$0 sm:$0xff] }
 0x3a1   : > { %v3961_v56 = vmul.f32 %v3897_v42, %v10346_v29  ;;  %v4531_v28 = vadd.f32 -0.016096033, %v4467_v4  ;;  %v4278_v44 = vadd.f32 -0.00073499064, %v4214_v63  ;;  %v4084_v50 = vmul.f32 %v4020_v2, %v10335_v51  ;;  %v7675_v25 = vpop.eup %7674 }
 0x3a2   : > { %v4793_v22 = vmul.f32 %v4729_v7, %v10346_v29  ;;  %v5110_v39 = vadd.f32 -0.014264739, %v5046_v1  ;;  %v4916_v12 = vmul.f32 %v4852_v61, %v10335_v51  ;;  %v3305_v9 = vadd.f32 %v10365_v17, %v9991_v36 }
 0x3a3   : > { %v4025_v16 = vadd.f32 -2.101024e-06, %v3961_v56  ;;  %v5298_v59 = vadd.f32 1.0, %v5182_v40  ;;  %v4342_v19 = vmul.f32 %v4278_v44, %v10308_v5  ;;  %v4148_v6 = vadd.f32 -5.6925062e-05, %v4084_v50 }
 0x3a4   : > { %v4857_v46 = vadd.f32 -0.001682827, %v4793_v22  ;;  %v5296_v20 = vadd.f32 1.0, %v5178_v26  ;;  %7678 = vrcp.f32 %v5110_v39  ;;  %v4980_v4 = vadd.f32 -0.0073733293, %v4916_v12 }
 0x3a5   : > { %v4089_v37 = vmul.f32 %v4025_v16, %v10346_v29  ;;  %v4595_v63 = vmul.f32 %v10262_v8, %v4531_v28  ;;  %v4406_v2 = vadd.f32 -0.0029546, %v4342_v19  ;;  %v4212_v7 = vmul.f32 %v4148_v6, %v10335_v51 }
 0x3a6   : > { %v7677_v42 = vpop.eup %7676  ;;  %v4921_v1 = vmul.f32 %v4857_v46, %v10346_v29  ;;  %v5188_v61 = vmul.f32 %v7675_v25, %v4597_v33  ;;  %v5044_v36 = vmul.f32 %v4980_v4, %v10335_v51  ;;  %v3575_v44 = vmul.f32 0.70710677, %v3305_v9 }
 0x3a7   : > { %v4153_v40 = vadd.f32 -5.6925062e-05, %v4089_v37  ;;  %v4470_v56 = vmul.f32 %v4406_v2, %v10308_v5  ;;  %v4276_v26 = vadd.f32 -0.00073499064, %v4212_v7  ;;  %v3316_v22 = vadd.f32 %v10365_v17, %v9994_v31 }
 0x3a8   : > { %v4985_v50 = vadd.f32 -0.0073733293, %v4921_v1  ;;  %v10379_v39 = vmul.f32 %v5298_v59, %v10194_v11  ;;  %v10382_v8 = vmul.f32 0.5, %v10296_v0  ;;  %v10385_v33 = vclamps-f32 %v3575_v44, 4.0 }
 0x3a9   : > { %v4217_v28 = vmul.f32 %v4153_v40, %v10346_v29  ;;  %v5184_v25 = vmul.f32 %v7677_v42, %v4595_v63  ;;  %v4534_v12 = vadd.f32 -0.016096033, %v4470_v56  ;;  %v4340_v16 = vmul.f32 %v4276_v26, %v10335_v51 }
 0x3aa   : > { %v5108_v5 = vadd.f32 -0.014264739, %v5044_v36  ;;  %v10389_v19 = vmul.f32 %v5296_v20, %v10253_v18  ;;  %v5301_v6 = vadd.f32 1.0, %v5188_v61  ;;  %v10393_v11 = vmul.f32 %v10385_v33, %v10385_v33 }
 0x3ab   : > { %v4281_v31 = vadd.f32 -0.00073499064, %v4217_v28  ;;  %v4598_v0 = vmul.f32 %v10299_v57, %v4534_v12  ;;  %v4404_v59 = vadd.f32 -0.0029546, %v4340_v16  ;;  %v5049_v46 = vmul.f32 %v4985_v50, %v10346_v29 }
 0x3ac   : > { %v3578_v4 = vmul.f32 0.70710677, %v3316_v22  ;;  %v3831_v42 = vmul.f32 -2.7261424e-10, %v10393_v11  ;;  %v4663_v63 = vmul.f32 -1.45660715e-05, %v10393_v11  ;;  %v3308_v18 = vadd.f32 %v10365_v17, %v9998_v13 }
 0x3ad   : > { %v4345_v37 = vmul.f32 %v4281_v31, %v10346_v29  ;;  %v5299_v20 = vadd.f32 1.0, %v5184_v25  ;;  %7680 = vrcp.f32 %v5108_v5  ;;  %v10402_v2 = vmul.f32 0.5, %v3305_v9  ;;  %v10416_v9 = vpop.f32.mrb[32].mxu1 }
 0x3ae   : > { %v10404_v7 = vclamps-f32 %v3578_v4, 4.0  ;;  %v7679_v57 = vpop.eup %7678  ;;  %v4468_v1 = vmul.f32 %v4404_v59, %v10335_v51  ;;  %v3895_v36 = vadd.f32 2.7706815e-08, %v3831_v42  ;;  %v4727_v40 = vadd.f32 -0.00021337405, %v4663_v63  ;;  %v10420_v12 = vpop.f32.mrb[33].mxu1 }
 0x3af   : > { %v4409_v61 = vadd.f32 -0.0029546, %v4345_v37  ;;  %v10408_v44 = vmul.f32 %v5301_v6, %v10267_v23  ;;  %v5113_v56 = vadd.f32 -0.014264739, %v5049_v46  ;;  %v10410_v26 = vmul.f32 0.5, %v3316_v22  ;;  %v10428_v6 = vpop.f32.mrb[34].mxu1 }
 0x3b0   : > { %v10414_v13 = vmul.f32 %v10404_v7, %v10404_v7  ;;  %v5190_v50 = vmul.f32 %v7679_v57, %v4598_v0  ;;  %v3959_v28 = vmul.f32 %v3895_v36, %v10393_v11  ;;  %v4791_v51 = vmul.f32 %v4727_v40, %v10393_v11 }
 0x3b1   : > { %v3576_v25 = vmul.f32 0.70710677, %v3308_v18  ;;  %v10423_v23 = vmul.f32 %v5299_v20, %v10278_v27  ;;  %v4473_v22 = vmul.f32 %v4409_v61, %v10346_v29  ;;  %v4532_v31 = vadd.f32 -0.016096033, %v4468_v1  ;;  %v10434_v27 = vpop.f32.mrb[35].mxu1 }
 0x3b2   : > { %v3834_v16 = vmul.f32 -2.7261424e-10, %v10414_v13  ;;  %v4666_v5 = vmul.f32 -1.45660715e-05, %v10414_v13  ;;  %v4023_v0 = vadd.f32 -2.101024e-06, %v3959_v28  ;;  %v3329_v46 = vadd.f32 %v10365_v17, %v10083_v43 }
 0x3b3   : > { %v4855_v59 = vadd.f32 -0.001682827, %v4791_v51  ;;  %7682 = vrcp.f32 %v5113_v56  ;;  %v10432_v42 = vclamps-f32 %v3576_v25, 4.0  ;;  %v5302_v29 = vadd.f32 1.0, %v5190_v50 }
 0x3b4   : > { %v3898_v4 = vadd.f32 2.7706815e-08, %v3834_v16  ;;  %v4730_v37 = vadd.f32 -0.00021337405, %v4666_v5  ;;  %v4087_v63 = vmul.f32 %v4023_v0, %v10393_v11  ;;  %v10440_v57 = vadd.f32 %v10365_v17, %v10088_v55 }
 0x3b5   : > { %v4919_v20 = vmul.f32 %v4855_v59, %v10393_v11  ;;  %v4537_v1 = vadd.f32 -0.016096033, %v4473_v22  ;;  %v10446_v36 = vmul.f32 %v10432_v42, %v10432_v42  ;;  %v4596_v40 = vmul.f32 %v10314_v34, %v4532_v31 }
 0x3b6   : > { %v3962_v61 = vmul.f32 %v3898_v4, %v10414_v13  ;;  %v4794_v43 = vmul.f32 %v4730_v37, %v10414_v13  ;;  %v4151_v56 = vadd.f32 -5.6925062e-05, %v4087_v63  ;;  %v3581_v28 = vmul.f32 0.70710677, %v3329_v46 }
 0x3b7   : > { %v4983_v50 = vadd.f32 -0.0073733293, %v4919_v20  ;;  %v7681_v51 = vpop.eup %7680  ;;  %v10449_v5 = vmul.f32 0.5, %v3308_v18  ;;  %v10453_v55 = vadd.f32 %v10365_v17, %v10095_v41  ;;  %v10456_v22 = vmul.f32 %v5302_v29, %v10289_v24 }
 0x3b8   : > { %v4026_v25 = vadd.f32 -2.101024e-06, %v3962_v61  ;;  %v4858_v16 = vadd.f32 -0.001682827, %v4794_v43  ;;  %v4215_v0 = vmul.f32 %v4151_v56, %v10393_v11  ;;  %v3832_v34 = vmul.f32 -2.7261424e-10, %v10446_v36 }
 0x3b9   : > { %v5047_v59 = vmul.f32 %v4983_v50, %v10393_v11  ;;  %v4601_v31 = vmul.f32 %v10338_v21, %v4537_v1  ;;  %v4664_v37 = vmul.f32 -1.45660715e-05, %v10446_v36  ;;  %v5186_v63 = vmul.f32 %v7681_v51, %v4596_v40 }
 0x3ba   : > { %v4090_v4 = vmul.f32 %v4026_v25, %v10414_v13  ;;  %v4922_v18 = vmul.f32 %v4858_v16, %v10414_v13  ;;  %v4279_v41 = vadd.f32 -0.00073499064, %v4215_v0  ;;  %v10465_v61 = vclamps-f32 %v3581_v28, 4.0 }
 0x3bb   : > { %v5111_v20 = vadd.f32 -0.014264739, %v5047_v59  ;;  %v3896_v43 = vadd.f32 2.7706815e-08, %v3832_v34  ;;  %v5415_v56 = vpack.c.bf16 %v10142_v49, %v10136_v62  ;;  %v4728_v21 = vadd.f32 -0.00021337405, %v4664_v37 }
 0x3bc   : > { %v4154_v24 = vadd.f32 -5.6925062e-05, %v4090_v4  ;;  %v4986_v29 = vadd.f32 -0.0073733293, %v4922_v18  ;;  %v4343_v50 = vmul.f32 %v4279_v41, %v10393_v11  ;;  %v10470_v1 = vmul.f32 0.5, %v3329_v46 }
 0x3bd   : > { %v10474_v25 = vadd.f32 %v10365_v17, %v10100_v45  ;;  %v7683_v40 = vpop.eup %7682  ;;  %v3960_v16 = vmul.f32 %v3896_v43, %v10446_v36  ;;  %v10481_v0 = vmul.f32 %v10465_v61, %v10465_v61  ;;  %7357 = vmatprep.mubr.bf16.mxu0 %v5415_v56  ;;  %v5300_v62 = vadd.f32 1.0, %v5186_v63 }
 0x3be   : > { %v4218_v51 = vmul.f32 %v4154_v24, %v10414_v13  ;;  %v5050_v28 = vmul.f32 %v4986_v29, %v10414_v13  ;;  %v4407_v49 = vadd.f32 -0.0029546, %v4343_v50  ;;  %v4792_v46 = vmul.f32 %v4728_v21, %v10446_v36 }
 0x3bf   : > { %v3579_v59 = vmul.f32 0.70710677, %v10440_v57  ;;  %v12466_v45 = vpack.c.bf16 %v10065_v58, %v10063_v53  ;;  %7684 = vrcp.f32 %v5111_v20  ;;  %v4024_v18 = vadd.f32 -2.101024e-06, %v3960_v16 }
 0x3c0   : > { %v4282_v34 = vadd.f32 -0.00073499064, %v4218_v51  ;;  %v5114_v4 = vadd.f32 -0.014264739, %v5050_v28  ;;  %v4471_v37 = vmul.f32 %v4407_v49, %v10393_v11  ;;  %v4856_v41 = vadd.f32 -0.001682827, %v4792_v46 }
 0x3c1   : > { %7358 = vmatmul.mubr.bf16.vlgmr.msra.gmra.mrb[64].mxu0 %v12466_v45  ;;  %v3837_v24 = vmul.f32 -2.7261424e-10, %v10481_v0  ;;  %v4669_v63 = vmul.f32 -1.45660715e-05, %v10481_v0  ;;  %v5196_v29 = vmul.f32 %v7683_v40, %v4601_v31  ;;  %v4088_v56 = vmul.f32 %v4024_v18, %v10446_v36 }
 0x3c2   : > { %v4346_v43 = vmul.f32 %v4282_v34, %v10414_v13  ;;  %v10493_v50 = vclamps-f32 %v3579_v59, 4.0  ;;  %7686 = vrcp.f32 %v5114_v4  ;;  %v4920_v53 = vmul.f32 %v4856_v41, %v10446_v36 }
 0x3c3   : > { %v3901_v58 = vadd.f32 2.7706815e-08, %v3837_v24  ;;  %v4733_v20 = vadd.f32 -0.00021337405, %v4669_v63  ;;  %v4152_v51 = vadd.f32 -5.6925062e-05, %v4088_v56 }
 0x3c4   : > { %v4410_v21 = vadd.f32 -0.0029546, %v4346_v43  ;;  %v10498_v11 = vmul.f32 %v10493_v50, %v10493_v50  ;;  %v3582_v28 = vmul.f32 0.70710677, %v10453_v55  ;;  %v4535_v31 = vadd.f32 -0.016096033, %v4471_v37 }
 0x3c5   : > { %v4984_v40 = vadd.f32 -0.0073733293, %v4920_v53  ;;  %v3965_v16 = vmul.f32 %v3901_v58, %v10481_v0  ;;  %v4797_v49 = vmul.f32 %v4733_v20, %v10481_v0  ;;  %v4216_v59 = vmul.f32 %v4152_v51, %v10446_v36 }
 0x3c6   : > { %v4474_v46 = vmul.f32 %v4410_v21, %v10414_v13  ;;  %v3835_v45 = vmul.f32 -2.7261424e-10, %v10498_v11  ;;  %v4667_v34 = vmul.f32 -1.45660715e-05, %v10498_v11  ;;  %v10509_v24 = vmul.f32 0.5, %v10440_v57 }
 0x3c7   : > { %v5048_v4 = vmul.f32 %v4984_v40, %v10446_v36  ;;  %v4029_v18 = vadd.f32 -2.101024e-06, %v3965_v16  ;;  %v4861_v41 = vadd.f32 -0.001682827, %v4797_v49  ;;  %v5305_v37 = vadd.f32 1.0, %v5196_v29 }
 0x3c8   : > { %v4280_v63 = vadd.f32 -0.00073499064, %v4216_v59  ;;  %v3899_v43 = vadd.f32 2.7706815e-08, %v3835_v45  ;;  %v10511_v56 = vclamps-f32 %v3582_v28, 4.0  ;;  %v4599_v13 = vmul.f32 %v10385_v33, %v4535_v31 }
 0x3c9   : > { %v4093_v53 = vmul.f32 %v4029_v18, %v10481_v0  ;;  %v4925_v58 = vmul.f32 %v4861_v41, %v10481_v0  ;;  %v4731_v20 = vadd.f32 -0.00021337405, %v4667_v34  ;;  %v7685_v21 = vpop.eup %7684  ;;  %v10517_v51 = vmul.f32 %v5300_v62, %v10329_v3 }
 0x3ca   : > { %v4538_v40 = vadd.f32 -0.016096033, %v4474_v46  ;;  %v4344_v57 = vmul.f32 %v4280_v63, %v10446_v36  ;;  %v3963_v29 = vmul.f32 %v3899_v43, %v10498_v11  ;;  %v5112_v16 = vadd.f32 -0.014264739, %v5048_v4 }
 0x3cb   : > { %v4157_v49 = vadd.f32 -5.6925062e-05, %v4093_v53  ;;  %v4989_v28 = vadd.f32 -0.0073733293, %v4925_v58  ;;  %v4795_v59 = vmul.f32 %v4731_v20, %v10498_v11  ;;  %v10523_v33 = vmul.f32 %v5305_v37, %v10382_v8 }
 0x3cc   : > { %v4408_v31 = vadd.f32 -0.0029546, %v4344_v57  ;;  %v4027_v45 = vadd.f32 -2.101024e-06, %v3963_v29  ;;  %v10527_v34 = vmul.f32 %v10511_v56, %v10511_v56  ;;  %v7687_v3 = vpop.eup %7686  ;;  %v5192_v62 = vmul.f32 %v7685_v21, %v4599_v13 }
 0x3cd   : > { %12467 = vst [vmem:[#allocation22_spill] sm:$0xff] %v10523_v33  ;;  %v4221_v46 = vmul.f32 %v4157_v49, %v10481_v0  ;;  %v5053_v18 = vmul.f32 %v4989_v28, %v10481_v0  ;;  %v4859_v4 = vadd.f32 -0.001682827, %v4795_v59  ;;  %v4602_v41 = vmul.f32 %v10404_v7, %v4538_v40 }
 0x3ce   : > { %v4091_v63 = vmul.f32 %v4027_v45, %v10498_v11  ;;  %v3838_v8 = vmul.f32 -2.7261424e-10, %v10527_v34  ;;  %v4670_v37 = vmul.f32 -1.45660715e-05, %v10527_v34  ;;  %7688 = vrcp.f32 %v5112_v16 }
 0x3cf   : > { %v4285_v43 = vadd.f32 -0.00073499064, %v4221_v46  ;;  %v5117_v53 = vadd.f32 -0.014264739, %v5053_v18  ;;  %v4923_v58 = vmul.f32 %v4859_v4, %v10498_v11  ;;  %v4472_v13 = vmul.f32 %v4408_v31, %v10446_v36 }
 0x3d0   : > { %v4155_v20 = vadd.f32 -5.6925062e-05, %v4091_v63  ;;  %v10538_v21 = vmul.f32 0.5, %v10453_v55  ;;  %v3902_v57 = vadd.f32 2.7706815e-08, %v3838_v8  ;;  %v5303_v29 = vadd.f32 1.0, %v5192_v62 }
 0x3d1   : > { %v4349_v7 = vmul.f32 %v4285_v43, %v10481_v0  ;;  %v4987_v40 = vadd.f32 -0.0073733293, %v4923_v58  ;;  %v3345_v49 = vadd.f32 %v10365_v17, %v10221_v35  ;;  %v5198_v28 = vmul.f32 %v7687_v3, %v4602_v41 }
 0x3d2   : > { %v4219_v16 = vmul.f32 %v4155_v20, %v10498_v11  ;;  %v3966_v59 = vmul.f32 %v3902_v57, %v10527_v34  ;;  %v4734_v45 = vadd.f32 -0.00021337405, %v4670_v37  ;;  %7690 = vrcp.f32 %v5117_v53 }
 0x3d3   : > { %v4413_v46 = vadd.f32 -0.0029546, %v4349_v7  ;;  %v5051_v36 = vmul.f32 %v4987_v40, %v10498_v11  ;;  %v3580_v55 = vmul.f32 0.70710677, %v10474_v25  ;;  %v4536_v31 = vadd.f32 -0.016096033, %v4472_v13 }
 0x3d4   : > { %v4283_v62 = vadd.f32 -0.00073499064, %v4219_v16  ;;  %v4030_v18 = vadd.f32 -2.101024e-06, %v3966_v59  ;;  %v4798_v4 = vmul.f32 %v4734_v45, %v10527_v34  ;;  %v10549_v63 = vmul.f32 %v5303_v29, %v10402_v2 }
 0x3d5   : > { %v4477_v35 = vmul.f32 %v4413_v46, %v10481_v0  ;;  %v10552_v3 = vclamps-f32 %v3580_v55, 4.0  ;;  %v3585_v41 = vmul.f32 0.70710677, %v3345_v49  ;;  %v5306_v8 = vadd.f32 1.0, %v5198_v28 }
 0x3d6   : > { %12468 = vst [vmem:[#allocation19_spill] sm:$0xff] %v10549_v63  ;;  %v4347_v37 = vmul.f32 %v4283_v62, %v10498_v11  ;;  %v4094_v43 = vmul.f32 %v4030_v18, %v10527_v34  ;;  %v4862_v53 = vadd.f32 -0.001682827, %v4798_v4  ;;  %v5115_v58 = vadd.f32 -0.014264739, %v5051_v36 }
 0x3d7   : > { %v10558_v13 = vmul.f32 %v10552_v3, %v10552_v3  ;;  %v10560_v20 = vclamps-f32 %v3585_v41, 4.0  ;;  %v10564_v2 = vadd.f32 %v10365_v17, %v10225_v60  ;;  %v4600_v0 = vmul.f32 %v10432_v42, %v4536_v31  ;;  %v10568_v40 = vpop.f32.mrb[36].mxu1 }
 0x3d8   : > { %v4541_v57 = vadd.f32 -0.016096033, %v4477_v35  ;;  %v4158_v29 = vadd.f32 -5.6925062e-05, %v4094_v43  ;;  %v4926_v7 = vmul.f32 %v4862_v53, %v10527_v34  ;;  %v7689_v28 = vpop.eup %7688  ;;  %v10571_v16 = vmul.f32 0.5, %v10474_v25  ;;  %v10579_v46 = vpop.f32.mrb[37].mxu1 }
 0x3d9   : > { %v3836_v59 = vmul.f32 -2.7261424e-10, %v10558_v13  ;;  %v4668_v45 = vmul.f32 -1.45660715e-05, %v10558_v13  ;;  %v10577_v60 = vmul.f32 %v10560_v20, %v10560_v20  ;;  %v4411_v42 = vadd.f32 -0.0029546, %v4347_v37 }
 0x3da   : > { %v4222_v36 = vmul.f32 %v4158_v29, %v10527_v34  ;;  %v4990_v55 = vadd.f32 -0.0073733293, %v4926_v7  ;;  %v10582_v31 = vmul.f32 0.5, %v3345_v49  ;;  %v10584_v62 = vpop.f32.mrb[38].mxu1  ;;  %v10587_v25 = vmul.f32 %v5306_v8, %v10410_v26 }
 0x3db   : > { %v3900_v18 = vadd.f32 2.7706815e-08, %v3836_v59  ;;  %v4732_v4 = vadd.f32 -0.00021337405, %v4668_v45  ;;  %v3841_v35 = vmul.f32 -2.7261424e-10, %v10577_v60  ;;  %v5194_v41 = vmul.f32 %v7689_v28, %v4600_v0 }
 0x3dc   : > { %12469 = vst [vmem:[#allocation23_spill] sm:$0xff] %v10587_v25  ;;  %v4605_v43 = vmul.f32 %v10465_v61, %v4541_v57  ;;  %v4286_v53 = vadd.f32 -0.00073499064, %v4222_v36  ;;  %v5054_v37 = vmul.f32 %v4990_v55, %v10527_v34  ;;  %v10592_v33 = vpop.f32.mrb[39].mxu1  ;;  %v7691_v29 = vpop.eup %7690  ;;  %v4673_v26 = vmul.f32 -1.45660715e-05, %v10577_v60 }
 0x3dd   : > { %v3964_v49 = vmul.f32 %v3900_v18, %v10558_v13  ;;  %v4796_v7 = vmul.f32 %v4732_v4, %v10558_v13  ;;  %v3905_v63 = vadd.f32 2.7706815e-08, %v3841_v35  ;;  %v4475_v8 = vmul.f32 %v4411_v42, %v10498_v11 }
 0x3de   : > { %7692 = vrcp.f32 %v5115_v58  ;;  %v4350_v0 = vmul.f32 %v4286_v53, %v10527_v34  ;;  %v5118_v28 = vadd.f32 -0.014264739, %v5054_v37  ;;  %v4737_v45 = vadd.f32 -0.00021337405, %v4673_v26 }
 0x3df   : > { %v4028_v61 = vadd.f32 -2.101024e-06, %v3964_v49  ;;  %v4860_v57 = vadd.f32 -0.001682827, %v4796_v7  ;;  %v3969_v59 = vmul.f32 %v3905_v63, %v10577_v60  ;;  %v5304_v36 = vadd.f32 1.0, %v5194_v41 }
 0x3e0   : > { %v5204_v55 = vmul.f32 %v7691_v29, %v4605_v43  ;;  %v4414_v25 = vadd.f32 -0.0029546, %v4350_v0  ;;  %v10602_v18 = vadd.f32 %v10365_v17, %v10232_v47  ;;  %v4801_v42 = vmul.f32 %v4737_v45, %v10577_v60 }
 0x3e1   : > { %v4092_v4 = vmul.f32 %v4028_v61, %v10558_v13  ;;  %v4924_v11 = vmul.f32 %v4860_v57, %v10558_v13  ;;  %v4033_v58 = vadd.f32 -2.101024e-06, %v3969_v59  ;;  %v4539_v35 = vadd.f32 -0.016096033, %v4475_v8 }
 0x3e2   : > { %v4478_v53 = vmul.f32 %v4414_v25, %v10527_v34  ;;  %7694 = vrcp.f32 %v5118_v28  ;;  %v3583_v63 = vmul.f32 0.70710677, %v10564_v2  ;;  %v4865_v29 = vadd.f32 -0.001682827, %v4801_v42 }
 0x3e3   : > { %v4156_v41 = vadd.f32 -5.6925062e-05, %v4092_v4  ;;  %v4988_v43 = vadd.f32 -0.0073733293, %v4924_v11  ;;  %v4097_v37 = vmul.f32 %v4033_v58, %v10577_v60  ;;  %v5309_v47 = vadd.f32 1.0, %v5204_v55 }
 0x3e4   : > { %v4542_v49 = vadd.f32 -0.016096033, %v4478_v53  ;;  %v10610_v7 = vclamps-f32 %v3583_v63, 4.0  ;;  %v3586_v26 = vmul.f32 0.70710677, %v10602_v18  ;;  %v4929_v34 = vmul.f32 %v4865_v29, %v10577_v60 }
 0x3e5   : > { %v4220_v0 = vmul.f32 %v4156_v41, %v10558_v13  ;;  %v5052_v8 = vmul.f32 %v4988_v43, %v10558_v13  ;;  %v4161_v61 = vadd.f32 -5.6925062e-05, %v4097_v37  ;;  %v10617_v25 = vmul.f32 %v5304_v36, %v10449_v5 }
 0x3e6   : > { %v4603_v28 = vmul.f32 %v10493_v50, %v4539_v35  ;;  %v10622_v57 = vmul.f32 %v10610_v7, %v10610_v7  ;;  %v10624_v59 = vclamps-f32 %v3586_v26, 4.0  ;;  %v4993_v11 = vadd.f32 -0.0073733293, %v4929_v34  ;;  %v10639_v43 = vpop.f32.mrb[40].mxu1 }
 0x3e7   : > { %v4284_v45 = vadd.f32 -0.00073499064, %v4220_v0  ;;  %v5116_v55 = vadd.f32 -0.014264739, %v5052_v8  ;;  %v4225_v4 = vmul.f32 %v4161_v61, %v10577_v60  ;;  %v10628_v42 = vmul.f32 %v5309_v47, %v10470_v1 }
 0x3e8   : > { %v7693_v58 = vpop.eup %7692  ;;  %v3839_v5 = vmul.f32 -2.7261424e-10, %v10622_v57  ;;  %v4671_v36 = vmul.f32 -1.45660715e-05, %v10622_v57  ;;  %v10634_v50 = vmul.f32 %v10624_v59, %v10624_v59  ;;  %v4606_v35 = vmul.f32 %v10511_v56, %v4542_v49  ;;  %v10645_v56 = vpop.f32.mrb[41].mxu1 }
 0x3e9   : > { %12470 = vst [vmem:[#allocation24_spill] sm:$0xff] %v10628_v42  ;;  %v4348_v53 = vmul.f32 %v4284_v45, %v10558_v13  ;;  %v4289_v63 = vadd.f32 -0.00073499064, %v4225_v4  ;;  %v5057_v41 = vmul.f32 %v4993_v11, %v10577_v60  ;;  %v5417_v47 = vpack.c.bf16 %v10260_v15, %v10247_v38  ;;  %v10650_v11 = vpop.f32.mrb[42].mxu1 }
 0x3ea   : > { %v3903_v37 = vadd.f32 2.7706815e-08, %v3839_v5  ;;  %v4735_v1 = vadd.f32 -0.00021337405, %v4671_v36  ;;  %v3842_v29 = vmul.f32 -2.7261424e-10, %v10634_v50  ;;  %7696 = vrcp.f32 %v5116_v55 }
 0x3eb   : > { %v4412_v26 = vadd.f32 -0.0029546, %v4348_v53  ;;  %v4353_v0 = vmul.f32 %v4289_v63, %v10577_v60  ;;  %v5121_v8 = vadd.f32 -0.014264739, %v5057_v41  ;;  %v4674_v4 = vmul.f32 -1.45660715e-05, %v10634_v50  ;;  %7361 = vmatprep.mubr.bf16.mxu0 %v5417_v47 }
 0x3ec   : > { %v7695_v49 = vpop.eup %7694  ;;  %v3967_v61 = vmul.f32 %v3903_v37, %v10622_v57  ;;  %v4799_v34 = vmul.f32 %v4735_v1, %v10622_v57  ;;  %v3906_v45 = vadd.f32 2.7706815e-08, %v3842_v29  ;;  %v10655_v55 = vadd.f32 %v10365_v17, %v10238_v10  ;;  %v10657_v5 = vpop.f32.mrb[43].mxu1 }
 0x3ed   : > { %v4476_v38 = vmul.f32 %v4412_v26, %v10558_v13  ;;  %v4417_v15 = vadd.f32 -0.0029546, %v4353_v0  ;;  %7698 = vrcp.f32 %v5121_v8  ;;  %v4738_v41 = vadd.f32 -0.00021337405, %v4674_v4 }
 0x3ee   : > { %v4031_v36 = vadd.f32 -2.101024e-06, %v3967_v61  ;;  %v4863_v53 = vadd.f32 -0.001682827, %v4799_v34  ;;  %v3970_v63 = vmul.f32 %v3906_v45, %v10634_v50  ;;  %v5200_v37 = vmul.f32 %v7693_v58, %v4603_v28 }
 0x3ef   : > { %v5206_v1 = vmul.f32 %v7695_v49, %v4606_v35  ;;  %v4540_v29 = vadd.f32 -0.016096033, %v4476_v38  ;;  %v4481_v47 = vmul.f32 %v4417_v15, %v10577_v60  ;;  %v4802_v10 = vmul.f32 %v4738_v41, %v10634_v50 }
 0x3f0   : > { %v4095_v13 = vmul.f32 %v4031_v36, %v10622_v57  ;;  %v4927_v26 = vmul.f32 %v4863_v53, %v10622_v57  ;;  %v4034_v0 = vadd.f32 -2.101024e-06, %v3970_v63  ;;  %v10665_v42 = vmul.f32 0.5, %v10564_v2 }
 0x3f1   : > { %v4545_v8 = vadd.f32 -0.016096033, %v4481_v47  ;;  %v3584_v61 = vmul.f32 0.70710677, %v10655_v55  ;;  %v10670_v28 = vadd.f32 %v10365_v17, %v10301_v54  ;;  %v4866_v49 = vadd.f32 -0.001682827, %v4802_v10 }
 0x3f2   : > { %v4159_v58 = vadd.f32 -5.6925062e-05, %v4095_v13  ;;  %v4991_v35 = vadd.f32 -0.0073733293, %v4927_v26  ;;  %v4098_v60 = vmul.f32 %v4034_v0, %v10634_v50  ;;  %v5307_v34 = vadd.f32 1.0, %v5200_v37 }
 0x3f3   : > { %v5310_v45 = vadd.f32 1.0, %v5206_v1  ;;  %v10673_v4 = vclamps-f32 %v3584_v61, 4.0  ;;  %v3589_v38 = vmul.f32 0.70710677, %v10670_v28  ;;  %v4604_v2 = vmul.f32 %v10552_v3, %v4540_v29 }
 0x3f4   : > { %v4223_v15 = vmul.f32 %v4159_v58, %v10622_v57  ;;  %v5055_v36 = vmul.f32 %v4991_v35, %v10622_v57  ;;  %v4162_v53 = vadd.f32 -5.6925062e-05, %v4098_v60  ;;  %v7697_v54 = vpop.eup %7696  ;;  %v4930_v63 = vmul.f32 %v4866_v49, %v10634_v50 }
 0x3f5   : > { %v10682_v41 = vmul.f32 %v10673_v4, %v10673_v4  ;;  %v10684_v37 = vclamps-f32 %v3589_v38, 4.0  ;;  %v5418_v1 = vpack.c.bf16 %v10250_v14, %v10179_v32  ;;  %v4609_v47 = vmul.f32 %v10560_v20, %v4545_v8 }
 0x3f6   : > { %v4287_v3 = vadd.f32 -0.00073499064, %v4223_v15  ;;  %v5119_v29 = vadd.f32 -0.014264739, %v5055_v36  ;;  %v4226_v13 = vmul.f32 %v4162_v53, %v10634_v50  ;;  %v10690_v26 = vpop.f32.mrb[44].mxu1  ;;  %v10693_v10 = vmul.f32 0.5, %v10602_v18 }
 0x3f7   : > { %12471 = vst [vmem:[#allocation10_spill] sm:$0xff] %v10690_v26  ;;  %v7699_v0 = vpop.eup %7698  ;;  %v3840_v61 = vmul.f32 -2.7261424e-10, %v10682_v41  ;;  %v4672_v58 = vmul.f32 -1.45660715e-05, %v10682_v41  ;;  %v10699_v35 = vmul.f32 %v10684_v37, %v10684_v37  ;;  %7362 = vmatmul.mubr.bf16.gmra.mrb[68].mxu0 %v5418_v1  ;;  %v10702_v32 = vmul.f32 %v5307_v34, %v10509_v24  ;;  %v10708_v18 = vpop.f32.mrb[45].mxu1 }
 0x3f8   : > { %v10705_v14 = vmul.f32 %v5310_v45, %v10538_v21  ;;  %v4351_v20 = vmul.f32 %v4287_v3, %v10622_v57  ;;  %v4994_v8 = vadd.f32 -0.0073733293, %v4930_v63  ;;  %v5202_v60 = vmul.f32 %v7697_v54, %v4604_v2  ;;  %v10711_v26 = vpop.f32.mrb[46].mxu1 }
 0x3f9   : > { %v4290_v49 = vadd.f32 -0.00073499064, %v4226_v13  ;;  %v3904_v38 = vadd.f32 2.7706815e-08, %v3840_v61  ;;  %v4736_v15 = vadd.f32 -0.00021337405, %v4672_v58  ;;  %v5212_v36 = vmul.f32 %v7699_v0, %v4609_v47 }
 0x3fa   : > { %v4415_v53 = vadd.f32 -0.0029546, %v4351_v20  ;;  %7700 = vrcp.f32 %v5119_v29  ;;  %v3845_v1 = vmul.f32 -2.7261424e-10, %v10699_v35  ;;  %12472 = vst [vmem:[#allocation12_spill] sm:$0xff] %v10711_v26  ;;  %v3353_v45 = vadd.f32 %v10365_v17, %v10303_v48 }
 0x3fb   : > { %v4354_v24 = vmul.f32 %v4290_v49, %v10634_v50  ;;  %v3968_v21 = vmul.f32 %v3904_v38, %v10682_v41  ;;  %v4800_v34 = vmul.f32 %v4736_v15, %v10682_v41  ;;  %v10720_v54 = vmul.f32 0.5, %v10655_v55  ;;  %v10727_v15 = vpop.f32.mrb[47].mxu1 }
 0x3fc   : > { %v4479_v2 = vmul.f32 %v4415_v53, %v10622_v57  ;;  %v3909_v63 = vadd.f32 2.7706815e-08, %v3845_v1  ;;  %v4677_v47 = vmul.f32 -1.45660715e-05, %v10699_v35  ;;  %v5308_v3 = vadd.f32 1.0, %v5202_v60  ;;  %12473 = vst [vmem:[#allocation15_spill] sm:$0xff] %v10727_v15 }
 0x3fd   : > { %v5058_v29 = vmul.f32 %v4994_v8, %v10634_v50  ;;  %v4032_v13 = vadd.f32 -2.101024e-06, %v3968_v21  ;;  %v4864_v0 = vadd.f32 -0.001682827, %v4800_v34  ;;  %v5313_v61 = vadd.f32 1.0, %v5212_v36 }
 0x3fe   : > { %v4418_v58 = vadd.f32 -0.0029546, %v4354_v24  ;;  %v3973_v20 = vmul.f32 %v3909_v63, %v10699_v35  ;;  %v4741_v49 = vadd.f32 -0.00021337405, %v4677_v47  ;;  %v4543_v38 = vadd.f32 -0.016096033, %v4479_v2 }
 0x3ff   : > { %v4096_v48 = vmul.f32 %v4032_v13, %v10682_v41  ;;  %v4928_v57 = vmul.f32 %v4864_v0, %v10682_v41  ;;  %v3587_v55 = vmul.f32 0.70710677, %v3353_v45  ;;  %v10730_v53 = vmul.f32 0.5, %v10670_v28 }
 0x400   : > { %v4037_v60 = vadd.f32 -2.101024e-06, %v3973_v20  ;;  %v4805_v8 = vmul.f32 %v4741_v49, %v10699_v35  ;;  %v3364_v36 = vadd.f32 %v10365_v17, %v10310_v52  ;;  %v10736_v1 = vmul.f32 %v5308_v3, %v10571_v16 }
 0x401   : > { %v5122_v24 = vadd.f32 -0.014264739, %v5058_v29  ;;  %v4160_v21 = vadd.f32 -5.6925062e-05, %v4096_v48  ;;  %v4992_v34 = vadd.f32 -0.0073733293, %v4928_v57  ;;  %v10739_v2 = vmul.f32 %v5313_v61, %v10582_v31 }
 0x402   : > { %v4101_v63 = vmul.f32 %v4037_v60, %v10699_v35  ;;  %v4869_v47 = vadd.f32 -0.001682827, %v4805_v8  ;;  %v10742_v28 = vclamps-f32 %v3587_v55, 4.0  ;;  %v4607_v13 = vmul.f32 %v10610_v7, %v4543_v38 }
 0x403   : > { %12474 = vst [vmem:[#allocation11_spill] sm:$0xff] %v10739_v2  ;;  %v4482_v0 = vmul.f32 %v4418_v58, %v10634_v50  ;;  %v4224_v52 = vmul.f32 %v4160_v21, %v10682_v41  ;;  %v5056_v16 = vmul.f32 %v4992_v34, %v10682_v41  ;;  %v3590_v61 = vmul.f32 0.70710677, %v3364_v36 }
 0x404   : > { %v7701_v3 = vpop.eup %7700  ;;  %v4165_v29 = vadd.f32 -5.6925062e-05, %v4101_v63  ;;  %v4933_v20 = vmul.f32 %v4869_v47, %v10699_v35  ;;  %v10751_v31 = vmul.f32 %v10742_v28, %v10742_v28  ;;  %7702 = vrcp.f32 %v5122_v24 }
 0x405   : > { %v4288_v49 = vadd.f32 -0.00073499064, %v4224_v52  ;;  %v5120_v48 = vadd.f32 -0.014264739, %v5056_v16  ;;  %v3356_v7 = vadd.f32 %v10365_v17, %v10316_v30  ;;  %v4546_v55 = vadd.f32 -0.016096033, %v4482_v0 }
 0x406   : > { %v4229_v50 = vmul.f32 %v4165_v29, %v10699_v35  ;;  %v4997_v58 = vadd.f32 -0.0073733293, %v4933_v20  ;;  %v3843_v38 = vmul.f32 -2.7261424e-10, %v10751_v31  ;;  %v4675_v57 = vmul.f32 -1.45660715e-05, %v10751_v31 }
 0x407   : > { %v4352_v60 = vmul.f32 %v4288_v49, %v10682_v41  ;;  %v10759_v8 = vmul.f32 0.5, %v3353_v45  ;;  %v10761_v21 = vclamps-f32 %v3590_v61, 4.0  ;;  %v5208_v24 = vmul.f32 %v7701_v3, %v4607_v13  ;;  %v10770_v61 = vpop.f32.mrb[48].mxu1 }
 0x408   : > { %v4293_v34 = vadd.f32 -0.00073499064, %v4229_v50  ;;  %v5061_v63 = vmul.f32 %v4997_v58, %v10699_v35  ;;  %v3907_v47 = vadd.f32 2.7706815e-08, %v3843_v38  ;;  %7704 = vrcp.f32 %v5120_v48  ;;  %12475 = vst [vmem:[#allocation13_spill] sm:$0xff] %v10770_v61 }
 0x409   : > { %v4416_v30 = vadd.f32 -0.0029546, %v4352_v60  ;;  %v4739_v52 = vadd.f32 -0.00021337405, %v4675_v57  ;;  %v10766_v16 = vmul.f32 %v10761_v21, %v10761_v21  ;;  %v3588_v20 = vmul.f32 0.70710677, %v3356_v7 }
 0x40a   : > { %v4357_v0 = vmul.f32 %v4293_v34, %v10699_v35  ;;  %v5125_v29 = vadd.f32 -0.014264739, %v5061_v63  ;;  %v3971_v45 = vmul.f32 %v3907_v47, %v10751_v31  ;;  %v4610_v50 = vmul.f32 %v10624_v59, %v4546_v55  ;;  %v12476_v47 = vld [vmem:[#allocation20_spill] sm:$0xff] }
 0x40b   : > { %v4480_v13 = vmul.f32 %v4416_v30, %v10682_v41  ;;  %v4803_v3 = vmul.f32 %v4739_v52, %v10751_v31  ;;  %v3846_v49 = vmul.f32 -2.7261424e-10, %v10766_v16  ;;  %v4678_v48 = vmul.f32 -1.45660715e-05, %v10766_v16 }
 0x40c   : > { %v4421_v58 = vadd.f32 -0.0029546, %v4357_v0  ;;  %v4035_v38 = vadd.f32 -2.101024e-06, %v3971_v45  ;;  %v10777_v57 = vmul.f32 0.5, %v3364_v36  ;;  %v5419_v61 = vpack.c.bf16 %v10389_v19, %v12476_v47  ;;  %v10794_v45 = vpop.f32.mrb[49].mxu1 }
 0x40d   : > { %v4544_v60 = vadd.f32 -0.016096033, %v4480_v13  ;;  %v4867_v34 = vadd.f32 -0.001682827, %v4803_v3  ;;  %v3910_v63 = vadd.f32 2.7706815e-08, %v3846_v49  ;;  %7706 = vrcp.f32 %v5125_v29 }
 0x40e   : > { %v4485_v41 = vmul.f32 %v4421_v58, %v10699_v35  ;;  %v4099_v30 = vmul.f32 %v4035_v38, %v10751_v31  ;;  %v4742_v52 = vadd.f32 -0.00021337405, %v4678_v48  ;;  %v10783_v2 = vclamps-f32 %v3588_v20, 4.0  ;;  %v7703_v15 = vpop.eup %7702  ;;  %7365 = vmatprep.mubr.bf16.mxu0 %v5419_v61  ;;  %v12477_v13 = vld [vmem:[#allocation21_spill] sm:$0xff] }
 0x40f   : > { %v5311_v26 = vadd.f32 1.0, %v5208_v24  ;;  %v4931_v59 = vmul.f32 %v4867_v34, %v10751_v31  ;;  %v3974_v36 = vmul.f32 %v3910_v63, %v10766_v16  ;;  %v3377_v35 = vadd.f32 %v10365_v17, %v10416_v9 }
 0x410   : > { %v4163_v55 = vadd.f32 -5.6925062e-05, %v4099_v30  ;;  %v4806_v0 = vmul.f32 %v4742_v52, %v10766_v16  ;;  %v10790_v19 = vmul.f32 %v10783_v2, %v10783_v2  ;;  %v10796_v29 = vmul.f32 0.5, %v3356_v7 }
 0x411   : > { %v4995_v20 = vadd.f32 -0.0073733293, %v4931_v59  ;;  %v4038_v24 = vadd.f32 -2.101024e-06, %v3974_v36  ;;  %v5420_v3 = vpack.c.bf16 %v10379_v39, %v12477_v13  ;;  %v4608_v61 = vmul.f32 %v10673_v4, %v4544_v60 }
 0x412   : > { %v4549_v49 = vadd.f32 -0.016096033, %v4485_v41  ;;  %v4227_v48 = vmul.f32 %v4163_v55, %v10751_v31  ;;  %v4870_v58 = vadd.f32 -0.001682827, %v4806_v0  ;;  %v7705_v38 = vpop.eup %7704  ;;  %v3844_v63 = vmul.f32 -2.7261424e-10, %v10790_v19 }
 0x413   : > { %v5059_v34 = vmul.f32 %v4995_v20, %v10751_v31  ;;  %v4102_v9 = vmul.f32 %v4038_v24, %v10766_v16  ;;  %v4676_v47 = vmul.f32 -1.45660715e-05, %v10790_v19  ;;  %7366 = vmatmul.mubr.bf16.gmra.mrb[72].mxu0 %v5420_v3  ;;  %v10807_v7 = vmul.f32 %v5311_v26, %v10665_v42  ;;  %v10811_v24 = vpop.f32.mrb[50].mxu1 }
 0x414   : > { %v4291_v39 = vadd.f32 -0.00073499064, %v4227_v48  ;;  %v4934_v4 = vmul.f32 %v4870_v58, %v10766_v16  ;;  %v3593_v60 = vmul.f32 0.70710677, %v3377_v35  ;;  %v5214_v41 = vmul.f32 %v7703_v15, %v4610_v50 }
 0x415   : > { %v5123_v30 = vadd.f32 -0.014264739, %v5059_v34  ;;  %v4166_v52 = vadd.f32 -5.6925062e-05, %v4102_v9  ;;  %v3908_v59 = vadd.f32 2.7706815e-08, %v3844_v63  ;;  %v5210_v36 = vmul.f32 %v7705_v38, %v4608_v61 }
 0x416   : > { %v4355_v55 = vmul.f32 %v4291_v39, %v10751_v31  ;;  %v4998_v0 = vadd.f32 -0.0073733293, %v4934_v4  ;;  %v4740_v20 = vadd.f32 -0.00021337405, %v4676_v47  ;;  %v4613_v13 = vmul.f32 %v10684_v37, %v4549_v49 }
 0x417   : > { %v4230_v42 = vmul.f32 %v4166_v52, %v10766_v16  ;;  %v3972_v26 = vmul.f32 %v3908_v59, %v10790_v19  ;;  %v3369_v3 = vadd.f32 %v10365_v17, %v10420_v12  ;;  %v10820_v48 = vclamps-f32 %v3593_v60, 4.0  ;;  %v7707_v58 = vpop.eup %7706 }
 0x418   : > { %v4419_v15 = vadd.f32 -0.0029546, %v4355_v55  ;;  %v5062_v50 = vmul.f32 %v4998_v0, %v10766_v16  ;;  %v4804_v61 = vmul.f32 %v4740_v20, %v10790_v19  ;;  %v5314_v38 = vadd.f32 1.0, %v5214_v41  ;;  %v10837_v55 = vld [vmem:[%s12404_s7] ss:$0 sm:$0xff] }
 0x419   : > { %v4294_v34 = vadd.f32 -0.00073499064, %v4230_v42  ;;  %v4036_v9 = vadd.f32 -2.101024e-06, %v3972_v26  ;;  %v10822_v63 = vmul.f32 0.5, %v3377_v35  ;;  %7708 = vrcp.f32 %v5123_v30  ;;  %v10846_v26 = vpop.f32.mrb[51].mxu1 }
 0x41a   : > { %v4483_v37 = vmul.f32 %v4419_v15, %v10751_v31  ;;  %v4868_v49 = vadd.f32 -0.001682827, %v4804_v61  ;;  %v10827_v17 = vmul.f32 %v10820_v48, %v10820_v48  ;;  %v5126_v47 = vadd.f32 -0.014264739, %v5062_v50 }
 0x41b   : > { %v4358_v12 = vmul.f32 %v4294_v34, %v10766_v16  ;;  %v4100_v39 = vmul.f32 %v4036_v9, %v10790_v19  ;;  %v3591_v4 = vmul.f32 0.70710677, %v3369_v3  ;;  %v5312_v60 = vadd.f32 1.0, %v5210_v36 }
 0x41c   : > { %v5220_v41 = vmul.f32 %v7707_v58, %v4613_v13  ;;  %v4932_v52 = vmul.f32 %v4868_v49, %v10790_v19  ;;  %v3849_v35 = vmul.f32 -2.7261424e-10, %v10827_v17  ;;  %v4681_v30 = vmul.f32 -1.45660715e-05, %v10827_v17 }
 0x41d   : > { %v4422_v59 = vadd.f32 -0.0029546, %v4358_v12  ;;  %v4164_v31 = vadd.f32 -5.6925062e-05, %v4100_v39  ;;  %v3380_v0 = vadd.f32 %v10837_v55, %v10428_v6  ;;  %v10842_v20 = vmul.f32 %v5314_v38, %v10693_v10 }
 0x41e   : > { %v4996_v36 = vadd.f32 -0.0073733293, %v4932_v52  ;;  %v3913_v13 = vadd.f32 2.7706815e-08, %v3849_v35  ;;  %v10844_v42 = vclamps-f32 %v3591_v4, 4.0  ;;  %7710 = vrcp.f32 %v5126_v47 }
 0x41f   : > { %v4547_v15 = vadd.f32 -0.016096033, %v4483_v37  ;;  %v4228_v50 = vmul.f32 %v4164_v31, %v10790_v19  ;;  %v4745_v61 = vadd.f32 -0.00021337405, %v4681_v30  ;;  %v4486_v58 = vmul.f32 %v4422_v59, %v10766_v16 }
 0x420   : > { %v5060_v34 = vmul.f32 %v4996_v36, %v10790_v19  ;;  %v3977_v6 = vmul.f32 %v3913_v13, %v10827_v17  ;;  %v10854_v10 = vmul.f32 %v10844_v42, %v10844_v42  ;;  %v5317_v38 = vadd.f32 1.0, %v5220_v41 }
 0x421   : > { %v4292_v9 = vadd.f32 -0.00073499064, %v4228_v50  ;;  %v4809_v49 = vmul.f32 %v4745_v61, %v10827_v17  ;;  %v3594_v12 = vmul.f32 0.70710677, %v3380_v0  ;;  %v10858_v37 = vmul.f32 %v5312_v60, %v10720_v54 }
 0x422   : > { %v5124_v47 = vadd.f32 -0.014264739, %v5060_v34  ;;  %v4041_v39 = vadd.f32 -2.101024e-06, %v3977_v6  ;;  %v3847_v16 = vmul.f32 -2.7261424e-10, %v10854_v10  ;;  %v4611_v4 = vmul.f32 %v10742_v28, %v4547_v15 }
 0x423   : > { %v4356_v52 = vmul.f32 %v4292_v9, %v10790_v19  ;;  %v4873_v35 = vadd.f32 -0.001682827, %v4809_v49  ;;  %v4679_v59 = vmul.f32 -1.45660715e-05, %v10854_v10  ;;  %v7709_v31 = vpop.eup %7708  ;;  %v4550_v41 = vadd.f32 -0.016096033, %v4486_v58 }
 0x424   : > { %v4105_v30 = vmul.f32 %v4041_v39, %v10827_v17  ;;  %v3911_v36 = vadd.f32 2.7706815e-08, %v3847_v16  ;;  %v3372_v54 = vadd.f32 %v10837_v55, %v10434_v27  ;;  %v10868_v61 = vclamps-f32 %v3594_v12, 4.0 }
 0x425   : > { %v4420_v60 = vadd.f32 -0.0029546, %v4356_v52  ;;  %v4937_v13 = vmul.f32 %v4873_v35, %v10827_v17  ;;  %v4743_v50 = vadd.f32 -0.00021337405, %v4679_v59  ;;  %7712 = vrcp.f32 %v5124_v47 }
 0x426   : > { %v4169_v28 = vadd.f32 -5.6925062e-05, %v4105_v30  ;;  %v10870_v15 = vmul.f32 0.5, %v3369_v3  ;;  %v3975_v34 = vmul.f32 %v3911_v36, %v10854_v10  ;;  %v5216_v6 = vmul.f32 %v7709_v31, %v4611_v4  ;;  %v10883_v3 = vpop.f32.mrb[52].mxu1 }
 0x427   : > { %v4484_v58 = vmul.f32 %v4420_v60, %v10790_v19  ;;  %v5001_v9 = vadd.f32 -0.0073733293, %v4937_v13  ;;  %v4807_v49 = vmul.f32 %v4743_v50, %v10854_v10  ;;  %v10876_v27 = vmul.f32 %v5317_v38, %v10730_v53 }
 0x428   : > { %v4233_v39 = vmul.f32 %v4169_v28, %v10827_v17  ;;  %v4039_v16 = vadd.f32 -2.101024e-06, %v3975_v34  ;;  %v10881_v12 = vmul.f32 %v10868_v61, %v10868_v61  ;;  %v7711_v47 = vpop.eup %7710  ;;  %v4614_v4 = vmul.f32 %v10761_v21, %v4550_v41 }
 0x429   : > { %v4548_v52 = vadd.f32 -0.016096033, %v4484_v58  ;;  %v4871_v19 = vadd.f32 -0.001682827, %v4807_v49  ;;  %v3592_v35 = vmul.f32 0.70710677, %v3372_v54  ;;  %v5065_v36 = vmul.f32 %v5001_v9, %v10827_v17 }
 0x42a   : > { %v4297_v59 = vadd.f32 -0.00073499064, %v4233_v39  ;;  %v4103_v31 = vmul.f32 %v4039_v16, %v10854_v10  ;;  %v3850_v53 = vmul.f32 -2.7261424e-10, %v10881_v12  ;;  %v4682_v38 = vmul.f32 -1.45660715e-05, %v10881_v12 }
 0x42b   : > { %v5315_v30 = vadd.f32 1.0, %v5216_v6  ;;  %v4935_v60 = vmul.f32 %v4871_v19, %v10854_v10  ;;  %v10891_v13 = vmul.f32 0.5, %v3380_v0  ;;  %v5222_v34 = vmul.f32 %v7711_v47, %v4614_v4 }
 0x42c   : > { %v4361_v50 = vmul.f32 %v4297_v59, %v10827_v17  ;;  %v4167_v21 = vadd.f32 -5.6925062e-05, %v4103_v31  ;;  %v3914_v41 = vadd.f32 2.7706815e-08, %v3850_v53  ;;  %v4746_v28 = vadd.f32 -0.00021337405, %v4682_v38 }
 0x42d   : > { %v4999_v58 = vadd.f32 -0.0073733293, %v4935_v60  ;;  %v10894_v49 = vclamps-f32 %v3592_v35, 4.0  ;;  %v5421_v39 = vpack.c.bf16 %v10517_v51, %v10423_v23  ;;  %v4612_v6 = vmul.f32 %v10783_v2, %v4548_v52 }
 0x42e   : > { %v4231_v9 = vmul.f32 %v4167_v21, %v10854_v10  ;;  %v3978_v16 = vmul.f32 %v3914_v41, %v10881_v12  ;;  %v4810_v0 = vmul.f32 %v4746_v28, %v10881_v12  ;;  %v4425_v19 = vadd.f32 -0.0029546, %v4361_v50 }
 0x42f   : > { %v5129_v59 = vadd.f32 -0.014264739, %v5065_v36  ;;  %v5063_v31 = vmul.f32 %v4999_v58, %v10854_v10  ;;  %v10905_v47 = vmul.f32 %v10894_v49, %v10894_v49  ;;  %7369 = vmatprep.mubr.bf16.mxu0 %v5421_v39  ;;  %v7713_v4 = vpop.eup %7712  ;;  %v10908_v23 = vmul.f32 %v5315_v30, %v10759_v8 }
 0x430   : > { %v4295_v51 = vadd.f32 -0.00073499064, %v4231_v9  ;;  %v4042_v2 = vadd.f32 -2.101024e-06, %v3978_v16  ;;  %v4874_v52 = vadd.f32 -0.001682827, %v4810_v0  ;;  %v3393_v36 = vadd.f32 %v10837_v55, %v10568_v40 }
 0x431   : > { %v5318_v35 = vadd.f32 1.0, %v5222_v34  ;;  %v10910_v53 = vmul.f32 0.5, %v3372_v54  ;;  %v3848_v38 = vmul.f32 -2.7261424e-10, %v10905_v47  ;;  %v5127_v50 = vadd.f32 -0.014264739, %v5063_v31 }
 0x432   : > { %v4359_v60 = vmul.f32 %v4295_v51, %v10854_v10  ;;  %v4106_v21 = vmul.f32 %v4042_v2, %v10881_v12  ;;  %v4938_v41 = vmul.f32 %v4874_v52, %v10881_v12  ;;  %v5218_v8 = vmul.f32 %v7713_v4, %v4612_v6  ;;  %v10919_v34 = vpop.f32.mrb[53].mxu1 }
 0x433   : > { %7714 = vrcp.f32 %v5129_v59  ;;  %v3912_v30 = vadd.f32 2.7706815e-08, %v3848_v38  ;;  %v4680_v28 = vmul.f32 -1.45660715e-05, %v10905_v47  ;;  %v4489_v54 = vmul.f32 %v4425_v19, %v10827_v17  ;;  %v10925_v51 = vpop.f32.mrb[54].mxu1 }
 0x434   : > { %v4423_v58 = vadd.f32 -0.0029546, %v4359_v60  ;;  %v4170_v39 = vadd.f32 -5.6925062e-05, %v4106_v21  ;;  %v5002_v9 = vadd.f32 -0.0073733293, %v4938_v41  ;;  %v5422_v31 = vpack.c.bf16 %v10456_v22, %v10408_v44 }
 0x435   : > { %v3976_v40 = vmul.f32 %v3912_v30, %v10905_v47  ;;  %v4744_v16 = vadd.f32 -0.00021337405, %v4680_v28  ;;  %v3597_v0 = vmul.f32 0.70710677, %v3393_v36  ;;  %v10928_v6 = vmul.f32 %v5318_v35, %v10777_v57 }
 0x436   : > { %v4487_v59 = vmul.f32 %v4423_v58, %v10854_v10  ;;  %v4234_v4 = vmul.f32 %v4170_v39, %v10881_v12  ;;  %v5066_v17 = vmul.f32 %v5002_v9, %v10881_v12  ;;  %7716 = vrcp.f32 %v5127_v50  ;;  %7370 = vmatmul.mubr.bf16.gmra.mrb[76].mxu0 %v5422_v31 }
 0x437   : > { %v4040_v19 = vadd.f32 -2.101024e-06, %v3976_v40  ;;  %v4808_v2 = vmul.f32 %v4744_v16, %v10905_v47  ;;  %v10934_v52 = vclamps-f32 %v3597_v0, 4.0  ;;  %v5316_v38 = vadd.f32 1.0, %v5218_v8  ;;  %v10957_v16 = vpop.f32.mrb[55].mxu1 }
 0x438   : > { %v4553_v44 = vadd.f32 -0.016096033, %v4489_v54  ;;  %v4298_v22 = vadd.f32 -0.00073499064, %v4234_v4  ;;  %v3385_v57 = vadd.f32 %v10837_v55, %v10579_v46  ;;  %v10939_v60 = vmul.f32 0.5, %v3393_v36 }
 0x439   : > { %v4104_v35 = vmul.f32 %v4040_v19, %v10905_v47  ;;  %v4872_v10 = vadd.f32 -0.001682827, %v4808_v2  ;;  %v10943_v50 = vmul.f32 %v10934_v52, %v10934_v52  ;;  %v4551_v21 = vadd.f32 -0.016096033, %v4487_v59 }
 0x43a   : > { %v4362_v41 = vmul.f32 %v4298_v22, %v10881_v12  ;;  %v5130_v30 = vadd.f32 -0.014264739, %v5066_v17  ;;  %v10948_v8 = vadd.f32 %v10837_v55, %v10584_v62  ;;  %v10954_v58 = vmul.f32 %v5316_v38, %v10796_v29 }
 0x43b   : > { %v4168_v28 = vadd.f32 -5.6925062e-05, %v4104_v35  ;;  %v4936_v46 = vmul.f32 %v4872_v10, %v10905_v47  ;;  %v3853_v54 = vmul.f32 -2.7261424e-10, %v10943_v50  ;;  %v4685_v36 = vmul.f32 -1.45660715e-05, %v10943_v50 }
 0x43c   : > { %v4617_v39 = vmul.f32 %v10820_v48, %v4553_v44  ;;  %v4426_v9 = vadd.f32 -0.0029546, %v4362_v41  ;;  %v3595_v40 = vmul.f32 0.70710677, %v3385_v57  ;;  %7718 = vrcp.f32 %v5130_v30 }
 0x43d   : > { %v7715_v0 = vpop.eup %7714  ;;  %v4232_v62 = vmul.f32 %v4168_v28, %v10905_v47  ;;  %v5000_v31 = vadd.f32 -0.0073733293, %v4936_v46  ;;  %v3917_v59 = vadd.f32 2.7706815e-08, %v3853_v54  ;;  %v4749_v4 = vadd.f32 -0.00021337405, %v4685_v36 }
 0x43e   : > { %v4490_v17 = vmul.f32 %v4426_v9, %v10881_v12  ;;  %v10961_v19 = vclamps-f32 %v3595_v40, 4.0  ;;  %v3598_v29 = vmul.f32 0.70710677, %v10948_v8  ;;  %v4615_v22 = vmul.f32 %v10844_v42, %v4551_v21 }
 0x43f   : > { %v4296_v2 = vadd.f32 -0.00073499064, %v4232_v62  ;;  %v5064_v48 = vmul.f32 %v5000_v31, %v10905_v47  ;;  %v3981_v38 = vmul.f32 %v3917_v59, %v10943_v50  ;;  %v4813_v44 = vmul.f32 %v4749_v4, %v10943_v50  ;;  %v10981_v59 = vpop.f32.mrb[56].mxu1 }
 0x440   : > { %v4554_v35 = vadd.f32 -0.016096033, %v4490_v17  ;;  %v10970_v10 = vmul.f32 %v10961_v19, %v10961_v19  ;;  %v10972_v12 = vclamps-f32 %v3598_v29, 4.0  ;;  %v7717_v41 = vpop.eup %7716  ;;  %v5228_v36 = vmul.f32 %v7715_v0, %v4617_v39  ;;  %12478 = vst [vmem:[#allocation14_spill] sm:$0xff] %v10981_v59 }
 0x441   : > { %v4360_v30 = vmul.f32 %v4296_v2, %v10905_v47  ;;  %v5128_v28 = vadd.f32 -0.014264739, %v5064_v48  ;;  %v4045_v46 = vadd.f32 -2.101024e-06, %v3981_v38  ;;  %v4877_v54 = vadd.f32 -0.001682827, %v4813_v44 }
 0x442   : > { %v10975_v9 = vmul.f32 0.5, %v3385_v57  ;;  %v3851_v40 = vmul.f32 -2.7261424e-10, %v10970_v10  ;;  %v4683_v42 = vmul.f32 -1.45660715e-05, %v10970_v10  ;;  %v5224_v4 = vmul.f32 %v7717_v41, %v4615_v22 }
 0x443   : > { %v4424_v21 = vadd.f32 -0.0029546, %v4360_v30  ;;  %7720 = vrcp.f32 %v5128_v28  ;;  %v4109_v62 = vmul.f32 %v4045_v46, %v10943_v50  ;;  %v4941_v31 = vmul.f32 %v4877_v54, %v10943_v50 }
 0x444   : > { %v3915_v17 = vadd.f32 2.7706815e-08, %v3851_v40  ;;  %v4747_v29 = vadd.f32 -0.00021337405, %v4683_v42  ;;  %v10985_v39 = vmul.f32 %v10972_v12, %v10972_v12  ;;  %v4618_v57 = vmul.f32 %v10868_v61, %v4554_v35  ;;  %v12479_v42 = vld [vmem:[#allocation19_spill] sm:$0xff] }
 0x445   : > { %v4488_v0 = vmul.f32 %v4424_v21, %v10905_v47  ;;  %v4173_v2 = vadd.f32 -5.6925062e-05, %v4109_v62  ;;  %v5005_v48 = vadd.f32 -0.0073733293, %v4941_v31  ;;  %v3388_v61 = vadd.f32 %v10837_v55, %v10592_v33 }
 0x446   : > { %v3979_v38 = vmul.f32 %v3915_v17, %v10970_v10  ;;  %v4811_v44 = vmul.f32 %v4747_v29, %v10970_v10  ;;  %v3854_v30 = vmul.f32 -2.7261424e-10, %v10985_v39  ;;  %v4686_v22 = vmul.f32 -1.45660715e-05, %v10985_v39  ;;  %v7719_v35 = vpop.eup %7718 }
 0x447   : > { %v4552_v41 = vadd.f32 -0.016096033, %v4488_v0  ;;  %v4237_v28 = vmul.f32 %v4173_v2, %v10943_v50  ;;  %v5069_v46 = vmul.f32 %v5005_v48, %v10943_v50  ;;  %v5423_v21 = vpack.c.bf16 %v10617_v25, %v12479_v42  ;;  %v12481_v42 = vld [vmem:[#allocation23_spill] sm:$0xff] }
 0x448   : > { %v4043_v47 = vadd.f32 -2.101024e-06, %v3979_v38  ;;  %v4875_v54 = vadd.f32 -0.001682827, %v4811_v44  ;;  %v3918_v40 = vadd.f32 2.7706815e-08, %v3854_v30  ;;  %v5230_v38 = vmul.f32 %v7719_v35, %v4618_v57 }
 0x449   : > { %v5321_v62 = vadd.f32 1.0, %v5228_v36  ;;  %v4616_v31 = vmul.f32 %v10894_v49, %v4552_v41  ;;  %v4301_v17 = vadd.f32 -0.00073499064, %v4237_v28  ;;  %v5133_v29 = vadd.f32 -0.014264739, %v5069_v46  ;;  %7373 = vmatprep.mubr.bf16.mxu0 %v5423_v21 }
 0x44a   : > { %v4107_v0 = vmul.f32 %v4043_v47, %v10970_v10  ;;  %v4939_v2 = vmul.f32 %v4875_v54, %v10970_v10  ;;  %v3982_v48 = vmul.f32 %v3918_v40, %v10985_v39  ;;  %v4750_v59 = vadd.f32 -0.00021337405, %v4686_v22  ;;  %v12480_v54 = vld [vmem:[#allocation22_spill] sm:$0xff] }
 0x44b   : > { %v5319_v33 = vadd.f32 1.0, %v5224_v4  ;;  %v4365_v44 = vmul.f32 %v4301_v17, %v10943_v50  ;;  %v3596_v30 = vmul.f32 0.70710677, %v3388_v61  ;;  %7722 = vrcp.f32 %v5133_v29 }
 0x44c   : > { %v4171_v25 = vadd.f32 -5.6925062e-05, %v4107_v0  ;;  %v4046_v36 = vadd.f32 -2.101024e-06, %v3982_v48  ;;  %v4814_v49 = vmul.f32 %v4750_v59, %v10985_v39  ;;  %v5003_v46 = vadd.f32 -0.0073733293, %v4939_v2 }
 0x44d   : > { %v7721_v41 = vpop.eup %7720  ;;  %v4429_v28 = vadd.f32 -0.0029546, %v4365_v44  ;;  %v11005_v47 = vclamps-f32 %v3596_v30, 4.0  ;;  %v5424_v40 = vpack.c.bf16 %v12481_v42, %v12480_v54  ;;  %v11010_v22 = vmul.f32 %v5321_v62, %v10822_v63 }
 0x44e   : > { %v5226_v4 = vmul.f32 %v7721_v41, %v4616_v31  ;;  %v4235_v57 = vmul.f32 %v4171_v25, %v10970_v10  ;;  %v4110_v35 = vmul.f32 %v4046_v36, %v10985_v39  ;;  %v11016_v59 = vmul.f32 0.5, %v10948_v8 }
 0x44f   : > { %v4493_v21 = vmul.f32 %v4429_v28, %v10943_v50  ;;  %v4878_v17 = vadd.f32 -0.001682827, %v4814_v49  ;;  %v11020_v29 = vmul.f32 %v11005_v47, %v11005_v47  ;;  %7374 = vmatmul.mubr.bf16.gmra.mrb[80].mxu0 %v5424_v40  ;;  %v11023_v0 = vmul.f32 %v5319_v33, %v10870_v15 }
 0x450   : > { %v5322_v63 = vadd.f32 1.0, %v5230_v38  ;;  %v4299_v62 = vadd.f32 -0.00073499064, %v4235_v57  ;;  %v3409_v31 = vadd.f32 %v10837_v55, %v10639_v43  ;;  %v5067_v2 = vmul.f32 %v5003_v46, %v10970_v10  ;;  %v11042_v57 = vpop.f32.mrb[57].mxu1 }
 0x451   : > { %v4174_v50 = vadd.f32 -5.6925062e-05, %v4110_v35  ;;  %v4942_v8 = vmul.f32 %v4878_v17, %v10985_v39  ;;  %v3852_v48 = vmul.f32 -2.7261424e-10, %v11020_v29  ;;  %v5320_v44 = vadd.f32 1.0, %v5226_v4 }
 0x452   : > { %v4557_v30 = vadd.f32 -0.016096033, %v4493_v21  ;;  %v4363_v25 = vmul.f32 %v4299_v62, %v10970_v10  ;;  %v4684_v36 = vmul.f32 -1.45660715e-05, %v11020_v29  ;;  %v3401_v43 = vadd.f32 %v10837_v55, %v10645_v56 }
 0x453   : > { %v4238_v15 = vmul.f32 %v4174_v50, %v10985_v39  ;;  %v5006_v33 = vadd.f32 -0.0073733293, %v4942_v8  ;;  %v3916_v38 = vadd.f32 2.7706815e-08, %v3852_v48  ;;  %v11036_v49 = vmul.f32 %v5322_v63, %v10891_v13  ;;  %v11048_v63 = vpop.f32.mrb[58].mxu1 }
 0x454   : > { %v4427_v41 = vadd.f32 -0.0029546, %v4363_v25  ;;  %v4748_v28 = vadd.f32 -0.00021337405, %v4684_v36  ;;  %v3601_v46 = vmul.f32 0.70710677, %v3409_v31  ;;  %v4621_v21 = vmul.f32 %v10934_v52, %v4557_v30 }
 0x455   : > { %v4302_v54 = vadd.f32 -0.00073499064, %v4238_v15  ;;  %v5070_v42 = vmul.f32 %v5006_v33, %v10985_v39  ;;  %v11039_v40 = vmul.f32 0.5, %v3388_v61  ;;  %v3980_v4 = vmul.f32 %v3916_v38, %v11020_v29  ;;  %v7723_v35 = vpop.eup %7722 }
 0x456   : > { %v5131_v17 = vadd.f32 -0.014264739, %v5067_v2  ;;  %v4812_v56 = vmul.f32 %v4748_v28, %v11020_v29  ;;  %v11046_v13 = vclamps-f32 %v3601_v46, 4.0  ;;  %v4491_v62 = vmul.f32 %v4427_v41, %v10970_v10  ;;  %v11064_v10 = vpop.f32.mrb[59].mxu1 }
 0x457   : > { %v4366_v50 = vmul.f32 %v4302_v54, %v10985_v39  ;;  %v4044_v61 = vadd.f32 -2.101024e-06, %v3980_v4  ;;  %v3599_v8 = vmul.f32 0.70710677, %v3401_v43  ;;  %v11053_v48 = vmul.f32 %v5320_v44, %v10910_v53 }
 0x458   : > { %v4876_v25 = vadd.f32 -0.001682827, %v4812_v56  ;;  %v11055_v36 = vmul.f32 0.5, %v3409_v31  ;;  %v11059_v52 = vmul.f32 %v11046_v13, %v11046_v13  ;;  %v5134_v30 = vadd.f32 -0.014264739, %v5070_v42 }
 0x459   : > { %v4430_v2 = vadd.f32 -0.0029546, %v4366_v50  ;;  %v4108_v15 = vmul.f32 %v4044_v61, %v11020_v29  ;;  %v11062_v33 = vclamps-f32 %v3599_v8, 4.0  ;;  %v5236_v38 = vmul.f32 %v7723_v35, %v4621_v21 }
 0x45a   : > { %7724 = vrcp.f32 %v5131_v17  ;;  %v4940_v53 = vmul.f32 %v4876_v25, %v11020_v29  ;;  %v3857_v44 = vmul.f32 -2.7261424e-10, %v11059_v52  ;;  %v4555_v31 = vadd.f32 -0.016096033, %v4491_v62 }
 0x45b   : > { %v4172_v41 = vadd.f32 -5.6925062e-05, %v4108_v15  ;;  %v4689_v28 = vmul.f32 -1.45660715e-05, %v11059_v52  ;;  %v11071_v46 = vmul.f32 %v11062_v33, %v11062_v33  ;;  %v11073_v4 = vmul.f32 0.5, %v3401_v43 }
 0x45c   : > { %v5004_v54 = vadd.f32 -0.0073733293, %v4940_v53  ;;  %v3921_v42 = vadd.f32 2.7706815e-08, %v3857_v44  ;;  %v3412_v35 = vadd.f32 %v10837_v55, %v10650_v11  ;;  %v4494_v21 = vmul.f32 %v4430_v2, %v10985_v39 }
 0x45d   : > { %7726 = vrcp.f32 %v5134_v30  ;;  %v4236_v17 = vmul.f32 %v4172_v41, %v11020_v29  ;;  %v4753_v56 = vadd.f32 -0.00021337405, %v4689_v28  ;;  %v3855_v61 = vmul.f32 -2.7261424e-10, %v11071_v46 }
 0x45e   : > { %v5068_v62 = vmul.f32 %v5004_v54, %v11020_v29  ;;  %v3985_v50 = vmul.f32 %v3921_v42, %v11059_v52  ;;  %v4687_v8 = vmul.f32 -1.45660715e-05, %v11071_v46  ;;  %v5325_v25 = vadd.f32 1.0, %v5236_v38 }
 0x45f   : > { %v4619_v43 = vmul.f32 %v10961_v19, %v4555_v31  ;;  %v4300_v15 = vadd.f32 -0.00073499064, %v4236_v17  ;;  %v4817_v11 = vmul.f32 %v4753_v56, %v11059_v52  ;;  %v3919_v2 = vadd.f32 2.7706815e-08, %v3855_v61 }
 0x460   : > { %v5132_v53 = vadd.f32 -0.014264739, %v5068_v62  ;;  %v4049_v39 = vadd.f32 -2.101024e-06, %v3985_v50  ;;  %v5425_v30 = vpack.c.bf16 %v10736_v1, %v10702_v32  ;;  %v4751_v28 = vadd.f32 -0.00021337405, %v4687_v8 }
 0x461   : > { %v4364_v44 = vmul.f32 %v4300_v15, %v11020_v29  ;;  %v4881_v41 = vadd.f32 -0.001682827, %v4817_v11  ;;  %v11090_v54 = vadd.f32 %v10837_v55, %v10657_v5  ;;  %v4558_v38 = vadd.f32 -0.016096033, %v4494_v21  ;;  %v11100_v21 = vpop.f32.mrb[60].mxu1 }
 0x462   : > { %v4113_v19 = vmul.f32 %v4049_v39, %v11059_v52  ;;  %v3983_v31 = vmul.f32 %v3919_v2, %v11071_v46  ;;  %v3602_v42 = vmul.f32 0.70710677, %v3412_v35  ;;  %7377 = vmatprep.mubr.bf16.mxu0 %v5425_v30  ;;  %v4815_v32 = vmul.f32 %v4751_v28, %v11071_v46  ;;  %12482 = vst [vmem:[#allocation16_spill] sm:$0xff] %v11100_v21 }
 0x463   : > { %v4428_v17 = vadd.f32 -0.0029546, %v4364_v44  ;;  %v4945_v56 = vmul.f32 %v4881_v41, %v11059_v52  ;;  %v11096_v1 = vmul.f32 0.5, %v3412_v35  ;;  %7728 = vrcp.f32 %v5132_v53 }
 0x464   : > { %v7725_v62 = vpop.eup %7724  ;;  %v4177_v50 = vadd.f32 -5.6925062e-05, %v4113_v19  ;;  %v4047_v61 = vadd.f32 -2.101024e-06, %v3983_v31  ;;  %v11098_v5 = vclamps-f32 %v3602_v42, 4.0  ;;  %v4622_v2 = vmul.f32 %v10972_v12, %v4558_v38 }
 0x465   : > { %v4492_v8 = vmul.f32 %v4428_v17, %v11020_v29  ;;  %v5009_v15 = vadd.f32 -0.0073733293, %v4945_v56  ;;  %v4879_v11 = vadd.f32 -0.001682827, %v4815_v32  ;;  %v3600_v39 = vmul.f32 0.70710677, %v11090_v54 }
 0x466   : > { %v4241_v30 = vmul.f32 %v4177_v50, %v11059_v52  ;;  %v4111_v35 = vmul.f32 %v4047_v61, %v11071_v46  ;;  %v11109_v53 = vmul.f32 %v11098_v5, %v11098_v5  ;;  %v11116_v31 = vmul.f32 %v5325_v25, %v10939_v60 }
 0x467   : > { %v7727_v44 = vpop.eup %7726  ;;  %v4556_v41 = vadd.f32 -0.016096033, %v4492_v8  ;;  %v5073_v28 = vmul.f32 %v5009_v15, %v11059_v52  ;;  %v4943_v29 = vmul.f32 %v4879_v11, %v11071_v46  ;;  %v11113_v19 = vclamps-f32 %v3600_v39, 4.0 }
 0x468   : > { %12483 = vst [vmem:[#allocation17_spill] sm:$0xff] %v11116_v31  ;;  %v4305_v12 = vadd.f32 -0.00073499064, %v4241_v30  ;;  %v4175_v38 = vadd.f32 -5.6925062e-05, %v4111_v35  ;;  %v5232_v17 = vmul.f32 %v7725_v62, %v4619_v43  ;;  %v5238_v60 = vmul.f32 %v7727_v44, %v4622_v2  ;;  %v11136_v31 = vpop.f32.mrb[61].mxu1 }
 0x469   : > { %v3858_v42 = vmul.f32 -2.7261424e-10, %v11109_v53  ;;  %v5137_v56 = vadd.f32 -0.014264739, %v5073_v28  ;;  %v5007_v32 = vadd.f32 -0.0073733293, %v4943_v29  ;;  %v11124_v11 = vmul.f32 %v11113_v19, %v11113_v19 }
 0x46a   : > { %v4690_v50 = vmul.f32 -1.45660715e-05, %v11109_v53  ;;  %v4369_v61 = vmul.f32 %v4305_v12, %v11059_v52  ;;  %v4239_v8 = vmul.f32 %v4175_v38, %v11071_v46  ;;  %v4620_v28 = vmul.f32 %v11005_v47, %v4556_v41  ;;  %12485 = vst [vmem:[#allocation18_spill] sm:$0xff] %v11136_v31  ;;  %v12486_v31 = vld [vmem:[#allocation24_spill] sm:$0xff] }
 0x46b   : > { %v3922_v15 = vadd.f32 2.7706815e-08, %v3858_v42  ;;  %7730 = vrcp.f32 %v5137_v56  ;;  %v5071_v25 = vmul.f32 %v5007_v32, %v11071_v46  ;;  %v3856_v35 = vmul.f32 -2.7261424e-10, %v11124_v11 }
 0x46c   : > { %v4754_v39 = vadd.f32 -0.00021337405, %v4690_v50  ;;  %v4433_v30 = vadd.f32 -0.0029546, %v4369_v61  ;;  %v4303_v43 = vadd.f32 -0.00073499064, %v4239_v8 }
 0x46d   : > { %v3986_v62 = vmul.f32 %v3922_v15, %v11109_v53  ;;  %v5135_v29 = vadd.f32 -0.014264739, %v5071_v25  ;;  %v4688_v38 = vmul.f32 -1.45660715e-05, %v11124_v11  ;;  %v7729_v42 = vpop.eup %7728  ;;  %v3920_v32 = vadd.f32 2.7706815e-08, %v3856_v35 }
 0x46e   : > { %v4818_v12 = vmul.f32 %v4754_v39, %v11109_v53  ;;  %v4497_v2 = vmul.f32 %v4433_v30, %v11059_v52  ;;  %v4367_v44 = vmul.f32 %v4303_v43, %v11071_v46  ;;  %v12484_v8 = vld [vmem:[#allocation10_spill] sm:$0xff]  ;;  %v5323_v21 = vadd.f32 1.0, %v5232_v17 }
 0x46f   : > { %v4050_v56 = vadd.f32 -2.101024e-06, %v3986_v62  ;;  %7732 = vrcp.f32 %v5135_v29  ;;  %v4752_v61 = vadd.f32 -0.00021337405, %v4688_v38  ;;  %v3425_v15 = vadd.f32 %v10837_v55, %v12484_v8  ;;  %v11142_v62 = vpop.f32.mrb[62].mxu1 }
 0x470   : > { %v4882_v50 = vadd.f32 -0.001682827, %v4818_v12  ;;  %v4561_v47 = vadd.f32 -0.016096033, %v4497_v2  ;;  %v4431_v41 = vadd.f32 -0.0029546, %v4367_v44  ;;  %v3984_v39 = vmul.f32 %v3920_v32, %v11124_v11 }
 0x471   : > { %v4114_v25 = vmul.f32 %v4050_v56, %v11109_v53  ;;  %v5326_v52 = vadd.f32 1.0, %v5238_v60  ;;  %v4816_v43 = vmul.f32 %v4752_v61, %v11124_v11  ;;  %v5234_v35 = vmul.f32 %v7729_v42, %v4620_v28 }
 0x472   : > { %v4946_v30 = vmul.f32 %v4882_v50, %v11109_v53  ;;  %v4495_v29 = vmul.f32 %v4431_v41, %v11071_v46  ;;  %v4048_v38 = vadd.f32 -2.101024e-06, %v3984_v39  ;;  %v3605_v44 = vmul.f32 0.70710677, %v3425_v15 }
 0x473   : > { %v4178_v12 = vadd.f32 -5.6925062e-05, %v4114_v25  ;;  %v4880_v2 = vadd.f32 -0.001682827, %v4816_v43  ;;  %v5426_v56 = vpack.c.bf16 %v10705_v14, %v12486_v31  ;;  %v4625_v17 = vmul.f32 %v11046_v13, %v4561_v47 }
 0x474   : > { %v5010_v8 = vadd.f32 -0.0073733293, %v4946_v30  ;;  %v4112_v32 = vmul.f32 %v4048_v38, %v11124_v11  ;;  %v3417_v50 = vadd.f32 %v10837_v55, %v10708_v18  ;;  %v4559_v42 = vadd.f32 -0.016096033, %v4495_v29 }
 0x475   : > { %v4242_v60 = vmul.f32 %v4178_v12, %v11109_v53  ;;  %v7731_v28 = vpop.eup %7730  ;;  %v4944_v61 = vmul.f32 %v4880_v2, %v11124_v11  ;;  %v11154_v41 = vclamps-f32 %v3605_v44, 4.0  ;;  %7378 = vmatmul.mubr.bf16.gmra.mrb[84].mxu0 %v5426_v56  ;;  %v11157_v14 = vmul.f32 %v5323_v21, %v10975_v9 }
 0x476   : > { %v5074_v46 = vmul.f32 %v5010_v8, %v11109_v53  ;;  %v5324_v13 = vadd.f32 1.0, %v5234_v35  ;;  %v4176_v47 = vadd.f32 -5.6925062e-05, %v4112_v32  ;;  %v11160_v25 = vmul.f32 %v5326_v52, %v11016_v59  ;;  %v11171_v35 = vpop.f32.mrb[63].mxu1 }
 0x477   : > { %v4306_v31 = vadd.f32 -0.00073499064, %v4242_v60  ;;  %v11163_v18 = vmul.f32 0.5, %v11090_v54  ;;  %v5008_v39 = vadd.f32 -0.0073733293, %v4944_v61  ;;  %v11167_v30 = vmul.f32 %v11154_v41, %v11154_v41 }
 0x478   : > { %v5244_v43 = vmul.f32 %v7731_v28, %v4625_v17  ;;  %v4240_v9 = vmul.f32 %v4176_v47, %v11124_v11  ;;  %v3603_v21 = vmul.f32 0.70710677, %v3417_v50  ;;  %v4623_v59 = vmul.f32 %v11062_v33, %v4559_v42  ;;  %v12487_v28 = vld [vmem:[#allocation12_spill] sm:$0xff] }
 0x479   : > { %v4370_v29 = vmul.f32 %v4306_v31, %v11109_v53  ;;  %v7733_v12 = vpop.eup %7732  ;;  %v5138_v52 = vadd.f32 -0.014264739, %v5074_v46  ;;  %v3861_v54 = vmul.f32 -2.7261424e-10, %v11167_v30  ;;  %v4693_v38 = vmul.f32 -1.45660715e-05, %v11167_v30 }
 0x47a   : > { %v11177_v8 = vmul.f32 %v5324_v13, %v11039_v40  ;;  %v4304_v44 = vadd.f32 -0.00073499064, %v4240_v9  ;;  %v5072_v56 = vmul.f32 %v5008_v39, %v11124_v11  ;;  %v11180_v17 = vmul.f32 0.5, %v3425_v15 }
 0x47b   : > { %v4434_v2 = vadd.f32 -0.0029546, %v4370_v29  ;;  %v3925_v60 = vadd.f32 2.7706815e-08, %v3861_v54  ;;  %v4757_v32 = vadd.f32 -0.00021337405, %v4693_v38  ;;  %v3428_v61 = vadd.f32 %v10837_v55, %v12487_v28 }
 0x47c   : > { %v5329_v33 = vadd.f32 1.0, %v5244_v43  ;;  %v4368_v42 = vmul.f32 %v4304_v44, %v11124_v11  ;;  %v11185_v46 = vmul.f32 0.5, %v3417_v50  ;;  %v11187_v31 = vclamps-f32 %v3603_v21, 4.0  ;;  %v12488_v43 = vld [vmem:[#allocation15_spill] sm:$0xff] }
 0x47d   : > { %v5240_v40 = vmul.f32 %v7733_v12, %v4623_v59  ;;  %7734 = vrcp.f32 %v5138_v52  ;;  %v3989_v13 = vmul.f32 %v3925_v60, %v11167_v30  ;;  %v4821_v47 = vmul.f32 %v4757_v32, %v11167_v30 }
 0x47e   : > { %v4498_v15 = vmul.f32 %v4434_v2, %v11109_v53  ;;  %v5136_v39 = vadd.f32 -0.014264739, %v5072_v56  ;;  %v11194_v29 = vmul.f32 %v11187_v31, %v11187_v31  ;;  %v3420_v9 = vadd.f32 %v10837_v55, %v12488_v43 }
 0x47f   : > { %v4053_v50 = vadd.f32 -2.101024e-06, %v3989_v13  ;;  %v4885_v54 = vadd.f32 -0.001682827, %v4821_v47  ;;  %v3606_v21 = vmul.f32 0.70710677, %v3428_v61  ;;  %v5427_v12 = vpack.c.bf16 %v10858_v37, %v10807_v7 }
 0x480   : > { %v11201_v59 = vmul.f32 %v5329_v33, %v11055_v36  ;;  %v4432_v52 = vadd.f32 -0.0029546, %v4368_v42  ;;  %v3859_v53 = vmul.f32 -2.7261424e-10, %v11194_v29  ;;  %v4691_v38 = vmul.f32 -1.45660715e-05, %v11194_v29 }
 0x481   : > { %v11205_v2 = vadd.f32 1.0, %v5240_v40  ;;  %v4117_v44 = vmul.f32 %v4053_v50, %v11167_v30  ;;  %v4949_v56 = vmul.f32 %v4885_v54, %v11167_v30  ;;  %v11209_v60 = vclamps-f32 %v3606_v21, 4.0  ;;  %7381 = vmatprep.mubr.bf16.mxu0 %v5427_v12 }
 0x482   : > { %12489 = vst [vmem:[#allocation20_spill] sm:$0xff] %v11201_v59  ;;  %v4562_v32 = vadd.f32 -0.016096033, %v4498_v15  ;;  %7736 = vrcp.f32 %v5136_v39  ;;  %v3923_v7 = vadd.f32 2.7706815e-08, %v3859_v53  ;;  %v4496_v40 = vmul.f32 %v4432_v52, %v11124_v11 }
 0x483   : > { %v4755_v37 = vadd.f32 -0.00021337405, %v4691_v38  ;;  %v4181_v36 = vadd.f32 -5.6925062e-05, %v4117_v44  ;;  %v5013_v28 = vadd.f32 -0.0073733293, %v4949_v56  ;;  %v11213_v33 = vmul.f32 %v11209_v60, %v11209_v60 }
 0x484   : > { %v3604_v42 = vmul.f32 0.70710677, %v3420_v9  ;;  %v3987_v13 = vmul.f32 %v3923_v7, %v11194_v29  ;;  %v11218_v43 = vmul.f32 0.5, %v3428_v61  ;;  %v4626_v21 = vmul.f32 %v11098_v5, %v4562_v32  ;;  %v12490_v61 = vld [vmem:[#allocation11_spill] sm:$0xff] }
 0x485   : > { %v4819_v47 = vmul.f32 %v4755_v37, %v11194_v29  ;;  %v4245_v15 = vmul.f32 %v4181_v36, %v11167_v30  ;;  %v5077_v39 = vmul.f32 %v5013_v28, %v11167_v30  ;;  %v3862_v50 = vmul.f32 -2.7261424e-10, %v11213_v33 }
 0x486   : > { %v4694_v54 = vmul.f32 -1.45660715e-05, %v11213_v33  ;;  %v4051_v12 = vadd.f32 -2.101024e-06, %v3987_v13  ;;  %v11225_v38 = vclamps-f32 %v3604_v42, 4.0  ;;  %v5428_v7 = vpack.c.bf16 %v10842_v20, %v12490_v61  ;;  %v12491_v20 = vld [vmem:[#allocation13_spill] sm:$0xff] }
 0x487   : > { %v4883_v53 = vadd.f32 -0.001682827, %v4819_v47  ;;  %v7735_v11 = vpop.eup %7734  ;;  %v4309_v52 = vadd.f32 -0.00073499064, %v4245_v15  ;;  %v5141_v44 = vadd.f32 -0.014264739, %v5077_v39 }
 0x488   : > { %v3926_v56 = vadd.f32 2.7706815e-08, %v3862_v50  ;;  %v4560_v37 = vadd.f32 -0.016096033, %v4496_v40  ;;  %v4115_v36 = vmul.f32 %v4051_v12, %v11194_v29  ;;  %v11231_v59 = vmul.f32 0.5, %v3420_v9  ;;  %7382 = vmatmul.mubr.bf16.gmra.mrb[88].mxu0 %v5428_v7 }
 0x489   : > { %v4947_v28 = vmul.f32 %v4883_v53, %v11194_v29  ;;  %v4373_v5 = vmul.f32 %v4309_v52, %v11167_v30  ;;  %7738 = vrcp.f32 %v5141_v44  ;;  %v4758_v42 = vadd.f32 -0.00021337405, %v4694_v54 }
 0x48a   : > { %v3990_v32 = vmul.f32 %v3926_v56, %v11213_v33  ;;  %v4179_v13 = vadd.f32 -5.6925062e-05, %v4115_v36  ;;  %v11237_v15 = vmul.f32 %v11225_v38, %v11225_v38  ;;  %v3441_v40 = vadd.f32 %v10837_v55, %v12491_v20 }
 0x48b   : > { %v5011_v47 = vadd.f32 -0.0073733293, %v4947_v28  ;;  %v5246_v39 = vmul.f32 %v7735_v11, %v4626_v21  ;;  %v4437_v50 = vadd.f32 -0.0029546, %v4373_v5  ;;  %v4822_v12 = vmul.f32 %v4758_v42, %v11213_v33 }
 0x48c   : > { %v4054_v9 = vadd.f32 -2.101024e-06, %v3990_v32  ;;  %v7737_v53 = vpop.eup %7736  ;;  %v4624_v52 = vmul.f32 %v11113_v19, %v4560_v37  ;;  %v4243_v54 = vmul.f32 %v4179_v13, %v11194_v29  ;;  %v3860_v56 = vmul.f32 -2.7261424e-10, %v11237_v15 }
 0x48d   : > { %v5075_v44 = vmul.f32 %v5011_v47, %v11194_v29  ;;  %v4501_v61 = vmul.f32 %v4437_v50, %v11167_v30  ;;  %v4886_v36 = vadd.f32 -0.001682827, %v4822_v12  ;;  %v4692_v21 = vmul.f32 -1.45660715e-05, %v11237_v15 }
 0x48e   : > { %v4118_v7 = vmul.f32 %v4054_v9, %v11213_v33  ;;  %v4307_v11 = vadd.f32 -0.00073499064, %v4243_v54  ;;  %v3924_v5 = vadd.f32 2.7706815e-08, %v3860_v56  ;;  %v3433_v32 = vadd.f32 %v10837_v55, %v10794_v45 }
 0x48f   : > { %v5139_v28 = vadd.f32 -0.014264739, %v5075_v44  ;;  %v4565_v19 = vadd.f32 -0.016096033, %v4501_v61  ;;  %v4950_v42 = vmul.f32 %v4886_v36, %v11213_v33  ;;  %v4756_v13 = vadd.f32 -0.00021337405, %v4692_v21 }
 0x490   : > { %v4182_v37 = vadd.f32 -5.6925062e-05, %v4118_v7  ;;  %v5242_v47 = vmul.f32 %v7737_v53, %v4624_v52  ;;  %v4371_v20 = vmul.f32 %v4307_v11, %v11194_v29  ;;  %v3988_v30 = vmul.f32 %v3924_v5, %v11237_v15 }
 0x491   : > { %v3609_v50 = vmul.f32 0.70710677, %v3441_v40  ;;  %7740 = vrcp.f32 %v5139_v28  ;;  %v5014_v12 = vadd.f32 -0.0073733293, %v4950_v42  ;;  %v4820_v54 = vmul.f32 %v4756_v13, %v11237_v15 }
 0x492   : > { %v4246_v9 = vmul.f32 %v4182_v37, %v11213_v33  ;;  %v4629_v44 = vmul.f32 %v11154_v41, %v4565_v19  ;;  %v4435_v45 = vadd.f32 -0.0029546, %v4371_v20  ;;  %v4052_v55 = vadd.f32 -2.101024e-06, %v3988_v30 }
 0x493   : > { %v11257_v56 = vclamps-f32 %v3609_v50, 4.0  ;;  %v7739_v61 = vpop.eup %7738  ;;  %v5078_v53 = vmul.f32 %v5014_v12, %v11213_v33  ;;  %v4884_v52 = vadd.f32 -0.001682827, %v4820_v54  ;;  %v3607_v36 = vmul.f32 0.70710677, %v3433_v32 }
 0x494   : > { %v4310_v7 = vadd.f32 -0.00073499064, %v4246_v9  ;;  %v5330_v21 = vadd.f32 1.0, %v5246_v39  ;;  %v4499_v11 = vmul.f32 %v4435_v45, %v11194_v29  ;;  %v4116_v28 = vmul.f32 %v4052_v55, %v11237_v15 }
 0x495   : > { %v11264_v5 = vmul.f32 %v11257_v56, %v11257_v56  ;;  %v5328_v41 = vadd.f32 1.0, %v5242_v47  ;;  %v4948_v37 = vmul.f32 %v4884_v52, %v11237_v15  ;;  %v11268_v42 = vclamps-f32 %v3607_v36, 4.0 }
 0x496   : > { %v4374_v19 = vmul.f32 %v4310_v7, %v11213_v33  ;;  %v5252_v13 = vmul.f32 %v7739_v61, %v4629_v44  ;;  %v4563_v20 = vadd.f32 -0.016096033, %v4499_v11  ;;  %v5142_v30 = vadd.f32 -0.014264739, %v5078_v53 }
 0x497   : > { %v4180_v50 = vadd.f32 -5.6925062e-05, %v4116_v28  ;;  %v11272_v29 = vmul.f32 %v11205_v2, %v11073_v4  ;;  %v5012_v9 = vadd.f32 -0.0073733293, %v4948_v37  ;;  %v3865_v12 = vmul.f32 -2.7261424e-10, %v11264_v5 }
 0x498   : > { %v4438_v39 = vadd.f32 -0.0029546, %v4374_v19  ;;  %v11276_v47 = vmul.f32 %v5330_v21, %v11096_v1  ;;  %v11279_v45 = vmul.f32 0.5, %v3441_v40  ;;  %v4697_v44 = vmul.f32 -1.45660715e-05, %v11264_v5 }
 0x499   : > { %v4244_v54 = vmul.f32 %v4180_v50, %v11237_v15  ;;  %v11283_v55 = vmul.f32 %v5328_v41, %v11163_v18  ;;  %v5076_v61 = vmul.f32 %v5012_v9, %v11237_v15  ;;  %v3929_v4 = vadd.f32 2.7706815e-08, %v3865_v12  ;;  %v11293_v40 = vld [vmem:[%s12404_s7] ss:$0 sm:$0xff] }
 0x49a   : > { %v11288_v2 = vmul.f32 %v11268_v42, %v11268_v42  ;;  %v5333_v7 = vadd.f32 1.0, %v5252_v13  ;;  %v4761_v1 = vadd.f32 -0.00021337405, %v4697_v44  ;;  %v3444_v52 = vadd.f32 %v11293_v40, %v10811_v24 }
 0x49b   : > { %v4308_v53 = vadd.f32 -0.00073499064, %v4244_v54  ;;  %v7741_v18 = vpop.eup %7740  ;;  %v4627_v36 = vmul.f32 %v11187_v31, %v4563_v20  ;;  %v4502_v21 = vmul.f32 %v4438_v39, %v11213_v33  ;;  %7742 = vrcp.f32 %v5142_v30 }
 0x49c   : > { %v3993_v11 = vmul.f32 %v3929_v4, %v11264_v5  ;;  %v4825_v41 = vmul.f32 %v4761_v1, %v11264_v5  ;;  %v3863_v19 = vmul.f32 -2.7261424e-10, %v11288_v2  ;;  %v4695_v37 = vmul.f32 -1.45660715e-05, %v11288_v2 }
 0x49d   : > { %v4372_v28 = vmul.f32 %v4308_v53, %v11237_v15  ;;  %v5140_v13 = vadd.f32 -0.014264739, %v5076_v61  ;;  %v11304_v9 = vmul.f32 0.5, %v3433_v32  ;;  %v11308_v24 = vadd.f32 %v11293_v40, %v10846_v26 }
 0x49e   : > { %v4057_v50 = vadd.f32 -2.101024e-06, %v3993_v11  ;;  %v4889_v33 = vadd.f32 -0.001682827, %v4825_v41  ;;  %v3927_v20 = vadd.f32 2.7706815e-08, %v3863_v19  ;;  %v5429_v30 = vpack.c.bf16 %v10954_v58, %v10908_v23 }
 0x49f   : > { %v4436_v31 = vadd.f32 -0.0029546, %v4372_v28  ;;  %v11313_v39 = vmul.f32 %v5333_v7, %v11180_v17  ;;  %v4759_v54 = vadd.f32 -0.00021337405, %v4695_v37  ;;  %v3610_v44 = vmul.f32 0.70710677, %v3444_v52 }
 0x4a0   : > { %v4121_v12 = vmul.f32 %v4057_v50, %v11264_v5  ;;  %v5248_v61 = vmul.f32 %v7741_v18, %v4627_v36  ;;  %v4566_v32 = vadd.f32 -0.016096033, %v4502_v21  ;;  %v4953_v4 = vmul.f32 %v4889_v33, %v11264_v5  ;;  %7385 = vmatprep.mubr.bf16.mxu0 %v5429_v30 }
 0x4a1   : > { %v3991_v26 = vmul.f32 %v3927_v20, %v11288_v2  ;;  %v4823_v1 = vmul.f32 %v4759_v54, %v11288_v2  ;;  %v11319_v11 = vclamps-f32 %v3610_v44, 4.0  ;;  %v3608_v23 = vmul.f32 0.70710677, %v11308_v24 }
 0x4a2   : > { %v4185_v53 = vadd.f32 -5.6925062e-05, %v4121_v12  ;;  %v4500_v58 = vmul.f32 %v4436_v31, %v11237_v15  ;;  %7744 = vrcp.f32 %v5140_v13  ;;  %v5017_v17 = vadd.f32 -0.0073733293, %v4953_v4 }
 0x4a3   : > { %v4055_v7 = vadd.f32 -2.101024e-06, %v3991_v26  ;;  %v4887_v36 = vadd.f32 -0.001682827, %v4823_v1  ;;  %v11326_v21 = vmul.f32 %v11319_v11, %v11319_v11  ;;  %v11328_v28 = vclamps-f32 %v3608_v23, 4.0 }
 0x4a4   : > { %v4249_v18 = vmul.f32 %v4185_v53, %v11264_v5  ;;  %v5331_v41 = vadd.f32 1.0, %v5248_v61  ;;  %v4630_v19 = vmul.f32 %v11209_v60, %v4566_v32  ;;  %v5081_v37 = vmul.f32 %v5017_v17, %v11264_v5 }
 0x4a5   : > { %v4119_v50 = vmul.f32 %v4055_v7, %v11288_v2  ;;  %v7743_v15 = vpop.eup %7742  ;;  %v4951_v31 = vmul.f32 %v4887_v36, %v11288_v2  ;;  %v3866_v33 = vmul.f32 -2.7261424e-10, %v11326_v21  ;;  %v4698_v20 = vmul.f32 -1.45660715e-05, %v11326_v21 }
 0x4a6   : > { %v4313_v13 = vadd.f32 -0.00073499064, %v4249_v18  ;;  %v4564_v30 = vadd.f32 -0.016096033, %v4500_v58  ;;  %v5145_v12 = vadd.f32 -0.014264739, %v5081_v37  ;;  %v11338_v44 = vmul.f32 %v11328_v28, %v11328_v28 }
 0x4a7   : > { %v4183_v54 = vadd.f32 -5.6925062e-05, %v4119_v50  ;;  %v5015_v61 = vadd.f32 -0.0073733293, %v4951_v31  ;;  %v3930_v32 = vadd.f32 2.7706815e-08, %v3866_v33  ;;  %v5254_v26 = vmul.f32 %v7743_v15, %v4630_v19 }
 0x4a8   : > { %v4377_v60 = vmul.f32 %v4313_v13, %v11264_v5  ;;  %v4762_v4 = vadd.f32 -0.00021337405, %v4698_v20  ;;  %v11342_v1 = vmul.f32 0.5, %v3444_v52  ;;  %v3864_v23 = vmul.f32 -2.7261424e-10, %v11338_v44 }
 0x4a9   : > { %v4247_v53 = vmul.f32 %v4183_v54, %v11288_v2  ;;  %v5079_v58 = vmul.f32 %v5015_v61, %v11288_v2  ;;  %v3994_v7 = vmul.f32 %v3930_v32, %v11326_v21  ;;  %v11349_v36 = vmul.f32 %v5331_v41, %v11185_v46  ;;  %v11358_v41 = vpop.f32.mrb[64].mxu0 }
 0x4aa   : > { %v4441_v17 = vadd.f32 -0.0029546, %v4377_v60  ;;  %v4826_v18 = vmul.f32 %v4762_v4, %v11326_v21  ;;  %v4628_v37 = vmul.f32 %v11225_v38, %v4564_v30  ;;  %v3928_v19 = vadd.f32 2.7706815e-08, %v3864_v23  ;;  %v11362_v61 = vpop.f32.mrb[65].mxu0 }
 0x4ab   : > { %v4311_v50 = vadd.f32 -0.00073499064, %v4247_v53  ;;  %7746 = vrcp.f32 %v5145_v12  ;;  %v4058_v15 = vadd.f32 -2.101024e-06, %v3994_v7  ;;  %v3457_v13 = vadd.f32 %v11293_v40, %v10883_v3 }
 0x4ac   : > { %v4890_v52 = vadd.f32 -0.001682827, %v4826_v18  ;;  %v7745_v31 = vpop.eup %7744  ;;  %v4505_v33 = vmul.f32 %v4441_v17, %v11264_v5  ;;  %v3992_v54 = vmul.f32 %v3928_v19, %v11338_v44  ;;  %v4696_v46 = vmul.f32 -1.45660715e-05, %v11338_v44 }
 0x4ad   : > { %v4375_v20 = vmul.f32 %v4311_v50, %v11288_v2  ;;  %v5334_v38 = vadd.f32 1.0, %v5254_v26  ;;  %v5143_v30 = vadd.f32 -0.014264739, %v5079_v58  ;;  %v4122_v12 = vmul.f32 %v4058_v15, %v11326_v21  ;;  %v11369_v26 = vpop.f32.mrb[66].mxu0 }
 0x4ae   : > { %v4954_v60 = vmul.f32 %v4890_v52, %v11326_v21  ;;  %v4056_v32 = vadd.f32 -2.101024e-06, %v3992_v54  ;;  %v4760_v4 = vadd.f32 -0.00021337405, %v4696_v46  ;;  %v5430_v5 = vpack.c.bf16 %v10928_v6, %v10876_v27  ;;  %v11373_v15 = vpop.f32.mrb[67].mxu0 }
 0x4af   : > { %v4439_v3 = vadd.f32 -0.0029546, %v4375_v20  ;;  %v5250_v53 = vmul.f32 %v7745_v31, %v4628_v37  ;;  %v4186_v23 = vadd.f32 -5.6925062e-05, %v4122_v12  ;;  %v11367_v7 = vmul.f32 0.5, %v11308_v24  ;;  %12492 = vst [vmem:[#allocation21_spill] sm:$0xff] %v11373_v15 }
 0x4b0   : > { %v5018_v17 = vadd.f32 -0.0073733293, %v4954_v60  ;;  %v4569_v58 = vadd.f32 -0.016096033, %v4505_v33  ;;  %v4120_v18 = vmul.f32 %v4056_v32, %v11338_v44  ;;  %v4824_v50 = vmul.f32 %v4760_v4, %v11338_v44  ;;  %7386 = vmatmul.mubr.bf16.gmra.mrb[92].mxu0 %v5430_v5 }
 0x4b1   : > { %v3613_v19 = vmul.f32 0.70710677, %v3457_v13  ;;  %v4503_v52 = vmul.f32 %v4439_v3, %v11288_v2  ;;  %7748 = vrcp.f32 %v5143_v30  ;;  %v4250_v27 = vmul.f32 %v4186_v23, %v11326_v21 }
 0x4b2   : > { %v5082_v6 = vmul.f32 %v5018_v17, %v11326_v21  ;;  %v11379_v24 = vmul.f32 %v5334_v38, %v11218_v43  ;;  %v4184_v37 = vadd.f32 -5.6925062e-05, %v4120_v18  ;;  %v4888_v31 = vadd.f32 -0.001682827, %v4824_v50 }
 0x4b3   : > { %v3449_v33 = vadd.f32 %v11293_v40, %v10919_v34  ;;  %v5332_v20 = vadd.f32 1.0, %v5250_v53  ;;  %v4314_v54 = vadd.f32 -0.00073499064, %v4250_v27  ;;  %v11383_v12 = vclamps-f32 %v3613_v19, 4.0 }
 0x4b4   : > { %v5146_v46 = vadd.f32 -0.014264739, %v5082_v6  ;;  %v4633_v2 = vmul.f32 %v11257_v56, %v4569_v58  ;;  %v4248_v30 = vmul.f32 %v4184_v37, %v11338_v44  ;;  %v4952_v60 = vmul.f32 %v4888_v31, %v11338_v44 }
 0x4b5   : > { %v11388_v3 = vmul.f32 0.5, %v3457_v13  ;;  %v7747_v43 = vpop.eup %7746  ;;  %v4567_v38 = vadd.f32 -0.016096033, %v4503_v52  ;;  %v4378_v32 = vmul.f32 %v4314_v54, %v11326_v21  ;;  %v11393_v34 = vmul.f32 %v11383_v12, %v11383_v12 }
 0x4b6   : > { %7750 = vrcp.f32 %v5146_v46  ;;  %v4312_v4 = vadd.f32 -0.00073499064, %v4248_v30  ;;  %v5016_v5 = vadd.f32 -0.0073733293, %v4952_v60  ;;  %v3611_v53 = vmul.f32 0.70710677, %v3449_v33 }
 0x4b7   : > { %v5431_v56 = vpack.c.bf16 %v11053_v48, %v11023_v0  ;;  %v4442_v23 = vadd.f32 -0.0029546, %v4378_v32  ;;  %v3869_v17 = vmul.f32 -2.7261424e-10, %v11393_v34  ;;  %v4701_v13 = vmul.f32 -1.45660715e-05, %v11393_v34 }
 0x4b8   : > { %v11401_v58 = vadd.f32 %v11293_v40, %v10925_v51  ;;  %v4376_v18 = vmul.f32 %v4312_v4, %v11338_v44  ;;  %v5080_v50 = vmul.f32 %v5016_v5, %v11338_v44  ;;  %v11405_v19 = vclamps-f32 %v3611_v53, 4.0 }
 0x4b9   : > { %v11409_v52 = vadd.f32 %v11293_v40, %v10957_v16  ;;  %7389 = vmatprep.mubr.bf16.mxu0 %v5431_v56  ;;  %v5260_v0 = vmul.f32 %v7747_v43, %v4633_v2  ;;  %v4506_v48 = vmul.f32 %v4442_v23, %v11326_v21  ;;  %v3933_v27 = vadd.f32 2.7706815e-08, %v3869_v17 }
 0x4ba   : > { %v4765_v6 = vadd.f32 -0.00021337405, %v4701_v13  ;;  %v4631_v37 = vmul.f32 %v11268_v42, %v4567_v38  ;;  %v4440_v51 = vadd.f32 -0.0029546, %v4376_v18  ;;  %v5144_v31 = vadd.f32 -0.014264739, %v5080_v50 }
 0x4bb   : > { %v11415_v54 = vmul.f32 %v11405_v19, %v11405_v19  ;;  %v7749_v46 = vpop.eup %7748  ;;  %v4570_v30 = vadd.f32 -0.016096033, %v4506_v48  ;;  %v3997_v60 = vmul.f32 %v3933_v27, %v11393_v34  ;;  %v3614_v2 = vmul.f32 0.70710677, %v11401_v58 }
 0x4bc   : > { %v4829_v16 = vmul.f32 %v4765_v6, %v11393_v34  ;;  %v4504_v21 = vmul.f32 %v4440_v51, %v11338_v44  ;;  %7752 = vrcp.f32 %v5144_v31  ;;  %v11421_v43 = vmul.f32 0.5, %v3449_v33 }
 0x4bd   : > { %v3867_v42 = vmul.f32 -2.7261424e-10, %v11415_v54  ;;  %v11425_v38 = vmul.f32 %v5332_v20, %v11231_v59  ;;  %v4061_v32 = vadd.f32 -2.101024e-06, %v3997_v60  ;;  %v4699_v5 = vmul.f32 -1.45660715e-05, %v11415_v54 }
 0x4be   : > { %v4893_v4 = vadd.f32 -0.001682827, %v4829_v16  ;;  %v5256_v53 = vmul.f32 %v7749_v46, %v4631_v37  ;;  %v4634_v56 = vmul.f32 %v11319_v11, %v4570_v30  ;;  %v11429_v17 = vclamps-f32 %v3614_v2, 4.0 }
 0x4bf   : > { %v3931_v23 = vadd.f32 2.7706815e-08, %v3867_v42  ;;  %v4125_v44 = vmul.f32 %v4061_v32, %v11393_v34  ;;  %v4763_v18 = vadd.f32 -0.00021337405, %v4699_v5  ;;  %v3612_v50 = vmul.f32 0.70710677, %v11409_v52 }
 0x4c0   : > { %v7751_v13 = vpop.eup %7750  ;;  %v4957_v33 = vmul.f32 %v4893_v4, %v11393_v34  ;;  %v5337_v59 = vadd.f32 1.0, %v5260_v0  ;;  %v4568_v20 = vadd.f32 -0.016096033, %v4504_v21  ;;  %v11437_v27 = vmul.f32 %v11429_v17, %v11429_v17 }
 0x4c1   : > { %v3995_v48 = vmul.f32 %v3931_v23, %v11415_v54  ;;  %v4189_v11 = vadd.f32 -5.6925062e-05, %v4125_v44  ;;  %v4827_v37 = vmul.f32 %v4763_v18, %v11415_v54  ;;  %v11440_v51 = vclamps-f32 %v3612_v50, 4.0 }
 0x4c2   : > { %v5021_v6 = vadd.f32 -0.0073733293, %v4957_v33  ;;  %v11442_v31 = vadd.f32 1.0, %v5256_v53  ;;  %v5262_v46 = vmul.f32 %v7751_v13, %v4634_v56  ;;  %v3870_v60 = vmul.f32 -2.7261424e-10, %v11437_v27 }
 0x4c3   : > { %v4059_v30 = vadd.f32 -2.101024e-06, %v3995_v48  ;;  %v4253_v0 = vmul.f32 %v4189_v11, %v11393_v34  ;;  %v4891_v2 = vadd.f32 -0.001682827, %v4827_v37  ;;  %v4702_v21 = vmul.f32 -1.45660715e-05, %v11437_v27 }
 0x4c4   : > { %v5085_v16 = vmul.f32 %v5021_v6, %v11393_v34  ;;  %v4632_v42 = vmul.f32 %v11328_v28, %v4568_v20  ;;  %v3934_v4 = vadd.f32 2.7706815e-08, %v3870_v60  ;;  %v11452_v5 = vmul.f32 %v11440_v51, %v11440_v51 }
 0x4c5   : > { %v4123_v32 = vmul.f32 %v4059_v30, %v11415_v54  ;;  %v4317_v53 = vadd.f32 -0.00073499064, %v4253_v0  ;;  %v4955_v23 = vmul.f32 %v4891_v2, %v11415_v54  ;;  %v4766_v13 = vadd.f32 -0.00021337405, %v4702_v21 }
 0x4c6   : > { %v5149_v56 = vadd.f32 -0.014264739, %v5085_v16  ;;  %v7753_v44 = vpop.eup %7752  ;;  %v3998_v18 = vmul.f32 %v3934_v4, %v11437_v27  ;;  %v3868_v50 = vmul.f32 -2.7261424e-10, %v11452_v5  ;;  %v4700_v28 = vmul.f32 -1.45660715e-05, %v11452_v5 }
 0x4c7   : > { %v4187_v33 = vadd.f32 -5.6925062e-05, %v4123_v32  ;;  %v5338_v20 = vadd.f32 1.0, %v5262_v46  ;;  %v4381_v48 = vmul.f32 %v4317_v53, %v11393_v34  ;;  %v5019_v11 = vadd.f32 -0.0073733293, %v4955_v23 }
 0x4c8   : > { %7754 = vrcp.f32 %v5149_v56  ;;  %v4062_v37 = vadd.f32 -2.101024e-06, %v3998_v18  ;;  %v4830_v30 = vmul.f32 %v4766_v13, %v11437_v27  ;;  %v3932_v60 = vadd.f32 2.7706815e-08, %v3868_v50  ;;  %v12493_v13 = vld [vmem:[#allocation14_spill] sm:$0xff] }
 0x4c9   : > { %v4251_v6 = vmul.f32 %v4187_v33, %v11415_v54  ;;  %v5258_v0 = vmul.f32 %v7753_v44, %v4632_v42  ;;  %v4445_v16 = vadd.f32 -0.0029546, %v4381_v48  ;;  %v5083_v2 = vmul.f32 %v5019_v11, %v11415_v54 }
 0x4ca   : > { %v4764_v21 = vadd.f32 -0.00021337405, %v4700_v28  ;;  %v4126_v4 = vmul.f32 %v4062_v37, %v11437_v27  ;;  %v4894_v15 = vadd.f32 -0.001682827, %v4830_v30  ;;  %v3996_v46 = vmul.f32 %v3932_v60, %v11452_v5  ;;  %v11464_v53 = vpop.f32.mrb[68].mxu0 }
 0x4cb   : > { %v4315_v32 = vadd.f32 -0.00073499064, %v4251_v6  ;;  %v4509_v56 = vmul.f32 %v4445_v16, %v11393_v34  ;;  %v5147_v23 = vadd.f32 -0.014264739, %v5083_v2  ;;  %v3473_v42 = vadd.f32 %v11293_v40, %v12493_v13  ;;  %v11470_v44 = vpop.f32.mrb[69].mxu0 }
 0x4cc   : > { %v4828_v33 = vmul.f32 %v4764_v21, %v11452_v5  ;;  %v4190_v50 = vadd.f32 -5.6925062e-05, %v4126_v4  ;;  %v4958_v28 = vmul.f32 %v4894_v15, %v11437_v27  ;;  %v4060_v48 = vadd.f32 -2.101024e-06, %v3996_v46  ;;  %v11474_v11 = vpop.f32.mrb[70].mxu0 }
 0x4cd   : > { %v4379_v18 = vmul.f32 %v4315_v32, %v11415_v54  ;;  %v11477_v6 = vmul.f32 %v5337_v59, %v11279_v45  ;;  %v5336_v34 = vadd.f32 1.0, %v5258_v0  ;;  %v4573_v37 = vadd.f32 -0.016096033, %v4509_v56  ;;  %v11479_v60 = vpop.f32.mrb[71].mxu0 }
 0x4ce   : > { %v4892_v30 = vadd.f32 -0.001682827, %v4828_v33  ;;  %12494 = vst [vmem:[#allocation19_spill] sm:$0xff] %v11479_v60  ;;  %v4254_v2 = vmul.f32 %v4190_v50, %v11437_v27  ;;  %v5022_v21 = vadd.f32 -0.0073733293, %v4958_v28  ;;  %v4124_v32 = vmul.f32 %v4060_v48, %v11452_v5 }
 0x4cf   : > { %v4443_v16 = vadd.f32 -0.0029546, %v4379_v18  ;;  %v4637_v4 = vmul.f32 %v11383_v12, %v4573_v37  ;;  %v3617_v46 = vmul.f32 0.70710677, %v3473_v42  ;;  %v5432_v45 = vpack.c.bf16 %v11036_v49, %v11010_v22 }
 0x4d0   : > { %v4956_v15 = vmul.f32 %v4892_v30, %v11452_v5  ;;  %v4318_v0 = vadd.f32 -0.00073499064, %v4254_v2  ;;  %v5086_v56 = vmul.f32 %v5022_v21, %v11437_v27  ;;  %v4188_v33 = vadd.f32 -5.6925062e-05, %v4124_v32 }
 0x4d1   : > { %v4507_v59 = vmul.f32 %v4443_v16, %v11415_v54  ;;  %v11491_v18 = vmul.f32 %v11442_v31, %v11304_v9  ;;  %v11494_v50 = vmul.f32 0.5, %v11401_v58  ;;  %v11496_v28 = vclamps-f32 %v3617_v46, 4.0  ;;  %7390 = vmatmul.mubr.bf16.gmra.mrb[96].mxu0 %v5432_v45 }
 0x4d2   : > { %v7755_v13 = vpop.eup %7754  ;;  %v5020_v12 = vadd.f32 -0.0073733293, %v4956_v15  ;;  %7756 = vrcp.f32 %v5147_v23  ;;  %v4382_v22 = vmul.f32 %v4318_v0, %v11437_v27  ;;  %v3465_v49 = vadd.f32 %v11293_v40, %v11042_v57 }
 0x4d3   : > { %v5268_v48 = vmul.f32 %v7755_v13, %v4637_v4  ;;  %v11502_v54 = vmul.f32 %v5338_v20, %v11342_v1  ;;  %v11505_v9 = vmul.f32 0.5, %v11409_v52  ;;  %v4252_v58 = vmul.f32 %v4188_v33, %v11452_v5 }
 0x4d4   : > { %v11510_v31 = vmul.f32 %v11496_v28, %v11496_v28  ;;  %v11513_v37 = vmul.f32 %v5336_v34, %v11367_v7  ;;  %v4571_v23 = vadd.f32 -0.016096033, %v4507_v59  ;;  %v5150_v30 = vadd.f32 -0.014264739, %v5086_v56 }
 0x4d5   : > { %v5084_v16 = vmul.f32 %v5020_v12, %v11452_v5  ;;  %v4446_v57 = vadd.f32 -0.0029546, %v4382_v22  ;;  %v4316_v2 = vadd.f32 -0.00073499064, %v4252_v58  ;;  %v3476_v52 = vadd.f32 %v11293_v40, %v11048_v63 }
 0x4d6   : > { %v3873_v1 = vmul.f32 -2.7261424e-10, %v11510_v31  ;;  %v5341_v20 = vadd.f32 1.0, %v5268_v48  ;;  %v11519_v21 = vmul.f32 0.5, %v3473_v42  ;;  %v4705_v32 = vmul.f32 -1.45660715e-05, %v11510_v31 }
 0x4d7   : > { %v3615_v4 = vmul.f32 0.70710677, %v3465_v49  ;;  %v4380_v7 = vmul.f32 %v4316_v2, %v11452_v5  ;;  %v11523_v15 = vmul.f32 0.5, %v3465_v49  ;;  %v3468_v46 = vadd.f32 %v11293_v40, %v11064_v10 }
 0x4d8   : > { %v3937_v34 = vadd.f32 2.7706815e-08, %v3873_v1  ;;  %v4635_v45 = vmul.f32 %v11405_v19, %v4571_v23  ;;  %v5148_v59 = vadd.f32 -0.014264739, %v5084_v16  ;;  %v4769_v0 = vadd.f32 -0.00021337405, %v4705_v32 }
 0x4d9   : > { %v11528_v56 = vclamps-f32 %v3615_v4, 4.0  ;;  %v4510_v63 = vmul.f32 %v4446_v57, %v11437_v27  ;;  %7758 = vrcp.f32 %v5150_v30  ;;  %v3618_v33 = vmul.f32 0.70710677, %v3476_v52 }
 0x4da   : > { %v4001_v42 = vmul.f32 %v3937_v34, %v11510_v31  ;;  %v11533_v13 = vmul.f32 %v5341_v20, %v11388_v3  ;;  %v4444_v12 = vadd.f32 -0.0029546, %v4380_v7  ;;  %v4833_v48 = vmul.f32 %v4769_v0, %v11510_v31 }
 0x4db   : > { %v11538_v10 = vmul.f32 %v11528_v56, %v11528_v56  ;;  %v11540_v22 = vmul.f32 0.5, %v3476_v52  ;;  %v11542_v49 = vclamps-f32 %v3618_v33, 4.0  ;;  %v3616_v27 = vmul.f32 0.70710677, %v3468_v46 }
 0x4dc   : > { %v4065_v19 = vadd.f32 -2.101024e-06, %v4001_v42  ;;  %v7757_v58 = vpop.eup %7756  ;;  %7760 = vrcp.f32 %v5148_v59  ;;  %v4897_v23 = vadd.f32 -0.001682827, %v4833_v48  ;;  %v4574_v16 = vadd.f32 -0.016096033, %v4510_v63 }
 0x4dd   : > { %v3871_v30 = vmul.f32 -2.7261424e-10, %v11538_v10  ;;  %v4703_v3 = vmul.f32 -1.45660715e-05, %v11538_v10  ;;  %v11549_v2 = vmul.f32 %v11542_v49, %v11542_v49  ;;  %v11551_v1 = vclamps-f32 %v3616_v27, 4.0 }
 0x4de   : > { %v4129_v57 = vmul.f32 %v4065_v19, %v11510_v31  ;;  %v4961_v52 = vmul.f32 %v4897_v23, %v11510_v31  ;;  %v5433_v4 = vpack.c.bf16 %v11177_v8, %v11157_v14  ;;  %v5264_v7 = vmul.f32 %v7757_v58, %v4635_v45 }
 0x4df   : > { %v3935_v20 = vadd.f32 2.7706815e-08, %v3871_v30  ;;  %v4767_v32 = vadd.f32 -0.00021337405, %v4703_v3  ;;  %v4508_v34 = vmul.f32 %v4444_v12, %v11452_v5  ;;  %v3874_v0 = vmul.f32 -2.7261424e-10, %v11549_v2 }
 0x4e0   : > { %v4193_v59 = vadd.f32 -5.6925062e-05, %v4129_v57  ;;  %v5025_v63 = vadd.f32 -0.0073733293, %v4961_v52  ;;  %v4706_v48 = vmul.f32 -1.45660715e-05, %v11549_v2  ;;  %7393 = vmatprep.mubr.bf16.mxu0 %v5433_v4  ;;  %v11566_v14 = vmul.f32 %v11551_v1, %v11551_v1 }
 0x4e1   : > { %v3999_v42 = vmul.f32 %v3935_v20, %v11538_v10  ;;  %v4831_v33 = vmul.f32 %v4767_v32, %v11538_v10  ;;  %v3938_v27 = vadd.f32 2.7706815e-08, %v3874_v0  ;;  %v11562_v23 = vmul.f32 0.5, %v3468_v46 }
 0x4e2   : > { %v4257_v19 = vmul.f32 %v4193_v59, %v11510_v31  ;;  %v4638_v8 = vmul.f32 %v11429_v17, %v4574_v16  ;;  %v5089_v5 = vmul.f32 %v5025_v63, %v11510_v31  ;;  %v5339_v30 = vadd.f32 1.0, %v5264_v7 }
 0x4e3   : > { %v4063_v45 = vadd.f32 -2.101024e-06, %v3999_v42  ;;  %v4895_v12 = vadd.f32 -0.001682827, %v4831_v33  ;;  %v7759_v58 = vpop.eup %7758  ;;  %v4002_v57 = vmul.f32 %v3938_v27, %v11549_v2  ;;  %v4770_v52 = vadd.f32 -0.00021337405, %v4706_v48 }
 0x4e4   : > { %v4321_v3 = vadd.f32 -0.00073499064, %v4257_v19  ;;  %v4572_v20 = vadd.f32 -0.016096033, %v4508_v34  ;;  %v5153_v32 = vadd.f32 -0.014264739, %v5089_v5  ;;  %v5270_v42 = vmul.f32 %v7759_v58, %v4638_v8 }
 0x4e5   : > { %v4127_v46 = vmul.f32 %v4063_v45, %v11538_v10  ;;  %v4959_v4 = vmul.f32 %v4895_v12, %v11538_v10  ;;  %v4066_v0 = vadd.f32 -2.101024e-06, %v4002_v57  ;;  %v4834_v17 = vmul.f32 %v4770_v52, %v11549_v2  ;;  %v12496_v57 = vld [vmem:[#allocation16_spill] sm:$0xff] }
 0x4e6   : > { %v4385_v59 = vmul.f32 %v4321_v3, %v11510_v31  ;;  %v3872_v16 = vmul.f32 -2.7261424e-10, %v11566_v14  ;;  %v7761_v63 = vpop.eup %7760  ;;  %7762 = vrcp.f32 %v5153_v32  ;;  %v11576_v19 = vpop.f32.mrb[72].mxu0  ;;  %v4704_v3 = vmul.f32 -1.45660715e-05, %v11566_v14 }
 0x4e7   : > { %v4191_v7 = vadd.f32 -5.6925062e-05, %v4127_v46  ;;  %v5023_v33 = vadd.f32 -0.0073733293, %v4959_v4  ;;  %12495 = vst [vmem:[#allocation22_spill] sm:$0xff] %v11576_v19  ;;  %v4130_v48 = vmul.f32 %v4066_v0, %v11549_v2  ;;  %v11584_v52 = vadd.f32 %v11293_v40, %v12496_v57  ;;  %v11586_v8 = vpop.f32.mrb[73].mxu0 }
 0x4e8   : > { %v4449_v34 = vadd.f32 -0.0029546, %v4385_v59  ;;  %v4898_v27 = vadd.f32 -0.001682827, %v4834_v17  ;;  %v3936_v5 = vadd.f32 2.7706815e-08, %v3872_v16  ;;  %v4636_v57 = vmul.f32 %v11440_v51, %v4572_v20 }
 0x4e9   : > { %v4255_v45 = vmul.f32 %v4191_v7, %v11538_v10  ;;  %v5087_v12 = vmul.f32 %v5023_v33, %v11538_v10  ;;  %12497 = vst [vmem:[#allocation23_spill] sm:$0xff] %v11586_v8  ;;  %v4194_v32 = vadd.f32 -5.6925062e-05, %v4130_v48  ;;  %v11591_v59 = vpop.f32.mrb[74].mxu0  ;;  %v4768_v16 = vadd.f32 -0.00021337405, %v4704_v3 }
 0x4ea   : > { %v4513_v58 = vmul.f32 %v4449_v34, %v11510_v31  ;;  %v4962_v46 = vmul.f32 %v4898_v27, %v11549_v2  ;;  %v4000_v4 = vmul.f32 %v3936_v5, %v11566_v14  ;;  %v12498_v7 = vld [vmem:[#allocation17_spill] sm:$0xff]  ;;  %v5342_v31 = vadd.f32 1.0, %v5270_v42  ;;  %v11599_v27 = vpop.f32.mrb[75].mxu0 }
 0x4eb   : > { %v4319_v0 = vadd.f32 -0.00073499064, %v4255_v45  ;;  %v5151_v17 = vadd.f32 -0.014264739, %v5087_v12  ;;  %v5434_v33 = vpack.c.bf16 %v11160_v25, %v12498_v7  ;;  %v4258_v19 = vmul.f32 %v4194_v32, %v11549_v2  ;;  %v12499_v32 = vld [vmem:[#allocation18_spill] sm:$0xff] }
 0x4ec   : > { %v5026_v8 = vadd.f32 -0.0073733293, %v4962_v46  ;;  %v4064_v60 = vadd.f32 -2.101024e-06, %v4000_v4  ;;  %v4832_v48 = vmul.f32 %v4768_v16, %v11566_v14  ;;  %v4577_v5 = vadd.f32 -0.016096033, %v4513_v58 }
 0x4ed   : > { %v4383_v34 = vmul.f32 %v4319_v0, %v11538_v10  ;;  %7764 = vrcp.f32 %v5151_v17  ;;  %7394 = vmatmul.mubr.bf16.gmra.mrb[100].mxu0 %v5434_v33  ;;  %v4322_v45 = vadd.f32 -0.00073499064, %v4258_v19  ;;  %v3621_v3 = vmul.f32 0.70710677, %v11584_v52 }
 0x4ee   : > { %v5090_v12 = vmul.f32 %v5026_v8, %v11549_v2  ;;  %v4128_v25 = vmul.f32 %v4064_v60, %v11566_v14  ;;  %v4896_v20 = vadd.f32 -0.001682827, %v4832_v48  ;;  %v11606_v42 = vadd.f32 %v11293_v40, %v12499_v32 }
 0x4ef   : > { %v4447_v51 = vadd.f32 -0.0029546, %v4383_v34  ;;  %v5266_v46 = vmul.f32 %v7761_v63, %v4636_v57  ;;  %v4386_v4 = vmul.f32 %v4322_v45, %v11549_v2  ;;  %v11610_v19 = vmul.f32 %v5339_v30, %v11421_v43 }
 0x4f0   : > { %v5154_v0 = vadd.f32 -0.014264739, %v5090_v12  ;;  %v4192_v17 = vadd.f32 -5.6925062e-05, %v4128_v25  ;;  %v7763_v16 = vpop.eup %7762  ;;  %v4960_v60 = vmul.f32 %v4896_v20, %v11566_v14  ;;  %v11614_v58 = vclamps-f32 %v3621_v3, 4.0 }
 0x4f1   : > { %v4511_v8 = vmul.f32 %v4447_v51, %v11538_v10  ;;  %v4641_v7 = vmul.f32 %v11496_v28, %v4577_v5  ;;  %v4450_v33 = vadd.f32 -0.0029546, %v4386_v4  ;;  %v3619_v43 = vmul.f32 0.70710677, %v11606_v42 }
 0x4f2   : > { %7766 = vrcp.f32 %v5154_v0  ;;  %v4256_v63 = vmul.f32 %v4192_v17, %v11566_v14  ;;  %v5024_v34 = vadd.f32 -0.0073733293, %v4960_v60  ;;  %v11620_v48 = vmul.f32 %v11614_v58, %v11614_v58 }
 0x4f3   : > { %v4575_v57 = vadd.f32 -0.016096033, %v4511_v8  ;;  %v11624_v10 = vmul.f32 %v5342_v31, %v11494_v50  ;;  %v5340_v30 = vadd.f32 1.0, %v5266_v46  ;;  %v4514_v45 = vmul.f32 %v4450_v33, %v11549_v2 }
 0x4f4   : > { %v4320_v12 = vadd.f32 -0.00073499064, %v4256_v63  ;;  %v5088_v28 = vmul.f32 %v5024_v34, %v11566_v14  ;;  %v3877_v5 = vmul.f32 -2.7261424e-10, %v11620_v48  ;;  %v4709_v25 = vmul.f32 -1.45660715e-05, %v11620_v48 }
 0x4f5   : > { %v11632_v51 = vadd.f32 %v11293_v40, %v11142_v62  ;;  %v4639_v20 = vmul.f32 %v11528_v56, %v4575_v57  ;;  %v4578_v3 = vadd.f32 -0.016096033, %v4514_v45  ;;  %v11636_v31 = vclamps-f32 %v3619_v43, 4.0 }
 0x4f6   : > { %v4384_v50 = vmul.f32 %v4320_v12, %v11566_v14  ;;  %v5276_v2 = vmul.f32 %v7763_v16, %v4641_v7  ;;  %v5152_v46 = vadd.f32 -0.014264739, %v5088_v28  ;;  %v3941_v4 = vadd.f32 2.7706815e-08, %v3877_v5 }
 0x4f7   : > { %v7765_v32 = vpop.eup %7764  ;;  %v4773_v0 = vadd.f32 -0.00021337405, %v4709_v25  ;;  %v4642_v17 = vmul.f32 %v11542_v49, %v4578_v3  ;;  %v11641_v60 = vmul.f32 %v11636_v31, %v11636_v31  ;;  %v11645_v62 = vadd.f32 %v11293_v40, %v11171_v35 }
 0x4f8   : > { %v4448_v8 = vadd.f32 -0.0029546, %v4384_v50  ;;  %7768 = vrcp.f32 %v5152_v46  ;;  %v4005_v56 = vmul.f32 %v3941_v4, %v11620_v48  ;;  %v3622_v16 = vmul.f32 0.70710677, %v11632_v51 }
 0x4f9   : > { %v4837_v33 = vmul.f32 %v4773_v0, %v11620_v48  ;;  %v5272_v7 = vmul.f32 %v7765_v32, %v4639_v20  ;;  %v3875_v49 = vmul.f32 -2.7261424e-10, %v11641_v60  ;;  %v4707_v57 = vmul.f32 -1.45660715e-05, %v11641_v60 }
 0x4fa   : > { %v4512_v63 = vmul.f32 %v4448_v8, %v11566_v14  ;;  %v11653_v34 = vadd.f32 1.0, %v5276_v2  ;;  %v4069_v43 = vadd.f32 -2.101024e-06, %v4005_v56  ;;  %v11655_v35 = vclamps-f32 %v3622_v16, 4.0  ;;  %v12500_v16 = vld [vmem:[#allocation20_spill] sm:$0xff] }
 0x4fb   : > { %v4901_v45 = vadd.f32 -0.001682827, %v4837_v33  ;;  %v11658_v12 = vmul.f32 %v5340_v30, %v11505_v9  ;;  %v3939_v5 = vadd.f32 2.7706815e-08, %v3875_v49  ;;  %v4771_v25 = vadd.f32 -0.00021337405, %v4707_v57 }
 0x4fc   : > { %v7767_v40 = vpop.eup %7766  ;;  %v4576_v28 = vadd.f32 -0.016096033, %v4512_v63  ;;  %v4133_v14 = vmul.f32 %v4069_v43, %v11620_v48  ;;  %v11664_v50 = vmul.f32 %v11655_v35, %v11655_v35  ;;  %v5343_v32 = vadd.f32 1.0, %v5272_v7 }
 0x4fd   : > { %v5278_v20 = vmul.f32 %v7767_v40, %v4642_v17  ;;  %v4965_v3 = vmul.f32 %v4901_v45, %v11620_v48  ;;  %v4003_v2 = vmul.f32 %v3939_v5, %v11641_v60  ;;  %v4835_v46 = vmul.f32 %v4771_v25, %v11641_v60 }
 0x4fe   : > { %v3620_v9 = vmul.f32 0.70710677, %v11645_v62  ;;  %v4640_v30 = vmul.f32 %v11551_v1, %v4576_v28  ;;  %v4197_v4 = vadd.f32 -5.6925062e-05, %v4133_v14  ;;  %v5435_v17 = vpack.c.bf16 %v11283_v55, %v11272_v29 }
 0x4ff   : > { %v5029_v0 = vadd.f32 -0.0073733293, %v4965_v3  ;;  %v4067_v8 = vadd.f32 -2.101024e-06, %v4003_v2  ;;  %v4899_v56 = vadd.f32 -0.001682827, %v4835_v46  ;;  %v5436_v7 = vpack.c.bf16 %v11276_v47, %v12500_v16 }
 0x500   : > { %v3878_v33 = vmul.f32 -2.7261424e-10, %v11664_v50  ;;  %v5346_v63 = vadd.f32 1.0, %v5278_v20  ;;  %v4261_v49 = vmul.f32 %v4197_v4, %v11620_v48  ;;  %v4710_v43 = vmul.f32 -1.45660715e-05, %v11664_v50  ;;  %7397 = vmatprep.mubr.bf16.mxu0 %v5435_v17 }
 0x501   : > { %v5093_v57 = vmul.f32 %v5029_v0, %v11620_v48  ;;  %v4131_v1 = vmul.f32 %v4067_v8, %v11641_v60  ;;  %v4963_v45 = vmul.f32 %v4899_v56, %v11641_v60  ;;  %v11680_v55 = vclamps-f32 %v3620_v9, 4.0  ;;  %7398 = vmatmul.mubr.bf16.gmra.mrb[104].mxu0 %v5436_v7 }
 0x502   : > { %v3942_v29 = vadd.f32 2.7706815e-08, %v3878_v33  ;;  %v7769_v40 = vpop.eup %7768  ;;  %v4325_v28 = vadd.f32 -0.00073499064, %v4261_v49  ;;  %v4774_v47 = vadd.f32 -0.00021337405, %v4710_v43  ;;  %v5437_v25 = vpack.c.bf16 %v11425_v38, %v11349_v36 }
 0x503   : > { %v5157_v5 = vadd.f32 -0.014264739, %v5093_v57  ;;  %v5274_v20 = vmul.f32 %v7769_v40, %v4640_v30  ;;  %v4195_v14 = vadd.f32 -5.6925062e-05, %v4131_v1  ;;  %v5027_v3 = vadd.f32 -0.0073733293, %v4963_v45 }
 0x504   : > { %v4006_v2 = vmul.f32 %v3942_v29, %v11664_v50  ;;  %v4389_v46 = vmul.f32 %v4325_v28, %v11620_v48  ;;  %v4838_v4 = vmul.f32 %v4774_v47, %v11664_v50  ;;  %v11689_v9 = vmul.f32 %v11680_v55, %v11680_v55  ;;  %7401 = vmatprep.mubr.bf16.mxu0 %v5437_v25 }
 0x505   : > { %7770 = vrcp.f32 %v5157_v5  ;;  %v5344_v0 = vadd.f32 1.0, %v5274_v20  ;;  %v4259_v17 = vmul.f32 %v4195_v14, %v11641_v60  ;;  %v5091_v36 = vmul.f32 %v5027_v3, %v11641_v60  ;;  %v11727_v3 = vld [vmem:[%s12406_s9] ss:$0 sm:$0xff] }
 0x506   : > { %v4070_v38 = vadd.f32 -2.101024e-06, %v4006_v2  ;;  %v4453_v30 = vadd.f32 -0.0029546, %v4389_v46  ;;  %v4902_v8 = vadd.f32 -0.001682827, %v4838_v4  ;;  %v5438_v33 = vpack.c.bf16 %v11379_v24, %v11313_v39 }
 0x507   : > { %v3876_v56 = vmul.f32 -2.7261424e-10, %v11689_v9  ;;  %v11697_v16 = vmul.f32 %v5343_v32, %v11523_v15  ;;  %v11700_v7 = vmul.f32 %v5346_v63, %v11540_v22  ;;  %v4323_v49 = vadd.f32 -0.00073499064, %v4259_v17 }
 0x508   : > { %v4134_v57 = vmul.f32 %v4070_v38, %v11664_v50  ;;  %v4517_v43 = vmul.f32 %v4453_v30, %v11620_v48  ;;  %v4966_v1 = vmul.f32 %v4902_v8, %v11664_v50  ;;  %v4708_v29 = vmul.f32 -1.45660715e-05, %v11689_v9 }
 0x509   : > { %v3940_v45 = vadd.f32 2.7706815e-08, %v3876_v56  ;;  %v11707_v40 = vmul.f32 %v5344_v0, %v11562_v23  ;;  %v4387_v39 = vmul.f32 %v4323_v49, %v11641_v60  ;;  %7402 = vmatmul.mubr.bf16.gmra.mrb[108].mxu0 %v5438_v33  ;;  %v5439_v15 = vpack.c.bf16 %v11513_v37, %v11491_v18  ;;  %v7371_v25 = vpop.f32.mrb[76].mxu0 }
 0x50a   : > { %v4198_v24 = vadd.f32 -5.6925062e-05, %v4134_v57  ;;  %v5155_v22 = vadd.f32 -0.014264739, %v5091_v36  ;;  %v5030_v32 = vadd.f32 -0.0073733293, %v4966_v1  ;;  %v5440_v23 = vpack.c.bf16 %v11502_v54, %v11477_v6 }
 0x50b   : > { %v4004_v63 = vmul.f32 %v3940_v45, %v11689_v9  ;;  %v4772_v48 = vadd.f32 -0.00021337405, %v4708_v29  ;;  %v4581_v28 = vadd.f32 -0.016096033, %v4517_v43  ;;  %7405 = vmatprep.mubr.bf16.mxu0 %v5439_v15  ;;  %v5441_v47 = vpack.c.bf16 %v11658_v12, %v11610_v19  ;;  %v5600_v2 = vpop.f32.mrb[77].mxu0  ;;  %v12501_v43 = vld [vmem:[#allocation21_spill] sm:$0xff] }
 0x50c   : > { %v4262_v5 = vmul.f32 %v4198_v24, %v11664_v50  ;;  %v11720_v20 = vmul.f32 %v11653_v34, %v11519_v21  ;;  %v5094_v18 = vmul.f32 %v5030_v32, %v11664_v50  ;;  %v4451_v6 = vadd.f32 -0.0029546, %v4387_v39  ;;  %v7372_v34 = vpop.f32.mrb[78].mxu0  ;;  %v12502_v15 = vld [vmem:[#allocation19_spill] sm:$0xff] }
 0x50d   : > { %v4068_v37 = vadd.f32 -2.101024e-06, %v4004_v63  ;;  %v4836_v14 = vmul.f32 %v4772_v48, %v11689_v9  ;;  %v5442_v19 = vpack.c.bf16 %v11624_v10, %v11533_v13  ;;  %v5443_v21 = vpack.c.bf16 %v11707_v40, %v11697_v16  ;;  %v5603_v36 = vpop.f32.mrb[79].mxu0 }
 0x50e   : > { %v4326_v54 = vadd.f32 -0.00073499064, %v4262_v5  ;;  %v5158_v46 = vadd.f32 -0.014264739, %v5094_v18  ;;  %v5444_v17 = vpack.c.bf16 %v11700_v7, %v11720_v20  ;;  %v4645_v38 = vmul.f32 %v11614_v58, %v4581_v28  ;;  %v12504_v18 = vld [vmem:[#allocation23_spill] sm:$0xff] }
 0x50f   : > { %v7771_v12 = vpop.eup %7770  ;;  %v4132_v4 = vmul.f32 %v4068_v37, %v11689_v9  ;;  %v4900_v0 = vadd.f32 -0.001682827, %v4836_v14  ;;  %7772 = vrcp.f32 %v5155_v22  ;;  %v4515_v8 = vmul.f32 %v4451_v6, %v11641_v60 }
 0x510   : > { %v4390_v30 = vmul.f32 %v4326_v54, %v11664_v50  ;;  %7774 = vrcp.f32 %v5158_v46  ;;  %v11742_v33 = vadd.f32 %v11358_v41, %v11727_v3  ;;  %v11746_v16 = vadd.f32 %v11369_v26, %v11727_v3 }
 0x511   : > { %v4196_v13 = vadd.f32 -5.6925062e-05, %v4132_v4  ;;  %v4964_v10 = vmul.f32 %v4900_v0, %v11689_v9  ;;  %7406 = vmatmul.mubr.bf16.gmra.mrb[112].mxu0 %v5440_v23  ;;  %v11751_v57 = vadd.f32 %v11727_v3, %v11362_v61  ;;  %v11755_v60 = vadd.f32 %v11727_v3, %v12501_v43 }
 0x512   : > { %v4454_v56 = vadd.f32 -0.0029546, %v4390_v30  ;;  %7409 = vmatprep.mubr.bf16.mxu0 %v5441_v47  ;;  %v5284_v1 = vmul.f32 %v7771_v12, %v4645_v38  ;;  %v6100_v45 = vpack.c.bf16 %v11746_v16, %v11742_v33  ;;  %v11765_v61 = vadd.f32 %v11464_v53, %v11727_v3  ;;  %v12503_v53 = vld [vmem:[#allocation22_spill] sm:$0xff] }
 0x513   : > { %v4260_v58 = vmul.f32 %v4196_v13, %v11689_v9  ;;  %v5028_v49 = vadd.f32 -0.0073733293, %v4964_v10  ;;  %v6099_v40 = vpack.c.bf16 %v11755_v60, %v11751_v57  ;;  %v11769_v24 = vadd.f32 %v11727_v3, %v11470_v44  ;;  %v11851_v57 = vld [vmem:[%s491_s20] sm:$0xf] }
 0x514   : > { %v4518_v41 = vmul.f32 %v4454_v56, %v11664_v50  ;;  %v11773_v50 = vadd.f32 %v11474_v11, %v11727_v3  ;;  %v11777_v22 = vadd.f32 %v11727_v3, %v12502_v15  ;;  %v4579_v32 = vadd.f32 -0.016096033, %v4515_v8 }
 0x515   : > { %v4324_v26 = vadd.f32 -0.00073499064, %v4260_v58  ;;  %v5092_v29 = vmul.f32 %v5028_v49, %v11689_v9  ;;  %v11782_v28 = vadd.f32 %v12503_v53, %v11727_v3  ;;  %v11791_v23 = vadd.f32 %v11591_v59, %v11727_v3 }
 0x516   : > { %v4582_v39 = vadd.f32 -0.016096033, %v4518_v41  ;;  %v6102_v44 = vpack.c.bf16 %v11773_v50, %v11765_v61  ;;  %v6101_v11 = vpack.c.bf16 %v11777_v22, %v11769_v24  ;;  %v11795_v37 = vadd.f32 %v11727_v3, %v12504_v18 }
 0x517   : > { %v4388_v63 = vmul.f32 %v4324_v26, %v11689_v9  ;;  %v5156_v48 = vadd.f32 -0.014264739, %v5092_v29  ;;  %v11799_v14 = vadd.f32 %v11727_v3, %v11599_v27  ;;  %v6104_v6 = vpack.c.bf16 %v11791_v23, %v11782_v28 }
 0x518   : > { %v4646_v5 = vmul.f32 %v11655_v35, %v4582_v39  ;;  %v11804_v54 = vadd.f32 %v7371_v25, %v11727_v3  ;;  %v11807_v59 = vadd.f32 %v7372_v34, %v11727_v3  ;;  %v11813_v27 = vadd.f32 %v11727_v3, %v5600_v2 }
 0x519   : > { %v4452_v47 = vadd.f32 -0.0029546, %v4388_v63  ;;  %7776 = vrcp.f32 %v5156_v48  ;;  %v7773_v35 = vpop.eup %7772  ;;  %7410 = vmatmul.mubr.bf16.gmra.mrb[116].mxu0 %v5442_v19  ;;  %v6103_v4 = vpack.c.bf16 %v11799_v14, %v11795_v37  ;;  %v11816_v19 = vadd.f32 %v11727_v3, %v5603_v36 }
 0x51a   : > { %v7775_v12 = vpop.eup %7774  ;;  %7413 = vmatprep.mubr.bf16.mxu0 %v5443_v21  ;;  %v5349_v0 = vadd.f32 1.0, %v5284_v1  ;;  %v4643_v25 = vmul.f32 %v11636_v31, %v4579_v32  ;;  %v6106_v34 = vpack.c.bf16 %v11807_v59, %v11804_v54  ;;  %v3557_v21 = vmul.f32 0.5, %v11584_v52 }
 0x51b   : > { %v4516_v46 = vmul.f32 %v4452_v47, %v11689_v9  ;;  %v5286_v38 = vmul.f32 %v7775_v12, %v4646_v5  ;;  %v6105_v9 = vpack.c.bf16 %v11816_v19, %v11813_v27  ;;  %v3558_v13 = vmul.f32 0.5, %v11632_v51 }
 0x51c   : > { %v5413_v10 = vmul.f32 %v5349_v0, %v3557_v21  ;;  %v5280_v8 = vmul.f32 %v7773_v35, %v4643_v25  ;;  %v3555_v52 = vmul.f32 0.5, %v11606_v42  ;;  %v3556_v51 = vmul.f32 0.5, %v11645_v62 }
 0x51d   : > { %v4580_v30 = vadd.f32 -0.016096033, %v4516_v46  ;;  %v5350_v2 = vadd.f32 1.0, %v5286_v38  ;;  %v5808_v62 = vlaneseq  ;;  %v11853_v60 = vstv %s6801_s24 }
 0x51e   : > { %v5347_v43 = vadd.f32 1.0, %v5280_v8  ;;  %v12521_v19 = vmov 0  ;;  %v12525_v59 = vmov 0 }
 0x51f   : > { %v5414_v36 = vmul.f32 %v5350_v2, %v3558_v13  ;;  %v4644_v56 = vmul.f32 %v11680_v55, %v4580_v30  ;;  %v11841_v53 = vshrl.u32 %v5808_v62, 7  ;;  %v7855_v13 = vmov 1.0|1.0  }
 0x521   : > { %7414 = vmatmul.mubr.bf16.gmra.mrb[120].mxu0 %v5444_v17  ;;  %v5446_v31 = vpack.c.bf16 %v5414_v36, %v5413_v10  ;;  %v5411_v17 = vmul.f32 %v5347_v43, %v3555_v52  ;;  %v5810_v47 = vadd.s32 8, %v11841_v53  ;;  %v5849_v18 = vsub.s32 1, %v11841_v53 }
 0x522   : > { %v7375_v49 = vpop.f32.mrb[80].mxu0  ;;  %v11857_v16 = vadd.s32 %v11853_v60, %v11841_v53  ;;  %v5811_v2 = vadd.s32 16, %v11841_v53  ;;  %v5812_v10 = vadd.s32 24, %v11841_v53  ;;  %v5813_v22 = vadd.s32 32, %v11841_v53 }
 0x523   : > { %v7777_v58 = vpop.eup %7776  ;;  %v5616_v41 = vpop.f32.mrb[81].mxu0  ;;  %v5625_v39 = vadd.f32 %v7375_v49, %v11727_v3  ;;  %v5819_v14 = vadd.s32 80, %v11841_v53  ;;  %v5820_v28 = vadd.s32 88, %v11841_v53 }
 0x524   : > { %v5282_v1 = vmul.f32 %v7777_v58, %v4644_v56  ;;  %v7376_v26 = vpop.f32.mrb[82].mxu0  ;;  %v5617_v7 = vadd.f32 %v11727_v3, %v5616_v41  ;;  %v11880_v8 = vadd.s32 %v11853_v60, %v5811_v2  ;;  %v11883_v36 = vadd.s32 %v11853_v60, %v5812_v10 }
 0x525   : > { %v5628_v55 = vadd.f32 %v7376_v26, %v11727_v3  ;;  %v5619_v15 = vpop.f32.mrb[83].mxu0  ;;  %v11899_v56 = vadd.s32 %v11853_v60, %v5813_v22  ;;  %v5815_v26 = vadd.s32 48, %v11841_v53  ;;  %v11957_v23 = vadd.s32 %v11853_v60, %v5819_v14 }
 0x526   : > { %v5348_v29 = vadd.f32 1.0, %v5282_v1  ;;  %v5620_v20 = vadd.f32 %v11727_v3, %v5619_v15 }
 0x527   : > { %v6108_v63 = vpack.c.bf16 %v5628_v55, %v5625_v39  ;;  %v11919_v55 = vadd.s32 %v11853_v60, %v5815_v26 }
 0x528   : > { %v5412_v32 = vmul.f32 %v5348_v29, %v3556_v51  ;;  %v6107_v48 = vpack.c.bf16 %v5620_v20, %v5617_v7  ;;  %v5816_v51 = vadd.s32 56, %v11841_v53  ;;  %v5817_v20 = vadd.s32 64, %v11841_v53 }
 0x52a   : > { %v5445_v42 = vpack.c.bf16 %v5412_v32, %v5411_v17  ;;  %7053 = vmatprep.subr.bf16.mxu1 %v6107_v48  ;;  %v11922_v15 = vadd.s32 %v11853_v60, %v5816_v51  ;;  %v5818_v17 = vadd.s32 72, %v11841_v53  ;;  %v11941_v32 = vadd.s32 %v11853_v60, %v5817_v20 }
 0x52b   : > { %7054 = vmatpush3.bf16.msra.mxu1 %v6099_v40  ;;  %v11863_v40 = vrot.slane %v11851_v57, %v5849_v18  ;;  %v5821_v48 = vadd.s32 96, %v11841_v53  ;;  %v5823_v18 = vadd.s32 112, %v11841_v53 }
 0x52c   : > { %7417 = vmatprep.mubr.bf16.mxu0 %v5445_v42  ;;  %7055 = vmatprep.subr.bf16.mxu1 %v6108_v63  ;;  %v11944_v63 = vadd.s32 %v11853_v60, %v5818_v17  ;;  %v5822_v42 = vadd.s32 104, %v11841_v53 }
 0x52d   : > { %7418 = vmatmul.mubr.bf16.gmra.mrb[124].mxu0 %v5446_v31  ;;  %vm5860_vm0 = vcmp.eq.s32.totalorder %v11857_v16, %v11863_v40  ;;  %vm5868_vm3 = vcmp.eq.s32.totalorder %v11880_v8, %v11863_v40  ;;  %vm5872_vm4 = vcmp.eq.s32.totalorder %v11883_v36, %v11863_v40  ;;  %vm5876_vm6 = vcmp.eq.s32.totalorder %v11899_v56, %v11863_v40 }
 0x52e   : > { %vm11892_vm5 = vmpackc.low %vm5872_vm4, %vm5868_vm3  ;;  %vm5884_vm9 = vcmp.eq.s32.totalorder %v11919_v55, %v11863_v40  ;;  %vm5888_vm10 = vcmp.eq.s32.totalorder %v11922_v15, %v11863_v40  ;;  %vm5892_vm12 = vcmp.eq.s32.totalorder %v11941_v32, %v11863_v40  ;;  %vm5896_vm13 = vcmp.eq.s32.totalorder %v11944_v63, %v11863_v40 }
 0x52f   : > { %7056 = vmatpush3.bf16.msra.mxu1 %v6100_v45  ;;  %v11860_v45 = vadd.s32 %v11853_v60, %v5810_v47  ;;  %vm11931_vm11 = vmpackc.low %vm5888_vm10, %vm5884_vm9  ;;  %vm5900_vm15 = vcmp.eq.s32.totalorder %v11957_v23, %v11863_v40  ;;  %v11973_v62 = vadd.s32 %v11853_v60, %v5821_v48 }
 0x530   : > { %vm11950_vm14 = vmpackc.low %vm5896_vm13, %vm5892_vm12 }
 0x531   : > { %vm5864_vm1 = vcmp.eq.s32.totalorder %v11860_v45, %v11863_v40 }
 0x532   : > { %vm6866_vm2 = vmpackc.low %vm5864_vm1, %vm5860_vm0 }
 0x533   : > { %6867 = vmatprep.mubr.msk.bf16.mxu1 %vm6866_vm2, %v7855_v13  ;;  %vm5908_vm2 = vcmp.eq.s32.totalorder %v11973_v62, %v11863_v40 }
 0x548   : > { %v7379_v5 = vpop.f32.mrb[84].mxu0 }
 0x549   : > { %v5632_v35 = vpop.f32.mrb[85].mxu0  ;;  %v5641_v12 = vadd.f32 %v7379_v5, %v11727_v3  ;;  %v11976_v5 = vadd.s32 %v11853_v60, %v5822_v42 }
 0x54a   : > { %v7380_v33 = vpop.f32.mrb[86].mxu0  ;;  %v5633_v25 = vadd.f32 %v11727_v3, %v5632_v35  ;;  %v5824_v35 = vadd.s32 120, %v11841_v53 }
 0x54b   : > { %v5644_v46 = vadd.f32 %v7380_v33, %v11727_v3  ;;  %v5635_v0 = vpop.f32.mrb[87].mxu0  ;;  %vm5912_vm3 = vcmp.eq.s32.totalorder %v11976_v5, %v11863_v40  ;;  %v11989_v33 = vadd.s32 %v11853_v60, %v5823_v18 }
 0x54c   : > { %v5636_v38 = vadd.f32 %v11727_v3, %v5635_v0  ;;  %vm11982_vm4 = vmpackc.low %vm5912_vm3, %vm5908_vm2 }
 0x54d   : > { %v6110_v30 = vpack.c.bf16 %v5644_v46, %v5641_v12  ;;  %v11992_v12 = vadd.s32 %v11853_v60, %v5824_v35 }
 0x54e   : > { %v6109_v21 = vpack.c.bf16 %v5636_v38, %v5633_v25  ;;  %v5845_v25 = vsub.s32 0, %v11841_v53 }
 0x550   : > { %7057 = vmatprep.subr.bf16.mxu1 %v6109_v21 }
 0x551   : > { %7058 = vmatpush3.bf16.msra.mxu1 %v6101_v11  ;;  %v5814_v11 = vadd.s32 40, %v11841_v53 }
 0x552   : > { %7059 = vmatprep.subr.bf16.mxu1 %v6110_v30 }
 0x553   : > { %v11902_v31 = vadd.s32 %v11853_v60, %v5814_v11 }
 0x555   : > { %7060 = vmatpush3.bf16.msra.mxu1 %v6102_v44  ;;  %vm5880_vm7 = vcmp.eq.s32.totalorder %v11902_v31, %v11863_v40 }
 0x556   : > { %vm11908_vm8 = vmpackc.low %vm5880_vm7, %vm5876_vm6  ;;  %vm5916_vm6 = vcmp.eq.s32.totalorder %v11989_v33, %v11863_v40  ;;  %vm5920_vm7 = vcmp.eq.s32.totalorder %v11992_v12, %v11863_v40 }
 0x557   : > { %vm11999_vm9 = vmpackc.low %vm5920_vm7, %vm5916_vm6 }
 0x55b   : > { %v7383_v58 = vpop.f32.mrb[88].mxu0 }
 0x55c   : > { %v5648_v61 = vpop.f32.mrb[89].mxu0  ;;  %v5657_v49 = vadd.f32 %v7383_v58, %v11727_v3  ;;  %v12008_v58 = vrot.slane %v11851_v57, %v5845_v25 }
 0x55d   : > { %v7384_v44 = vpop.f32.mrb[90].mxu0  ;;  %v5649_v41 = vadd.f32 %v11727_v3, %v5648_v61 }
 0x55e   : > { %v5660_v43 = vadd.f32 %v7384_v44, %v11727_v3  ;;  %v5651_v1 = vpop.f32.mrb[91].mxu0  ;;  %v5853_v44 = vsub.s32 2, %v11841_v53  ;;  %vm5859_vm10 = vcmp.eq.s32.totalorder %v11857_v16, %v12008_v58  ;;  %vm5863_vm12 = vcmp.eq.s32.totalorder %v11860_v45, %v12008_v58 }
 0x55f   : > { %v5652_v52 = vadd.f32 %v11727_v3, %v5651_v1  ;;  %vm6868_vm13 = vmpackc.low %vm5863_vm12, %vm5859_vm10  ;;  %vm5867_vm10 = vcmp.eq.s32.totalorder %v11880_v8, %v12008_v58  ;;  %vm5871_vm12 = vcmp.eq.s32.totalorder %v11883_v36, %v12008_v58  ;;  %v12531_v1 = vmov 0 }
 0x560   : > { %v6112_v29 = vpack.c.bf16 %v5660_v43, %v5657_v49  ;;  %v12023_v43 = vrot.slane %v11851_v57, %v5853_v44 }
 0x561   : > { %v6111_v39 = vpack.c.bf16 %v5652_v52, %v5649_v41  ;;  %v12533_v52 = vmov 0 }
 0x562   : > { %vm5869_vm3 = vcmp.eq.s32.totalorder %v11880_v8, %v12023_v43  ;;  %vm5873_vm6 = vcmp.eq.s32.totalorder %v11883_v36, %v12023_v43 }
 0x563   : > { %7061 = vmatprep.subr.bf16.mxu1 %v6111_v39  ;;  %vm12040_vm7 = vmpackc.low %vm5873_vm6, %vm5869_vm3 }
 0x564   : > { %7062 = vmatpush3.bf16.msra.mxu1 %v6103_v4  ;;  %v12522_v19 = vsel %vm12040_vm7, 4294967295, %v12521_v19 }
 0x565   : > { %7063 = vmatprep.subr.bf16.mxu1 %v6112_v29  ;;  %v12537_v29 = vmov 0 }
 0x568   : > { %7064 = vmatpush3.bf16.msra.mxu1 %v6104_v6  ;;  %v11960_v6 = vadd.s32 %v11853_v60, %v5820_v28 }
 0x56a   : > { %vm5904_vm0 = vcmp.eq.s32.totalorder %v11960_v6, %v11863_v40  ;;  %v5857_v40 = vsub.s32 3, %v11841_v53 }
 0x56b   : > { %vm11966_vm1 = vmpackc.low %vm5904_vm0, %vm5900_vm15 }
 0x56c   : > { %v12020_v49 = vrot.slane %v11851_v57, %v5857_v40 }
 0x56e   : > { %vm5870_vm15 = vcmp.eq.s32.totalorder %v11880_v8, %v12020_v49  ;;  %vm5874_vm0 = vcmp.eq.s32.totalorder %v11883_v36, %v12020_v49  ;;  %vm5882_vm3 = vcmp.eq.s32.totalorder %v11902_v31, %v12020_v49 }
 0x56f   : > { %vm12032_vm2 = vmpackc.low %vm5874_vm0, %vm5870_vm15  ;;  %vm5878_vm0 = vcmp.eq.s32.totalorder %v11899_v56, %v12020_v49 }
 0x570   : > { %vm6872_vm15 = vmpackc.low %vm5871_vm12, %vm5867_vm10  ;;  %vm5875_vm10 = vcmp.eq.s32.totalorder %v11899_v56, %v12008_v58  ;;  %vm5879_vm12 = vcmp.eq.s32.totalorder %v11902_v31, %v12008_v58 }
 0x571   : > { %vm12056_vm6 = vmpackc.low %vm5882_vm3, %vm5878_vm0  ;;  %vm5886_vm3 = vcmp.eq.s32.totalorder %v11919_v55, %v12020_v49 }
 0x572   : > { %vm6876_vm0 = vmpackc.low %vm5879_vm12, %vm5875_vm10  ;;  %vm5883_vm10 = vcmp.eq.s32.totalorder %v11919_v55, %v12008_v58  ;;  %vm5887_vm12 = vcmp.eq.s32.totalorder %v11922_v15, %v12008_v58 }
 0x583   : > { %v7387_v46 = vpop.f32.mrb[92].mxu0 }
 0x584   : > { %v5664_v0 = vpop.f32.mrb[93].mxu0  ;;  %v5673_v21 = vadd.f32 %v7387_v46, %v11727_v3 }
 0x585   : > { %v7388_v38 = vpop.f32.mrb[94].mxu0  ;;  %v5665_v10 = vadd.f32 %v11727_v3, %v5664_v0 }
 0x586   : > { %v5676_v60 = vadd.f32 %v7388_v38, %v11727_v3  ;;  %v5667_v2 = vpop.f32.mrb[95].mxu0 }
 0x587   : > { %v5668_v22 = vadd.f32 %v11727_v3, %v5667_v2 }
 0x588   : > { %v6114_v11 = vpack.c.bf16 %v5676_v60, %v5673_v21 }
 0x589   : > { %v6113_v61 = vpack.c.bf16 %v5668_v22, %v5665_v10 }
 0x58b   : > { %7065 = vmatprep.subr.bf16.mxu1 %v6113_v61 }
 0x58c   : > { %7066 = vmatpush3.bf16.msra.mxu1 %v6105_v9 }
 0x58d   : > { %7067 = vmatprep.subr.bf16.mxu1 %v6114_v11 }
 0x590   : > { %7068 = vmatpush3.bf16.msra.mxu1 %v6106_v34 }
 0x593   : > { %6869 = vmatmul.mubr.msk.bf16.vlgmr.msra.gmra.mrb[64].mxu1 %vm6868_vm13, %v7855_v13  ;;  %vm5881_vm13 = vcmp.eq.s32.totalorder %v11902_v31, %v12023_v43 }
 0x594   : > { %6871 = vmatprep.mubr.msk.bf16.mxu1 %vm11892_vm5, %v7855_v13  ;;  %vm5877_vm5 = vcmp.eq.s32.totalorder %v11899_v56, %v12023_v43 }
 0x595   : > { %vm12064_vm7 = vmpackc.low %vm5881_vm13, %vm5877_vm5  ;;  %vm5890_vm5 = vcmp.eq.s32.totalorder %v11922_v15, %v12020_v49 }
 0x596   : > { %v12526_v59 = vsel %vm12064_vm7, 4294967295, %v12525_v59  ;;  %vm12080_vm13 = vmpackc.low %vm5890_vm5, %vm5886_vm3  ;;  %vm5894_vm3 = vcmp.eq.s32.totalorder %v11941_v32, %v12020_v49 }
 0x59b   : > { %6873 = vmatmul.mubr.msk.bf16.gmra.mrb[68].mxu1 %vm6872_vm15, %v7855_v13  ;;  %vm5889_vm15 = vcmp.eq.s32.totalorder %v11922_v15, %v12023_v43 }
 0x59c   : > { %6875 = vmatprep.mubr.msk.bf16.mxu1 %vm11908_vm8, %v7855_v13  ;;  %vm5885_vm8 = vcmp.eq.s32.totalorder %v11919_v55, %v12023_v43  ;;  %v12541_v55 = vmov 0 }
 0x59d   : > { %vm12088_vm7 = vmpackc.low %vm5889_vm15, %vm5885_vm8  ;;  %vm5893_vm8 = vcmp.eq.s32.totalorder %v11941_v32, %v12023_v43  ;;  %vm5897_vm15 = vcmp.eq.s32.totalorder %v11944_v63, %v12023_v43 }
 0x5a3   : > { %6877 = vmatmul.mubr.msk.bf16.gmra.mrb[72].mxu1 %vm6876_vm0, %v7855_v13  ;;  %vm6880_vm0 = vmpackc.low %vm5887_vm12, %vm5883_vm10  ;;  %vm5891_vm12 = vcmp.eq.s32.totalorder %v11941_v32, %v12008_v58 }
 0x5a4   : > { %v7391_v53 = vpop.f32.mrb[96].mxu0  ;;  %6879 = vmatprep.mubr.msk.bf16.mxu1 %vm11931_vm11, %v7855_v13  ;;  %vm5898_vm11 = vcmp.eq.s32.totalorder %v11944_v63, %v12020_v49  ;;  %vm12126_vm10 = vmpackc.low %vm5897_vm15, %vm5893_vm8  ;;  %vm5902_vm8 = vcmp.eq.s32.totalorder %v11957_v23, %v12020_v49  ;;  %vm5906_vm15 = vcmp.eq.s32.totalorder %v11960_v6, %v12020_v49 }
 0x5a5   : > { %v5680_v57 = vpop.f32.mrb[97].mxu0  ;;  %v12101_v36 = vadd.f32 %v7391_v53, %v11727_v3  ;;  %vm12116_vm5 = vmpackc.low %vm5898_vm11, %vm5894_vm3  ;;  %v12534_v52 = vsel %vm12126_vm10, 4294967295, %v12533_v52  ;;  %vm5895_vm3 = vcmp.eq.s32.totalorder %v11944_v63, %v12008_v58 }
 0x5a6   : > { %v7392_v8 = vpop.f32.mrb[98].mxu0  ;;  %v12111_v31 = vadd.f32 %v11727_v3, %v5680_v57  ;;  %v12532_v1 = vsel %vm12116_vm5, 4294967295, %v12531_v1  ;;  %vm6884_vm11 = vmpackc.low %vm5895_vm3, %vm5891_vm12  ;;  %vm5899_vm12 = vcmp.eq.s32.totalorder %v11957_v23, %v12008_v58  ;;  %vm5903_vm3 = vcmp.eq.s32.totalorder %v11960_v6, %v12008_v58 }
 0x5a7   : > { %v12104_v24 = vadd.f32 %v7392_v8, %v11727_v3  ;;  %v5683_v56 = vpop.f32.mrb[99].mxu0  ;;  %vm12144_vm10 = vmpackc.low %vm5906_vm15, %vm5902_vm8  ;;  %vm5910_vm15 = vcmp.eq.s32.totalorder %v11973_v62, %v12020_v49 }
 0x5a8   : > { %v12114_v50 = vadd.f32 %v11727_v3, %v5683_v56  ;;  %vm6888_vm8 = vmpackc.low %vm5903_vm3, %vm5899_vm12  ;;  %vm5907_vm12 = vcmp.eq.s32.totalorder %v11973_v62, %v12008_v58  ;;  %vm5911_vm3 = vcmp.eq.s32.totalorder %v11976_v5, %v12008_v58 }
 0x5a9   : > { %v6116_v41 = vpack.c.bf16 %v12104_v24, %v12101_v36 }
 0x5aa   : > { %v6115_v26 = vpack.c.bf16 %v12114_v50, %v12111_v31 }
 0x5ab   : > { %6881 = vmatmul.mubr.msk.bf16.gmra.mrb[76].mxu1 %vm6880_vm0, %v7855_v13  ;;  %vm5905_vm0 = vcmp.eq.s32.totalorder %v11960_v6, %v12023_v43 }
 0x5ac   : > { %6883 = vmatprep.mubr.msk.bf16.mxu1 %vm11950_vm14, %v7855_v13  ;;  %vm5901_vm14 = vcmp.eq.s32.totalorder %v11957_v23, %v12023_v43 }
 0x5ad   : > { %vm12152_vm5 = vmpackc.low %vm5905_vm0, %vm5901_vm14  ;;  %vm5914_vm14 = vcmp.eq.s32.totalorder %v11976_v5, %v12020_v49 }
 0x5ae   : > { %v12538_v29 = vsel %vm12152_vm5, 4294967295, %v12537_v29  ;;  %vm12168_vm0 = vmpackc.low %vm5914_vm14, %vm5910_vm15  ;;  %vm5918_vm14 = vcmp.eq.s32.totalorder %v11989_v33, %v12020_v49 }
 0x5af   : > { %vm6892_vm15 = vmpackc.low %vm5911_vm3, %vm5907_vm12  ;;  %vm5915_vm12 = vcmp.eq.s32.totalorder %v11989_v33, %v12008_v58  ;;  %vm5919_vm3 = vcmp.eq.s32.totalorder %v11992_v12, %v12008_v58 }
 0x5b3   : > { %6885 = vmatmul.mubr.msk.bf16.gmra.mrb[80].mxu1 %vm6884_vm11, %v7855_v13  ;;  %vm5913_vm11 = vcmp.eq.s32.totalorder %v11976_v5, %v12023_v43 }
 0x5b4   : > { %6887 = vmatprep.mubr.msk.bf16.mxu1 %vm11966_vm1, %v7855_v13  ;;  %vm5909_vm1 = vcmp.eq.s32.totalorder %v11973_v62, %v12023_v43 }
 0x5b5   : > { %vm12176_vm5 = vmpackc.low %vm5913_vm11, %vm5909_vm1  ;;  %vm5922_vm1 = vcmp.eq.s32.totalorder %v11992_v12, %v12020_v49  ;;  %vm5921_vm11 = vcmp.eq.s32.totalorder %v11992_v12, %v12023_v43 }
 0x5b6   : > { %v12542_v55 = vsel %vm12176_vm5, 4294967295, %v12541_v55 }
 0x5bb   : > { %6889 = vmatmul.mubr.msk.bf16.gmra.mrb[84].mxu1 %vm6888_vm8, %v7855_v13  ;;  %vm12192_vm8 = vmpackc.low %vm5922_vm1, %vm5918_vm14  ;;  %vm5862_vm14 = vcmp.eq.s32.totalorder %v11857_v16, %v12020_v49 }
 0x5bc   : > { %6891 = vmatprep.mubr.msk.bf16.mxu1 %vm11982_vm4, %v7855_v13  ;;  %vm5917_vm4 = vcmp.eq.s32.totalorder %v11989_v33, %v12023_v43  ;;  %vm6896_vm1 = vmpackc.low %vm5919_vm3, %vm5915_vm12  ;;  %vm12547_vm3 = vnez %v12522_v19 }
 0x5bd   : > { %vm12200_vm5 = vmpackc.low %vm5921_vm11, %vm5917_vm4  ;;  %vm5865_vm11 = vcmp.eq.s32.totalorder %v11860_v45, %v12023_v43 }
 0x5c0   : > { %v7395_v15 = vpop.f32.mrb[100].mxu0 }
 0x5c1   : > { %v5696_v7 = vpop.f32.mrb[101].mxu0  ;;  %v12205_v63 = vadd.f32 %v7395_v15, %v11727_v3 }
 0x5c2   : > { %v7396_v17 = vpop.f32.mrb[102].mxu0  ;;  %v5697_v28 = vadd.f32 %v11727_v3, %v5696_v7 }
 0x5c3   : > { %v12208_v37 = vadd.f32 %v7396_v17, %v11727_v3  ;;  %v5699_v14 = vpop.f32.mrb[103].mxu0  ;;  %6893 = vmatmul.mubr.msk.bf16.gmra.mrb[88].mxu1 %vm6892_vm15, %v7855_v13  ;;  %vm5866_vm15 = vcmp.eq.s32.totalorder %v11860_v45, %v12020_v49 }
 0x5c4   : > { %v5700_v23 = vadd.f32 %v11727_v3, %v5699_v14  ;;  %6895 = vmatprep.mubr.msk.bf16.mxu1 %vm11999_vm9, %v7855_v13  ;;  %vm6898_vm4 = vmpackc.low %vm5866_vm15, %vm5862_vm14  ;;  %vm5861_vm9 = vcmp.eq.s32.totalorder %v11857_v16, %v12023_v43  ;;  %vm12548_vm14 = vnez %v12526_v59  ;;  %vm12550_vm15 = vnez %v12534_v52 }
 0x5c5   : > { %v6118_v6 = vpack.c.bf16 %v12208_v37, %v12205_v63  ;;  %vm6900_vm12 = vmpackc.low %vm5865_vm11, %vm5861_vm9 }
 0x5c6   : > { %v6117_v4 = vpack.c.bf16 %v5700_v23, %v5697_v28 }
 0x5cb   : > { %6897 = vmatmul.mubr.msk.bf16.gmra.mrb[92].mxu1 %vm6896_vm1, %v7855_v13 }
 0x5cc   : > { %6899 = vmatprep.mubr.msk.bf16.mxu1 %vm6898_vm4, %v7855_v13 }
 0x5d4   : > { %v7399_v48 = vpop.f32.mrb[104].mxu0 }
 0x5d5   : > { %v5712_v42 = vpop.f32.mrb[105].mxu0  ;;  %v5721_v5 = vadd.f32 %v7399_v48, %v11727_v3 }
 0x5d6   : > { %v7400_v62 = vpop.f32.mrb[106].mxu0  ;;  %v5713_v35 = vadd.f32 %v11727_v3, %v5712_v42 }
 0x5d7   : > { %v5724_v47 = vadd.f32 %v7400_v62, %v11727_v3  ;;  %v5715_v18 = vpop.f32.mrb[107].mxu0 }
 0x5d8   : > { %v5716_v33 = vadd.f32 %v11727_v3, %v5715_v18 }
 0x5d9   : > { %v6120_v12 = vpack.c.bf16 %v5724_v47, %v5721_v5 }
 0x5da   : > { %v6119_v46 = vpack.c.bf16 %v5716_v33, %v5713_v35 }
 0x5dc   : > { %v7403_v0 = vpop.f32.mrb[108].mxu0 }
 0x5dd   : > { %v5728_v25 = vpop.f32.mrb[109].mxu0  ;;  %v12233_v30 = vadd.f32 %v7403_v0, %v11727_v3 }
 0x5de   : > { %v7404_v38 = vpop.f32.mrb[110].mxu0  ;;  %v5729_v2 = vadd.f32 %v11727_v3, %v5728_v25 }
 0x5df   : > { %v12236_v21 = vadd.f32 %v7404_v38, %v11727_v3  ;;  %v5731_v60 = vpop.f32.mrb[111].mxu0 }
 0x5e0   : > { %v5732_v10 = vadd.f32 %v11727_v3, %v5731_v60 }
 0x5e1   : > { %v6122_v22 = vpack.c.bf16 %v12236_v21, %v12233_v30 }
 0x5e2   : > { %v6121_v11 = vpack.c.bf16 %v5732_v10, %v5729_v2 }
 0x5e4   : > { %v7407_v58 = vpop.f32.mrb[112].mxu0 }
 0x5e5   : > { %v5744_v61 = vpop.f32.mrb[113].mxu0  ;;  %v5753_v44 = vadd.f32 %v7407_v58, %v11727_v3 }
 0x5e6   : > { %v7408_v40 = vpop.f32.mrb[114].mxu0  ;;  %v5745_v57 = vadd.f32 %v11727_v3, %v5744_v61 }
 0x5e7   : > { %v5756_v49 = vadd.f32 %v7408_v40, %v11727_v3  ;;  %v5747_v53 = vpop.f32.mrb[115].mxu0 }
 0x5e8   : > { %v5748_v8 = vadd.f32 %v11727_v3, %v5747_v53 }
 0x5e9   : > { %v6124_v56 = vpack.c.bf16 %v5756_v49, %v5753_v44 }
 0x5ea   : > { %v6123_v15 = vpack.c.bf16 %v5748_v8, %v5745_v57 }
 0x5ec   : > { %v7411_v7 = vpop.f32.mrb[116].mxu0  ;;  %7117 = vmatprep.subr.bf16.mxu1 %v6123_v15 }
 0x5ed   : > { %v5760_v17 = vpop.f32.mrb[117].mxu0  ;;  %7118 = vmatpush3.bf16.msra.mxu1 %v6115_v26  ;;  %v5769_v28 = vadd.f32 %v7411_v7, %v11727_v3 }
 0x5ee   : > { %v7412_v14 = vpop.f32.mrb[118].mxu0  ;;  %7119 = vmatprep.subr.bf16.mxu1 %v6124_v56  ;;  %v5761_v42 = vadd.f32 %v11727_v3, %v5760_v17 }
 0x5ef   : > { %v5772_v23 = vadd.f32 %v7412_v14, %v11727_v3  ;;  %v5763_v48 = vpop.f32.mrb[119].mxu0 }
 0x5f0   : > { %v5764_v62 = vadd.f32 %v11727_v3, %v5763_v48 }
 0x5f1   : > { %v6126_v5 = vpack.c.bf16 %v5772_v23, %v5769_v28  ;;  %7120 = vmatpush3.bf16.msra.mxu1 %v6116_v41 }
 0x5f2   : > { %v6125_v47 = vpack.c.bf16 %v5764_v62, %v5761_v42 }
 0x5f4   : > { %v7415_v18 = vpop.f32.mrb[120].mxu0  ;;  %7121 = vmatprep.subr.bf16.mxu1 %v6125_v47 }
 0x5f5   : > { %v5776_v31 = vpop.f32.mrb[121].mxu0  ;;  %7122 = vmatpush3.bf16.msra.mxu1 %v6117_v4  ;;  %v5785_v26 = vadd.f32 %v7415_v18, %v11727_v3 }
 0x5f6   : > { %v7416_v50 = vpop.f32.mrb[122].mxu0  ;;  %7123 = vmatprep.subr.bf16.mxu1 %v6126_v5  ;;  %v5777_v0 = vadd.f32 %v11727_v3, %v5776_v31 }
 0x5f7   : > { %v5788_v35 = vadd.f32 %v7416_v50, %v11727_v3  ;;  %v5779_v33 = vpop.f32.mrb[123].mxu0 }
 0x5f8   : > { %v5780_v25 = vadd.f32 %v11727_v3, %v5779_v33 }
 0x5f9   : > { %v6128_v38 = vpack.c.bf16 %v5788_v35, %v5785_v26  ;;  %7124 = vmatpush3.bf16.msra.mxu1 %v6118_v6 }
 0x5fa   : > { %v6127_v36 = vpack.c.bf16 %v5780_v25, %v5777_v0 }
 0x5fc   : > { %7125 = vmatprep.subr.bf16.mxu1 %v6127_v36 }
 0x5fd   : > { %7126 = vmatpush3.bf16.msra.mxu1 %v6119_v46 }
 0x5fe   : > { %7127 = vmatprep.subr.bf16.mxu1 %v6128_v38  ;;  %v6083_v38 = vld [vmem:[#allocation2] sm:$0xff] }
 0x600   : > { %v7419_v24 = vpop.f32.mrb[124].mxu0 }
 0x601   : > { %v5792_v41 = vpop.f32.mrb[125].mxu0  ;;  %7128 = vmatpush3.bf16.msra.mxu1 %v6120_v12  ;;  %v5801_v30 = vadd.f32 %v7419_v24, %v11727_v3 }
 0x602   : > { %v7420_v4 = vpop.f32.mrb[126].mxu0  ;;  %v5793_v2 = vadd.f32 %v11727_v3, %v5792_v41 }
 0x603   : > { %v5804_v21 = vadd.f32 %v7420_v4, %v11727_v3  ;;  %v5795_v60 = vpop.f32.mrb[127].mxu0  ;;  %v6084_v4 = vld [vmem:[#allocation2 + $0x8] sm:$0xff] }
 0x604   : > { %v5796_v10 = vadd.f32 %v11727_v3, %v5795_v60 }
 0x605   : > { %v6130_v58 = vpack.c.bf16 %v5804_v21, %v5801_v30 }
 0x606   : > { %v6129_v63 = vpack.c.bf16 %v5796_v10, %v5793_v2 }
 0x608   : > { %7129 = vmatprep.subr.bf16.mxu1 %v6129_v63 }
 0x609   : > { %7130 = vmatpush3.bf16.msra.mxu1 %v6121_v11 }
 0x60a   : > { %7131 = vmatprep.subr.bf16.mxu1 %v6130_v58 }
 0x60d   : > { %7132 = vmatpush3.bf16.msra.mxu1 %v6122_v22 }
 0x610   : > { %6901 = vmatmul.mubr.msk.bf16.vlgmr.msra.gmra.mrb[96].mxu1 %vm6900_vm12, %v7855_v13 }
 0x611   : > { %6903 = vmatprep.mubr.msk.bf16.mxu1 %vm12032_vm2, %v7855_v13  ;;  %vm12549_vm2 = vnez %v12532_v1 }
 0x618   : > { %6905 = vmatmul.mubr.msk.bf16.gmra.mrb[100].mxu1 %vm12547_vm3, %v7855_v13 }
 0x619   : > { %6907 = vmatprep.mubr.msk.bf16.mxu1 %vm12056_vm6, %v7855_v13  ;;  %vm12551_vm6 = vnez %v12538_v29 }
 0x620   : > { %6909 = vmatmul.mubr.msk.bf16.gmra.mrb[104].mxu1 %vm12548_vm14, %v7855_v13 }
 0x621   : > { %6911 = vmatprep.mubr.msk.bf16.mxu1 %vm12080_vm13, %v7855_v13 }
 0x628   : > { %6913 = vmatmul.mubr.msk.bf16.gmra.mrb[108].mxu1 %vm12088_vm7, %v7855_v13  ;;  %vm12552_vm7 = vnez %v12542_v55 }
 0x629   : > { %6915 = vmatprep.mubr.msk.bf16.mxu1 %vm12549_vm2, %v7855_v13 }
 0x630   : > { %6917 = vmatmul.mubr.msk.bf16.gmra.mrb[112].mxu1 %vm12550_vm15, %v7855_v13 }
 0x631   : > { %6919 = vmatprep.mubr.msk.bf16.mxu1 %vm12144_vm10, %v7855_v13 }
 0x638   : > { %6921 = vmatmul.mubr.msk.bf16.gmra.mrb[116].mxu1 %vm12551_vm6, %v7855_v13 }
 0x639   : > { %6923 = vmatprep.mubr.msk.bf16.mxu1 %vm12168_vm0, %v7855_v13 }
 0x640   : > { %6925 = vmatmul.mubr.msk.bf16.gmra.mrb[120].mxu1 %vm12552_vm7, %v7855_v13 }
 0x641   : > { %6927 = vmatprep.mubr.msk.bf16.mxu1 %vm12192_vm8, %v7855_v13 }
 0x648   : > { %6929 = vmatmul.mubr.msk.bf16.gmra.mrb[124].mxu1 %vm12200_vm5, %v7855_v13 }
 0x666   : > { %v7069_v3 = vpop.f32.mrb[64].mxu1 }
 0x667   : > { %v7070_v16 = vpop.f32.mrb[65].mxu1 }
 0x668   : > { %v7071_v45 = vadd.f32 %v7070_v16, %v7069_v3  ;;  %v7072_v43 = vpop.f32.mrb[66].mxu1  ;;  %v6085_v3 = vld [vmem:[#allocation2 + $0x10] sm:$0xff] }
 0x669   : > { %v7073_v27 = vpop.f32.mrb[67].mxu1 }
 0x66a   : > { %v7074_v19 = vadd.f32 %v7073_v27, %v7072_v43 }
 0x66e   : > { %v7075_v54 = vpop.f32.mrb[68].mxu1 }
 0x66f   : > { %v7076_v59 = vpop.f32.mrb[69].mxu1 }
 0x670   : > { %v7077_v34 = vadd.f32 %v7076_v59, %v7075_v54  ;;  %v7078_v9 = vpop.f32.mrb[70].mxu1  ;;  %v6086_v54 = vld [vmem:[#allocation2 + $0x18] sm:$0xff] }
 0x671   : > { %v7079_v1 = vpop.f32.mrb[71].mxu1 }
 0x672   : > { %v7080_v52 = vadd.f32 %v7079_v1, %v7078_v9 }
 0x676   : > { %v7081_v51 = vpop.f32.mrb[72].mxu1 }
 0x677   : > { %v7082_v29 = vpop.f32.mrb[73].mxu1 }
 0x678   : > { %v12314_v39 = vadd.f32 %v7082_v29, %v7081_v51  ;;  %v7084_v55 = vpop.f32.mrb[74].mxu1 }
 0x679   : > { %v7085_v20 = vpop.f32.mrb[75].mxu1 }
 0x67a   : > { %v12316_v32 = vadd.f32 %v7085_v20, %v7084_v55  ;;  %v6087_v55 = vld [vmem:[#allocation2 + $0x20] sm:$0xff] }
 0x67e   : > { %v7087_v13 = vpop.f32.mrb[76].mxu1 }
 0x67f   : > { %v7088_v37 = vpop.f32.mrb[77].mxu1 }
 0x680   : > { %v12318_v6 = vadd.f32 %v7088_v37, %v7087_v13  ;;  %v7090_v12 = vpop.f32.mrb[78].mxu1 }
 0x681   : > { %v7091_v46 = vpop.f32.mrb[79].mxu1 }
 0x682   : > { %v12320_v22 = vadd.f32 %v7091_v46, %v7090_v12  ;;  %v6088_v12 = vld [vmem:[#allocation2 + $0x28] sm:$0xff] }
 0x686   : > { %v7093_v11 = vpop.f32.mrb[80].mxu1 }
 0x687   : > { %v7094_v61 = vpop.f32.mrb[81].mxu1 }
 0x688   : > { %v12322_v40 = vadd.f32 %v7094_v61, %v7093_v11  ;;  %v7096_v44 = vpop.f32.mrb[82].mxu1 }
 0x689   : > { %v7097_v49 = vpop.f32.mrb[83].mxu1 }
 0x68a   : > { %v12324_v53 = vadd.f32 %v7097_v49, %v7096_v44 }
 0x68e   : > { %v7099_v57 = vpop.f32.mrb[84].mxu1 }
 0x68f   : > { %v7100_v8 = vpop.f32.mrb[85].mxu1 }
 0x690   : > { %v12326_v56 = vadd.f32 %v7100_v8, %v7099_v57  ;;  %v7102_v15 = vpop.f32.mrb[86].mxu1  ;;  %v6089_v57 = vld [vmem:[#allocation2 + $0x30] sm:$0xff] }
 0x691   : > { %v7103_v7 = vpop.f32.mrb[87].mxu1 }
 0x692   : > { %v12328_v17 = vadd.f32 %v7103_v7, %v7102_v15 }
 0x696   : > { %v7105_v14 = vpop.f32.mrb[88].mxu1 }
 0x697   : > { %v7106_v28 = vpop.f32.mrb[89].mxu1 }
 0x698   : > { %v12330_v23 = vadd.f32 %v7106_v28, %v7105_v14  ;;  %v7108_v48 = vpop.f32.mrb[90].mxu1  ;;  %v6090_v14 = vld [vmem:[#allocation2 + $0x38] sm:$0xff] }
 0x699   : > { %v7109_v42 = vpop.f32.mrb[91].mxu1 }
 0x69a   : > { %v12332_v62 = vadd.f32 %v7109_v42, %v7108_v48 }
 0x69e   : > { %v7111_v5 = vpop.f32.mrb[92].mxu1 }
 0x69f   : > { %v7112_v47 = vpop.f32.mrb[93].mxu1 }
 0x6a0   : > { %v12334_v18 = vadd.f32 %v7112_v47, %v7111_v5  ;;  %v7114_v31 = vpop.f32.mrb[94].mxu1 }
 0x6a1   : > { %v7115_v50 = vpop.f32.mrb[95].mxu1 }
 0x6a2   : > { %v12336_v26 = vadd.f32 %v7115_v50, %v7114_v31  ;;  %v6091_v31 = vld [vmem:[#allocation2 + $0x40] sm:$0xff] }
 0x6e3   : > { %v7133_v35 = vpop.f32.mrb[96].mxu1 }
 0x6e4   : > { %v7134_v33 = vpop.f32.mrb[97].mxu1 }
 0x6e5   : > { %v7135_v0 = vadd.f32 %v7134_v33, %v7133_v35  ;;  %v7136_v25 = vpop.f32.mrb[98].mxu1 }
 0x6e6   : > { %v7137_v36 = vpop.f32.mrb[99].mxu1 }
 0x6e7   : > { %v6263_v24 = vadd.f32 %v7135_v0, %v7071_v45  ;;  %v7138_v41 = vadd.f32 %v7137_v36, %v7136_v25  ;;  %v6092_v0 = vld [vmem:[#allocation2 + $0x48] sm:$0xff] }
 0x6e9   : > { %v6325_v30 = vadd.f32 %v6263_v24, %v6083_v38  ;;  %v6266_v21 = vadd.f32 %v7138_v41, %v7074_v19 }
 0x6eb   : > { %6341 = vst [vmem:[#allocation2] sm:$0xff] %v6325_v30  ;;  %v6326_v60 = vadd.f32 %v6266_v21, %v6084_v4  ;;  %v7139_v2 = vpop.f32.mrb[100].mxu1  ;;  %v6093_v4 = vld [vmem:[#allocation2 + $0x50] sm:$0xff] }
 0x6ec   : > { %v7140_v10 = vpop.f32.mrb[101].mxu1 }
 0x6ed   : > { %6342 = vst [vmem:[#allocation2 + $0x8] sm:$0xff] %v6326_v60  ;;  %v7141_v58 = vadd.f32 %v7140_v10, %v7139_v2  ;;  %v7142_v63 = vpop.f32.mrb[102].mxu1  ;;  %v6094_v2 = vld [vmem:[#allocation2 + $0x58] sm:$0xff] }
 0x6ee   : > { %v7143_v16 = vpop.f32.mrb[103].mxu1 }
 0x6ef   : > { %v6271_v43 = vadd.f32 %v7141_v58, %v7077_v34  ;;  %v7144_v27 = vadd.f32 %v7143_v16, %v7142_v63 }
 0x6f1   : > { %v6327_v59 = vadd.f32 %v6271_v43, %v6085_v3  ;;  %v6274_v9 = vadd.f32 %v7144_v27, %v7080_v52  ;;  %v6095_v43 = vld [vmem:[#allocation2 + $0x60] sm:$0xff] }
 0x6f3   : > { %6343 = vst [vmem:[#allocation2 + $0x10] sm:$0xff] %v6327_v59  ;;  %v6328_v45 = vadd.f32 %v6274_v9, %v6086_v54  ;;  %v7145_v1 = vpop.f32.mrb[104].mxu1  ;;  %v6096_v9 = vld [vmem:[#allocation2 + $0x68] sm:$0xff] }
 0x6f4   : > { %v7146_v51 = vpop.f32.mrb[105].mxu1 }
 0x6f5   : > { %6344 = vst [vmem:[#allocation2 + $0x18] sm:$0xff] %v6328_v45  ;;  %v7147_v19 = vadd.f32 %v7146_v51, %v7145_v1  ;;  %v7148_v29 = vpop.f32.mrb[106].mxu1 }
 0x6f6   : > { %v7149_v20 = vpop.f32.mrb[107].mxu1 }
 0x6f7   : > { %v6279_v13 = vadd.f32 %v7147_v19, %v12314_v39  ;;  %v7150_v37 = vadd.f32 %v7149_v20, %v7148_v29 }
 0x6f9   : > { %v6329_v46 = vadd.f32 %v6279_v13, %v6087_v55  ;;  %v6282_v34 = vadd.f32 %v7150_v37, %v12316_v32  ;;  %v6097_v55 = vld [vmem:[#allocation2 + $0x70] sm:$0xff] }
 0x6fb   : > { %6345 = vst [vmem:[#allocation2 + $0x20] sm:$0xff] %v6329_v46  ;;  %v6330_v11 = vadd.f32 %v6282_v34, %v6088_v12  ;;  %v7151_v61 = vpop.f32.mrb[108].mxu1  ;;  %v6098_v12 = vld [vmem:[#allocation2 + $0x78] sm:$0xff] }
 0x6fc   : > { %v7152_v52 = vpop.f32.mrb[109].mxu1 }
 0x6fd   : > { %6346 = vst [vmem:[#allocation2 + $0x28] sm:$0xff] %v6330_v11  ;;  %v7153_v44 = vadd.f32 %v7152_v52, %v7151_v61  ;;  %v7154_v49 = vpop.f32.mrb[110].mxu1 }
 0x6fe   : > { %v7155_v8 = vpop.f32.mrb[111].mxu1 }
 0x6ff   : > { %v6287_v15 = vadd.f32 %v7153_v44, %v12318_v6  ;;  %v7156_v7 = vadd.f32 %v7155_v8, %v7154_v49 }
 0x701   : > { %v6331_v28 = vadd.f32 %v6287_v15, %v6089_v57  ;;  %v6290_v39 = vadd.f32 %v7156_v7, %v12320_v22 }
 0x703   : > { %6347 = vst [vmem:[#allocation2 + $0x30] sm:$0xff] %v6331_v28  ;;  %v6332_v48 = vadd.f32 %v6290_v39, %v6090_v14  ;;  %v7157_v42 = vpop.f32.mrb[112].mxu1 }
 0x704   : > { %v7158_v32 = vpop.f32.mrb[113].mxu1 }
 0x705   : > { %6348 = vst [vmem:[#allocation2 + $0x38] sm:$0xff] %v6332_v48  ;;  %v7159_v5 = vadd.f32 %v7158_v32, %v7157_v42  ;;  %v7160_v47 = vpop.f32.mrb[114].mxu1 }
 0x706   : > { %v7161_v50 = vpop.f32.mrb[115].mxu1 }
 0x707   : > { %v6295_v35 = vadd.f32 %v7159_v5, %v12322_v40  ;;  %v7162_v33 = vadd.f32 %v7161_v50, %v7160_v47 }
 0x709   : > { %v6333_v25 = vadd.f32 %v6295_v35, %v6091_v31  ;;  %v6298_v6 = vadd.f32 %v7162_v33, %v12324_v53 }
 0x70b   : > { %6349 = vst [vmem:[#allocation2 + $0x40] sm:$0xff] %v6333_v25  ;;  %v6334_v38 = vadd.f32 %v6298_v6, %v6092_v0  ;;  %v7163_v36 = vpop.f32.mrb[116].mxu1 }
 0x70c   : > { %v7164_v22 = vpop.f32.mrb[117].mxu1 }
 0x70d   : > { %6350 = vst [vmem:[#allocation2 + $0x48] sm:$0xff] %v6334_v38  ;;  %v7165_v24 = vadd.f32 %v7164_v22, %v7163_v36  ;;  %v7166_v41 = vpop.f32.mrb[118].mxu1 }
 0x70e   : > { %v7167_v30 = vpop.f32.mrb[119].mxu1 }
 0x70f   : > { %v6303_v21 = vadd.f32 %v7165_v24, %v12326_v56  ;;  %v7168_v60 = vadd.f32 %v7167_v30, %v7166_v41 }
 0x711   : > { %v6335_v10 = vadd.f32 %v6303_v21, %v6093_v4  ;;  %v6306_v40 = vadd.f32 %v7168_v60, %v12328_v17 }
 0x713   : > { %6351 = vst [vmem:[#allocation2 + $0x50] sm:$0xff] %v6335_v10  ;;  %v6336_v58 = vadd.f32 %v6306_v40, %v6094_v2  ;;  %v7169_v63 = vpop.f32.mrb[120].mxu1 }
 0x714   : > { %v7170_v53 = vpop.f32.mrb[121].mxu1 }
 0x715   : > { %6352 = vst [vmem:[#allocation2 + $0x58] sm:$0xff] %v6336_v58  ;;  %v7171_v3 = vadd.f32 %v7170_v53, %v7169_v63  ;;  %v7172_v16 = vpop.f32.mrb[122].mxu1 }
 0x716   : > { %v7173_v27 = vpop.f32.mrb[123].mxu1 }
 0x717   : > { %v6311_v54 = vadd.f32 %v7171_v3, %v12330_v23  ;;  %v7174_v59 = vadd.f32 %v7173_v27, %v7172_v16 }
 0x719   : > { %v6337_v45 = vadd.f32 %v6311_v54, %v6095_v43  ;;  %v6314_v56 = vadd.f32 %v7174_v59, %v12332_v62 }
 0x71b   : > { %6353 = vst [vmem:[#allocation2 + $0x60] sm:$0xff] %v6337_v45  ;;  %v6338_v1 = vadd.f32 %v6314_v56, %v6096_v9  ;;  %v7175_v51 = vpop.f32.mrb[124].mxu1 }
 0x71c   : > { %v7176_v17 = vpop.f32.mrb[125].mxu1 }
 0x71d   : > { %6354 = vst [vmem:[#allocation2 + $0x68] sm:$0xff] %v6338_v1  ;;  %v7177_v19 = vadd.f32 %v7176_v17, %v7175_v51  ;;  %v7178_v29 = vpop.f32.mrb[126].mxu1 }
 0x71e   : > { %v7179_v20 = vpop.f32.mrb[127].mxu1 }
 0x71f   : > { %v6319_v13 = vadd.f32 %v7177_v19, %v12334_v18  ;;  %v7180_v37 = vadd.f32 %v7179_v20, %v7178_v29 }
 0x721   : > { %v6339_v46 = vadd.f32 %v6319_v13, %v6097_v55  ;;  %v6322_v23 = vadd.f32 %v7180_v37, %v12336_v26 }
 0x723   : > { %6355 = vst [vmem:[#allocation2 + $0x70] sm:$0xff] %v6339_v46  ;;  %v6340_v34 = vadd.f32 %v6322_v23, %v6098_v12 }
 0x725   : > { %6356 = vst [vmem:[#allocation2 + $0x78] sm:$0xff] %v6340_v34 }
 0x726 PF: > { %p6930_p12 = scmp.ne.s32.totalorder %s7834_s1, 1 }
 0x727   : > { %v6379_v62 = vld [vmem:[%s7966_s23 + $0x10] sm:$0xff] (!%p6930_p12)  ;;  %v6377_v18 = vld [vmem:[%s7966_s23] sm:$0xff] (!%p6930_p12)  ;;  %v7856_v11 = vmov (!%p6930_p12), 0   ;;  %v6380_v26 = vld [vmem:[%s7966_s23 + $0x18] sm:$0xff] (!%p6930_p12) }
 0x728   : > { %6360 = sbr.rel (%p6930_p12) target bundleno = 1992 (0x7c8), region = 68  ;;  %7785 = vset.pattern.permute.xlu1 (!%p6930_p12), %v7856_v11  ;;  %7784 = vset.pattern.permute.xlu0 (!%p6930_p12), %v7856_v11  ;;  %v6378_v61 = vld [vmem:[%s7966_s23 + $0x8] sm:$0xff] (!%p6930_p12)  ;;  %v6381_v44 = vld [vmem:[%s7966_s23 + $0x20] sm:$0xff] (!%p6930_p12)  ;;  %v6384_v49 = vld [vmem:[%s7966_s23 + $0x38] sm:$0xff] (!%p6930_p12) }
 0x729   : > { %6405 = vperm.xlu1 (!%p6930_p12), %7785, %v6379_v62   ;;  %6395 = vperm.xlu0 (!%p6930_p12), %7784, %v6377_v18   ;;  %v6382_v52 = vld [vmem:[%s7966_s23 + $0x28] sm:$0xff] (!%p6930_p12)  ;;  %v6383_v57 = vld [vmem:[%s7966_s23 + $0x30] sm:$0xff] (!%p6930_p12)  ;;  %v6385_v15 = vld [vmem:[%s7966_s23 + $0x40] sm:$0xff] (!%p6930_p12) }
 0x72a   : > { %v6386_v8 = vld [vmem:[%s7966_s23 + $0x48] sm:$0xff] (!%p6930_p12)  ;;  %v6388_v7 = vld [vmem:[%s7966_s23 + $0x58] sm:$0xff] (!%p6930_p12)  ;;  %v6387_v14 = vld [vmem:[%s7966_s23 + $0x50] sm:$0xff] (!%p6930_p12) }
 0x72b   : > { %v6390_v28 = vld [vmem:[%s7966_s23 + $0x68] sm:$0xff] (!%p6930_p12)  ;;  %v6389_v39 = vld [vmem:[%s7966_s23 + $0x60] sm:$0xff] (!%p6930_p12)  ;;  %v6392_v48 = vld [vmem:[%s7966_s23 + $0x78] sm:$0xff] (!%p6930_p12) }
 0x72c   : > { %v6391_v42 = vld [vmem:[%s7966_s23 + $0x70] sm:$0xff] (!%p6930_p12)  ;;  %v6361_v5 = vld [vmem:[#allocation2] sm:$0xff] (!%p6930_p12)  ;;  %v6364_v33 = vld [vmem:[#allocation2 + $0x18] sm:$0xff] (!%p6930_p12) }
 0x72d   : > { %6410 = vperm.xlu1 (!%p6930_p12), %7785, %v6380_v26   ;;  %6400 = vperm.xlu0 (!%p6930_p12), %7784, %v6378_v61   ;;  %v6363_v32 = vld [vmem:[#allocation2 + $0x10] sm:$0xff] (!%p6930_p12)  ;;  %v6362_v0 = vld [vmem:[#allocation2 + $0x8] sm:$0xff] (!%p6930_p12)  ;;  %v6365_v24 = vld [vmem:[#allocation2 + $0x20] sm:$0xff] (!%p6930_p12) }
 0x72e   : > { %v6366_v22 = vld [vmem:[#allocation2 + $0x28] sm:$0xff] (!%p6930_p12)  ;;  %v6368_v60 = vld [vmem:[#allocation2 + $0x38] sm:$0xff] (!%p6930_p12)  ;;  %v6367_v2 = vld [vmem:[#allocation2 + $0x30] sm:$0xff] (!%p6930_p12) }
 0x72f   : > { %v6370_v53 = vld [vmem:[#allocation2 + $0x48] sm:$0xff]  ;;  %v6369_v3 = vld [vmem:[#allocation2 + $0x40] sm:$0xff]  ;;  %v6372_v59 = vld [vmem:[#allocation2 + $0x58] sm:$0xff] }
 0x730   : > { %v6371_v9 = vld [vmem:[#allocation2 + $0x50] sm:$0xff]  ;;  %v6374_v17 = vld [vmem:[#allocation2 + $0x68] sm:$0xff]  ;;  %v6373_v19 = vld [vmem:[#allocation2 + $0x60] sm:$0xff] }
 0x731   : > { %6420 = vperm.xlu1 %7785, %v6382_v52   ;;  %6415 = vperm.xlu0 %7784, %v6381_v44   ;;  %v6376_v37 = vld [vmem:[#allocation2 + $0x78] sm:$0xff]  ;;  %v6375_v12 = vld [vmem:[#allocation2 + $0x70] sm:$0xff] }
 0x735   : > { %6430 = vperm.xlu1 %7785, %v6384_v49   ;;  %6425 = vperm.xlu0 %7784, %v6383_v57  }
 0x739   : > { %6440 = vperm.xlu1 %7785, %v6386_v8   ;;  %6435 = vperm.xlu0 %7784, %v6385_v15  }
 0x73d   : > { %6450 = vperm.xlu1 %7785, %v6388_v7   ;;  %6445 = vperm.xlu0 %7784, %v6387_v14  }
 0x741   : > { %6460 = vperm.xlu1 %7785, %v6390_v28   ;;  %6455 = vperm.xlu0 %7784, %v6389_v39  }
 0x745   : > { %6470 = vperm.xlu1 %7785, %v6392_v48   ;;  %6465 = vperm.xlu0 %7784, %v6391_v42  }
 0x7a8   : > { %v6406_v47 = vpop.permute.xlu1 %6405  ;;  %v6396_v31 = vpop.permute.xlu0 %6395 }
 0x7a9   : > { %v6475_v50 = vmul.f32 %v6406_v47, %v6363_v32  ;;  %v6473_v35 = vmul.f32 %v6396_v31, %v6361_v5 }
 0x7ab   : > { %6491 = vst [vmem:[%s7972_s0 + $0x10] sm:$0xff] %v6475_v50  ;;  %6489 = vst [vmem:[%s7972_s0] sm:$0xff] %v6473_v35 }
 0x7ac   : > { %v6411_v25 = vpop.permute.xlu1 %6410  ;;  %v6401_v6 = vpop.permute.xlu0 %6400 }
 0x7ad   : > { %v6476_v38 = vmul.f32 %v6411_v25, %v6364_v33  ;;  %v6474_v36 = vmul.f32 %v6401_v6, %v6362_v0 }
 0x7af   : > { %6492 = vst [vmem:[%s7972_s0 + $0x18] sm:$0xff] %v6476_v38  ;;  %6490 = vst [vmem:[%s7972_s0 + $0x8] sm:$0xff] %v6474_v36 }
 0x7b0   : > { %v6421_v41 = vpop.permute.xlu1 %6420  ;;  %v6416_v4 = vpop.permute.xlu0 %6415 }
 0x7b1   : > { %v6478_v30 = vmul.f32 %v6421_v41, %v6366_v22  ;;  %v6477_v21 = vmul.f32 %v6416_v4, %v6365_v24 }
 0x7b3   : > { %6494 = vst [vmem:[%s7972_s0 + $0x28] sm:$0xff] %v6478_v30  ;;  %6493 = vst [vmem:[%s7972_s0 + $0x20] sm:$0xff] %v6477_v21 }
 0x7b4   : > { %v6431_v10 = vpop.permute.xlu1 %6430  ;;  %v6426_v40 = vpop.permute.xlu0 %6425 }
 0x7b5   : > { %v6480_v58 = vmul.f32 %v6431_v10, %v6368_v60  ;;  %v6479_v63 = vmul.f32 %v6426_v40, %v6367_v2 }
 0x7b7   : > { %6496 = vst [vmem:[%s7972_s0 + $0x38] sm:$0xff] %v6480_v58  ;;  %6495 = vst [vmem:[%s7972_s0 + $0x30] sm:$0xff] %v6479_v63 }
 0x7b8   : > { %v6441_v16 = vpop.permute.xlu1 %6440  ;;  %v6436_v43 = vpop.permute.xlu0 %6435 }
 0x7b9   : > { %v6482_v27 = vmul.f32 %v6441_v16, %v6370_v53  ;;  %v6481_v54 = vmul.f32 %v6436_v43, %v6369_v3 }
 0x7bb   : > { %6498 = vst [vmem:[%s7972_s0 + $0x48] sm:$0xff] %v6482_v27  ;;  %6497 = vst [vmem:[%s7972_s0 + $0x40] sm:$0xff] %v6481_v54 }
 0x7bc   : > { %v6451_v45 = vpop.permute.xlu1 %6450  ;;  %v6446_v56 = vpop.permute.xlu0 %6445 }
 0x7bd   : > { %v6484_v1 = vmul.f32 %v6451_v45, %v6372_v59  ;;  %v6483_v51 = vmul.f32 %v6446_v56, %v6371_v9 }
 0x7bf   : > { %6500 = vst [vmem:[%s7972_s0 + $0x58] sm:$0xff] %v6484_v1  ;;  %6499 = vst [vmem:[%s7972_s0 + $0x50] sm:$0xff] %v6483_v51 }
 0x7c0   : > { %v6461_v29 = vpop.permute.xlu1 %6460  ;;  %v6456_v55 = vpop.permute.xlu0 %6455 }
 0x7c1   : > { %v6486_v20 = vmul.f32 %v6461_v29, %v6374_v17  ;;  %v6485_v13 = vmul.f32 %v6456_v55, %v6373_v19 }
 0x7c3   : > { %6502 = vst [vmem:[%s7972_s0 + $0x68] sm:$0xff] %v6486_v20  ;;  %6501 = vst [vmem:[%s7972_s0 + $0x60] sm:$0xff] %v6485_v13 }
 0x7c4   : > { %v6471_v46 = vpop.permute.xlu1 %6470  ;;  %v6466_v23 = vpop.permute.xlu0 %6465 }
 0x7c5   : > { %v6488_v34 = vmul.f32 %v6471_v46, %v6376_v37  ;;  %v6487_v62 = vmul.f32 %v6466_v23, %v6375_v12 }
 0x7c7   : > { %6504 = vst [vmem:[%s7972_s0 + $0x78] sm:$0xff] %v6488_v34  ;;  %6503 = vst [vmem:[%s7972_s0 + $0x70] sm:$0xff] %v6487_v62 }
 0x7c8 PF: > { %s31_s29 = sadd.s32 1, %s7850_s29   ;;  %s12553_s26 = sld [smem:[#allocation7_spill]] }
 0x7c9   : > { %p28_p13 = scmp.ge.s32.totalorder %s31_s29, 6   ;;  %s12554_s23 = sld [smem:[#allocation8_spill]] }
 0x7ca   : > { %s12555_s28 = sld [smem:[#allocation9_spill]]  ;;  %s12556_s1 = smov %s7842_s27 }
 0x7cb   :  { %30 = sbr.rel (!%p28_p13) target bundleno = 28 (0x1c), region = 104 }
 0x7cf   : > { %s12557_s27 = smov %s12554_s23 }

</bundles_post_ra>
